<compile_context>
chip_gen: v6e
topology: v6e:2x2x1
jax: 0.10.0
libtpu: 0.0.40
codegen_flags: <defaults>
</compile_context>

<pallas_src>
from functools import partial

import numpy as np
import jax
import jax.numpy as jnp
from jax import lax
from jax.experimental import pallas as pl
from jax.experimental.pallas import tpu as pltpu


# ----------------------------------------------------------------------------
# Fused Pallas kernel: one grid step == one batch element.
# ----------------------------------------------------------------------------
def _upconv_kernel(x1_ref, x2_ref, mrow_ref, mcolT_ref,
                   w1_ref, s1_ref, b1_ref, w2_ref, s2_ref, b2_ref,
                   o_ref, xin_pad, mid_pad, *,
                   C1, C2, H1, W1, H2, W2, Ho, Wo, padT, padL, Cout):
    # x1_ref:  (1, C1, H1*W1) f32      low-res decoder feature
    # x2_ref:  (1, C2, H2*W2) bf16     skip connection
    # mrow_ref:(Ho, H1) f32, mcolT_ref:(W1, Wo) f32   bilinear interp matrices
    # w*_ref:  (Cout, 9*Cin) bf16      im2col conv weights (tap-major, ch-minor)
    # s*/b*:   (Cout, 1) f32           folded BN scale / bias
    # o_ref:   (1, Cout, H2*W2) f32    lane-dense NCHW-order output slab
    # xin_pad: (C2+C1, H2+2, W2+2) f32 concat input, spatially padded (scratch)
    # mid_pad: (Cout,  H2+2, W2+2) f32 conv1 output, spatially padded (scratch)

    # Zero the scratches every step: the untouched border rows/cols provide both
    # the conv padding=1 halo and the F.pad band around the upsampled x1.
    # (Cheap, and safe even when the batch axis is split across TensorCores.)
    xin_pad[...] = jnp.zeros_like(xin_pad)
    mid_pad[...] = jnp.zeros_like(mid_pad)

    # --- cat([x2, up(x1)], channel axis), built directly inside padded scratch
    # x2 -> channels [0, C2)
    xin_pad[0:C2, 1:1 + H2, 1:1 + W2] = (
        x2_ref[0].astype(jnp.float32).reshape(C2, H2, W2))

    # x1 -> bilinear x2 upsample (align_corners=True) via two interp matmuls,
    # written at the F.pad offset into channels [C2, C2+C1).
    x1 = x1_ref[0].reshape(C1, H1, W1)
    mrow = mrow_ref[...]
    mcolT = mcolT_ref[...]
    for c in range(C1):                                # static unroll (C1 small)
        t = jnp.dot(x1[c], mcolT, preferred_element_type=jnp.float32)   # (H1,Wo)
        up = jnp.dot(mrow, t, preferred_element_type=jnp.float32)       # (Ho,Wo)
        xin_pad[C2 + c, 1 + padT:1 + padT + Ho, 1 + padL:1 + padL + Wo] = up

    # --- DoubleConv: each 3x3 conv = one im2col MXU matmul + f32 epilogue
    def conv_bn_relu(xpad, w_ref, s_ref, b_ref):
        C = xpad.shape[0]
        taps = [xpad[:, dy:dy + H2, dx:dx + W2].reshape(C, H2 * W2)
                for dy in range(3) for dx in range(3)]
        patches = jnp.concatenate(taps, axis=0).astype(jnp.bfloat16)  # (9C, HW)
        y = jnp.dot(w_ref[...], patches,
                    preferred_element_type=jnp.float32)               # (Cout, HW)
        return jnp.maximum(y * s_ref[...] + b_ref[...], 0.0)          # f32

    y1 = conv_bn_relu(xin_pad, w1_ref, s1_ref, b1_ref)
    mid_pad[:, 1:1 + H2, 1:1 + W2] = y1.reshape(Cout, H2, W2)
    y2 = conv_bn_relu(mid_pad, w2_ref, s2_ref, b2_ref)
    # TODO(synk): Dropout(drop_path_rate) is stochastic in training; identity in eval.

    # Lane-dense store (last dim = H2*W2), already in NCHW channel order.
    o_ref[0] = y2.astype(o_ref.dtype)


# ----------------------------------------------------------------------------
# Parameter packing helpers
# ----------------------------------------------------------------------------
def _interp_matrix(n_in, n_out):
    """(n_out, n_in) bilinear interpolation matrix, align_corners=True."""
    m = np.zeros((n_out, n_in), np.float32)
    if n_in == 1 or n_out == 1:
        m[:, 0] = 1.0
        return jnp.asarray(m)
    src = np.arange(n_out, dtype=np.float64) * (n_in - 1) / (n_out - 1)
    i0 = np.clip(np.floor(src).astype(np.int64), 0, n_in - 1)
    i1 = np.clip(i0 + 1, 0, n_in - 1)
    frac = (src - i0).astype(np.float32)
    m[np.arange(n_out), i0] += (1.0 - frac)
    m[np.arange(n_out), i1] += frac
    return jnp.asarray(m)


def fold_bn(conv_bias, gamma, beta, running_mean, running_var, eps=1e-5):
    scale = gamma / jnp.sqrt(running_var + eps)
    bias = (conv_bias - running_mean) * scale + beta
    return scale[:, None].astype(jnp.float32), bias[:, None].astype(jnp.float32)


def conv_weight_to_mat(w_oihw):
    """(Cout, Cin, 3, 3) -> (Cout, 9*Cin); row order = tap-major, channel-minor."""
    Cout, Cin = w_oihw.shape[0], w_oihw.shape[1]
    return jnp.transpose(w_oihw, (0, 2, 3, 1)).reshape(Cout, 9 * Cin)


# ----------------------------------------------------------------------------
# UpConvModule forward (NCHW in / NCHW out, like PyTorch)
# ----------------------------------------------------------------------------
def up_conv_module_forward(x1_nchw, x2_nchw, params):
    N, C1, H1, W1 = x1_nchw.shape
    _, C2, H2, W2 = x2_nchw.shape
    Ho, Wo = 2 * H1, 2 * W1
    diffY, diffX = H2 - Ho, W2 - Wo          # assumed >= 0 (standard UNet usage)
    padT, padL = diffY // 2, diffX // 2
    Cout = params["w1"].shape[0]
    Cin = C1 + C2

    mrow = _interp_matrix(H1, Ho)            # (Ho, H1)
    mcolT = _interp_matrix(W1, Wo).T         # (W1, Wo)

    s1, b1 = fold_bn(params["b1"], params["g1"], params["be1"],
                     params["rm"], params["rv"])
    s2, b2 = fold_bn(params["b2"], params["g2"], params["be2"],
                     params["rm"], params["rv"])
    w1m = conv_weight_to_mat(params["w1"]).astype(jnp.bfloat16)
    w2m = conv_weight_to_mat(params["w2"]).astype(jnp.bfloat16)

    # Free metadata reshapes (no transposes); x2 moves as bf16 over the DMA.
    x1_flat = x1_nchw.reshape(N, C1, H1 * W1)
    x2_flat = x2_nchw.reshape(N, C2, H2 * W2).astype(jnp.bfloat16)

    kernel = partial(_upconv_kernel, C1=C1, C2=C2, H1=H1, W1=W1, H2=H2, W2=W2,
                     Ho=Ho, Wo=Wo, padT=padT, padL=padL, Cout=Cout)

    out_flat = pl.pallas_call(
        kernel,
        out_shape=jax.ShapeDtypeStruct((N, Cout, H2 * W2), jnp.float32),
        grid=(N,),
        in_specs=[
            pl.BlockSpec((1, C1, H1 * W1), lambda n: (n, 0, 0)),
            pl.BlockSpec((1, C2, H2 * W2), lambda n: (n, 0, 0)),
            pl.BlockSpec((Ho, H1), lambda n: (0, 0)),
            pl.BlockSpec((W1, Wo), lambda n: (0, 0)),
            pl.BlockSpec((Cout, 9 * Cin), lambda n: (0, 0)),
            pl.BlockSpec((Cout, 1), lambda n: (0, 0)),
            pl.BlockSpec((Cout, 1), lambda n: (0, 0)),
            pl.BlockSpec((Cout, 9 * Cout), lambda n: (0, 0)),
            pl.BlockSpec((Cout, 1), lambda n: (0, 0)),
            pl.BlockSpec((Cout, 1), lambda n: (0, 0)),
        ],
        out_specs=pl.BlockSpec((1, Cout, H2 * W2), lambda n: (n, 0, 0)),
        scratch_shapes=[
            pltpu.VMEM((Cin, H2 + 2, W2 + 2), jnp.float32),
            pltpu.VMEM((Cout, H2 + 2, W2 + 2), jnp.float32),
        ],
        compiler_params=pltpu.CompilerParams(dimension_semantics=("parallel",)),
    )(x1_flat, x2_flat, mrow, mcolT, w1m, s1, b1, w2m, s2, b2)

    # Kernel already wrote NCHW channel order; this reshape is free.
    return out_flat.reshape(N, Cout, H2, W2)


# ----------------------------------------------------------------------------
# Pure-JAX f32 reference (exact PyTorch eval semantics) for correctness check
# ----------------------------------------------------------------------------
def _ref_upsample_x2_ac(x):  # NCHW, bilinear, align_corners=True
    N, C, H, W = x.shape
    Ho, Wo = 2 * H, 2 * W

    def idx(n_in, n_out):
        if n_in == 1:
            z = jnp.zeros((n_out,), jnp.int32)
            return z, z, jnp.zeros((n_out,), jnp.float32)
        src = jnp.arange(n_out, dtype=jnp.float32) * (n_in - 1) / (n_out - 1)
        i0 = jnp.clip(jnp.floor(src).astype(jnp.int32), 0, n_in - 1)
        i1 = jnp.clip(i0 + 1, 0, n_in - 1)
        return i0, i1, src - i0.astype(jnp.float32)

    r0, r1, rf = idx(H, Ho)
    c0, c1, cf = idx(W, Wo)
    rows = (x[:, :, r0, :] * (1.0 - rf)[None, None, :, None]
            + x[:, :, r1, :] * rf[None, None, :, None])
    return (rows[:, :, :, c0] * (1.0 - cf)[None, None, None, :]
            + rows[:, :, :, c1] * cf[None, None, None, :])


def _ref_forward(x1, x2, p, eps=1e-5):
    x1u = _ref_upsample_x2_ac(x1)
    diffY = x2.shape[2] - x1u.shape[2]
    diffX = x2.shape[3] - x1u.shape[3]
    x1u = jnp.pad(x1u, ((0, 0), (0, 0),
                        (diffY // 2, diffY - diffY // 2),
                        (diffX // 2, diffX - diffX // 2)))
    x = jnp.concatenate([x2, x1u], axis=1)

    def cbr(x, w, b, g, beta):
        y = lax.conv_general_dilated(
            x, w, (1, 1), "SAME",
            dimension_numbers=("NCHW", "OIHW", "NCHW"),
            precision=lax.Precision.HIGHEST)
        y = y + b[None, :, None, None]
        y = ((y - p["rm"][None, :, None, None])
             / jnp.sqrt(p["rv"][None, :, None, None] + eps)
             * g[None, :, None, None] + beta[None, :, None, None])
        return jnp.maximum(y, 0.0)

    y = cbr(x, p["w1"], p["b1"], p["g1"], p["be1"])
    y = cbr(y, p["w2"], p["b2"], p["g2"], p["be2"])
    return y


# ----------------------------------------------------------------------------
# main
# ----------------------------------------------------------------------------
if __name__ == "__main__":
    key = jax.random.PRNGKey(0)
    ks = jax.random.split(key, 10)

    # UpConvModule(in_channels=8, out_channels=8, bilinear=True)
    in_channels, out_channels = 8, 8
    N = 2
    C1 = in_channels // 2          # channels of x1 (decoder feature)
    C2 = in_channels - C1          # channels of x2 (skip connection)
    H1, W1 = 8, 8                  # x1 spatial
    H2, W2 = 16, 16                # x2 spatial (2x of x1)

    x1 = jax.random.normal(ks[0], (N, C1, H1, W1), jnp.float32)
    x2 = jax.random.normal(ks[1], (N, C2, H2, W2), jnp.float32)

    # Deterministic synthetic parameters (PyTorch shapes).
    w1 = 0.1 * jax.random.normal(ks[2], (out_channels, in_channels, 3, 3), jnp.float32)
    b1 = 0.1 * jax.random.normal(ks[3], (out_channels,), jnp.float32)
    g1 = 1.0 + 0.05 * jax.random.normal(ks[4], (out_channels,), jnp.float32)
    be1 = 0.05 * jax.random.normal(ks[5], (out_channels,), jnp.float32)

    w2 = 0.1 * jax.random.normal(ks[6], (out_channels, out_channels, 3, 3), jnp.float32)
    b2 = 0.1 * jax.random.normal(ks[7], (out_channels,), jnp.float32)
    g2 = 1.0 + 0.05 * jax.random.normal(ks[8], (out_channels,), jnp.float32)
    be2 = 0.05 * jax.random.normal(ks[9], (out_channels,), jnp.float32)

    rm = jnp.zeros((out_channels,), jnp.float32)   # BN running_mean (fresh module)
    rv = jnp.ones((out_channels,), jnp.float32)    # BN running_var

    params = dict(w1=w1, b1=b1, g1=g1, be1=be1,
                  w2=w2, b2=b2, g2=g2, be2=be2, rm=rm, rv=rv)

    fwd = jax.jit(partial(up_conv_module_forward, params=params))
    out = jax.block_until_ready(fwd(x1, x2))
    assert out.shape == (N, out_channels, H2, W2), out.shape

    # Check against the exact-semantics f32 reference.  The kernel runs the
    # matmuls with bf16 MXU inputs (f32 accumulation), hence the bf16-level
    # tolerance.
    y_ref = _ref_forward(x1, x2, params)
    err = float(jnp.max(jnp.abs(out - y_ref)))
    assert jnp.allclose(out, y_ref, atol=5e-2, rtol=5e-2), err

    print("KERNEL_OK")
</pallas_src>

<mosaic_0001>
module attributes {stable_mosaic.version = 11 : i64} {
  func.func @_upconv_kernel(%arg0: i32, %arg1: memref<1x4x64xf32, #tpu.memory_space<vmem>>, %arg2: memref<1x4x256xbf16, #tpu.memory_space<vmem>>, %arg3: memref<16x8xf32, #tpu.memory_space<vmem>>, %arg4: memref<8x16xf32, #tpu.memory_space<vmem>>, %arg5: memref<8x72xbf16, #tpu.memory_space<vmem>>, %arg6: memref<8x1xf32, #tpu.memory_space<vmem>>, %arg7: memref<8x1xf32, #tpu.memory_space<vmem>>, %arg8: memref<8x72xbf16, #tpu.memory_space<vmem>>, %arg9: memref<8x1xf32, #tpu.memory_space<vmem>>, %arg10: memref<8x1xf32, #tpu.memory_space<vmem>>, %arg11: memref<1x8x256xf32, #tpu.memory_space<vmem>>, %arg12: memref<8x18x18xf32, #tpu.memory_space<vmem>>, %arg13: memref<8x18x18xf32, #tpu.memory_space<vmem>>) attributes {dimension_semantics = [#tpu.dimension_semantics<parallel>], iteration_bounds = array<i64: 2>, scalar_prefetch = 0 : i64, scratch_operands = 2 : i64, tpu.core_type = #tpu.core_type<tc>, window_params = [{transform_indices = @transform_0, window_bounds = array<i64: 1, 4, 64>}, {transform_indices = @transform_1, window_bounds = array<i64: 1, 4, 256>}, {pipeline_mode = #tpu.pipeline_mode<synchronous>, transform_indices = @transform_2, window_bounds = array<i64: 16, 8>}, {pipeline_mode = #tpu.pipeline_mode<synchronous>, transform_indices = @transform_3, window_bounds = array<i64: 8, 16>}, {pipeline_mode = #tpu.pipeline_mode<synchronous>, transform_indices = @transform_4, window_bounds = array<i64: 8, 72>}, {pipeline_mode = #tpu.pipeline_mode<synchronous>, transform_indices = @transform_5, window_bounds = array<i64: 8, 1>}, {pipeline_mode = #tpu.pipeline_mode<synchronous>, transform_indices = @transform_6, window_bounds = array<i64: 8, 1>}, {pipeline_mode = #tpu.pipeline_mode<synchronous>, transform_indices = @transform_7, window_bounds = array<i64: 8, 72>}, {pipeline_mode = #tpu.pipeline_mode<synchronous>, transform_indices = @transform_8, window_bounds = array<i64: 8, 1>}, {pipeline_mode = #tpu.pipeline_mode<synchronous>, transform_indices = @transform_9, window_bounds = array<i64: 8, 1>}, {transform_indices = @transform_10, window_bounds = array<i64: 1, 8, 256>}]} {
    %cst = arith.constant 0.000000e+00 : f32
    %0 = vector.broadcast %cst : f32 to vector<8x18x18xf32>
    %c0 = arith.constant 0 : index
    %c0_0 = arith.constant 0 : index
    %c0_1 = arith.constant 0 : index
    %1 = vector.load %arg12[%c0, %c0_0, %c0_1] : memref<8x18x18xf32, #tpu.memory_space<vmem>>, vector<8x18x18xf32>
    tpu.vector_store %arg12[%c0, %c0_0, %c0_1], %0 {strides = array<i32>} : memref<8x18x18xf32, #tpu.memory_space<vmem>>, vector<8x18x18xf32>,
    %cst_2 = arith.constant 0.000000e+00 : f32
    %2 = vector.broadcast %cst_2 : f32 to vector<8x18x18xf32>
    %c0_3 = arith.constant 0 : index
    %c0_4 = arith.constant 0 : index
    %c0_5 = arith.constant 0 : index
    %3 = vector.load %arg13[%c0_3, %c0_4, %c0_5] : memref<8x18x18xf32, #tpu.memory_space<vmem>>, vector<8x18x18xf32>
    tpu.vector_store %arg13[%c0_3, %c0_4, %c0_5], %2 {strides = array<i32>} : memref<8x18x18xf32, #tpu.memory_space<vmem>>, vector<8x18x18xf32>,
    %c0_6 = arith.constant 0 : index
    %c0_7 = arith.constant 0 : index
    %c0_8 = arith.constant 0 : index
    %4 = vector.load %arg2[%c0_6, %c0_7, %c0_8] : memref<1x4x256xbf16, #tpu.memory_space<vmem>>, vector<1x4x256xbf16>
    %5 = vector.shape_cast %4 : vector<1x4x256xbf16> to vector<4x256xbf16>
    %6 = arith.extf %5 : vector<4x256xbf16> to vector<4x256xf32>
    %7 = vector.shape_cast %6 : vector<4x256xf32> to vector<4x16x16xf32>
    %c0_9 = arith.constant 0 : index
    %c1 = arith.constant 1 : index
    %c1_10 = arith.constant 1 : index
    %8 = vector.load %arg12[%c0_9, %c1, %c1_10] : memref<8x18x18xf32, #tpu.memory_space<vmem>>, vector<4x16x16xf32>
    tpu.vector_store %arg12[%c0_9, %c1, %c1_10], %7 {strides = array<i32>} : memref<8x18x18xf32, #tpu.memory_space<vmem>>, vector<4x16x16xf32>,
    %c0_11 = arith.constant 0 : index
    %c0_12 = arith.constant 0 : index
    %c0_13 = arith.constant 0 : index
    %9 = vector.load %arg1[%c0_11, %c0_12, %c0_13] : memref<1x4x64xf32, #tpu.memory_space<vmem>>, vector<1x4x64xf32>
    %10 = vector.shape_cast %9 : vector<1x4x64xf32> to vector<4x64xf32>
    %11 = vector.shape_cast %10 : vector<4x64xf32> to vector<4x8x8xf32>
    %c0_14 = arith.constant 0 : index
    %c0_15 = arith.constant 0 : index
    %12 = vector.load %arg3[%c0_14, %c0_15] : memref<16x8xf32, #tpu.memory_space<vmem>>, vector<16x8xf32>
    %c0_16 = arith.constant 0 : index
    %c0_17 = arith.constant 0 : index
    %13 = vector.load %arg4[%c0_16, %c0_17] : memref<8x16xf32, #tpu.memory_space<vmem>>, vector<8x16xf32>
    %14 = vector.extract_strided_slice %11 {offsets = [0, 0, 0], sizes = [1, 8, 8], strides = [1, 1, 1]} : vector<4x8x8xf32> to vector<1x8x8xf32>
    %15 = vector.shape_cast %14 : vector<1x8x8xf32> to vector<8x8xf32>
    %cst_18 = arith.constant dense<0.000000e+00> : vector<8x16xf32>
    %16 = tpu.matmul %15, %13, %cst_18 {dimension_numbers = #tpu.dot_dimension_numbers<[1], [0], [0], [1], [0, 0, 1, 1], [], []>} : vector<8x8xf32>, vector<8x16xf32>, vector<8x16xf32> -> vector<8x16xf32>
    %cst_19 = arith.constant dense<0.000000e+00> : vector<16x16xf32>
    %17 = tpu.matmul %12, %16, %cst_19 {dimension_numbers = #tpu.dot_dimension_numbers<[1], [0], [0], [1], [0, 0, 1, 1], [], []>} : vector<16x8xf32>, vector<8x16xf32>, vector<16x16xf32> -> vector<16x16xf32>
    %c4 = arith.constant 4 : index
    %c1_20 = arith.constant 1 : index
    %c1_21 = arith.constant 1 : index
    %18 = vector.load %arg12[%c4, %c1_20, %c1_21] : memref<8x18x18xf32, #tpu.memory_space<vmem>>, vector<1x16x16xf32>
    %19 = vector.shape_cast %18 : vector<1x16x16xf32> to vector<16x16xf32>
    %20 = vector.shape_cast %17 : vector<16x16xf32> to vector<1x16x16xf32>
    tpu.vector_store %arg12[%c4, %c1_20, %c1_21], %20 {strides = array<i32>} : memref<8x18x18xf32, #tpu.memory_space<vmem>>, vector<1x16x16xf32>,
    %21 = vector.extract_strided_slice %11 {offsets = [1, 0, 0], sizes = [1, 8, 8], strides = [1, 1, 1]} : vector<4x8x8xf32> to vector<1x8x8xf32>
    %22 = vector.shape_cast %21 : vector<1x8x8xf32> to vector<8x8xf32>
    %cst_22 = arith.constant dense<0.000000e+00> : vector<8x16xf32>
    %23 = tpu.matmul %22, %13, %cst_22 {dimension_numbers = #tpu.dot_dimension_numbers<[1], [0], [0], [1], [0, 0, 1, 1], [], []>} : vector<8x8xf32>, vector<8x16xf32>, vector<8x16xf32> -> vector<8x16xf32>
    %cst_23 = arith.constant dense<0.000000e+00> : vector<16x16xf32>
    %24 = tpu.matmul %12, %23, %cst_23 {dimension_numbers = #tpu.dot_dimension_numbers<[1], [0], [0], [1], [0, 0, 1, 1], [], []>} : vector<16x8xf32>, vector<8x16xf32>, vector<16x16xf32> -> vector<16x16xf32>
    %c5 = arith.constant 5 : index
    %c1_24 = arith.constant 1 : index
    %c1_25 = arith.constant 1 : index
    %25 = vector.load %arg12[%c5, %c1_24, %c1_25] : memref<8x18x18xf32, #tpu.memory_space<vmem>>, vector<1x16x16xf32>
    %26 = vector.shape_cast %25 : vector<1x16x16xf32> to vector<16x16xf32>
    %27 = vector.shape_cast %24 : vector<16x16xf32> to vector<1x16x16xf32>
    tpu.vector_store %arg12[%c5, %c1_24, %c1_25], %27 {strides = array<i32>} : memref<8x18x18xf32, #tpu.memory_space<vmem>>, vector<1x16x16xf32>,
    %28 = vector.extract_strided_slice %11 {offsets = [2, 0, 0], sizes = [1, 8, 8], strides = [1, 1, 1]} : vector<4x8x8xf32> to vector<1x8x8xf32>
    %29 = vector.shape_cast %28 : vector<1x8x8xf32> to vector<8x8xf32>
    %cst_26 = arith.constant dense<0.000000e+00> : vector<8x16xf32>
    %30 = tpu.matmul %29, %13, %cst_26 {dimension_numbers = #tpu.dot_dimension_numbers<[1], [0], [0], [1], [0, 0, 1, 1], [], []>} : vector<8x8xf32>, vector<8x16xf32>, vector<8x16xf32> -> vector<8x16xf32>
    %cst_27 = arith.constant dense<0.000000e+00> : vector<16x16xf32>
    %31 = tpu.matmul %12, %30, %cst_27 {dimension_numbers = #tpu.dot_dimension_numbers<[1], [0], [0], [1], [0, 0, 1, 1], [], []>} : vector<16x8xf32>, vector<8x16xf32>, vector<16x16xf32> -> vector<16x16xf32>
    %c6 = arith.constant 6 : index
    %c1_28 = arith.constant 1 : index
    %c1_29 = arith.constant 1 : index
    %32 = vector.load %arg12[%c6, %c1_28, %c1_29] : memref<8x18x18xf32, #tpu.memory_space<vmem>>, vector<1x16x16xf32>
    %33 = vector.shape_cast %32 : vector<1x16x16xf32> to vector<16x16xf32>
    %34 = vector.shape_cast %31 : vector<16x16xf32> to vector<1x16x16xf32>
    tpu.vector_store %arg12[%c6, %c1_28, %c1_29], %34 {strides = array<i32>} : memref<8x18x18xf32, #tpu.memory_space<vmem>>, vector<1x16x16xf32>,
    %35 = vector.extract_strided_slice %11 {offsets = [3, 0, 0], sizes = [1, 8, 8], strides = [1, 1, 1]} : vector<4x8x8xf32> to vector<1x8x8xf32>
    %36 = vector.shape_cast %35 : vector<1x8x8xf32> to vector<8x8xf32>
    %cst_30 = arith.constant dense<0.000000e+00> : vector<8x16xf32>
    %37 = tpu.matmul %36, %13, %cst_30 {dimension_numbers = #tpu.dot_dimension_numbers<[1], [0], [0], [1], [0, 0, 1, 1], [], []>} : vector<8x8xf32>, vector<8x16xf32>, vector<8x16xf32> -> vector<8x16xf32>
    %cst_31 = arith.constant dense<0.000000e+00> : vector<16x16xf32>
    %38 = tpu.matmul %12, %37, %cst_31 {dimension_numbers = #tpu.dot_dimension_numbers<[1], [0], [0], [1], [0, 0, 1, 1], [], []>} : vector<16x8xf32>, vector<8x16xf32>, vector<16x16xf32> -> vector<16x16xf32>
    %c7 = arith.constant 7 : index
    %c1_32 = arith.constant 1 : index
    %c1_33 = arith.constant 1 : index
    %39 = vector.load %arg12[%c7, %c1_32, %c1_33] : memref<8x18x18xf32, #tpu.memory_space<vmem>>, vector<1x16x16xf32>
    %40 = vector.shape_cast %39 : vector<1x16x16xf32> to vector<16x16xf32>
    %41 = vector.shape_cast %38 : vector<16x16xf32> to vector<1x16x16xf32>
    tpu.vector_store %arg12[%c7, %c1_32, %c1_33], %41 {strides = array<i32>} : memref<8x18x18xf32, #tpu.memory_space<vmem>>, vector<1x16x16xf32>,
    %c0_34 = arith.constant 0 : index
    %c0_35 = arith.constant 0 : index
    %c0_36 = arith.constant 0 : index
    %42 = vector.load %arg12[%c0_34, %c0_35, %c0_36] : memref<8x18x18xf32, #tpu.memory_space<vmem>>, vector<8x16x16xf32>
    %43 = vector.shape_cast %42 : vector<8x16x16xf32> to vector<8x256xf32>
    %c0_37 = arith.constant 0 : index
    %c0_38 = arith.constant 0 : index
    %c1_39 = arith.constant 1 : index
    %44 = vector.load %arg12[%c0_37, %c0_38, %c1_39] : memref<8x18x18xf32, #tpu.memory_space<vmem>>, vector<8x16x16xf32>
    %45 = vector.shape_cast %44 : vector<8x16x16xf32> to vector<8x256xf32>
    %c0_40 = arith.constant 0 : index
    %c0_41 = arith.constant 0 : index
    %c2 = arith.constant 2 : index
    %46 = vector.load %arg12[%c0_40, %c0_41, %c2] : memref<8x18x18xf32, #tpu.memory_space<vmem>>, vector<8x16x16xf32>
    %47 = vector.shape_cast %46 : vector<8x16x16xf32> to vector<8x256xf32>
    %c0_42 = arith.constant 0 : index
    %c1_43 = arith.constant 1 : index
    %c0_44 = arith.constant 0 : index
    %48 = vector.load %arg12[%c0_42, %c1_43, %c0_44] : memref<8x18x18xf32, #tpu.memory_space<vmem>>, vector<8x16x16xf32>
    %49 = vector.shape_cast %48 : vector<8x16x16xf32> to vector<8x256xf32>
    %c0_45 = arith.constant 0 : index
    %c1_46 = arith.constant 1 : index
    %c1_47 = arith.constant 1 : index
    %50 = vector.load %arg12[%c0_45, %c1_46, %c1_47] : memref<8x18x18xf32, #tpu.memory_space<vmem>>, vector<8x16x16xf32>
    %51 = vector.shape_cast %50 : vector<8x16x16xf32> to vector<8x256xf32>
    %c0_48 = arith.constant 0 : index
    %c1_49 = arith.constant 1 : index
    %c2_50 = arith.constant 2 : index
    %52 = vector.load %arg12[%c0_48, %c1_49, %c2_50] : memref<8x18x18xf32, #tpu.memory_space<vmem>>, vector<8x16x16xf32>
    %53 = vector.shape_cast %52 : vector<8x16x16xf32> to vector<8x256xf32>
    %c0_51 = arith.constant 0 : index
    %c2_52 = arith.constant 2 : index
    %c0_53 = arith.constant 0 : index
    %54 = vector.load %arg12[%c0_51, %c2_52, %c0_53] : memref<8x18x18xf32, #tpu.memory_space<vmem>>, vector<8x16x16xf32>
    %55 = vector.shape_cast %54 : vector<8x16x16xf32> to vector<8x256xf32>
    %c0_54 = arith.constant 0 : index
    %c2_55 = arith.constant 2 : index
    %c1_56 = arith.constant 1 : index
    %56 = vector.load %arg12[%c0_54, %c2_55, %c1_56] : memref<8x18x18xf32, #tpu.memory_space<vmem>>, vector<8x16x16xf32>
    %57 = vector.shape_cast %56 : vector<8x16x16xf32> to vector<8x256xf32>
    %c0_57 = arith.constant 0 : index
    %c2_58 = arith.constant 2 : index
    %c2_59 = arith.constant 2 : index
    %58 = vector.load %arg12[%c0_57, %c2_58, %c2_59] : memref<8x18x18xf32, #tpu.memory_space<vmem>>, vector<8x16x16xf32>
    %59 = vector.shape_cast %58 : vector<8x16x16xf32> to vector<8x256xf32>
    %60 = tpu.concatenate %43, %45, %47, %49, %51, %53, %55, %57, %59 in 0 : vector<8x256xf32>, vector<8x256xf32>, vector<8x256xf32>, vector<8x256xf32>, vector<8x256xf32>, vector<8x256xf32>, vector<8x256xf32>, vector<8x256xf32>, vector<8x256xf32> -> vector<72x256xf32>
    %61 = arith.truncf %60 : vector<72x256xf32> to vector<72x256xbf16>
    %c0_60 = arith.constant 0 : index
    %c0_61 = arith.constant 0 : index
    %62 = vector.load %arg5[%c0_60, %c0_61] : memref<8x72xbf16, #tpu.memory_space<vmem>>, vector<8x72xbf16>
    %cst_62 = arith.constant dense<0.000000e+00> : vector<8x256xf32>
    %63 = tpu.matmul %62, %61, %cst_62 {dimension_numbers = #tpu.dot_dimension_numbers<[1], [0], [0], [1], [0, 0, 1, 1], [], []>} : vector<8x72xbf16>, vector<72x256xbf16>, vector<8x256xf32> -> vector<8x256xf32>
    %c0_63 = arith.constant 0 : index
    %c0_64 = arith.constant 0 : index
    %64 = vector.load %arg6[%c0_63, %c0_64] : memref<8x1xf32, #tpu.memory_space<vmem>>, vector<8x1xf32>
    %65 = vector.broadcast %64 : vector<8x1xf32> to vector<8x256xf32>
    %66 = arith.mulf %63, %65 : vector<8x256xf32>
    %c0_65 = arith.constant 0 : index
    %c0_66 = arith.constant 0 : index
    %67 = vector.load %arg7[%c0_65, %c0_66] : memref<8x1xf32, #tpu.memory_space<vmem>>, vector<8x1xf32>
    %68 = vector.broadcast %67 : vector<8x1xf32> to vector<8x256xf32>
    %69 = arith.addf %66, %68 : vector<8x256xf32>
    %cst_67 = arith.constant 0.000000e+00 : f32
    %70 = vector.broadcast %cst_67 : f32 to vector<8x256xf32>
    %71 = arith.maximumf %69, %70 : vector<8x256xf32>
    %72 = vector.shape_cast %71 : vector<8x256xf32> to vector<8x16x16xf32>
    %c0_68 = arith.constant 0 : index
    %c1_69 = arith.constant 1 : index
    %c1_70 = arith.constant 1 : index
    %73 = vector.load %arg13[%c0_68, %c1_69, %c1_70] : memref<8x18x18xf32, #tpu.memory_space<vmem>>, vector<8x16x16xf32>
    tpu.vector_store %arg13[%c0_68, %c1_69, %c1_70], %72 {strides = array<i32>} : memref<8x18x18xf32, #tpu.memory_space<vmem>>, vector<8x16x16xf32>,
    %c0_71 = arith.constant 0 : index
    %c0_72 = arith.constant 0 : index
    %c0_73 = arith.constant 0 : index
    %74 = vector.load %arg13[%c0_71, %c0_72, %c0_73] : memref<8x18x18xf32, #tpu.memory_space<vmem>>, vector<8x16x16xf32>
    %75 = vector.shape_cast %74 : vector<8x16x16xf32> to vector<8x256xf32>
    %c0_74 = arith.constant 0 : index
    %c0_75 = arith.constant 0 : index
    %c1_76 = arith.constant 1 : index
    %76 = vector.load %arg13[%c0_74, %c0_75, %c1_76] : memref<8x18x18xf32, #tpu.memory_space<vmem>>, vector<8x16x16xf32>
    %77 = vector.shape_cast %76 : vector<8x16x16xf32> to vector<8x256xf32>
    %c0_77 = arith.constant 0 : index
    %c0_78 = arith.constant 0 : index
    %c2_79 = arith.constant 2 : index
    %78 = vector.load %arg13[%c0_77, %c0_78, %c2_79] : memref<8x18x18xf32, #tpu.memory_space<vmem>>, vector<8x16x16xf32>
    %79 = vector.shape_cast %78 : vector<8x16x16xf32> to vector<8x256xf32>
    %c0_80 = arith.constant 0 : index
    %c1_81 = arith.constant 1 : index
    %c0_82 = arith.constant 0 : index
    %80 = vector.load %arg13[%c0_80, %c1_81, %c0_82] : memref<8x18x18xf32, #tpu.memory_space<vmem>>, vector<8x16x16xf32>
    %81 = vector.shape_cast %80 : vector<8x16x16xf32> to vector<8x256xf32>
    %c0_83 = arith.constant 0 : index
    %c1_84 = arith.constant 1 : index
    %c1_85 = arith.constant 1 : index
    %82 = vector.load %arg13[%c0_83, %c1_84, %c1_85] : memref<8x18x18xf32, #tpu.memory_space<vmem>>, vector<8x16x16xf32>
    %83 = vector.shape_cast %82 : vector<8x16x16xf32> to vector<8x256xf32>
    %c0_86 = arith.constant 0 : index
    %c1_87 = arith.constant 1 : index
    %c2_88 = arith.constant 2 : index
    %84 = vector.load %arg13[%c0_86, %c1_87, %c2_88] : memref<8x18x18xf32, #tpu.memory_space<vmem>>, vector<8x16x16xf32>
    %85 = vector.shape_cast %84 : vector<8x16x16xf32> to vector<8x256xf32>
    %c0_89 = arith.constant 0 : index
    %c2_90 = arith.constant 2 : index
    %c0_91 = arith.constant 0 : index
    %86 = vector.load %arg13[%c0_89, %c2_90, %c0_91] : memref<8x18x18xf32, #tpu.memory_space<vmem>>, vector<8x16x16xf32>
    %87 = vector.shape_cast %86 : vector<8x16x16xf32> to vector<8x256xf32>
    %c0_92 = arith.constant 0 : index
    %c2_93 = arith.constant 2 : index
    %c1_94 = arith.constant 1 : index
    %88 = vector.load %arg13[%c0_92, %c2_93, %c1_94] : memref<8x18x18xf32, #tpu.memory_space<vmem>>, vector<8x16x16xf32>
    %89 = vector.shape_cast %88 : vector<8x16x16xf32> to vector<8x256xf32>
    %c0_95 = arith.constant 0 : index
    %c2_96 = arith.constant 2 : index
    %c2_97 = arith.constant 2 : index
    %90 = vector.load %arg13[%c0_95, %c2_96, %c2_97] : memref<8x18x18xf32, #tpu.memory_space<vmem>>, vector<8x16x16xf32>
    %91 = vector.shape_cast %90 : vector<8x16x16xf32> to vector<8x256xf32>
    %92 = tpu.concatenate %75, %77, %79, %81, %83, %85, %87, %89, %91 in 0 : vector<8x256xf32>, vector<8x256xf32>, vector<8x256xf32>, vector<8x256xf32>, vector<8x256xf32>, vector<8x256xf32>, vector<8x256xf32>, vector<8x256xf32>, vector<8x256xf32> -> vector<72x256xf32>
    %93 = arith.truncf %92 : vector<72x256xf32> to vector<72x256xbf16>
    %c0_98 = arith.constant 0 : index
    %c0_99 = arith.constant 0 : index
    %94 = vector.load %arg8[%c0_98, %c0_99] : memref<8x72xbf16, #tpu.memory_space<vmem>>, vector<8x72xbf16>
    %cst_100 = arith.constant dense<0.000000e+00> : vector<8x256xf32>
    %95 = tpu.matmul %94, %93, %cst_100 {dimension_numbers = #tpu.dot_dimension_numbers<[1], [0], [0], [1], [0, 0, 1, 1], [], []>} : vector<8x72xbf16>, vector<72x256xbf16>, vector<8x256xf32> -> vector<8x256xf32>
    %c0_101 = arith.constant 0 : index
    %c0_102 = arith.constant 0 : index
    %96 = vector.load %arg9[%c0_101, %c0_102] : memref<8x1xf32, #tpu.memory_space<vmem>>, vector<8x1xf32>
    %97 = vector.broadcast %96 : vector<8x1xf32> to vector<8x256xf32>
    %98 = arith.mulf %95, %97 : vector<8x256xf32>
    %c0_103 = arith.constant 0 : index
    %c0_104 = arith.constant 0 : index
    %99 = vector.load %arg10[%c0_103, %c0_104] : memref<8x1xf32, #tpu.memory_space<vmem>>, vector<8x1xf32>
    %100 = vector.broadcast %99 : vector<8x1xf32> to vector<8x256xf32>
    %101 = arith.addf %98, %100 : vector<8x256xf32>
    %cst_105 = arith.constant 0.000000e+00 : f32
    %102 = vector.broadcast %cst_105 : f32 to vector<8x256xf32>
    %103 = arith.maximumf %101, %102 : vector<8x256xf32>
    %c0_106 = arith.constant 0 : index
    %c0_107 = arith.constant 0 : index
    %c0_108 = arith.constant 0 : index
    %104 = vector.load %arg11[%c0_106, %c0_107, %c0_108] : memref<1x8x256xf32, #tpu.memory_space<vmem>>, vector<1x8x256xf32>
    %105 = vector.shape_cast %104 : vector<1x8x256xf32> to vector<8x256xf32>
    %106 = vector.shape_cast %103 : vector<8x256xf32> to vector<1x8x256xf32>
    tpu.vector_store %arg11[%c0_106, %c0_107, %c0_108], %106 {strides = array<i32>} : memref<1x8x256xf32, #tpu.memory_space<vmem>>, vector<1x8x256xf32>,
    return
  }
  func.func @transform_0(%arg0: i32) -> (i32, i32, i32) {
    %c0_i32 = arith.constant 0 : i32
    %c0_i32_0 = arith.constant 0 : i32
    %c0_i32_1 = arith.constant 0 : i32
    return %arg0, %c0_i32, %c0_i32_0 : i32, i32, i32
  }
  func.func @transform_1(%arg0: i32) -> (i32, i32, i32) {
    %c0_i32 = arith.constant 0 : i32
    %c0_i32_0 = arith.constant 0 : i32
    %c0_i32_1 = arith.constant 0 : i32
    return %arg0, %c0_i32, %c0_i32_0 : i32, i32, i32
  }
  func.func @transform_2(%arg0: i32) -> (i32, i32) {
    %c0_i32 = arith.constant 0 : i32
    %c0_i32_0 = arith.constant 0 : i32
    %c0_i32_1 = arith.constant 0 : i32
    return %c0_i32, %c0_i32_0 : i32, i32
  }
  func.func @transform_3(%arg0: i32) -> (i32, i32) {
    %c0_i32 = arith.constant 0 : i32
    %c0_i32_0 = arith.constant 0 : i32
    %c0_i32_1 = arith.constant 0 : i32
    return %c0_i32, %c0_i32_0 : i32, i32
  }
  func.func @transform_4(%arg0: i32) -> (i32, i32) {
    %c0_i32 = arith.constant 0 : i32
    %c0_i32_0 = arith.constant 0 : i32
    %c0_i32_1 = arith.constant 0 : i32
    return %c0_i32, %c0_i32_0 : i32, i32
  }
  func.func @transform_5(%arg0: i32) -> (i32, i32) {
    %c0_i32 = arith.constant 0 : i32
    %c0_i32_0 = arith.constant 0 : i32
    %c0_i32_1 = arith.constant 0 : i32
    return %c0_i32, %c0_i32_0 : i32, i32
  }
  func.func @transform_6(%arg0: i32) -> (i32, i32) {
    %c0_i32 = arith.constant 0 : i32
    %c0_i32_0 = arith.constant 0 : i32
    %c0_i32_1 = arith.constant 0 : i32
    return %c0_i32, %c0_i32_0 : i32, i32
  }
  func.func @transform_7(%arg0: i32) -> (i32, i32) {
    %c0_i32 = arith.constant 0 : i32
    %c0_i32_0 = arith.constant 0 : i32
    %c0_i32_1 = arith.constant 0 : i32
    return %c0_i32, %c0_i32_0 : i32, i32
  }
  func.func @transform_8(%arg0: i32) -> (i32, i32) {
    %c0_i32 = arith.constant 0 : i32
    %c0_i32_0 = arith.constant 0 : i32
    %c0_i32_1 = arith.constant 0 : i32
    return %c0_i32, %c0_i32_0 : i32, i32
  }
  func.func @transform_9(%arg0: i32) -> (i32, i32) {
    %c0_i32 = arith.constant 0 : i32
    %c0_i32_0 = arith.constant 0 : i32
    %c0_i32_1 = arith.constant 0 : i32
    return %c0_i32, %c0_i32_0 : i32, i32
  }
  func.func @transform_10(%arg0: i32) -> (i32, i32, i32) {
    %c0_i32 = arith.constant 0 : i32
    %c0_i32_0 = arith.constant 0 : i32
    %c0_i32_1 = arith.constant 0 : i32
    return %arg0, %c0_i32, %c0_i32_0 : i32, i32, i32
  }
}

</mosaic_0001>

<bundles_post_ra>
// kernel: up_conv_module_forward.1
= control target key start
LH: loop header
LB: loop body
LE: loop exit
PB: predicated region body
PF: predicated region fallthrough
CT: control target
= control target key end

     0   :  { %s9865_s13 = smov 0   ;;  %s15035_s0 = inlined_call_operand.vmem [shape: f32[2,4,64], index: 0, kind: input, shape index: {}]   ;;  %s15036_s1 = inlined_call_operand.vmem [shape: bf16[2,4,256], index: 1, kind: input, shape index: {}]   ;;  %s15037_s2 = inlined_call_operand.vmem [shape: f32[16,8], index: 2, kind: input, shape index: {}]   ;;  %s15038_s3 = inlined_call_operand.vmem [shape: f32[8,16], index: 3, kind: input, shape index: {}]   ;;  %s15039_s4 = inlined_call_operand.vmem [shape: bf16[8,72], index: 4, kind: input, shape index: {}]   ;;  %s15040_s5 = inlined_call_operand.vmem [shape: f32[8,1], index: 5, kind: input, shape index: {}]   ;;  %s15041_s6 = inlined_call_operand.vmem [shape: f32[8,1], index: 6, kind: input, shape index: {}]   ;;  %s15042_s7 = inlined_call_operand.vmem [shape: bf16[8,72], index: 7, kind: input, shape index: {}]   ;;  %s15043_s8 = inlined_call_operand.vmem [shape: f32[8,1], index: 8, kind: input, shape index: {}]   ;;  %s15044_s9 = inlined_call_operand.vmem [shape: f32[8,1], index: 9, kind: input, shape index: {}]   ;;  %s15045_s10 = inlined_call_operand.vmem [shape: f32[2,8,256], index: 10, kind: output, shape index: {}]  }
   0x1 LB: > { %s8954_s14 = sadd.s32 4294967295, %s9789_s13   ;;  %p8958_p0 = scmp.ge.s32.totalorder %s9789_s13, 1  ;;  %s9789_s13 = sphi %s9865_s13, %s20_s13  }
   0x2   : > { %p321_p1 = scmp.lt.s32.totalorder %s9789_s13, 3 }
   0x4   : > { %p322_p2 = pnand %p8958_p0, %p321_p1 }
   0x6   : > { %325 = sbr.rel (%p322_p2) target bundleno = 2282 (0x8ea), region = 60 }
   0xb   : > { %p363_p3 = scmp.lt.s32.totalorder %s8954_s14, 1  ;;  %s9791_s19 = smov 104   ;;  %v9795_v2 = vmov 0.0   ;;  %v9894_v3 = vld [vmem:[%s15038_s3] sm:$0xff]  ;;  %vm9798_vm0 = vmmov 0   ;;  %vm378_vm1 = vcmask 146432   ;;  %v472_v9 = vlaneseq }
   0xc   : > { %s9792_s20 = smov 120   ;;  %s9793_s24 = smov 96   ;;  %9008 = vmatprep.subr.mxu0 %v9795_v2  ;;  %9010 = vmatprep.mubr.msk.f32.mxu0 %vm9798_vm0, %v9795_v2  ;;  %379 = vst.msk [vmem:[#allocation2] sm:$0xff] %vm378_vm1, %v9795_v2  ;;  %380 = vst.msk [vmem:[#allocation2 + $0x8] sm:$0xff] %vm378_vm1, %v9795_v2  ;;  %v9804_v7 = vmov 1983009808  }
   0xd   : > { %s16181_s14 = smov (!%p363_p3, %s8954_s14), 1  ;;  %s9794_s25 = smov 112   ;;  %9009 = vmatpush3.msra.mxu0 %v9894_v3  ;;  %383 = vst.msk [vmem:[#allocation2 + $0x18] sm:$0xff] %vm378_vm1, %v9795_v2  ;;  %384 = vst.msk [vmem:[#allocation2 + $0x20] sm:$0xff] %vm378_vm1, %v9795_v2  ;;  %v470_v8 = vunpack.c.l.s4 %v9804_v7  ;;  %v473_v13 = vshrl.u32 %v472_v9, 7  ;;  %vm755_vm2 = vcmask 64512  }
   0xe   : > { %s8959_s15 = sshll.u32 %s16181_s14, 2  ;;  %s9796_s28 = smov 80   ;;  %9018 = vmatprep.subr.mxu0 %v9795_v2  ;;  %386 = vst.msk [vmem:[#allocation2 + $0x30] sm:$0xff] %vm378_vm1, %v9795_v2  ;;  %387 = vst.msk [vmem:[#allocation2 + $0x38] sm:$0xff] %vm378_vm1, %v9795_v2  ;;  %v9805_v14 = vmov 1934713408  }
   0xf   : > { %s366_s18 = scalar_lea.vmem %s15035_s0, %s8959_s15  ;;  %s371_s23 = scalar_lea.vmem %s15036_s1, %s8959_s15  ;;  %389 = vst.msk [vmem:[#allocation2 + $0x48] sm:$0xff] %vm378_vm1, %v9795_v2  ;;  %390 = vst.msk [vmem:[#allocation2 + $0x50] sm:$0xff] %vm378_vm1, %v9795_v2  ;;  %v471_v12 = vunpack.c.0.s8 %v470_v8  ;;  %v487_v15 = vunpack.c.l.s4 %v9805_v14  ;;  %vm381_vm3 = vcmask 140288   ;;  %vm652_vm4 = vcmask 138248  }
  0x10   : > { %v9879_v0 = vld [vmem:[%s366_s18] sm:$0xf]  ;;  %s9797_s29 = smov 88   ;;  %s9799_s30 = smov 72   ;;  %392 = vst.msk [vmem:[#allocation2 + $0x60] sm:$0xff] %vm378_vm1, %v9795_v2  ;;  %393 = vst.msk [vmem:[#allocation2 + $0x68] sm:$0xff] %vm378_vm1, %v9795_v2 }
  0x11   : > { %669 = vrot.lane.b32.xlu1 %v9879_v0, %s9791_s19  ;;  %663 = vrot.lane.b32.xlu0 %v9879_v0, %s9792_s20  ;;  %v428_v1 = vld [vmem:[%s371_s23] sm:$0xf]  ;;  %s9800_s11 = smov 48   ;;  %s9801_s12 = smov 64   ;;  %395 = vst.msk [vmem:[#allocation2 + $0x78] sm:$0xff] %vm378_vm1, %v9795_v2  ;;  %396 = vst.msk [vmem:[#allocation2 + $0x80] sm:$0xff] %vm378_vm1, %v9795_v2  ;;  %v9985_v19 = vsub.s32 %v471_v12, %v473_v13  ;;  %v488_v21 = vunpack.c.0.s8 %v487_v15 }
  0x12   : > { %v9896_v4 = vunpack.c.l.bf16 %v428_v1  ;;  %s9802_s15 = smov 16   ;;  %s9803_s16 = smov 32   ;;  %398 = vst.msk [vmem:[#allocation2 + $0x90] sm:$0xff] %vm378_vm1, %v9795_v2  ;;  %399 = vst.msk [vmem:[#allocation2 + $0x98] sm:$0xff] %vm378_vm1, %v9795_v2  ;;  %vm1742_vm5 = vcmask 130048   ;;  %vm1744_vm6 = vcmask 261120  }
  0x13   : > { %401 = vst.msk [vmem:[#allocation2 + $0xa8] sm:$0xff] %vm378_vm1, %v9795_v2  ;;  %402 = vst.msk [vmem:[#allocation2 + $0xb0] sm:$0xff] %vm378_vm1, %v9795_v2  ;;  %v9989_v28 = vsub.s32 %v488_v21, %v473_v13  ;;  %s9806_s17 = smov 1   ;;  %s9807_s20 = smov 126   ;;  %vm1746_vm7 = vcmask 392192   ;;  %vm1748_vm8 = vcmask 523264  }
  0x14   : > { %404 = vst.msk [vmem:[#allocation3] sm:$0xff] %vm378_vm1, %v9795_v2  ;;  %405 = vst.msk [vmem:[#allocation3 + $0x8] sm:$0xff] %vm378_vm1, %v9795_v2  ;;  %v431_v34 = vrot.slane %v9896_v4, 4  ;;  %s9808_s21 = smov 127   ;;  %vm1750_vm9 = vcmask 654336   ;;  %vm1752_vm10 = vcmask 785408  }
  0x15   : > { %672 = vrot.lane.b32.xlu1 %v9879_v0, %s9793_s24  ;;  %666 = vrot.lane.b32.xlu0 %v9879_v0, %s9794_s25  ;;  %407 = vst.msk [vmem:[#allocation3 + $0x18] sm:$0xff] %vm378_vm1, %v9795_v2  ;;  %408 = vst.msk [vmem:[#allocation3 + $0x20] sm:$0xff] %vm378_vm1, %v9795_v2  ;;  %vm1754_vm11 = vcmask 916480   ;;  %vm4882_vm12 = vcmask 1043456   ;;  %vm4878_vm13 = vcmask 588800  }
  0x16   : > { %410 = vst.msk [vmem:[#allocation3 + $0x30] sm:$0xff] %vm378_vm1, %v9795_v2  ;;  %411 = vst.msk [vmem:[#allocation3 + $0x38] sm:$0xff] %vm378_vm1, %v9795_v2 }
  0x17   : > { %413 = vst.msk [vmem:[#allocation3 + $0x48] sm:$0xff] %vm378_vm1, %v9795_v2  ;;  %414 = vst.msk [vmem:[#allocation3 + $0x50] sm:$0xff] %vm378_vm1, %v9795_v2 }
  0x18   : > { %416 = vst.msk [vmem:[#allocation3 + $0x60] sm:$0xff] %vm378_vm1, %v9795_v2  ;;  %417 = vst.msk [vmem:[#allocation3 + $0x68] sm:$0xff] %vm378_vm1, %v9795_v2 }
  0x19   : > { %678 = vrot.lane.b32.xlu1 %v9879_v0, %s9796_s28  ;;  %675 = vrot.lane.b32.xlu0 %v9879_v0, %s9797_s29  ;;  %419 = vst.msk [vmem:[#allocation3 + $0x78] sm:$0xff] %vm378_vm1, %v9795_v2  ;;  %420 = vst.msk [vmem:[#allocation3 + $0x80] sm:$0xff] %vm378_vm1, %v9795_v2 }
  0x1a   : > { %422 = vst.msk [vmem:[#allocation3 + $0x90] sm:$0xff] %vm378_vm1, %v9795_v2  ;;  %423 = vst.msk [vmem:[#allocation3 + $0x98] sm:$0xff] %vm378_vm1, %v9795_v2 }
  0x1b   : > { %425 = vst.msk [vmem:[#allocation3 + $0xa8] sm:$0xff] %vm378_vm1, %v9795_v2  ;;  %426 = vst.msk [vmem:[#allocation3 + $0xb0] sm:$0xff] %vm378_vm1, %v9795_v2 }
  0x1c   : > { %15423 = vst [vmem:[#allocation4_spill] sm:$0xff] %v9985_v19  ;;  %15424 = vst [vmem:[#allocation5_spill] sm:$0xff] %v9989_v28 }
  0x1d   : > { %681 = vrot.lane.b32.xlu0 %v9879_v0, %s9799_s30  ;;  %433 = vrot.lane.b32.xlu1 %v9896_v4, %s9794_s25  ;;  %382 = vst.msk [vmem:[#allocation2 + $0x10] sm:$0x3] %vm381_vm3, %v9795_v2  ;;  %385 = vst.msk [vmem:[#allocation2 + $0x28] sm:$0x3] %vm381_vm3, %v9795_v2 }
  0x1e   : > { %388 = vst.msk [vmem:[#allocation2 + $0x40] sm:$0x3] %vm381_vm3, %v9795_v2  ;;  %391 = vst.msk [vmem:[#allocation2 + $0x58] sm:$0x3] %vm381_vm3, %v9795_v2 }
  0x1f   : > { %394 = vst.msk [vmem:[#allocation2 + $0x70] sm:$0x3] %vm381_vm3, %v9795_v2  ;;  %397 = vst.msk [vmem:[#allocation2 + $0x88] sm:$0x3] %vm381_vm3, %v9795_v2 }
  0x20   : > { %400 = vst.msk [vmem:[#allocation2 + $0xa0] sm:$0x3] %vm381_vm3, %v9795_v2  ;;  %403 = vst.msk [vmem:[#allocation2 + $0xb8] sm:$0x3] %vm381_vm3, %v9795_v2 }
  0x21   : > { %441 = vrot.lane.b32.xlu1 %v9896_v4, %s9796_s28  ;;  %437 = vrot.lane.b32.xlu0 %v9896_v4, %s9793_s24  ;;  %406 = vst.msk [vmem:[#allocation3 + $0x10] sm:$0x3] %vm381_vm3, %v9795_v2  ;;  %409 = vst.msk [vmem:[#allocation3 + $0x28] sm:$0x3] %vm381_vm3, %v9795_v2 }
  0x22   : > { %412 = vst.msk [vmem:[#allocation3 + $0x40] sm:$0x3] %vm381_vm3, %v9795_v2  ;;  %415 = vst.msk [vmem:[#allocation3 + $0x58] sm:$0x3] %vm381_vm3, %v9795_v2 }
  0x23   : > { %418 = vst.msk [vmem:[#allocation3 + $0x70] sm:$0x3] %vm381_vm3, %v9795_v2  ;;  %421 = vst.msk [vmem:[#allocation3 + $0x88] sm:$0x3] %vm381_vm3, %v9795_v2 }
  0x24   : > { %424 = vst.msk [vmem:[#allocation3 + $0xa0] sm:$0x3] %vm381_vm3, %v9795_v2  ;;  %427 = vst.msk [vmem:[#allocation3 + $0xb8] sm:$0x3] %vm381_vm3, %v9795_v2 }
  0x25   : > { %449 = vrot.lane.b32.xlu1 %v9896_v4, %s9800_s11  ;;  %445 = vrot.lane.b32.xlu0 %v9896_v4, %s9801_s12 }
  0x29   : > { %457 = vrot.lane.b32.xlu1 %v9896_v4, %s9802_s15  ;;  %453 = vrot.lane.b32.xlu0 %v9896_v4, %s9803_s16 }
  0x83   : > { %v670_v5 = vpop.permute.xlu1 %669  ;;  %v664_v6 = vpop.permute.xlu0 %663 }
  0x84   : > { %v692_v20 = vcombine.low %v664_v6, %v670_v5 }
  0x86   : > { %v699_v26 = vrot.slane %v692_v20, %v9985_v19 }
  0x87   : > { %v673_v10 = vpop.permute.xlu1 %672  ;;  %v667_v11 = vpop.permute.xlu0 %666 }
  0x88   : > { %v684_v16 = vcombine.low %v9879_v0, %v667_v11 }
  0x8a   : > { %v691_v22 = vrot.slane %v684_v16, %v9985_v19 }
  0x8b   : > { %v679_v17 = vpop.permute.xlu1 %678  ;;  %v676_v18 = vpop.permute.xlu0 %675 }
  0x8c   : > { %v700_v23 = vcombine.low %v673_v10, %v679_v17  ;;  %v716_v29 = vcombine.low %v691_v22, %v699_v26  ;;  %v717_v51 = vcombine.high %v691_v22, %v699_v26 }
  0x8e   : > { %v707_v30 = vrot.slane %v700_v23, %v9985_v19  ;;  %v724_v41 = vrot.slane %v716_v29, %v9989_v28  ;;  %v731_v1 = vrot.slane %v717_v51, %v9989_v28 }
  0x8f   : > { %v682_v24 = vpop.permute.xlu0 %681  ;;  %v434_v25 = vpop.permute.xlu1 %433 }
  0x90   : > { %v708_v27 = vcombine.low %v676_v18, %v682_v24  ;;  %v435_v32 = vrot.slane %v434_v25, 4 }
  0x92   : > { %v715_v31 = vrot.slane %v708_v27, %v9985_v19 }
  0x93   : > { %v442_v33 = vpop.permute.xlu1 %441  ;;  %v438_v35 = vpop.permute.xlu0 %437 }
  0x94   : > { %v732_v36 = vcombine.low %v707_v30, %v715_v31  ;;  %v443_v37 = vrot.slane %v442_v33, 4  ;;  %v476_v38 = vcombine.low %v434_v25, %v442_v33  ;;  %v439_v39 = vrot.slane %v438_v35, 4 }
  0x95   : > { %v468_v40 = vcombine.low %v9896_v4, %v438_v35  ;;  %v733_v42 = vcombine.high %v707_v30, %v715_v31 }
  0x96   : > { %v740_v43 = vrot.slane %v732_v36, %v9989_v28  ;;  %v483_v44 = vrot.slane %v476_v38, %v9985_v19  ;;  %v544_v45 = vcombine.low %v435_v32, %v443_v37  ;;  %v536_v47 = vcombine.low %v431_v34, %v439_v39  ;;  %v10041_v36 = vld [vmem:[%s15037_s2] sm:$0xff] }
  0x97   : > { %v475_v46 = vrot.slane %v468_v40, %v9985_v19  ;;  %v450_v48 = vpop.permute.xlu1 %449  ;;  %v446_v49 = vpop.permute.xlu0 %445  ;;  %v747_v52 = vrot.slane %v733_v42, %v9989_v28  ;;  %9015 = vmatprep.mubr.msk.f32.mxu1 %vm755_vm2, %v10041_v36 }
  0x98   : > { %v748_v50 = vcombine.low %v724_v41, %v740_v43  ;;  %v749_v53 = vcombine.high %v724_v41, %v740_v43  ;;  %v451_v54 = vrot.slane %v450_v48, 4  ;;  %v447_v55 = vrot.slane %v446_v49, 4 }
  0x99   : > { %v551_v56 = vrot.slane %v544_v45, %v9985_v19  ;;  %v484_v57 = vcombine.low %v475_v46, %v483_v44  ;;  %v543_v58 = vrot.slane %v536_v47, %v9985_v19  ;;  %v750_v8 = vcombine.low %v731_v1, %v747_v52 }
  0x9a   : > { %9011 = vmatmul.mubr.msk.f32.vlgmr.msra.gmra.mxu0 %vm755_vm2, %v748_v50  ;;  %v485_v14 = vcombine.high %v475_v46, %v483_v44  ;;  %v751_v20 = vcombine.high %v731_v1, %v747_v52 }
  0x9b   : > { %9019 = vmatpush3.msra.mxu0 %v9894_v3  ;;  %9020 = vmatprep.mubr.msk.f32.mxu0 %vm9798_vm0, %v9795_v2  ;;  %v458_v59 = vpop.permute.xlu1 %457  ;;  %v454_v60 = vpop.permute.xlu0 %453  ;;  %v552_v9 = vcombine.low %v543_v58, %v551_v56  ;;  %v492_v13 = vrot.slane %v484_v57, %v9989_v28  ;;  %v553_v23 = vcombine.high %v543_v58, %v551_v56 }
  0x9c   : > { %9028 = vmatprep.subr.mxu0 %v9795_v2  ;;  %v459_v61 = vrot.slane %v458_v59, 4  ;;  %v510_v62 = vcombine.low %v450_v48, %v458_v59  ;;  %v455_v63 = vrot.slane %v454_v60, 4  ;;  %v502_v0 = vcombine.low %v446_v49, %v454_v60 }
  0x9d   : > { %v560_v18 = vrot.slane %v552_v9, %v9989_v28  ;;  %v499_v26 = vrot.slane %v485_v14, %v9989_v28  ;;  %v567_v30 = vrot.slane %v553_v23, %v9989_v28 }
  0x9e   : > { %9021 = vmatmul.mubr.msk.f32.vlgmr.msra.gmra.mxu0 %vm755_vm2, %v749_v53  ;;  %v517_v4 = vrot.slane %v510_v62, %v9985_v19  ;;  %v578_v5 = vcombine.low %v451_v54, %v459_v61  ;;  %v509_v6 = vrot.slane %v502_v0, %v9985_v19  ;;  %v570_v7 = vcombine.low %v447_v55, %v455_v63 }
  0x9f   : > { %9029 = vmatpush3.msra.mxu0 %v9894_v3  ;;  %9030 = vmatprep.mubr.msk.f32.mxu0 %vm9798_vm0, %v9795_v2 }
  0xa0   : > { %9038 = vmatprep.subr.mxu0 %v9795_v2  ;;  %v585_v10 = vrot.slane %v578_v5, %v9985_v19  ;;  %v518_v11 = vcombine.low %v509_v6, %v517_v4  ;;  %v577_v12 = vrot.slane %v570_v7, %v9985_v19  ;;  %v519_v15 = vcombine.high %v509_v6, %v517_v4 }
  0xa2   : > { %9031 = vmatmul.mubr.msk.f32.vlgmr.msra.gmra.mxu0 %vm755_vm2, %v750_v8  ;;  %v526_v16 = vrot.slane %v518_v11, %v9989_v28  ;;  %v586_v17 = vcombine.low %v577_v12, %v585_v10  ;;  %v587_v24 = vcombine.high %v577_v12, %v585_v10 }
  0xa3   : > { %9039 = vmatpush3.msra.mxu0 %v9894_v3  ;;  %9040 = vmatprep.mubr.msk.f32.mxu0 %vm9798_vm0, %v9795_v2  ;;  %v533_v3 = vrot.slane %v519_v15, %v9989_v28 }
  0xa4   : > { %v620_v21 = vcombine.low %v492_v13, %v526_v16  ;;  %v594_v22 = vrot.slane %v586_v17, %v9989_v28  ;;  %v8964_v25 = vcombine.high %v492_v13, %v526_v16  ;;  %v601_v31 = vrot.slane %v587_v24, %v9989_v28 }
  0xa5   : > { %v624_v32 = vcombine.low %v499_v26, %v533_v3  ;;  %v8966_v34 = vcombine.high %v499_v26, %v533_v3 }
  0xa6   : > { %9041 = vmatmul.mubr.msk.f32.vlgmr.msra.gmra.mxu0 %vm755_vm2, %v751_v20  ;;  %628 = vrot.lane.b32.xlu0 %v620_v21, %s9806_s17  ;;  %v621_v27 = vcombine.low %v560_v18, %v594_v22  ;;  %v8965_v29 = vcombine.high %v560_v18, %v594_v22  ;;  %v625_v33 = vcombine.low %v567_v30, %v601_v31 }
  0xa7   : > { %v8967_v35 = vcombine.high %v567_v30, %v601_v31 }
  0xa8   : > { %630 = vrot.lane.b32.xlu1 %v621_v27, %s9806_s17 }
  0xaa   : > { %632 = vrot.lane.b32.xlu0 %v8964_v25, %s9806_s17 }
  0xac   : > { %634 = vrot.lane.b32.xlu1 %v8965_v29, %s9806_s17 }
  0xae   : > { %636 = vrot.lane.b32.xlu0 %v624_v32, %s9806_s17 }
  0xb0   : > { %638 = vrot.lane.b32.xlu1 %v625_v33, %s9806_s17 }
  0xb2   : > { %640 = vrot.lane.b32.xlu0 %v8966_v34, %s9806_s17 }
  0xb4   : > { %642 = vrot.lane.b32.xlu1 %v8967_v35, %s9806_s17 }
 0x118   : > { %v629_v37 = vpop.permute.xlu0 %628 }
 0x119   : > { %653 = vst.msk [vmem:[#allocation2 + $0x1] sm:$0xff] %vm652_vm4, %v629_v37 }
 0x11a   : > { %v631_v38 = vpop.permute.xlu1 %630 }
 0x11b   : > { %654 = vst.msk [vmem:[#allocation2 + $0x9] sm:$0xff] %vm652_vm4, %v631_v38 }
 0x11c   : > { %v633_v39 = vpop.permute.xlu0 %632 }
 0x11d   : > { %655 = vst.msk [vmem:[#allocation2 + $0x19] sm:$0xff] %vm652_vm4, %v633_v39 }
 0x11e   : > { %v635_v40 = vpop.permute.xlu1 %634 }
 0x11f   : > { %656 = vst.msk [vmem:[#allocation2 + $0x21] sm:$0xff] %vm652_vm4, %v635_v40 }
 0x120   : > { %v637_v41 = vpop.permute.xlu0 %636  ;;  %v1398_v42 = vld [vmem:[#allocation2] sm:$0xff] }
 0x121   : > { %657 = vst.msk [vmem:[#allocation2 + $0x31] sm:$0xff] %vm652_vm4, %v637_v41  ;;  %2169 = vrot.lane.b32.xlu0 %v1398_v42, %s9807_s20  ;;  %1779 = vrot.lane.b32.xlu1 %v1398_v42, %s9808_s21  ;;  %v10088_v47 = vld [vmem:[#allocation2 + $0x1] sm:$0xff] }
 0x122   : > { %v639_v2 = vpop.permute.xlu1 %638  ;;  %v10099_v53 = vld [vmem:[#allocation2 + $0x8] sm:$0xff] }
 0x123   : > { %658 = vst.msk [vmem:[#allocation2 + $0x39] sm:$0xff] %vm652_vm4, %v639_v2  ;;  %v10112_v58 = vld [vmem:[#allocation2 + $0x2] sm:$0xff]  ;;  %v10181_v31 = vld [vmem:[#allocation2 + $0xa] sm:$0xff] }
 0x124   : > { %v641_v43 = vpop.permute.xlu0 %640  ;;  %v1400_v44 = vld [vmem:[#allocation2 + $0x18] sm:$0xff] }
 0x125   : > { %659 = vst.msk [vmem:[#allocation2 + $0x49] sm:$0xff] %vm652_vm4, %v641_v43  ;;  %2173 = vrot.lane.b32.xlu0 %v1400_v44, %s9807_s20  ;;  %1783 = vrot.lane.b32.xlu1 %v1400_v44, %s9808_s21  ;;  %v10116_v61 = vld [vmem:[#allocation2 + $0x19] sm:$0xff] }
 0x126   : > { %v643_v45 = vpop.permute.xlu1 %642  ;;  %v1401_v15 = vld [vmem:[#allocation2 + $0x20] sm:$0xff] }
 0x127   : > { %660 = vst.msk [vmem:[#allocation2 + $0x51] sm:$0xff] %vm652_vm4, %v643_v45  ;;  %v10183_v32 = vld [vmem:[#allocation2 + $0x1a] sm:$0xff]  ;;  %v3716_v37 = vld [vmem:[#allocation2 + $0x22] sm:$0xff] }
 0x128   : > { %v1402_v46 = vld [vmem:[#allocation2 + $0x30] sm:$0xff] }
 0x129   : > { %v10090_v48 = vld [vmem:[#allocation2 + $0x31] sm:$0xff]  ;;  %2177 = vrot.lane.b32.xlu0 %v1402_v46, %s9807_s20  ;;  %v1414_v49 = vcombine.low %v1398_v42, %v1402_v46  ;;  %v1415_v50 = vcombine.high %v1398_v42, %v1402_v46  ;;  %1787 = vrot.lane.b32.xlu1 %v1402_v46, %s9808_s21 }
 0x12a   : > { %v2575_v51 = vcombine.low %v10088_v47, %v10090_v48  ;;  %v2576_v52 = vcombine.high %v10088_v47, %v10090_v48  ;;  %v10110_v57 = vld [vmem:[#allocation2 + $0x38] sm:$0xff] }
 0x12b   : > { %v10102_v54 = vrot.slane %v1414_v49, %v9985_v19  ;;  %v10105_v55 = vrot.slane %v1415_v50, %v9985_v19  ;;  %v10114_v59 = vld [vmem:[#allocation2 + $0x32] sm:$0xff]  ;;  %v1550_v0 = vcombine.low %v10099_v53, %v10110_v57  ;;  %v1551_v1 = vcombine.high %v10099_v53, %v10110_v57  ;;  %v10185_v33 = vld [vmem:[#allocation2 + $0x3a] sm:$0xff] }
 0x12c   : > { %v10108_v56 = vrot.slane %v2575_v51, %v9985_v19  ;;  %v1404_v60 = vld [vmem:[#allocation2 + $0x48] sm:$0xff]  ;;  %v10121_v63 = vrot.slane %v2576_v52, %v9985_v19  ;;  %v3729_v4 = vcombine.low %v10112_v58, %v10114_v59  ;;  %v3730_v11 = vcombine.high %v10112_v58, %v10114_v59 }
 0x12d   : > { %v10118_v62 = vld [vmem:[#allocation2 + $0x49] sm:$0xff]  ;;  %2181 = vrot.lane.b32.xlu0 %v1404_v60, %s9807_s20  ;;  %v1430_v5 = vcombine.low %v1400_v44, %v1404_v60  ;;  %v1431_v6 = vcombine.high %v1400_v44, %v1404_v60  ;;  %1791 = vrot.lane.b32.xlu1 %v1404_v60, %s9808_s21  ;;  %v10136_v9 = vrot.slane %v1550_v0, %v9985_v19 }
 0x12e   : > { %v2591_v7 = vcombine.low %v10116_v61, %v10118_v62  ;;  %v2592_v8 = vcombine.high %v10116_v61, %v10118_v62  ;;  %v10139_v10 = vrot.slane %v1551_v1, %v9985_v19  ;;  %v1405_v16 = vld [vmem:[#allocation2 + $0x50] sm:$0xff]  ;;  %v10153_v17 = vrot.slane %v3729_v4, %v9985_v19 }
 0x12f   : > { %v10144_v12 = vrot.slane %v1430_v5, %v9985_v19  ;;  %v10147_v13 = vrot.slane %v1431_v6, %v9985_v19  ;;  %v1566_v20 = vcombine.low %v1401_v15, %v1405_v16  ;;  %v1567_v21 = vcombine.high %v1401_v15, %v1405_v16  ;;  %v10197_v40 = vld [vmem:[#allocation2 + $0x4a] sm:$0xff]  ;;  %v10199_v41 = vld [vmem:[#allocation2 + $0x52] sm:$0xff] }
 0x130   : > { %v10150_v14 = vrot.slane %v2591_v7, %v9985_v19  ;;  %v10156_v18 = vrot.slane %v2592_v8, %v9985_v19  ;;  %v10159_v22 = vrot.slane %v3730_v11, %v9985_v19  ;;  %v3865_v38 = vcombine.low %v10181_v31, %v10185_v33 }
 0x131   : > { %2937 = vrot.lane.b32.xlu0 %v10116_v61, %s9808_s21  ;;  %2933 = vrot.lane.b32.xlu1 %v10088_v47, %s9808_s21  ;;  %v10188_v34 = vrot.slane %v1566_v20, %v9985_v19  ;;  %v10191_v35 = vrot.slane %v1567_v21, %v9985_v19  ;;  %v3866_v39 = vcombine.high %v10181_v31, %v10185_v33 }
 0x132   : > { %v3745_v42 = vcombine.low %v10183_v32, %v10197_v40  ;;  %v3746_v2 = vcombine.high %v10183_v32, %v10197_v40  ;;  %v3881_v43 = vcombine.low %v3716_v37, %v10199_v41  ;;  %v3882_v44 = vcombine.high %v3716_v37, %v10199_v41 }
 0x133   : > { %v10220_v51 = vrot.slane %v3865_v38, %v9985_v19  ;;  %v10223_v52 = vrot.slane %v3866_v39, %v9985_v19 }
 0x134   : > { %v10226_v60 = vrot.slane %v3745_v42, %v9985_v19  ;;  %v10229_v0 = vrot.slane %v3746_v2, %v9985_v19  ;;  %v10232_v1 = vrot.slane %v3881_v43, %v9985_v19  ;;  %v10235_v4 = vrot.slane %v3882_v44, %v9985_v19 }
 0x135   : > { %2945 = vrot.lane.b32.xlu0 %v10118_v62, %s9808_s21  ;;  %2941 = vrot.lane.b32.xlu1 %v10090_v48, %s9808_s21 }
 0x139   : > { %3327 = vrot.lane.b32.xlu0 %v10116_v61, %s9807_s20  ;;  %3323 = vrot.lane.b32.xlu1 %v10088_v47, %s9807_s20 }
 0x13d   : > { %3335 = vrot.lane.b32.xlu0 %v10118_v62, %s9807_s20  ;;  %3331 = vrot.lane.b32.xlu1 %v10090_v48, %s9807_s20  ;;  %v753_v48 = vld [vmem:[%s15037_s2 + $0x8] sm:$0xff] }
 0x141   : > { %1781 = vrot.lane.b32.xlu0 %v10099_v53, %s9808_s21  ;;  %2171 = vrot.lane.b32.xlu1 %v10099_v53, %s9807_s20 }
 0x145   : > { %1785 = vrot.lane.b32.xlu0 %v1401_v15, %s9808_s21  ;;  %2175 = vrot.lane.b32.xlu1 %v1401_v15, %s9807_s20 }
 0x149   : > { %1789 = vrot.lane.b32.xlu0 %v10110_v57, %s9808_s21  ;;  %2179 = vrot.lane.b32.xlu1 %v10110_v57, %s9807_s20 }
 0x14d   : > { %1793 = vrot.lane.b32.xlu0 %v1405_v16, %s9808_s21  ;;  %2183 = vrot.lane.b32.xlu1 %v1405_v16, %s9807_s20 }
 0x151   : > { %4479 = vrot.lane.b32.xlu0 %v10181_v31, %s9807_s20  ;;  %4477 = vrot.lane.b32.xlu1 %v10112_v58, %s9807_s20 }
 0x155   : > { %4483 = vrot.lane.b32.xlu0 %v3716_v37, %s9807_s20  ;;  %4481 = vrot.lane.b32.xlu1 %v10183_v32, %s9807_s20 }
 0x159   : > { %4487 = vrot.lane.b32.xlu0 %v10185_v33, %s9807_s20  ;;  %4485 = vrot.lane.b32.xlu1 %v10114_v59, %s9807_s20 }
 0x15a   : > { %v825_v47 = vpop.f32.mrf.mxu0 }
 0x15b   : > { %9013 = vmatprep.subr.mxu1 %v825_v47 }
 0x15c   : > { %v9012_v53 = vpop.f32.mrf.mxu0  ;;  %9014 = vmatpush3.msra.mxu1 %v825_v47 }
 0x15d   : > { %9016 = vmatmul.mubr.msk.f32.vlgmr.msra.gmra.mxu1 %vm755_vm2, %v753_v48  ;;  %4491 = vrot.lane.b32.xlu0 %v10199_v41, %s9807_s20 }
 0x15e   : > { %v990_v57 = vpop.f32.mrf.mxu0  ;;  %9025 = vmatprep.mubr.msk.f32.mxu1 %vm755_vm2, %v10041_v36  ;;  %4489 = vrot.lane.b32.xlu1 %v10197_v40, %s9807_s20 }
 0x15f   : > { %9023 = vmatprep.subr.mxu1 %v990_v57 }
 0x160   : > { %v9022_v61 = vpop.f32.mrf.mxu0  ;;  %9024 = vmatpush3.msra.mxu1 %v990_v57 }
 0x161   : > { %9026 = vmatmul.mubr.msk.f32.vlgmr.msra.gmra.mxu1 %vm755_vm2, %v753_v48  ;;  %4093 = vrot.lane.b32.xlu0 %v3716_v37, %s9808_s21 }
 0x162   : > { %v1149_v62 = vpop.f32.mrf.mxu0  ;;  %9035 = vmatprep.mubr.msk.f32.mxu1 %vm755_vm2, %v10041_v36  ;;  %4089 = vrot.lane.b32.xlu1 %v10181_v31, %s9808_s21  ;;  %v10318_v31 = vld [vmem:[#allocation2 + $0x9] sm:$0xff] }
 0x163   : > { %9033 = vmatprep.subr.mxu1 %v1149_v62 }
 0x164   : > { %v9032_v15 = vpop.f32.mrf.mxu0  ;;  %9034 = vmatpush3.msra.mxu1 %v1149_v62 }
 0x165   : > { %9036 = vmatmul.mubr.msk.f32.vlgmr.msra.gmra.mxu1 %vm755_vm2, %v753_v48  ;;  %4101 = vrot.lane.b32.xlu0 %v10199_v41, %s9808_s21 }
 0x166   : > { %v1308_v16 = vpop.f32.mrf.mxu0  ;;  %9045 = vmatprep.mubr.msk.f32.mxu1 %vm755_vm2, %v10041_v36  ;;  %4097 = vrot.lane.b32.xlu1 %v10185_v33, %s9808_s21  ;;  %v10316_v36 = vld [vmem:[#allocation2 + $0x21] sm:$0xff]  ;;  %v10326_v33 = vld [vmem:[#allocation2 + $0x39] sm:$0xff] }
 0x167   : > { %9043 = vmatprep.subr.mxu1 %v1308_v16 }
 0x168   : > { %v9042_v37 = vpop.f32.mrf.mxu0  ;;  %9044 = vmatpush3.msra.mxu1 %v1308_v16 }
 0x169   : > { %9046 = vmatmul.mubr.msk.f32.vlgmr.msra.gmra.mxu1 %vm755_vm2, %v753_v48  ;;  %4091 = vrot.lane.b32.xlu0 %v10183_v32, %s9808_s21  ;;  %v10324_v32 = vld [vmem:[#allocation2 + $0x51] sm:$0xff] }
 0x16a   : > { %4087 = vrot.lane.b32.xlu1 %v10112_v58, %s9808_s21 }
 0x16d   : > { %4099 = vrot.lane.b32.xlu0 %v10197_v40, %s9808_s21 }
 0x16e   : > { %4095 = vrot.lane.b32.xlu1 %v10114_v59, %s9808_s21 }
 0x171   : > { %2939 = vrot.lane.b32.xlu0 %v10316_v36, %s9808_s21 }
 0x172   : > { %2935 = vrot.lane.b32.xlu1 %v10318_v31, %s9808_s21 }
 0x175   : > { %2947 = vrot.lane.b32.xlu0 %v10324_v32, %s9808_s21 }
 0x176   : > { %2943 = vrot.lane.b32.xlu1 %v10326_v33, %s9808_s21 }
 0x179   : > { %3329 = vrot.lane.b32.xlu0 %v10316_v36, %s9807_s20 }
 0x17a   : > { %3325 = vrot.lane.b32.xlu1 %v10318_v31, %s9807_s20 }
 0x17d   : > { %3337 = vrot.lane.b32.xlu0 %v10324_v32, %s9807_s20 }
 0x17e   : > { %3333 = vrot.lane.b32.xlu1 %v10326_v33, %s9807_s20 }
 0x193   : > { %v10340_v58 = vpop.permute.xlu1 %1779  ;;  %v10342_v59 = vpop.permute.xlu0 %2169 }
 0x194   : > { %15425 = vst [vmem:[#allocation6_spill] sm:$0xff] %v10340_v58  ;;  %15426 = vst [vmem:[#allocation7_spill] sm:$0xff] %v10342_v59 }
 0x197   : > { %v10344_v39 = vpop.permute.xlu1 %1783  ;;  %v10346_v40 = vpop.permute.xlu0 %2173 }
 0x198   : > { %15427 = vst [vmem:[#allocation8_spill] sm:$0xff] %v10344_v39  ;;  %15428 = vst [vmem:[#allocation9_spill] sm:$0xff] %v10346_v40 }
 0x19b   : > { %v10348_v41 = vpop.permute.xlu1 %1787  ;;  %v10350_v42 = vpop.permute.xlu0 %2177 }
 0x19c   : > { %15429 = vst [vmem:[#allocation10_spill] sm:$0xff] %v10348_v41  ;;  %15430 = vst [vmem:[#allocation11_spill] sm:$0xff] %v10350_v42 }
 0x19f   : > { %v10352_v2 = vpop.permute.xlu1 %1791  ;;  %v10354_v43 = vpop.permute.xlu0 %2181 }
 0x1a0   : > { %15431 = vst [vmem:[#allocation12_spill] sm:$0xff] %v10352_v2  ;;  %15432 = vst [vmem:[#allocation13_spill] sm:$0xff] %v10354_v43 }
 0x1a3   : > { %v10356_v44 = vpop.permute.xlu1 %2933  ;;  %v10358_v47 = vpop.permute.xlu0 %2937 }
 0x1a4   : > { %15433 = vst [vmem:[#allocation14_spill] sm:$0xff] %v10356_v44  ;;  %15434 = vst [vmem:[#allocation15_spill] sm:$0xff] %v10358_v47 }
 0x1a7   : > { %v10361_v57 = vpop.permute.xlu1 %2941  ;;  %v10364_v62 = vpop.permute.xlu0 %2945 }
 0x1a8   : > { %15435 = vst [vmem:[#allocation16_spill] sm:$0xff] %v10361_v57  ;;  %15436 = vst [vmem:[#allocation17_spill] sm:$0xff] %v10364_v62 }
 0x1ab   : > { %v10368_v37 = vpop.permute.xlu1 %3323 }
 0x1ac   : > { %15437 = vst [vmem:[#allocation18_spill] sm:$0xff] %v10368_v37 }
 0x1af   : > { %v10375_v27 = vpop.permute.xlu1 %3331 }
 0x1b0   : > { %15439 = vst [vmem:[#allocation20_spill] sm:$0xff] %v10375_v27 }
 0x21d   : > { %v9017_v48 = vpop.f32.mrf.mxu1 }
 0x21e   : > { %914 = vrot.lane.b32.xlu1 %v9017_v48, %s9806_s17  ;;  %v10371_v48 = vpop.permute.xlu0 %3327 }
 0x21f   : > { %v901_v53 = vpop.f32.mrf.mxu1  ;;  %15438 = vst [vmem:[#allocation19_spill] sm:$0xff] %v10371_v48 }
 0x220   : > { %912 = vrot.lane.b32.xlu0 %v901_v53, %s9806_s17 }
 0x221   : > { %v9027_v61 = vpop.f32.mrf.mxu1 }
 0x222   : > { %1073 = vrot.lane.b32.xlu1 %v9027_v61, %s9806_s17  ;;  %v10378_v61 = vpop.permute.xlu0 %3335 }
 0x223   : > { %v1060_v15 = vpop.f32.mrf.mxu1  ;;  %15440 = vst [vmem:[#allocation21_spill] sm:$0xff] %v10378_v61 }
 0x224   : > { %1071 = vrot.lane.b32.xlu0 %v1060_v15, %s9806_s17  ;;  %v10380_v15 = vpop.permute.xlu1 %2171 }
 0x225   : > { %v9037_v16 = vpop.f32.mrf.mxu1  ;;  %15441 = vst [vmem:[#allocation22_spill] sm:$0xff] %v10380_v15  ;;  %v15480_v15 = vcombine.low %v10139_v10, %v10191_v35 }
 0x226   : > { %1232 = vrot.lane.b32.xlu1 %v9037_v16, %s9806_s17  ;;  %v10382_v3 = vpop.permute.xlu0 %1781 }
 0x227   : > { %v1219_v30 = vpop.f32.mrf.mxu1  ;;  %15442 = vst [vmem:[#allocation23_spill] sm:$0xff] %v10382_v3 }
 0x228   : > { %1230 = vrot.lane.b32.xlu0 %v1219_v30, %s9806_s17  ;;  %v10384_v16 = vpop.permute.xlu1 %2175 }
 0x229   : > { %v9047_v29 = vpop.f32.mrf.mxu1  ;;  %15443 = vst [vmem:[#allocation24_spill] sm:$0xff] %v10384_v16 }
 0x22a   : > { %1391 = vrot.lane.b32.xlu1 %v9047_v29, %s9806_s17  ;;  %v10386_v8 = vpop.permute.xlu0 %1785 }
 0x22b   : > { %v1378_v53 = vpop.f32.mrf.mxu1  ;;  %15444 = vst [vmem:[#allocation25_spill] sm:$0xff] %v10386_v8 }
 0x22c   : > { %1389 = vrot.lane.b32.xlu0 %v1378_v53, %s9806_s17  ;;  %v10388_v5 = vpop.permute.xlu1 %2179 }
 0x22d   : > { %15445 = vst [vmem:[#allocation26_spill] sm:$0xff] %v10388_v5  ;;  %v10500_v5 = vrot.slane %v15480_v15, %v9989_v28  ;;  %v15483_v15 = vcombine.high %v10220_v51, %v10232_v1 }
 0x22e   : > { %v10390_v30 = vpop.permute.xlu0 %1789 }
 0x22f   : > { %15446 = vst [vmem:[#allocation27_spill] sm:$0xff] %v10390_v30 }
 0x230   : > { %v10392_v29 = vpop.permute.xlu1 %2183 }
 0x231   : > { %15447 = vst [vmem:[#allocation28_spill] sm:$0xff] %v10392_v29 }
 0x232   : > { %v10394_v7 = vpop.permute.xlu0 %1793 }
 0x233   : > { %15448 = vst [vmem:[#allocation29_spill] sm:$0xff] %v10394_v7 }
 0x234   : > { %v10396_v6 = vpop.permute.xlu1 %4477 }
 0x235   : > { %15449 = vst [vmem:[#allocation30_spill] sm:$0xff] %v10396_v6 }
 0x236   : > { %v10398_v53 = vpop.permute.xlu0 %4479 }
 0x237   : > { %15450 = vst [vmem:[#allocation31_spill] sm:$0xff] %v10398_v53 }
 0x238   : > { %v10400_v38 = vpop.permute.xlu1 %4481 }
 0x239   : > { %15451 = vst [vmem:[#allocation32_spill] sm:$0xff] %v10400_v38 }
 0x23a   : > { %v10402_v21 = vpop.permute.xlu0 %4483 }
 0x23b   : > { %15452 = vst [vmem:[#allocation33_spill] sm:$0xff] %v10402_v21 }
 0x23c   : > { %v10404_v11 = vpop.permute.xlu1 %4485 }
 0x23d   : > { %15453 = vst [vmem:[#allocation34_spill] sm:$0xff] %v10404_v11 }
 0x23e   : > { %v10406_v20 = vpop.permute.xlu0 %4487 }
 0x23f   : > { %15454 = vst [vmem:[#allocation35_spill] sm:$0xff] %v10406_v20 }
 0x240   : > { %v10408_v50 = vpop.permute.xlu1 %4489 }
 0x241   : > { %15455 = vst [vmem:[#allocation36_spill] sm:$0xff] %v10408_v50 }
 0x242   : > { %v10410_v26 = vpop.permute.xlu0 %4491 }
 0x243   : > { %15456 = vst [vmem:[#allocation37_spill] sm:$0xff] %v10410_v26 }
 0x244   : > { %v10412_v49 = vpop.permute.xlu1 %4089 }
 0x245   : > { %15457 = vst [vmem:[#allocation38_spill] sm:$0xff] %v10412_v49 }
 0x246   : > { %v10414_v25 = vpop.permute.xlu0 %4093 }
 0x247   : > { %15458 = vst [vmem:[#allocation39_spill] sm:$0xff] %v10414_v25 }
 0x248   : > { %v10416_v45 = vpop.permute.xlu1 %4097 }
 0x249   : > { %15459 = vst [vmem:[#allocation40_spill] sm:$0xff] %v10416_v45 }
 0x24a   : > { %v10418_v23 = vpop.permute.xlu0 %4101 }
 0x24b   : > { %15460 = vst [vmem:[#allocation41_spill] sm:$0xff] %v10418_v23 }
 0x24c   : > { %v10420_v46 = vpop.permute.xlu1 %4087 }
 0x24d   : > { %15461 = vst [vmem:[#allocation42_spill] sm:$0xff] %v10420_v46 }
 0x24e   : > { %v10422_v24 = vpop.permute.xlu0 %4091 }
 0x24f   : > { %15462 = vst [vmem:[#allocation43_spill] sm:$0xff] %v10422_v24 }
 0x250   : > { %v10424_v38 = vpop.permute.xlu1 %4095 }
 0x251   : > { %15463 = vst [vmem:[#allocation44_spill] sm:$0xff] %v10424_v38  ;;  %v2711_v38 = vcombine.low %v10318_v31, %v10326_v33 }
 0x252   : > { %v10426_v6 = vpop.permute.xlu0 %4099 }
 0x253   : > { %15464 = vst [vmem:[#allocation45_spill] sm:$0xff] %v10426_v6  ;;  %v2727_v6 = vcombine.low %v10316_v36, %v10324_v32 }
 0x254   : > { %v10428_v11 = vpop.permute.xlu1 %2935 }
 0x255   : > { %15465 = vst [vmem:[#allocation46_spill] sm:$0xff] %v10428_v11 }
 0x256   : > { %v10430_v50 = vpop.permute.xlu0 %2939 }
 0x257   : > { %15466 = vst [vmem:[#allocation47_spill] sm:$0xff] %v10430_v50 }
 0x258   : > { %v10432_v16 = vpop.permute.xlu1 %2943 }
 0x259   : > { %15467 = vst [vmem:[#allocation48_spill] sm:$0xff] %v10432_v16  ;;  %v2712_v16 = vcombine.high %v10318_v31, %v10326_v33 }
 0x25a   : > { %v10434_v49 = vpop.permute.xlu0 %2947 }
 0x25b   : > { %15468 = vst [vmem:[#allocation49_spill] sm:$0xff] %v10434_v49  ;;  %v2726_v50 = vrot.slane %v2712_v16, %v9985_v19 }
 0x25c   : > { %v10436_v25 = vpop.permute.xlu1 %3325 }
 0x25d   : > { %15469 = vst [vmem:[#allocation50_spill] sm:$0xff] %v10436_v25  ;;  %v2728_v25 = vcombine.high %v10316_v36, %v10324_v32  ;;  %v15474_v32 = vcombine.high %v10136_v9, %v10188_v34 }
 0x25e   : > { %v10438_v45 = vpop.permute.xlu0 %3329 }
 0x25f   : > { %15470 = vst [vmem:[#allocation51_spill] sm:$0xff] %v10438_v45  ;;  %v2735_v45 = vrot.slane %v2727_v6, %v9985_v19  ;;  %v2742_v49 = vrot.slane %v2728_v25, %v9985_v19  ;;  %v15473_v25 = vcombine.high %v10102_v54, %v10144_v12  ;;  %v10474_v16 = vrot.slane %v15474_v32, %v9989_v28 }
 0x260   : > { %v10440_v23 = vpop.permute.xlu1 %3333 }
 0x261   : > { %15471 = vst [vmem:[#allocation52_spill] sm:$0xff] %v10440_v23  ;;  %v2791_v36 = vcombine.low %v2726_v50, %v2742_v49  ;;  %v2792_v6 = vcombine.high %v2726_v50, %v2742_v49  ;;  %v15475_v49 = vcombine.low %v10102_v54, %v10144_v12  ;;  %v15481_v54 = vcombine.high %v10105_v55, %v10147_v13 }
 0x262   : > { %v10442_v46 = vpop.permute.xlu0 %3337  ;;  %v15482_v12 = vcombine.high %v10139_v10, %v10191_v35  ;;  %v15488_v35 = vcombine.high %v10223_v52, %v10235_v4 }
 0x263   : > { %15472 = vst [vmem:[#allocation53_spill] sm:$0xff] %v10442_v46  ;;  %v10482_v50 = vrot.slane %v15475_v49, %v9989_v28 }
 0x265   : > { %15476 = vst [vmem:[#allocation54_spill] sm:$0xff] %v10482_v50 }
 0x290   : > { %v915_v24 = vpop.permute.xlu1 %914 }
 0x291   : > { %920 = vst.msk [vmem:[#allocation2 + $0x69] sm:$0xff] %vm652_vm4, %v915_v24  ;;  %v2719_v24 = vrot.slane %v2711_v38, %v9985_v19 }
 0x292   : > { %v913_v11 = vpop.permute.xlu0 %912 }
 0x293   : > { %919 = vst.msk [vmem:[#allocation2 + $0x61] sm:$0xff] %vm652_vm4, %v913_v11  ;;  %v2776_v11 = vcombine.high %v2719_v24, %v2735_v45 }
 0x294   : > { %v1074_v23 = vpop.permute.xlu1 %1073 }
 0x295   : > { %1079 = vst.msk [vmem:[#allocation2 + $0x81] sm:$0xff] %vm652_vm4, %v1074_v23  ;;  %v2775_v23 = vcombine.low %v2719_v24, %v2735_v45  ;;  %v15477_v24 = vcombine.low %v10136_v9, %v10188_v34  ;;  %v10510_v9 = vrot.slane %v15481_v54, %v9989_v28  ;;  %v10516_v34 = vrot.slane %v15482_v12, %v9989_v28 }
 0x296   : > { %v1072_v46 = vpop.permute.xlu0 %1071  ;;  %v15490_v54 = vcombine.high %v10153_v17, %v10226_v60 }
 0x297   : > { %1078 = vst.msk [vmem:[#allocation2 + $0x79] sm:$0xff] %vm652_vm4, %v1072_v46  ;;  %v10468_v46 = vrot.slane %v15473_v25, %v9989_v28  ;;  %v15479_v25 = vcombine.low %v10105_v55, %v10147_v13  ;;  %v15486_v13 = vcombine.low %v10223_v52, %v10235_v4  ;;  %v15494_v52 = vcombine.low %v10153_v17, %v10226_v60 }
 0x298   : > { %v1233_v31 = vpop.permute.xlu1 %1232  ;;  %v3722_v33 = vld [vmem:[#allocation2 + $0x6a] sm:$0xff]  ;;  %v10546_v12 = vrot.slane %v15490_v54, %v9989_v28  ;;  %v10578_v17 = vrot.slane %v2775_v23, %v9989_v28 }
 0x299   : > { %1238 = vst.msk [vmem:[#allocation2 + $0x99] sm:$0xff] %vm652_vm4, %v1233_v31  ;;  %4105 = vrot.lane.b32.xlu1 %v3722_v33, %s9808_s21  ;;  %4495 = vrot.lane.b32.xlu0 %v3722_v33, %s9807_s20  ;;  %v2568_v29 = vld [vmem:[#allocation2 + $0x69] sm:$0xff]  ;;  %v10494_v32 = vrot.slane %v15479_v25, %v9989_v28  ;;  %v10534_v10 = vrot.slane %v15486_v13, %v9989_v28 }
 0x29a   : > { %v1231_v38 = vpop.permute.xlu0 %1230  ;;  %v10476_v45 = vld [vmem:[#allocation2 + $0x68] sm:$0xff]  ;;  %v10540_v25 = vrot.slane %v15488_v35, %v9989_v28  ;;  %15491 = vst [vmem:[#allocation59_spill] sm:$0xff] %v10546_v12  ;;  %v10559_v4 = vrot.slane %v15494_v52, %v9989_v28  ;;  %v1406_v35 = vld [vmem:[#allocation2 + $0x60] sm:$0xff]  ;;  %15502 = vst [vmem:[#allocation66_spill] sm:$0xff] %v10578_v17 }
 0x29b   : > { %1237 = vst.msk [vmem:[#allocation2 + $0x91] sm:$0xff] %vm652_vm4, %v1231_v38  ;;  %v10488_v38 = vrot.slane %v15477_v24, %v9989_v28  ;;  %v15484_v24 = vcombine.low %v10220_v51, %v10232_v1  ;;  %15487 = vst [vmem:[#allocation57_spill] sm:$0xff] %v10534_v10  ;;  %v15492_v51 = vcombine.low %v10159_v22, %v10229_v0  ;;  %v3721_v3 = vld [vmem:[#allocation2 + $0x62] sm:$0xff] }
 0x29c   : > { %v1392_v31 = vpop.permute.xlu1 %1391  ;;  %15489 = vst [vmem:[#allocation58_spill] sm:$0xff] %v10540_v25  ;;  %15495 = vst [vmem:[#allocation61_spill] sm:$0xff] %v10559_v4  ;;  %v10630_v8 = vld [vmem:[#allocation2 + $0x81] sm:$0xff] }
 0x29d   : > { %15478 = vst [vmem:[#allocation55_spill] sm:$0xff] %v10488_v38  ;;  %1397 = vst.msk [vmem:[#allocation2 + $0xb1] sm:$0xff] %vm652_vm4, %v1392_v31  ;;  %2951 = vrot.lane.b32.xlu1 %v2568_v29, %s9808_s21  ;;  %1797 = vrot.lane.b32.xlu0 %v10476_v45, %s9808_s21  ;;  %v10522_v31 = vrot.slane %v15483_v15, %v9989_v28  ;;  %v10528_v55 = vrot.slane %v15484_v24, %v9989_v28  ;;  %v10662_v57 = vld [vmem:[#allocation2 + $0x61] sm:$0xff] }
 0x29e   : > { %v1390_v49 = vpop.permute.xlu0 %1389  ;;  %v10553_v1 = vrot.slane %v15492_v51, %v9989_v28  ;;  %v15496_v15 = vcombine.high %v10159_v22, %v10229_v0  ;;  %v15503_v22 = vcombine.high %v10108_v56, %v10150_v14  ;;  %v15505_v0 = vcombine.low %v10121_v63, %v10156_v18  ;;  %v10695_v40 = vld [vmem:[#allocation2 + $0x78] sm:$0xff]  ;;  %v15598_v17 = vld [vmem:[#allocation16_spill] sm:$0xff] }
 0x29f   : > { %15485 = vst [vmem:[#allocation56_spill] sm:$0xff] %v10528_v55  ;;  %1396 = vst.msk [vmem:[#allocation2 + $0xa9] sm:$0xff] %vm652_vm4, %v1390_v49  ;;  %v15498_v49 = vcombine.low %v10108_v56, %v10150_v14  ;;  %v10697_v43 = vld [vmem:[#allocation2 + $0x7a] sm:$0xff] }
 0x2a0   : > { %15493 = vst [vmem:[#allocation60_spill] sm:$0xff] %v10553_v1  ;;  %v10565_v24 = vrot.slane %v15496_v15, %v9989_v28  ;;  %v10573_v54 = vld [vmem:[#allocation2 + $0x9a] sm:$0xff]  ;;  %v10584_v60 = vrot.slane %v15503_v22, %v9989_v28  ;;  %v10590_v52 = vrot.slane %v15505_v0, %v9989_v28  ;;  %v15507_v15 = vcombine.high %v10121_v63, %v10156_v18  ;;  %v3724_v22 = vld [vmem:[#allocation2 + $0x82] sm:$0xff] }
 0x2a1   : > { %v10571_v13 = vrot.slane %v15498_v49, %v9989_v28  ;;  %15500 = vst [vmem:[#allocation64_spill] sm:$0xff] %v10573_v54  ;;  %v10575_v51 = vld [vmem:[#allocation2 + $0x99] sm:$0xff]  ;;  %3341 = vrot.lane.b32.xlu1 %v2568_v29, %s9807_s20  ;;  %2185 = vrot.lane.b32.xlu0 %v1406_v35, %s9807_s20  ;;  %v3897_v56 = vcombine.low %v3722_v33, %v10573_v54  ;;  %v15608_v1 = vld [vmem:[#allocation29_spill] sm:$0xff] }
 0x2a2   : > { %15497 = vst [vmem:[#allocation62_spill] sm:$0xff] %v10565_v24  ;;  %15501 = vst [vmem:[#allocation65_spill] sm:$0xff] %v10575_v51  ;;  %v10596_v49 = vrot.slane %v15507_v15, %v9989_v28  ;;  %v3898_v14 = vcombine.high %v3722_v33, %v10573_v54  ;;  %v2743_v23 = vcombine.low %v2568_v29, %v10575_v51  ;;  %v10604_v21 = vld [vmem:[#allocation2 + $0x98] sm:$0xff]  ;;  %v10606_v26 = vld [vmem:[#allocation2 + $0x90] sm:$0xff] }
 0x2a3   : > { %15499 = vst [vmem:[#allocation63_spill] sm:$0xff] %v10571_v13  ;;  %15504 = vst [vmem:[#allocation67_spill] sm:$0xff] %v10584_v60  ;;  %v2744_v0 = vcombine.high %v2568_v29, %v10575_v51  ;;  %v10609_v63 = vrot.slane %v2776_v11, %v9989_v28  ;;  %v10612_v18 = vrot.slane %v2791_v36, %v9989_v28  ;;  %v10628_v11 = vld [vmem:[#allocation2 + $0x92] sm:$0xff]  ;;  %v15600_v24 = vld [vmem:[#allocation21_spill] sm:$0xff] }
 0x2a4   : > { %15506 = vst [vmem:[#allocation68_spill] sm:$0xff] %v10590_v52  ;;  %15508 = vst [vmem:[#allocation69_spill] sm:$0xff] %v10596_v49  ;;  %v10615_v15 = vrot.slane %v2792_v6, %v9989_v28  ;;  %v10618_v33 = vrot.slane %v3897_v56, %v9985_v19  ;;  %v10621_v53 = vrot.slane %v3898_v14, %v9985_v19  ;;  %v10639_v7 = vld [vmem:[#allocation2 + $0xb2] sm:$0xff]  ;;  %v15592_v52 = vld [vmem:[#allocation4_spill] sm:$0xff] }
 0x2a5   : > { %15509 = vst [vmem:[#allocation70_spill] sm:$0xff] %v10604_v21  ;;  %15510 = vst [vmem:[#allocation71_spill] sm:$0xff] %v10606_v26  ;;  %v10624_v29 = vrot.slane %v2743_v23, %v9985_v19  ;;  %v1582_v20 = vcombine.low %v10476_v45, %v10604_v21  ;;  %v10633_v36 = vrot.slane %v2744_v0, %v9985_v19  ;;  %v10641_v23 = vld [vmem:[#allocation2 + $0xb1] sm:$0xff]  ;;  %1795 = vrot.lane.b32.xlu1 %v1406_v35, %s9808_s21  ;;  %v10712_v42 = vld [vmem:[#allocation2 + $0x79] sm:$0xff] }
 0x2a6   : > { %15511 = vst [vmem:[#allocation72_spill] sm:$0xff] %v10609_v63  ;;  %15512 = vst [vmem:[#allocation73_spill] sm:$0xff] %v10612_v18  ;;  %v1583_v6 = vcombine.high %v10476_v45, %v10604_v21  ;;  %v1446_v56 = vcombine.low %v1406_v35, %v10606_v26  ;;  %v1447_v14 = vcombine.high %v1406_v35, %v10606_v26  ;;  %4499 = vrot.lane.b32.xlu0 %v3724_v22, %s9807_s20  ;;  %v10650_v27 = vld [vmem:[#allocation2 + $0x91] sm:$0xff]  ;;  %v10710_v58 = vld [vmem:[#allocation2 + $0xa8] sm:$0xff] }
 0x2a7   : > { %15513 = vst [vmem:[#allocation74_spill] sm:$0xff] %v10615_v15  ;;  %15514 = vst [vmem:[#allocation75_spill] sm:$0xff] %v10628_v11  ;;  %v10646_v30 = vrot.slane %v1582_v20, %v9985_v19  ;;  %v3913_v0 = vcombine.low %v3724_v22, %v10639_v7  ;;  %v3914_v37 = vcombine.high %v3724_v22, %v10639_v7  ;;  %v10684_v2 = vld [vmem:[#allocation2 + $0xb0] sm:$0xff]  ;;  %v15602_v4 = vld [vmem:[#allocation20_spill] sm:$0xff] }
 0x2a8   : > { %15515 = vst [vmem:[#allocation76_spill] sm:$0xff] %v10639_v7  ;;  %15516 = vst [vmem:[#allocation77_spill] sm:$0xff] %v10641_v23  ;;  %v10653_v48 = vrot.slane %v1583_v6, %v9985_v19  ;;  %v10656_v61 = vrot.slane %v1446_v56, %v9985_v19  ;;  %v10659_v35 = vrot.slane %v1447_v14, %v9985_v19  ;;  %v10673_v56 = vld [vmem:[#allocation2 + $0x80] sm:$0xff]  ;;  %v10724_v59 = vld [vmem:[#allocation2 + $0xaa] sm:$0xff] }
 0x2a9   : > { %15517 = vst [vmem:[#allocation78_spill] sm:$0xff] %v10650_v27  ;;  %v3761_v44 = vcombine.low %v3721_v3, %v10628_v11  ;;  %v10665_v20 = vrot.slane %v3913_v0, %v9985_v19  ;;  %v10668_v47 = vrot.slane %v3914_v37, %v9985_v19  ;;  %v3762_v62 = vcombine.high %v3721_v3, %v10628_v11 }
 0x2aa   : > { %v2759_v6 = vcombine.low %v10630_v8, %v10641_v23  ;;  %v2760_v39 = vcombine.high %v10630_v8, %v10641_v23  ;;  %v2607_v0 = vcombine.low %v10662_v57, %v10650_v27  ;;  %v2608_v37 = vcombine.high %v10662_v57, %v10650_v27  ;;  %15518 = vst [vmem:[#allocation79_spill] sm:$0xff] %v10684_v2 }
 0x2ab   : > { %v10676_v14 = vrot.slane %v3761_v44, %v9985_v19  ;;  %2187 = vrot.lane.b32.xlu1 %v10476_v45, %s9807_s20  ;;  %4109 = vrot.lane.b32.xlu0 %v3724_v22, %s9808_s21  ;;  %v10702_v45 = vrot.slane %v3762_v62, %v9985_v19  ;;  %15519 = vst [vmem:[#allocation80_spill] sm:$0xff] %v10710_v58  ;;  %15520 = vst [vmem:[#allocation81_spill] sm:$0xff] %v10724_v59 }
 0x2ac   : > { %v10705_v22 = vrot.slane %v2759_v6, %v9985_v19  ;;  %v10708_v44 = vrot.slane %v2760_v39, %v9985_v19  ;;  %v10715_v41 = vrot.slane %v2607_v0, %v9985_v19  ;;  %v10718_v27 = vrot.slane %v2608_v37, %v9985_v19  ;;  %v10726_v39 = vld [vmem:[#allocation2 + $0xa9] sm:$0xff] }
 0x2ad   : > { %v1598_v62 = vcombine.low %v10673_v56, %v10684_v2  ;;  %v1599_v6 = vcombine.high %v10673_v56, %v10684_v2  ;;  %15521 = vst [vmem:[#allocation82_spill] sm:$0xff] %v10726_v39  ;;  %v1462_v23 = vcombine.low %v10695_v40, %v10710_v58  ;;  %v1463_v0 = vcombine.high %v10695_v40, %v10710_v58 }
 0x2ae   : > { %v3777_v37 = vcombine.low %v10697_v43, %v10724_v59  ;;  %v3778_v11 = vcombine.high %v10697_v43, %v10724_v59  ;;  %v2623_v26 = vcombine.low %v10712_v42, %v10726_v39 }
 0x2af   : > { %4493 = vrot.lane.b32.xlu1 %v3721_v3, %s9807_s20  ;;  %2955 = vrot.lane.b32.xlu0 %v10630_v8, %s9808_s21  ;;  %v1606_v2 = vrot.slane %v1598_v62, %v9985_v19  ;;  %v1613_v7 = vrot.slane %v1599_v6, %v9985_v19  ;;  %v1470_v15 = vrot.slane %v1462_v23, %v9985_v19 }
 0x2b0   : > { %v1477_v58 = vrot.slane %v1463_v0, %v9985_v19  ;;  %v10758_v54 = vrot.slane %v3777_v37, %v9985_v19  ;;  %v10761_v59 = vrot.slane %v3778_v11, %v9985_v19 }
 0x2b1   : > { %v1646_v21 = vcombine.low %v10646_v30, %v1606_v2  ;;  %v1647_v62 = vcombine.high %v10646_v30, %v1606_v2  ;;  %v1662_v6 = vcombine.low %v10653_v48, %v1613_v7  ;;  %v1663_v51 = vcombine.high %v10653_v48, %v1613_v7 }
 0x2b2   : > { %v2624_v2 = vcombine.high %v10712_v42, %v10726_v39  ;;  %v10769_v7 = vrot.slane %v2623_v26, %v9985_v19  ;;  %v1510_v30 = vcombine.low %v10656_v61, %v1470_v15  ;;  %v1511_v23 = vcombine.high %v10656_v61, %v1470_v15 }
 0x2b3   : > { %4103 = vrot.lane.b32.xlu1 %v3721_v3, %s9808_s21  ;;  %3345 = vrot.lane.b32.xlu0 %v10630_v8, %s9807_s20  ;;  %v1661_v48 = vrot.slane %v1647_v62, %v9989_v28  ;;  %v1526_v11 = vcombine.low %v10659_v35, %v1477_v58  ;;  %v1527_v0 = vcombine.high %v10659_v35, %v1477_v58 }
 0x2b4   : > { %v3825_v3 = vcombine.low %v10676_v14, %v10758_v54  ;;  %v3826_v8 = vcombine.high %v10676_v14, %v10758_v54  ;;  %v3841_v26 = vcombine.low %v10702_v45, %v10761_v59  ;;  %v3842_v37 = vcombine.high %v10702_v45, %v10761_v59 }
 0x2b5   : > { %v10785_v62 = vrot.slane %v2624_v2, %v9985_v19  ;;  %v1525_v15 = vrot.slane %v1511_v23, %v9989_v28  ;;  %v1680_v54 = vcombine.low %v10474_v16, %v1661_v48  ;;  %v10798_v59 = vrot.slane %v1510_v30, %v9989_v28 }
 0x2b6   : > { %v10801_v35 = vrot.slane %v1646_v21, %v9989_v28  ;;  %v1534_v23 = vrot.slane %v1526_v11, %v9989_v28  ;;  %v1670_v61 = vrot.slane %v1662_v6, %v9989_v28  ;;  %v1681_v45 = vcombine.high %v10474_v16, %v1661_v48 }
 0x2b7   : > { %2949 = vrot.lane.b32.xlu1 %v10662_v57, %s9808_s21  ;;  %1801 = vrot.lane.b32.xlu0 %v10673_v56, %s9808_s21  ;;  %15522 = vst [vmem:[#allocation83_spill] sm:$0xff] %v10798_v59  ;;  %v2687_v14 = vcombine.low %v10718_v27, %v10785_v62  ;;  %v1544_v2 = vcombine.low %v10468_v46, %v1525_v15 }
 0x2b8   : > { %15523 = vst [vmem:[#allocation84_spill] sm:$0xff] %v10801_v35  ;;  %v1543_v58 = vcombine.high %v10482_v50, %v10798_v59  ;;  %v1679_v30 = vcombine.high %v10488_v38, %v10801_v35  ;;  %v1545_v21 = vcombine.high %v10468_v46, %v1525_v15  ;;  %v1546_v39 = vcombine.low %v10494_v32, %v1534_v23  ;;  %v15586_v38 = vld [vmem:[#allocation10_spill] sm:$0xff] }
 0x2b9   : > { %v10815_v19 = vpack.i.bf16 %v1680_v54, %v1544_v2  ;;  %v1541_v49 = vrot.slane %v1527_v0, %v9989_v28  ;;  %v1682_v6 = vcombine.low %v10500_v5, %v1670_v61  ;;  %v1677_v46 = vrot.slane %v1663_v51, %v9989_v28  ;;  %v15587_v59 = vld [vmem:[#allocation6_spill] sm:$0xff] }
 0x2ba   : > { %v10824_v11 = vpack.i.bf16 %v1679_v30, %v1543_v58  ;;  %v10828_v15 = vpack.i.bf16 %v1681_v45, %v1545_v21  ;;  %v1547_v16 = vcombine.high %v10494_v32, %v1534_v23  ;;  %v1683_v48 = vcombine.high %v10500_v5, %v1670_v61  ;;  %v15582_v21 = vld [vmem:[#allocation11_spill] sm:$0xff]  ;;  %v15584_v61 = vld [vmem:[#allocation13_spill] sm:$0xff] }
 0x2bb   : > { %3339 = vrot.lane.b32.xlu1 %v10662_v57, %s9807_s20  ;;  %2189 = vrot.lane.b32.xlu0 %v10695_v40, %s9807_s20  ;;  %v1548_v54 = vcombine.low %v10510_v9, %v1541_v49  ;;  %v10833_v0 = vpack.i.bf16 %v1682_v6, %v1546_v39  ;;  %v1684_v57 = vcombine.low %v10516_v34, %v1677_v46 }
 0x2bc   : > { %v1549_v2 = vcombine.high %v10510_v9, %v1541_v49  ;;  %v1685_v58 = vcombine.high %v10516_v34, %v1677_v46  ;;  %v10838_v30 = vpack.i.bf16 %v1683_v48, %v1547_v16  ;;  %v15524_v51 = vcombine.high %v10618_v33, %v10665_v20 }
 0x2bd   : > { %v15525_v5 = vcombine.low %v10618_v33, %v10665_v20  ;;  %v15527_v9 = vcombine.low %v10621_v53, %v10668_v47  ;;  %v10862_v34 = vpack.i.bf16 %v1684_v57, %v1548_v54  ;;  %v15529_v46 = vcombine.high %v10621_v53, %v10668_v47  ;;  %v15585_v20 = vld [vmem:[#allocation9_spill] sm:$0xff] }
 0x2be   : > { %v10844_v45 = vrot.slane %v15524_v51, %v9989_v28  ;;  %v10864_v39 = vpack.i.bf16 %v1685_v58, %v1549_v2  ;;  %v10887_v16 = vrot.slane %v3826_v8, %v9989_v28  ;;  %v10890_v48 = vrot.slane %v3841_v26, %v9989_v28 }
 0x2bf   : > { %v10850_v32 = vrot.slane %v15525_v5, %v9989_v28  ;;  %v10856_v49 = vrot.slane %v15527_v9, %v9989_v28  ;;  %1799 = vrot.lane.b32.xlu1 %v10695_v40, %s9808_s21  ;;  %4107 = vrot.lane.b32.xlu0 %v10697_v43, %s9808_s21  ;;  %v10884_v54 = vrot.slane %v15529_v46, %v9989_v28  ;;  %v15583_v40 = vld [vmem:[#allocation7_spill] sm:$0xff] }
 0x2c0   : > { %15531 = vst [vmem:[#allocation88_spill] sm:$0xff] %v10887_v16  ;;  %15532 = vst [vmem:[#allocation89_spill] sm:$0xff] %v10890_v48  ;;  %v10893_v57 = vrot.slane %v3825_v3, %v9989_v28  ;;  %v10896_v2 = vrot.slane %v3842_v37, %v9989_v28  ;;  %v15535_v58 = vcombine.low %v10624_v29, %v10705_v22 }
 0x2c1   : > { %15526 = vst [vmem:[#allocation85_spill] sm:$0xff] %v10850_v32  ;;  %15528 = vst [vmem:[#allocation86_spill] sm:$0xff] %v10856_v49  ;;  %v15539_v33 = vcombine.low %v10715_v41, %v10769_v7  ;;  %v15541_v5 = vcombine.low %v10633_v36, %v10708_v44  ;;  %v15543_v46 = vcombine.high %v10715_v41, %v10769_v7 }
 0x2c2   : > { %15530 = vst [vmem:[#allocation87_spill] sm:$0xff] %v10884_v54  ;;  %15533 = vst [vmem:[#allocation90_spill] sm:$0xff] %v10893_v57  ;;  %v10902_v51 = vrot.slane %v15535_v58, %v9989_v28  ;;  %v15537_v58 = vcombine.high %v10624_v29, %v10705_v22  ;;  %v10953_v29 = vrot.slane %v2687_v14, %v9989_v28 }
 0x2c3   : > { %15534 = vst [vmem:[#allocation91_spill] sm:$0xff] %v10896_v2  ;;  %2191 = vrot.lane.b32.xlu1 %v10673_v56, %s9807_s20  ;;  %2953 = vrot.lane.b32.xlu0 %v10712_v42, %s9808_s21  ;;  %v10938_v37 = vrot.slane %v15539_v33, %v9989_v28  ;;  %v10944_v9 = vrot.slane %v15541_v5, %v9989_v28  ;;  %v15599_v2 = vld [vmem:[#allocation14_spill] sm:$0xff] }
 0x2c4   : > { %15536 = vst [vmem:[#allocation92_spill] sm:$0xff] %v10902_v51  ;;  %v10932_v6 = vrot.slane %v15537_v58, %v9989_v28  ;;  %v10950_v56 = vrot.slane %v15543_v46, %v9989_v28  ;;  %15545 = vst [vmem:[#allocation97_spill] sm:$0xff] %v10953_v29  ;;  %v15546_v41 = vcombine.high %v10718_v27, %v10785_v62  ;;  %v15551_v58 = vld [vmem:[#allocation64_spill] sm:$0xff]  ;;  %v15554_v27 = vld [vmem:[#allocation70_spill] sm:$0xff] }
 0x2c5   : > { %15540 = vst [vmem:[#allocation94_spill] sm:$0xff] %v10938_v37  ;;  %15542 = vst [vmem:[#allocation95_spill] sm:$0xff] %v10944_v9  ;;  %v15549_v5 = vcombine.high %v10633_v36, %v10708_v44  ;;  %v2217_v23 = vcombine.low %v15583_v40, %v15582_v21  ;;  %v2233_v35 = vcombine.low %v15585_v20, %v15584_v61  ;;  %v15603_v20 = vld [vmem:[#allocation18_spill] sm:$0xff] }
 0x2c6   : > { %15538 = vst [vmem:[#allocation93_spill] sm:$0xff] %v10932_v6  ;;  %15544 = vst [vmem:[#allocation96_spill] sm:$0xff] %v10950_v56  ;;  %v10967_v7 = vrot.slane %v15546_v41, %v9989_v28  ;;  %v1827_v50 = vcombine.low %v15587_v59, %v15586_v38  ;;  %v15589_v41 = vld [vmem:[#allocation8_spill] sm:$0xff]  ;;  %v1828_v60 = vcombine.high %v15587_v59, %v15586_v38 }
 0x2c7   : > { %4497 = vrot.lane.b32.xlu1 %v10697_v43, %s9807_s20  ;;  %3343 = vrot.lane.b32.xlu0 %v10712_v42, %s9807_s20  ;;  %v10993_v46 = vrot.slane %v15549_v5, %v9989_v28  ;;  %v15553_v5 = vld [vmem:[#allocation65_spill] sm:$0xff]  ;;  %v15556_v43 = vld [vmem:[#allocation76_spill] sm:$0xff]  ;;  %v15557_v42 = vld [vmem:[#allocation75_spill] sm:$0xff]  ;;  %v11128_v9 = vrot.slane %v2217_v23, %v15592_v52  ;;  %v11131_v18 = vrot.slane %v2233_v35, %v15592_v52 }
 0x2c8   : > { %15547 = vst [vmem:[#allocation98_spill] sm:$0xff] %v10967_v7  ;;  %v1835_v37 = vrot.slane %v1827_v50, %v15592_v52  ;;  %v1842_v51 = vrot.slane %v1828_v60, %v15592_v52  ;;  %v2981_v50 = vcombine.low %v15599_v2, %v15598_v17  ;;  %v3371_v61 = vcombine.low %v15603_v20, %v15602_v4  ;;  %v15613_v20 = vld [vmem:[#allocation37_spill] sm:$0xff] }
 0x2c9   : > { %15550 = vst [vmem:[#allocation99_spill] sm:$0xff] %v10993_v46  ;;  %v15588_v46 = vld [vmem:[#allocation12_spill] sm:$0xff]  ;;  %15594 = vst [vmem:[#allocation8_spill] sm:$0xff] %v11131_v18  ;;  %v2281_v59 = vcombine.low %v11128_v9, %v11131_v18  ;;  %v15607_v18 = vld [vmem:[#allocation23_spill] sm:$0xff] }
 0x2ca   : > { %v1843_v7 = vcombine.low %v15589_v41, %v15588_v46  ;;  %v1844_v29 = vcombine.high %v15589_v41, %v15588_v46  ;;  %15593 = vst [vmem:[#allocation12_spill] sm:$0xff] %v11128_v9  ;;  %v15596_v46 = vld [vmem:[#allocation17_spill] sm:$0xff]  ;;  %v15597_v41 = vld [vmem:[#allocation15_spill] sm:$0xff] }
 0x2cb   : > { %4113 = vrot.lane.b32.xlu1 %v15551_v58, %s9808_s21  ;;  %4503 = vrot.lane.b32.xlu0 %v15551_v58, %s9807_s20  ;;  %v15555_v58 = vld [vmem:[#allocation71_spill] sm:$0xff]  ;;  %v2997_v35 = vcombine.low %v15597_v41, %v15596_v46  ;;  %v15609_v41 = vld [vmem:[#allocation25_spill] sm:$0xff]  ;;  %v11160_v2 = vrot.slane %v2281_v59, %v9989_v28  ;;  %v15620_v59 = vld [vmem:[#allocation26_spill] sm:$0xff] }
 0x2cc   : > { %v1851_v13 = vrot.slane %v1843_v7, %v15592_v52  ;;  %v1858_v38 = vrot.slane %v1844_v29, %v15592_v52  ;;  %v15601_v7 = vld [vmem:[#allocation19_spill] sm:$0xff]  ;;  %v1979_v46 = vcombine.low %v15609_v41, %v15608_v1  ;;  %v15614_v4 = vld [vmem:[#allocation33_spill] sm:$0xff] }
 0x2cd   : > { %v3387_v57 = vcombine.low %v15601_v7, %v15600_v24  ;;  %v15606_v9 = vld [vmem:[#allocation27_spill] sm:$0xff]  ;;  %v4677_v12 = vcombine.low %v15614_v4, %v15613_v20 }
 0x2ce   : > { %v1891_v23 = vcombine.low %v1835_v37, %v1851_v13  ;;  %v1892_v29 = vcombine.high %v1835_v37, %v1851_v13  ;;  %v1907_v21 = vcombine.low %v1842_v51, %v1858_v38  ;;  %v1963_v48 = vcombine.low %v15607_v18, %v15606_v9  ;;  %15610 = vst [vmem:[#allocation27_spill] sm:$0xff] %v11160_v2  ;;  %v15611_v7 = vld [vmem:[#allocation35_spill] sm:$0xff] }
 0x2cf   : > { %2959 = vrot.lane.b32.xlu1 %v15553_v5, %s9808_s21  ;;  %1805 = vrot.lane.b32.xlu0 %v15554_v27, %s9808_s21  ;;  %v1908_v17 = vcombine.high %v1842_v51, %v1858_v38  ;;  %v15612_v24 = vld [vmem:[#allocation31_spill] sm:$0xff]  ;;  %v11170_v13 = vrot.slane %v2997_v35, %v15592_v52  ;;  %v11173_v37 = vrot.slane %v2981_v50, %v15592_v52 }
 0x2d0   : > { %v4661_v16 = vcombine.low %v15612_v24, %v15611_v7  ;;  %v11167_v54 = vrot.slane %v1891_v23, %v9989_v28  ;;  %v11176_v25 = vrot.slane %v3387_v57, %v15592_v52  ;;  %v11179_v51 = vrot.slane %v3371_v61, %v15592_v52 }
 0x2d1   : > { %15616 = vst [vmem:[#allocation29_spill] sm:$0xff] %v11170_v13  ;;  %15617 = vst [vmem:[#allocation25_spill] sm:$0xff] %v11173_v37  ;;  %v1964_v38 = vcombine.high %v15607_v18, %v15606_v9  ;;  %v1980_v23 = vcombine.high %v15609_v41, %v15608_v1  ;;  %v11192_v50 = vrot.slane %v1892_v29, %v9989_v28  ;;  %v15629_v1 = vld [vmem:[#allocation41_spill] sm:$0xff]  ;;  %v15630_v41 = vld [vmem:[#allocation39_spill] sm:$0xff] }
 0x2d2   : > { %15615 = vst [vmem:[#allocation23_spill] sm:$0xff] %v11167_v54  ;;  %15618 = vst [vmem:[#allocation35_spill] sm:$0xff] %v11176_v25  ;;  %v1971_v57 = vrot.slane %v1963_v48, %v15592_v52  ;;  %v1987_v61 = vrot.slane %v1979_v46, %v15592_v52  ;;  %v15626_v54 = vld [vmem:[#allocation24_spill] sm:$0xff]  ;;  %v11199_v9 = vrot.slane %v4661_v16, %v15592_v52 }
 0x2d3   : > { %3349 = vrot.lane.b32.xlu1 %v15553_v5, %s9807_s20  ;;  %2193 = vrot.lane.b32.xlu0 %v15555_v58, %s9807_s20  ;;  %v15558_v5 = vld [vmem:[#allocation77_spill] sm:$0xff]  ;;  %15619 = vst [vmem:[#allocation31_spill] sm:$0xff] %v11179_v51  ;;  %15624 = vst [vmem:[#allocation108_spill] sm:$0xff] %v11192_v50  ;;  %v11209_v50 = vrot.slane %v1907_v21, %v9989_v28  ;;  %v11212_v48 = vrot.slane %v1908_v17, %v9989_v28 }
 0x2d4   : > { %15627 = vst [vmem:[#allocation109_spill] sm:$0xff] %v11199_v9  ;;  %v3045_v46 = vcombine.low %v11173_v37, %v11170_v13  ;;  %v1994_v21 = vrot.slane %v1980_v23, %v15592_v52 }
 0x2d5   : > { %15633 = vst [vmem:[#allocation41_spill] sm:$0xff] %v11209_v50  ;;  %15634 = vst [vmem:[#allocation39_spill] sm:$0xff] %v11212_v48  ;;  %v2027_v48 = vcombine.low %v1971_v57, %v1987_v61 }
 0x2d7   : > { %1803 = vrot.lane.b32.xlu1 %v15555_v58, %s9808_s21  ;;  %4507 = vrot.lane.b32.xlu0 %v15556_v43, %s9807_s20  ;;  %v15559_v58 = vld [vmem:[#allocation78_spill] sm:$0xff] }
 0x2db   : > { %2195 = vrot.lane.b32.xlu1 %v15554_v27, %s9807_s20  ;;  %4117 = vrot.lane.b32.xlu0 %v15556_v43, %s9808_s21  ;;  %v15560_v27 = vld [vmem:[#allocation79_spill] sm:$0xff]  ;;  %v15561_v43 = vld [vmem:[#allocation80_spill] sm:$0xff] }
 0x2df   : > { %4501 = vrot.lane.b32.xlu1 %v15557_v42, %s9807_s20  ;;  %2963 = vrot.lane.b32.xlu0 %v15558_v5, %s9808_s21 }
 0x2e3   : > { %4111 = vrot.lane.b32.xlu1 %v15557_v42, %s9808_s21  ;;  %3353 = vrot.lane.b32.xlu0 %v15558_v5, %s9807_s20  ;;  %v15562_v42 = vld [vmem:[#allocation81_spill] sm:$0xff]  ;;  %v15563_v5 = vld [vmem:[#allocation82_spill] sm:$0xff] }
 0x2e7   : > { %2957 = vrot.lane.b32.xlu1 %v15559_v58, %s9808_s21  ;;  %1809 = vrot.lane.b32.xlu0 %v15560_v27, %s9808_s21 }
 0x2eb   : > { %3347 = vrot.lane.b32.xlu1 %v15559_v58, %s9807_s20  ;;  %2197 = vrot.lane.b32.xlu0 %v15561_v43, %s9807_s20 }
 0x2ef   : > { %1807 = vrot.lane.b32.xlu1 %v15561_v43, %s9808_s21  ;;  %4115 = vrot.lane.b32.xlu0 %v15562_v42, %s9808_s21 }
 0x2f3   : > { %4505 = vrot.lane.b32.xlu1 %v15562_v42, %s9807_s20  ;;  %2961 = vrot.lane.b32.xlu0 %v15563_v5, %s9808_s21 }
 0x2f7   : > { %2199 = vrot.lane.b32.xlu1 %v15560_v27, %s9807_s20  ;;  %3351 = vrot.lane.b32.xlu0 %v15563_v5, %s9807_s20 }
 0x2fb   : > { %9081 = vrot.lane.b32.xlu1 %v10815_v19, %s9803_s16  ;;  %9076 = vrot.lane.b32.xlu0 %v10824_v11, %s9802_s15 }
 0x2ff   : > { %9091 = vrot.lane.b32.xlu1 %v10833_v0, %s9801_s12  ;;  %9086 = vrot.lane.b32.xlu0 %v10828_v15, %s9800_s11 }
 0x303   : > { %9101 = vrot.lane.b32.xlu1 %v10862_v34, %s9793_s24  ;;  %9096 = vrot.lane.b32.xlu0 %v10838_v30, %s9796_s28 }
 0x307   : > { %9106 = vrot.lane.b32.xlu0 %v10864_v39, %s9794_s25 }
 0x30b   : > { %v11067_v58 = vpop.permute.xlu0 %4495  ;;  %v11069_v19 = vpop.permute.xlu1 %4105 }
 0x30c   : > { %15564 = vst [vmem:[#allocation64_spill] sm:$0xff] %v11067_v58 }
 0x30f   : > { %v11071_v11 = vpop.permute.xlu0 %1797  ;;  %v11073_v27 = vpop.permute.xlu1 %2951 }
 0x310   : > { %15565 = vst [vmem:[#allocation65_spill] sm:$0xff] %v11071_v11  ;;  %15566 = vst [vmem:[#allocation70_spill] sm:$0xff] %v11073_v27 }
 0x313   : > { %v11075_v0 = vpop.permute.xlu0 %2185  ;;  %v11077_v15 = vpop.permute.xlu1 %3341 }
 0x314   : > { %15567 = vst [vmem:[#allocation71_spill] sm:$0xff] %v11075_v0  ;;  %15568 = vst [vmem:[#allocation76_spill] sm:$0xff] %v11077_v15 }
 0x317   : > { %v11081_v34 = vpop.permute.xlu1 %1795 }
 0x318   : > { %v11079_v43 = vpop.permute.xlu0 %4499 }
 0x319   : > { %15569 = vst [vmem:[#allocation75_spill] sm:$0xff] %v11079_v43 }
 0x31d   : > { %v11083_v30 = vpop.permute.xlu0 %4109  ;;  %v11085_v42 = vpop.permute.xlu1 %2187 }
 0x31e   : > { %15570 = vst [vmem:[#allocation77_spill] sm:$0xff] %v11085_v42  ;;  %v15625_v42 = vld [vmem:[#allocation28_spill] sm:$0xff] }
 0x31f   : > { %v2369_v18 = vcombine.low %v15626_v54, %v15625_v42  ;;  %v1978_v54 = vrot.slane %v1964_v38, %v15592_v52 }
 0x321   : > { %v11087_v39 = vpop.permute.xlu0 %2955  ;;  %v11089_v5 = vpop.permute.xlu1 %4493  ;;  %v11230_v37 = vrot.slane %v2369_v18, %v15592_v52  ;;  %v15642_v18 = vld [vmem:[#allocation46_spill] sm:$0xff] }
 0x322   : > { %15571 = vst [vmem:[#allocation78_spill] sm:$0xff] %v11087_v39  ;;  %15572 = vst [vmem:[#allocation79_spill] sm:$0xff] %v11089_v5  ;;  %v2028_v5 = vcombine.high %v1971_v57, %v1987_v61  ;;  %v11245_v57 = vrot.slane %v3045_v46, %v9989_v28  ;;  %v15641_v61 = vld [vmem:[#allocation48_spill] sm:$0xff] }
 0x323   : > { %15637 = vst [vmem:[#allocation111_spill] sm:$0xff] %v11230_v37 }
 0x325   : > { %v11091_v44 = vpop.permute.xlu0 %3345  ;;  %v11093_v36 = vpop.permute.xlu1 %4103 }
 0x326   : > { %15573 = vst [vmem:[#allocation80_spill] sm:$0xff] %v11091_v44  ;;  %15574 = vst [vmem:[#allocation81_spill] sm:$0xff] %v11093_v36 }
 0x329   : > { %v11095_v14 = vpop.permute.xlu0 %1801  ;;  %v11097_v33 = vpop.permute.xlu1 %2949 }
 0x32a   : > { %15575 = vst [vmem:[#allocation82_spill] sm:$0xff] %v11095_v14  ;;  %15576 = vst [vmem:[#allocation100_spill] sm:$0xff] %v11097_v33  ;;  %v2044_v33 = vcombine.high %v1978_v54, %v1994_v21 }
 0x32d   : > { %v11099_v22 = vpop.permute.xlu0 %2189  ;;  %v11101_v26 = vpop.permute.xlu1 %3339 }
 0x32e   : > { %15577 = vst [vmem:[#allocation101_spill] sm:$0xff] %v11099_v22  ;;  %15578 = vst [vmem:[#allocation102_spill] sm:$0xff] %v11101_v26 }
 0x331   : > { %v11103_v8 = vpop.permute.xlu0 %4107  ;;  %v11105_v3 = vpop.permute.xlu1 %1799 }
 0x332   : > { %15579 = vst [vmem:[#allocation103_spill] sm:$0xff] %v11105_v3 }
 0x335   : > { %v11107_v53 = vpop.permute.xlu0 %2953  ;;  %v11109_v47 = vpop.permute.xlu1 %2191 }
 0x336   : > { %15580 = vst [vmem:[#allocation104_spill] sm:$0xff] %v11107_v53  ;;  %15581 = vst [vmem:[#allocation105_spill] sm:$0xff] %v11109_v47  ;;  %v15621_v47 = vld [vmem:[#allocation22_spill] sm:$0xff] }
 0x337   : > { %v15632_v53 = vld [vmem:[#allocation38_spill] sm:$0xff] }
 0x339   : > { %v11119_v62 = vpop.permute.xlu0 %3343  ;;  %v11121_v56 = vpop.permute.xlu1 %4497 }
 0x33a   : > { %15590 = vst [vmem:[#allocation10_spill] sm:$0xff] %v11119_v62  ;;  %15591 = vst [vmem:[#allocation6_spill] sm:$0xff] %v11121_v56  ;;  %v2353_v62 = vcombine.low %v15621_v47, %v15620_v59  ;;  %v11202_v47 = vrot.slane %v4677_v12, %v15592_v52  ;;  %v4287_v59 = vcombine.low %v15630_v41, %v15629_v1  ;;  %v15631_v56 = vld [vmem:[#allocation40_spill] sm:$0xff] }
 0x33b   : > { %v4271_v29 = vcombine.low %v15632_v53, %v15631_v56  ;;  %v3435_v12 = vcombine.low %v11179_v51, %v11176_v25  ;;  %v15638_v51 = vld [vmem:[#allocation49_spill] sm:$0xff]  ;;  %v15639_v25 = vld [vmem:[#allocation47_spill] sm:$0xff] }
 0x33c   : > { %15628 = vst [vmem:[#allocation110_spill] sm:$0xff] %v11202_v47  ;;  %v11222_v42 = vrot.slane %v2353_v62, %v15592_v52  ;;  %v4725_v38 = vcombine.low %v11199_v9, %v11202_v47  ;;  %v11237_v62 = vrot.slane %v4287_v59, %v15592_v52  ;;  %15640 = vst [vmem:[#allocation49_spill] sm:$0xff] %v11245_v57 }
 0x33d   : > { %v11135_v6 = vpop.permute.xlu0 %4503  ;;  %v11137_v63 = vpop.permute.xlu1 %4113  ;;  %v11240_v23 = vrot.slane %v4271_v29, %v15592_v52  ;;  %v11256_v59 = vrot.slane %v3435_v12, %v9989_v28  ;;  %v2043_v29 = vcombine.low %v1978_v54, %v1994_v21  ;;  %v11263_v57 = vrot.slane %v2027_v48, %v9989_v28 }
 0x33e   : > { %15595 = vst [vmem:[#allocation4_spill] sm:$0xff] %v11135_v6  ;;  %v4693_v16 = vcombine.low %v11067_v58, %v11135_v6  ;;  %15635 = vst [vmem:[#allocation40_spill] sm:$0xff] %v11222_v42  ;;  %v3133_v58 = vcombine.low %v15639_v25, %v15638_v51  ;;  %v3117_v6 = vcombine.low %v15642_v18, %v15641_v61 }
 0x33f   : > { %15645 = vst [vmem:[#allocation46_spill] sm:$0xff] %v11256_v59  ;;  %v4303_v9 = vcombine.low %v11069_v19, %v11137_v63  ;;  %15647 = vst [vmem:[#allocation113_spill] sm:$0xff] %v11263_v57  ;;  %v11273_v54 = vrot.slane %v4725_v38, %v9989_v28  ;;  %v4335_v21 = vcombine.low %v11240_v23, %v11237_v62 }
 0x340   : > { %v11278_v59 = vrot.slane %v3133_v58, %v15592_v52  ;;  %v15655_v58 = vld [vmem:[#allocation50_spill] sm:$0xff] }
 0x341   : > { %v11151_v40 = vpop.permute.xlu0 %1805  ;;  %v11153_v60 = vpop.permute.xlu1 %2959  ;;  %15649 = vst [vmem:[#allocation115_spill] sm:$0xff] %v11273_v54  ;;  %v4311_v3 = vrot.slane %v4303_v9, %v15592_v52  ;;  %v11311_v9 = vrot.slane %v2044_v33, %v9989_v28  ;;  %v15669_v54 = vld [vmem:[#allocation34_spill] sm:$0xff] }
 0x342   : > { %15604 = vst [vmem:[#allocation106_spill] sm:$0xff] %v11151_v40  ;;  %15605 = vst [vmem:[#allocation107_spill] sm:$0xff] %v11153_v60 }
 0x343   : > { %15657 = vst [vmem:[#allocation117_spill] sm:$0xff] %v11311_v9 }
 0x345   : > { %v11187_v35 = vpop.permute.xlu0 %2193  ;;  %v11189_v26 = vpop.permute.xlu1 %3349 }
 0x346   : > { %15622 = vst [vmem:[#allocation37_spill] sm:$0xff] %v11187_v35  ;;  %15623 = vst [vmem:[#allocation33_spill] sm:$0xff] %v11189_v26 }
 0x349   : > { %v11225_v50 = vpop.permute.xlu0 %4507  ;;  %v11227_v17 = vpop.permute.xlu1 %1803 }
 0x34a   : > { %15636 = vst [vmem:[#allocation38_spill] sm:$0xff] %v11225_v50  ;;  %v4709_v13 = vcombine.low %v11079_v43, %v11225_v50  ;;  %v11250_v43 = vrot.slane %v4693_v16, %v15592_v52  ;;  %v11266_v16 = vrot.slane %v2028_v5, %v9989_v28  ;;  %v11282_v5 = vrot.slane %v3117_v6, %v15592_v52 }
 0x34c   : > { %15643 = vst [vmem:[#allocation47_spill] sm:$0xff] %v11250_v43  ;;  %v11253_v50 = vrot.slane %v4709_v13, %v15592_v52  ;;  %15648 = vst [vmem:[#allocation114_spill] sm:$0xff] %v11266_v16  ;;  %v2417_v13 = vcombine.low %v11222_v42, %v11230_v37  ;;  %v15650_v16 = vld [vmem:[#allocation53_spill] sm:$0xff]  ;;  %v3149_v37 = vcombine.low %v11073_v27, %v11153_v60 }
 0x34d   : > { %v4118_v47 = vpop.permute.xlu0 %4117  ;;  %v11260_v46 = vpop.permute.xlu1 %2195  ;;  %v4288_v27 = vcombine.high %v15630_v41, %v15629_v1  ;;  %v3181_v1 = vcombine.low %v11282_v5, %v11278_v59 }
 0x34e   : > { %15644 = vst [vmem:[#allocation48_spill] sm:$0xff] %v11253_v50  ;;  %15646 = vst [vmem:[#allocation112_spill] sm:$0xff] %v11260_v46  ;;  %v4757_v12 = vcombine.low %v11250_v43, %v11253_v50  ;;  %v4319_v48 = vcombine.low %v11083_v30, %v4118_v47  ;;  %v15651_v46 = vld [vmem:[#allocation51_spill] sm:$0xff]  ;;  %v11292_v43 = vrot.slane %v2043_v29, %v9989_v28  ;;  %v15654_v50 = vld [vmem:[#allocation52_spill] sm:$0xff] }
 0x34f   : > { %v3523_v42 = vcombine.low %v15651_v46, %v15650_v16  ;;  %v3507_v2 = vcombine.low %v15655_v58, %v15654_v50  ;;  %v4320_v60 = vcombine.high %v11083_v30, %v4118_v47  ;;  %v3539_v47 = vcombine.low %v11077_v15, %v11189_v26  ;;  %v15672_v26 = vld [vmem:[#allocation32_spill] sm:$0xff]  ;;  %v15680_v50 = vld [vmem:[#allocation42_spill] sm:$0xff] }
 0x350   : > { %v11289_v38 = vrot.slane %v4757_v12, %v9989_v28  ;;  %15653 = vst [vmem:[#allocation51_spill] sm:$0xff] %v11292_v43  ;;  %v4327_v6 = vrot.slane %v4319_v48, %v15592_v52  ;;  %v4272_v12 = vcombine.high %v15632_v53, %v15631_v56  ;;  %v11314_v48 = vrot.slane %v4335_v21, %v9989_v28 }
 0x351   : > { %v11298_v49 = vpop.permute.xlu0 %2963  ;;  %v11300_v10 = vpop.permute.xlu1 %4501  ;;  %v11320_v53 = vrot.slane %v3523_v42, %v15592_v52  ;;  %v11323_v56 = vrot.slane %v3149_v37, %v15592_v52  ;;  %v11329_v33 = vrot.slane %v3507_v2, %v15592_v52  ;;  %v4304_v21 = vcombine.high %v11069_v19, %v11137_v63 }
 0x352   : > { %15652 = vst [vmem:[#allocation53_spill] sm:$0xff] %v11289_v38  ;;  %15656 = vst [vmem:[#allocation116_spill] sm:$0xff] %v11298_v49  ;;  %v3165_v43 = vcombine.low %v11087_v39, %v11298_v49  ;;  %v4367_v58 = vcombine.low %v4311_v3, %v4327_v6  ;;  %v11343_v37 = vrot.slane %v2417_v13, %v9989_v28 }
 0x353   : > { %15658 = vst [vmem:[#allocation118_spill] sm:$0xff] %v11314_v48  ;;  %15659 = vst [vmem:[#allocation119_spill] sm:$0xff] %v11329_v33  ;;  %v11349_v2 = vrot.slane %v4272_v12, %v15592_v52  ;;  %v11354_v19 = vrot.slane %v4320_v60, %v15592_v52  ;;  %v11363_v38 = vrot.slane %v3181_v1, %v9989_v28 }
 0x354   : > { %v11326_v41 = vrot.slane %v3165_v43, %v15592_v52  ;;  %v11336_v30 = vrot.slane %v4367_v58, %v9989_v28  ;;  %15662 = vst [vmem:[#allocation122_spill] sm:$0xff] %v11343_v37  ;;  %v11346_v43 = vrot.slane %v4288_v27, %v15592_v52  ;;  %v4368_v58 = vcombine.high %v4311_v3, %v4327_v6  ;;  %v15670_v37 = vld [vmem:[#allocation30_spill] sm:$0xff] }
 0x355   : > { %v11338_v42 = vpop.permute.xlu0 %3353  ;;  %v11340_v29 = vpop.permute.xlu1 %4111  ;;  %15663 = vst [vmem:[#allocation123_spill] sm:$0xff] %v11354_v19  ;;  %v4336_v27 = vcombine.high %v11240_v23, %v11237_v62  ;;  %15664 = vst [vmem:[#allocation124_spill] sm:$0xff] %v11363_v38  ;;  %v1995_v12 = vcombine.low %v11071_v11, %v11151_v40  ;;  %v3571_v3 = vcombine.low %v11329_v33, %v11320_v53 }
 0x356   : > { %15660 = vst [vmem:[#allocation120_spill] sm:$0xff] %v11336_v30  ;;  %15661 = vst [vmem:[#allocation121_spill] sm:$0xff] %v11338_v42  ;;  %v3213_v63 = vcombine.low %v11323_v56, %v11326_v41  ;;  %v3555_v13 = vcombine.low %v11091_v44, %v11338_v42  ;;  %v11373_v60 = vrot.slane %v4304_v21, %v15592_v52 }
 0x357   : > { %v11376_v6 = vrot.slane %v3539_v47, %v15592_v52  ;;  %v4525_v39 = vcombine.low %v15670_v37, %v15669_v54  ;;  %v4382_v49 = vrot.slane %v4368_v58, %v9989_v28  ;;  %v4351_v21 = vcombine.low %v11349_v2, %v11346_v43  ;;  %v15675_v58 = vld [vmem:[#allocation43_spill] sm:$0xff] }
 0x358   : > { %v11368_v9 = vrot.slane %v3213_v63, %v9989_v28  ;;  %15666 = vst [vmem:[#allocation126_spill] sm:$0xff] %v11373_v60  ;;  %v11379_v62 = vrot.slane %v3555_v13, %v15592_v52  ;;  %v4662_v63 = vcombine.high %v15612_v24, %v15611_v7  ;;  %v4526_v13 = vcombine.high %v15670_v37, %v15669_v54  ;;  %v15671_v7 = vld [vmem:[#allocation36_spill] sm:$0xff]  ;;  %v15674_v37 = vld [vmem:[#allocation45_spill] sm:$0xff] }
 0x359   : > { %v11381_v23 = vpop.permute.xlu0 %1809  ;;  %v11383_v1 = vpop.permute.xlu1 %2957  ;;  %v4383_v15 = vcombine.low %v11373_v60, %v11354_v19  ;;  %v4541_v44 = vcombine.low %v15672_v26, %v15671_v7  ;;  %v11405_v42 = vrot.slane %v1995_v12, %v15592_v52  ;;  %v4350_v54 = vrot.slane %v4336_v27, %v9989_v28  ;;  %v15679_v12 = vld [vmem:[#allocation44_spill] sm:$0xff] }
 0x35a   : > { %15665 = vst [vmem:[#allocation125_spill] sm:$0xff] %v11368_v9  ;;  %15667 = vst [vmem:[#allocation127_spill] sm:$0xff] %v11381_v23  ;;  %v2011_v47 = vcombine.low %v11095_v14, %v11381_v23  ;;  %v3603_v24 = vcombine.low %v11376_v6, %v11379_v62  ;;  %v4151_v40 = vcombine.low %v15675_v58, %v15674_v37 }
 0x35b   : > { %15668 = vst [vmem:[#allocation128_spill] sm:$0xff] %v11383_v1  ;;  %15673 = vst [vmem:[#allocation34_spill] sm:$0xff] %v11405_v42  ;;  %v11414_v14 = vrot.slane %v3571_v3, %v9989_v28  ;;  %v11422_v19 = vrot.slane %v4662_v63, %v15592_v52  ;;  %v2249_v27 = vcombine.low %v11075_v0, %v11187_v35 }
 0x35c   : > { %v11408_v11 = vrot.slane %v2011_v47, %v15592_v52  ;;  %v11417_v23 = vrot.slane %v3603_v24, %v9989_v28  ;;  %v4135_v47 = vcombine.low %v15680_v50, %v15679_v12  ;;  %v11433_v3 = vrot.slane %v4525_v39, %v15592_v52 }
 0x35d   : > { %15676 = vst [vmem:[#allocation30_spill] sm:$0xff] %v11414_v14  ;;  %v11419_v60 = vpop.permute.xlu0 %2197  ;;  %v11430_v37 = vpop.permute.xlu1 %3347  ;;  %v11436_v24 = vrot.slane %v4383_v15, %v9989_v28  ;;  %v4401_v33 = vcombine.low %v4350_v54, %v4382_v49  ;;  %v4678_v50 = vcombine.high %v15614_v4, %v15613_v20  ;;  %v11443_v0 = vrot.slane %v4541_v44, %v15592_v52 }
 0x35e   : > { %15677 = vst [vmem:[#allocation36_spill] sm:$0xff] %v11417_v23  ;;  %15678 = vst [vmem:[#allocation32_spill] sm:$0xff] %v11419_v60  ;;  %v2059_v58 = vcombine.low %v11405_v42, %v11408_v11  ;;  %v11446_v35 = vrot.slane %v4351_v21, %v9989_v28  ;;  %v11452_v39 = vrot.slane %v4151_v40, %v15592_v52 }
 0x35f   : > { %15681 = vst [vmem:[#allocation129_spill] sm:$0xff] %v11430_v37  ;;  %v15683_v15 = vcombine.low %v10522_v31, %v10844_v45  ;;  %v4400_v42 = vcombine.high %v11314_v48, %v11336_v30  ;;  %v2265_v4 = vcombine.low %v11099_v22, %v11419_v60  ;;  %v11464_v44 = vrot.slane %v4135_v47, %v15592_v52 }
 0x360   : > { %v11449_v12 = vrot.slane %v2059_v58, %v9989_v28  ;;  %v11467_v21 = vrot.slane %v2249_v27, %v15592_v52  ;;  %v4167_v40 = vcombine.low %v11093_v36, %v11340_v29  ;;  %v15685_v58 = vcombine.high %v10528_v55, %v10850_v32  ;;  %v15692_v55 = vld [vmem:[#allocation103_spill] sm:$0xff] }
 0x361   : > { %v9115_v63 = vpack.i.bf16 %v4401_v33, %v15683_v15  ;;  %v11461_v20 = vpop.permute.xlu0 %4115  ;;  %v11478_v30 = vrot.slane %v2265_v4, %v15592_v52  ;;  %v4403_v47 = vcombine.low %v11446_v35, %v11436_v24  ;;  %v4402_v27 = vcombine.high %v4350_v54, %v4382_v49 }
 0x362   : > { %15682 = vst [vmem:[#allocation130_spill] sm:$0xff] %v11449_v12  ;;  %15684 = vst [vmem:[#allocation131_spill] sm:$0xff] %v11467_v21  ;;  %v9110_v15 = vpack.i.bf16 %v4400_v42, %v15685_v58  ;;  %v4542_v48 = vcombine.high %v15672_v26, %v15671_v7  ;;  %v3134_v22 = vcombine.high %v15639_v25, %v15638_v51  ;;  %v11490_v42 = vpop.permute.xlu1 %1807  ;;  %v15687_v25 = vld [vmem:[#allocation57_spill] sm:$0xff]  ;;  %v15688_v51 = vld [vmem:[#allocation86_spill] sm:$0xff] }
 0x363   : > { %9116 = vrot.lane.b32.xlu1 %v9115_v63, %s9803_s16  ;;  %15686 = vst [vmem:[#allocation132_spill] sm:$0xff] %v11478_v30  ;;  %v3118_v63 = vcombine.high %v15642_v18, %v15641_v61  ;;  %v4183_v33 = vcombine.low %v11103_v8, %v11461_v20  ;;  %v11493_v4 = vrot.slane %v4678_v50, %v15592_v52 }
 0x364   : > { %v1859_v49 = vcombine.low %v11081_v34, %v11227_v17  ;;  %9111 = vrot.lane.b32.xlu0 %v9110_v15, %s9802_s15  ;;  %v2313_v26 = vcombine.low %v11467_v21, %v11478_v30  ;;  %v15689_v7 = vcombine.low %v15687_v25, %v15688_v51  ;;  %v4589_v18 = vcombine.low %v11433_v3, %v11443_v0 }
 0x365   : > { %v4199_v54 = vcombine.low %v11464_v44, %v11452_v39  ;;  %v11508_v50 = vrot.slane %v4167_v40, %v15592_v52  ;;  %v11511_v58 = vrot.slane %v4183_v33, %v15592_v52  ;;  %v4352_v15 = vcombine.high %v11349_v2, %v11346_v43 }
 0x366   : > { %v9125_v61 = vpack.i.bf16 %v4403_v47, %v15689_v7  ;;  %v11516_v32 = vrot.slane %v2313_v26, %v9989_v28  ;;  %v15691_v47 = vcombine.high %v10522_v31, %v10844_v45  ;;  %v1875_v21 = vcombine.low %v15692_v55, %v11490_v42 }
 0x367   : > { %v11525_v40 = vrot.slane %v4526_v13, %v15592_v52  ;;  %v11528_v33 = vrot.slane %v3134_v22, %v15592_v52  ;;  %v11531_v43 = vrot.slane %v3118_v63, %v15592_v52  ;;  %v4231_v2 = vcombine.low %v11508_v50, %v11511_v58  ;;  %v11547_v13 = vpop.permute.xlu0 %2961  ;;  %v15695_v63 = vld [vmem:[#allocation110_spill] sm:$0xff] }
 0x368   : > { %15690 = vst [vmem:[#allocation57_spill] sm:$0xff] %v11516_v32  ;;  %9126 = vrot.lane.b32.xlu1 %v9125_v61, %s9801_s12  ;;  %v9120_v7 = vpack.i.bf16 %v4402_v27, %v15691_v47  ;;  %v11536_v26 = vrot.slane %v4542_v48, %v15592_v52  ;;  %v11539_v31 = vrot.slane %v1859_v49, %v15592_v52  ;;  %15694 = vst [vmem:[#allocation86_spill] sm:$0xff] %v11547_v13  ;;  %v15696_v61 = vld [vmem:[#allocation109_spill] sm:$0xff]  ;;  %v11559_v27 = vpop.permute.xlu1 %4505  ;;  %v15700_v47 = vld [vmem:[#allocation100_spill] sm:$0xff] }
 0x369   : > { %v11545_v22 = vrot.slane %v1875_v21, %v15592_v52  ;;  %v11554_v30 = vrot.slane %v4199_v54, %v9989_v28  ;;  %v11557_v49 = vrot.slane %v4231_v2, %v9989_v28  ;;  %v11567_v45 = vrot.slane %v4352_v15, %v9989_v28  ;;  %v15703_v21 = vld [vmem:[#allocation104_spill] sm:$0xff] }
 0x36a   : > { %9121 = vrot.lane.b32.xlu0 %v9120_v7, %s9800_s11  ;;  %v11564_v7 = vrot.slane %v4589_v18, %v9989_v28  ;;  %v3182_v54 = vcombine.high %v11282_v5, %v11278_v59  ;;  %v3013_v32 = vcombine.low %v15700_v47, %v11383_v1  ;;  %v15701_v18 = vld [vmem:[#allocation79_spill] sm:$0xff]  ;;  %v3246_v36 = vcombine.high %v11363_v38, %v11368_v9  ;;  %v15704_v1 = vld [vmem:[#allocation6_spill] sm:$0xff]  ;;  %v15713_v38 = vld [vmem:[#allocation112_spill] sm:$0xff] }
 0x36b   : > { %15697 = vst [vmem:[#allocation103_spill] sm:$0xff] %v11554_v30  ;;  %15698 = vst [vmem:[#allocation110_spill] sm:$0xff] %v11557_v49  ;;  %v1923_v48 = vcombine.low %v11539_v31, %v11545_v22  ;;  %v4557_v60 = vcombine.low %v15701_v18, %v11300_v10  ;;  %v3636_v59 = vcombine.high %v11414_v14, %v11417_v23  ;;  %v15705_v9 = vld [vmem:[#allocation23_spill] sm:$0xff] }
 0x36c   : > { %15699 = vst [vmem:[#allocation109_spill] sm:$0xff] %v11564_v7  ;;  %v3524_v5 = vcombine.high %v15651_v46, %v15650_v16  ;;  %v3214_v2 = vcombine.high %v11323_v56, %v11326_v41  ;;  %v3029_v47 = vcombine.low %v15703_v21, %v11547_v13  ;;  %v4573_v30 = vcombine.low %v15704_v1, %v11559_v27  ;;  %v11602_v46 = vpop.permute.xlu0 %3351  ;;  %v15707_v16 = vld [vmem:[#allocation119_spill] sm:$0xff]  ;;  %v15714_v21 = vld [vmem:[#allocation77_spill] sm:$0xff]  ;;  %v15716_v13 = vld [vmem:[#allocation10_spill] sm:$0xff] }
 0x36d   : > { %v11582_v15 = vrot.slane %v1923_v48, %v9989_v28  ;;  %v3604_v48 = vcombine.high %v11376_v6, %v11379_v62  ;;  %v9130_v49 = vpack.i.bf16 %v3636_v59, %v3246_v36  ;;  %v4404_v23 = vcombine.high %v11446_v35, %v11436_v24  ;;  %15706 = vst [vmem:[#allocation6_spill] sm:$0xff] %v11602_v46  ;;  %v11615_v62 = vpop.permute.xlu1 %2199  ;;  %v15711_v35 = vld [vmem:[#allocation52_spill] sm:$0xff]  ;;  %v15712_v24 = vld [vmem:[#allocation50_spill] sm:$0xff] }
 0x36e   : > { %v3572_v56 = vcombine.high %v15707_v16, %v11320_v53  ;;  %v11607_v41 = vrot.slane %v3013_v32, %v15592_v52  ;;  %v11610_v14 = vrot.slane %v3029_v47, %v15592_v52  ;;  %v11613_v6 = vrot.slane %v4573_v30, %v15592_v52  ;;  %15710 = vst [vmem:[#allocation134_spill] sm:$0xff] %v11615_v62  ;;  %v15715_v30 = vld [vmem:[#allocation102_spill] sm:$0xff] }
 0x36f   : > { %15702 = vst [vmem:[#allocation79_spill] sm:$0xff] %v11582_v15  ;;  %v11618_v36 = vrot.slane %v3182_v54, %v9989_v28  ;;  %v3508_v59 = vcombine.high %v15712_v24, %v15711_v35  ;;  %v2385_v53 = vcombine.low %v15714_v21, %v15713_v38  ;;  %v11625_v32 = vrot.slane %v4557_v60, %v15592_v52  ;;  %v15718_v21 = vld [vmem:[#allocation105_spill] sm:$0xff] }
 0x370   : > { %15708 = vst [vmem:[#allocation119_spill] sm:$0xff] %v11607_v41  ;;  %15709 = vst [vmem:[#allocation133_spill] sm:$0xff] %v11610_v14  ;;  %9131 = vrot.lane.b32.xlu0 %v9130_v49, %s9802_s15  ;;  %v11629_v47 = vrot.slane %v3214_v2, %v9989_v28  ;;  %v3403_v16 = vcombine.low %v15715_v30, %v11430_v37  ;;  %v3077_v54 = vcombine.low %v11607_v41, %v11610_v14  ;;  %v15721_v41 = vld [vmem:[#allocation126_spill] sm:$0xff] }
 0x371   : > { %v3419_v35 = vcombine.low %v15716_v13, %v11602_v46  ;;  %v11638_v24 = vrot.slane %v3604_v48, %v9989_v28  ;;  %v4621_v60 = vcombine.low %v11625_v32, %v11613_v6  ;;  %v15717_v49 = vcombine.high %v15687_v25, %v15688_v51  ;;  %v15720_v46 = vld [vmem:[#allocation123_spill] sm:$0xff] }
 0x372   : > { %v2401_v38 = vcombine.low %v15718_v21, %v11615_v62  ;;  %v11648_v30 = vrot.slane %v3524_v5, %v15592_v52  ;;  %v11651_v37 = vrot.slane %v3572_v56, %v9989_v28  ;;  %v1860_v48 = vcombine.high %v11081_v34, %v11227_v17  ;;  %v15724_v5 = vld [vmem:[#allocation127_spill] sm:$0xff]  ;;  %v15725_v56 = vld [vmem:[#allocation82_spill] sm:$0xff]  ;;  %v15734_v21 = vld [vmem:[#allocation76_spill] sm:$0xff] }
 0x373   : > { %v9135_v2 = vpack.i.bf16 %v4404_v23, %v15717_v49  ;;  %v11656_v13 = vrot.slane %v3077_v54, %v9989_v28  ;;  %v4384_v14 = vcombine.high %v15721_v41, %v15720_v46  ;;  %v11661_v23 = vrot.slane %v2385_v53, %v15592_v52  ;;  %v15729_v49 = vld [vmem:[#allocation106_spill] sm:$0xff] }
 0x374   : > { %v1876_v25 = vcombine.high %v15692_v55, %v11490_v42  ;;  %v11666_v51 = vrot.slane %v4621_v60, %v9989_v28  ;;  %v2012_v34 = vcombine.high %v15725_v56, %v15724_v5  ;;  %v11672_v17 = vrot.slane %v3403_v16, %v15592_v52  ;;  %v15732_v56 = vld [vmem:[#allocation80_spill] sm:$0xff] }
 0x375   : > { %15719 = vst [vmem:[#allocation52_spill] sm:$0xff] %v11656_v13  ;;  %15722 = vst [vmem:[#allocation50_spill] sm:$0xff] %v11661_v23  ;;  %9136 = vrot.lane.b32.xlu0 %v9135_v2, %s9796_s28  ;;  %v11677_v41 = vrot.slane %v3419_v35, %v15592_v52  ;;  %v11682_v42 = vrot.slane %v2401_v38, %v15592_v52  ;;  %v3247_v53 = vcombine.low %v11618_v36, %v11629_v47  ;;  %v15730_v2 = vld [vmem:[#allocation65_spill] sm:$0xff] }
 0x376   : > { %15723 = vst [vmem:[#allocation123_spill] sm:$0xff] %v11666_v51  ;;  %15726 = vst [vmem:[#allocation126_spill] sm:$0xff] %v11672_v17  ;;  %v3637_v60 = vcombine.low %v11651_v37, %v11638_v24  ;;  %v11689_v16 = vrot.slane %v3508_v59, %v15592_v52  ;;  %v1996_v5 = vcombine.high %v15730_v2, %v15729_v49  ;;  %v15731_v35 = vld [vmem:[#allocation121_spill] sm:$0xff]  ;;  %v15735_v51 = vld [vmem:[#allocation116_spill] sm:$0xff] }
 0x377   : > { %15728 = vst [vmem:[#allocation127_spill] sm:$0xff] %v11682_v42  ;;  %v3556_v46 = vcombine.high %v15732_v56, %v15731_v35  ;;  %v3467_v55 = vcombine.low %v11672_v17, %v11677_v41  ;;  %v15733_v38 = vld [vmem:[#allocation33_spill] sm:$0xff]  ;;  %v1890_v54 = vrot.slane %v1876_v25, %v15592_v52  ;;  %v2449_v13 = vcombine.low %v11661_v23, %v11682_v42  ;;  %v15736_v49 = vld [vmem:[#allocation78_spill] sm:$0xff] }
 0x378   : > { %v3540_v62 = vcombine.high %v15734_v21, %v15733_v38  ;;  %v9140_v7 = vpack.i.bf16 %v3637_v60, %v3247_v53  ;;  %v11703_v59 = vrot.slane %v4384_v14, %v9989_v28  ;;  %v3166_v2 = vcombine.high %v15736_v49, %v15735_v51  ;;  %v15738_v38 = vld [vmem:[#allocation34_spill] sm:$0xff]  ;;  %v15740_v51 = vld [vmem:[#allocation107_spill] sm:$0xff] }
 0x379   : > { %v1924_v35 = vcombine.high %v11539_v31, %v11545_v22  ;;  %v11710_v56 = vrot.slane %v3467_v55, %v9989_v28  ;;  %v1874_v21 = vrot.slane %v1860_v48, %v15592_v52  ;;  %v2026_v25 = vrot.slane %v2012_v34, %v15592_v52  ;;  %v15741_v31 = vld [vmem:[#allocation70_spill] sm:$0xff]  ;;  %v15745_v34 = vld [vmem:[#allocation64_spill] sm:$0xff] }
 0x37a   : > { %v2060_v23 = vcombine.high %v15738_v38, %v11408_v11  ;;  %v11717_v53 = vrot.slane %v2449_v13, %v9989_v28  ;;  %9141 = vrot.lane.b32.xlu0 %v9140_v7, %s9803_s16  ;;  %v3587_v14 = vcombine.low %v11689_v16, %v11648_v30  ;;  %v3150_v22 = vcombine.high %v15741_v31, %v15740_v51 }
 0x37b   : > { %15737 = vst [vmem:[#allocation82_spill] sm:$0xff] %v11710_v56  ;;  %v11725_v55 = vrot.slane %v3556_v46, %v15592_v52  ;;  %v2010_v60 = vrot.slane %v1996_v5, %v15592_v52  ;;  %v11731_v11 = vrot.slane %v3540_v62, %v15592_v52  ;;  %v1939_v13 = vcombine.low %v1874_v21, %v1890_v54  ;;  %v15744_v5 = vld [vmem:[#allocation4_spill] sm:$0xff]  ;;  %v15747_v56 = vld [vmem:[#allocation87_spill] sm:$0xff] }
 0x37c   : > { %15739 = vst [vmem:[#allocation106_spill] sm:$0xff] %v11717_v53  ;;  %v11736_v38 = vrot.slane %v3166_v2, %v15592_v52  ;;  %v11739_v51 = vrot.slane %v1924_v35, %v9989_v28  ;;  %v4405_v46 = vcombine.low %v11567_v45, %v11703_v59  ;;  %v1956_v31 = vcombine.high %v15705_v9, %v11582_v15  ;;  %v15746_v53 = vld [vmem:[#allocation58_spill] sm:$0xff] }
 0x37d   : > { %v4694_v62 = vcombine.high %v15745_v34, %v15744_v5  ;;  %v11748_v42 = vrot.slane %v2060_v23, %v9989_v28  ;;  %v2075_v48 = vcombine.low %v2010_v60, %v2026_v25  ;;  %v2092_v2 = vcombine.high %v11263_v57, %v11449_v12  ;;  %v15750_v57 = vld [vmem:[#allocation75_spill] sm:$0xff] }
 0x37e   : > { %v11753_v49 = vrot.slane %v3150_v22, %v15592_v52  ;;  %v3619_v35 = vcombine.low %v11731_v11, %v11725_v55  ;;  %v1940_v7 = vcombine.high %v1874_v21, %v1890_v54  ;;  %v15748_v15 = vcombine.low %v15746_v53, %v15747_v56  ;;  %v15749_v22 = vld [vmem:[#allocation38_spill] sm:$0xff]  ;;  %v15751_v21 = vld [vmem:[#allocation108_spill] sm:$0xff] }
 0x37f   : > { %v11761_v34 = vrot.slane %v1939_v13, %v9989_v28  ;;  %v4574_v23 = vcombine.high %v15704_v1, %v11559_v27  ;;  %v9180_v5 = vpack.i.bf16 %v2092_v2, %v1956_v31  ;;  %v3638_v12 = vcombine.high %v11651_v37, %v11638_v24 }
 0x380   : > { %v9145_v9 = vpack.i.bf16 %v4405_v46, %v15748_v15  ;;  %v4710_v17 = vcombine.high %v15750_v57, %v15749_v22  ;;  %v3229_v54 = vcombine.low %v11753_v49, %v11736_v38  ;;  %v3248_v15 = vcombine.high %v11618_v36, %v11629_v47  ;;  %v15752_v57 = vld [vmem:[#allocation114_spill] sm:$0xff] }
 0x381   : > { %v1958_v13 = vcombine.high %v15751_v21, %v11739_v51  ;;  %v4558_v1 = vcombine.high %v15701_v18, %v11300_v10  ;;  %v2076_v27 = vcombine.high %v2010_v60, %v2026_v25  ;;  %v11779_v37 = vrot.slane %v2075_v48, %v9989_v28  ;;  %9181 = vrot.lane.b32.xlu1 %v9180_v5, %s9802_s15  ;;  %v15753_v48 = vld [vmem:[#allocation41_spill] sm:$0xff] }
 0x382   : > { %9146 = vrot.lane.b32.xlu0 %v9145_v9, %s9793_s24  ;;  %v2094_v24 = vcombine.high %v15752_v57, %v11748_v42  ;;  %v3627_v9 = vrot.slane %v3619_v35, %v9989_v28  ;;  %v11786_v46 = vrot.slane %v1940_v7, %v9989_v28  ;;  %v9150_v36 = vpack.i.bf16 %v3638_v12, %v3248_v15 }
 0x383   : > { %v4406_v47 = vcombine.high %v11567_v45, %v11703_v59  ;;  %v11791_v10 = vrot.slane %v4574_v23, %v15592_v52  ;;  %v4622_v18 = vcombine.high %v11625_v32, %v11613_v6  ;;  %v1960_v60 = vcombine.high %v15753_v48, %v11761_v34  ;;  %v15755_v59 = vld [vmem:[#allocation48_spill] sm:$0xff]  ;;  %v15756_v6 = vld [vmem:[#allocation47_spill] sm:$0xff] }
 0x384   : > { %v9190_v25 = vpack.i.bf16 %v2094_v24, %v1958_v13  ;;  %v15754_v31 = vcombine.low %v11531_v43, %v11528_v33  ;;  %v3595_v12 = vrot.slane %v3587_v14, %v9989_v28  ;;  %v11803_v2 = vrot.slane %v4710_v17, %v15592_v52  ;;  %v15757_v14 = vld [vmem:[#allocation51_spill] sm:$0xff] }
 0x385   : > { %v3237_v45 = vrot.slane %v3229_v54, %v9989_v28  ;;  %v4758_v32 = vcombine.high %v15756_v6, %v15755_v59  ;;  %v11810_v35 = vrot.slane %v4558_v1, %v15592_v52  ;;  %v11813_v23 = vrot.slane %v2076_v27, %v9989_v28 }
 0x386   : > { %v3205_v7 = vrot.slane %v15754_v31, %v9989_v28  ;;  %9151 = vrot.lane.b32.xlu0 %v9150_v36, %s9800_s11  ;;  %9191 = vrot.lane.b32.xlu1 %v9190_v25, %s9800_s11  ;;  %v2096_v5 = vcombine.high %v15757_v14, %v11779_v37  ;;  %v11819_v17 = vrot.slane %v4694_v62, %v15592_v52  ;;  %v15759_v36 = vld [vmem:[#allocation39_spill] sm:$0xff] }
 0x387   : > { %v3620_v22 = vcombine.high %v11731_v11, %v11725_v55  ;;  %v15758_v54 = vcombine.high %v15746_v53, %v15747_v56  ;;  %v3639_v13 = vcombine.low %v3595_v12, %v3627_v9  ;;  %v11827_v1 = vrot.slane %v4622_v18, %v9989_v28 }
 0x388   : > { %v4637_v27 = vcombine.low %v11810_v35, %v11791_v10  ;;  %v9200_v24 = vpack.i.bf16 %v2096_v5, %v1960_v60  ;;  %v1962_v25 = vcombine.high %v15759_v36, %v11786_v46  ;;  %v4605_v62 = vcombine.low %v11525_v40, %v11536_v26 }
 0x389   : > { %v9155_v15 = vpack.i.bf16 %v4406_v47, %v15758_v54  ;;  %v3588_v55 = vcombine.high %v11689_v16, %v11648_v30  ;;  %v3230_v56 = vcombine.high %v11753_v49, %v11736_v38  ;;  %v3249_v53 = vcombine.low %v3205_v7, %v3237_v45  ;;  %v15761_v30 = vld [vmem:[#allocation117_spill] sm:$0xff] }
 0x38a   : > { %v15760_v11 = vcombine.high %v11433_v3, %v11443_v0  ;;  %v11847_v18 = vrot.slane %v4758_v32, %v9989_v28  ;;  %v4773_v60 = vcombine.low %v11819_v17, %v11803_v2  ;;  %9201 = vrot.lane.b32.xlu1 %v9200_v24, %s9796_s28  ;;  %v2098_v16 = vcombine.high %v15761_v30, %v11813_v23 }
 0x38b   : > { %9156 = vrot.lane.b32.xlu0 %v9155_v15, %s9794_s25  ;;  %v3198_v49 = vcombine.high %v11531_v43, %v11528_v33  ;;  %v3634_v38 = vrot.slane %v3620_v22, %v9989_v28  ;;  %v9160_v31 = vpack.i.bf16 %v3639_v13, %v3249_v53  ;;  %v3640_v0 = vcombine.high %v3595_v12, %v3627_v9  ;;  %v15766_v53 = vld [vmem:[#allocation44_spill] sm:$0xff] }
 0x38c   : > { %v11844_v47 = vrot.slane %v15760_v11, %v9989_v28  ;;  %v15762_v3 = vcombine.high %v15696_v61, %v15695_v63  ;;  %v4645_v6 = vrot.slane %v4637_v27, %v9989_v28  ;;  %v9210_v32 = vpack.i.bf16 %v2098_v16, %v1962_v25  ;;  %v15767_v11 = vld [vmem:[#allocation42_spill] sm:$0xff]  ;;  %v15768_v16 = vld [vmem:[#allocation81_spill] sm:$0xff] }
 0x38d   : > { %v3602_v54 = vrot.slane %v3588_v55, %v9989_v28  ;;  %v3244_v33 = vrot.slane %v3230_v56, %v9989_v28  ;;  %v3250_v43 = vcombine.high %v3205_v7, %v3237_v45  ;;  %v4613_v9 = vrot.slane %v4605_v62, %v9989_v28  ;;  %v15764_v62 = vld [vmem:[#allocation45_spill] sm:$0xff]  ;;  %v15765_v55 = vld [vmem:[#allocation43_spill] sm:$0xff] }
 0x38e   : > { %v11861_v59 = vrot.slane %v15762_v3, %v9989_v28  ;;  %v4655_v5 = vcombine.low %v11844_v47, %v11827_v1  ;;  %v4781_v12 = vrot.slane %v4773_v60, %v9989_v28  ;;  %9211 = vrot.lane.b32.xlu1 %v9210_v32, %s9794_s25  ;;  %v3212_v61 = vrot.slane %v3198_v49, %v9989_v28 }
 0x38f   : > { %9161 = vrot.lane.b32.xlu0 %v9160_v31, %s9801_s12  ;;  %v4184_v22 = vcombine.high %v11103_v8, %v11461_v20  ;;  %v9165_v15 = vpack.i.bf16 %v3640_v0, %v3250_v43  ;;  %v3641_v13 = vcombine.low %v3602_v54, %v3634_v38  ;;  %v15763_v7 = vcombine.low %v11422_v19, %v11493_v4 }
 0x390   : > { %v4791_v63 = vcombine.low %v11861_v59, %v11847_v18  ;;  %v4232_v27 = vcombine.high %v11508_v50, %v11511_v58  ;;  %v4657_v25 = vcombine.low %v4613_v9, %v4645_v6  ;;  %v4152_v56 = vcombine.high %v15765_v55, %v15764_v62 }
 0x391   : > { %v4749_v45 = vrot.slane %v15763_v7, %v9989_v28  ;;  %v4136_v60 = vcombine.high %v15767_v11, %v15766_v53  ;;  %v3251_v8 = vcombine.low %v3212_v61, %v3244_v33  ;;  %v4200_v20 = vcombine.high %v11464_v44, %v11452_v39  ;;  %v15773_v53 = vld [vmem:[#allocation109_spill] sm:$0xff] }
 0x392   : > { %v9220_v24 = vpack.i.bf16 %v4791_v63, %v4655_v5  ;;  %v4168_v49 = vcombine.high %v15768_v16, %v11340_v29  ;;  %v11894_v58 = vrot.slane %v4184_v22, %v15592_v52  ;;  %v3642_v0 = vcombine.high %v3602_v54, %v3634_v38  ;;  %v15776_v16 = vld [vmem:[#allocation89_spill] sm:$0xff] }
 0x393   : > { %9166 = vrot.lane.b32.xlu0 %v9165_v15, %s9796_s28  ;;  %v4793_v50 = vcombine.low %v4749_v45, %v4781_v12  ;;  %v9170_v31 = vpack.i.bf16 %v3641_v13, %v3251_v8  ;;  %v11897_v3 = vrot.slane %v4232_v27, %v9989_v28  ;;  %v4638_v32 = vcombine.high %v11810_v35, %v11791_v10  ;;  %v15770_v15 = vld [vmem:[#allocation88_spill] sm:$0xff] }
 0x394   : > { %9221 = vrot.lane.b32.xlu1 %v9220_v24, %s9803_s16  ;;  %v4658_v43 = vcombine.high %v4613_v9, %v4645_v6  ;;  %v4606_v39 = vcombine.high %v11525_v40, %v11536_v26  ;;  %v11904_v29 = vrot.slane %v4152_v56, %v15592_v52  ;;  %v11907_v44 = vrot.slane %v4136_v60, %v15592_v52  ;;  %v15774_v60 = vld [vmem:[#allocation126_spill] sm:$0xff] }
 0x395   : > { %v9230_v5 = vpack.i.bf16 %v4793_v50, %v4657_v25  ;;  %v3252_v38 = vcombine.high %v3212_v61, %v3244_v33  ;;  %v11911_v54 = vrot.slane %v4200_v20, %v9989_v28  ;;  %v4774_v10 = vcombine.high %v11819_v17, %v11803_v2  ;;  %v15775_v20 = vld [vmem:[#allocation60_spill] sm:$0xff]  ;;  %v15779_v50 = vld [vmem:[#allocation46_spill] sm:$0xff] }
 0x396   : > { %v4182_v35 = vrot.slane %v4168_v49, %v15592_v52  ;;  %v4794_v40 = vcombine.high %v4749_v45, %v4781_v12  ;;  %v4742_v26 = vcombine.high %v11422_v19, %v11493_v4  ;;  %v1957_v9 = vcombine.low %v15751_v21, %v11739_v51 }
 0x397   : > { %9171 = vrot.lane.b32.xlu0 %v9170_v31, %s9793_s24  ;;  %v9175_v6 = vpack.i.bf16 %v3642_v0, %v3252_v38  ;;  %v11923_v63 = vrot.slane %v4638_v32, %v9989_v28  ;;  %v4265_v2 = vcombine.low %v11911_v54, %v11897_v3  ;;  %v2093_v17 = vcombine.low %v15752_v57, %v11748_v42  ;;  %v15769_v57 = vld [vmem:[#allocation59_spill] sm:$0xff]  ;;  %v15780_v0 = vld [vmem:[#allocation53_spill] sm:$0xff] }
 0x398   : > { %9231 = vrot.lane.b32.xlu1 %v9230_v5, %s9801_s12  ;;  %v4247_v33 = vcombine.low %v4182_v35, %v11894_v58  ;;  %v9235_v61 = vpack.i.bf16 %v4794_v40, %v4658_v43  ;;  %v11931_v19 = vrot.slane %v4606_v39, %v9989_v28  ;;  %v4215_v4 = vcombine.low %v11907_v44, %v11904_v29  ;;  %v15782_v32 = vld [vmem:[#allocation35_spill] sm:$0xff]  ;;  %v15784_v39 = vld [vmem:[#allocation133_spill] sm:$0xff] }
 0x399   : > { %v11936_v51 = vrot.slane %v4774_v10, %v9989_v28  ;;  %v9185_v21 = vpack.i.bf16 %v2093_v17, %v1957_v9  ;;  %v1959_v12 = vcombine.low %v15753_v48, %v11761_v34  ;;  %v11942_v22 = vrot.slane %v4742_v26, %v9989_v28  ;;  %v15783_v5 = vld [vmem:[#allocation31_spill] sm:$0xff]  ;;  %v15787_v40 = vld [vmem:[#allocation49_spill] sm:$0xff] }
 0x39a   : > { %v4255_v42 = vrot.slane %v4247_v33, %v9989_v28  ;;  %v15771_v13 = vcombine.low %v15769_v57, %v15770_v15  ;;  %v4660_v45 = vcombine.high %v11931_v19, %v11923_v63  ;;  %v2095_v27 = vcombine.low %v15757_v14, %v11779_v37  ;;  %v15772_v14 = vld [vmem:[#allocation123_spill] sm:$0xff]  ;;  %v15789_v9 = vld [vmem:[#allocation25_spill] sm:$0xff] }
 0x39b   : > { %9176 = vrot.lane.b32.xlu0 %v9175_v6, %s9794_s25  ;;  %v4223_v24 = vrot.slane %v4215_v4, %v9989_v28  ;;  %v4796_v34 = vcombine.high %v11942_v22, %v11936_v51  ;;  %v1961_v25 = vcombine.low %v15759_v36, %v11786_v46  ;;  %v2097_v56 = vcombine.low %v15761_v30, %v11813_v23  ;;  %v15778_v36 = vld [vmem:[#allocation82_spill] sm:$0xff]  ;;  %v15781_v23 = vld [vmem:[#allocation115_spill] sm:$0xff]  ;;  %v15788_v6 = vld [vmem:[#allocation29_spill] sm:$0xff] }
 0x39c   : > { %9236 = vrot.lane.b32.xlu1 %v9235_v61, %s9796_s28  ;;  %v9250_v7 = vpack.i.bf16 %v4265_v2, %v15771_v13  ;;  %v9195_v48 = vpack.i.bf16 %v2095_v27, %v1959_v12  ;;  %v4654_v11 = vcombine.high %v15773_v53, %v15772_v14  ;;  %v3468_v8 = vcombine.high %v15774_v60, %v11677_v41  ;;  %v15785_v38 = vld [vmem:[#allocation119_spill] sm:$0xff]  ;;  %v15786_v41 = vld [vmem:[#allocation52_spill] sm:$0xff]  ;;  %v15799_v60 = vld [vmem:[#allocation21_spill] sm:$0xff] }
 0x39d   : > { %v9255_v62 = vpack.i.bf16 %v4796_v34, %v4660_v45  ;;  %v4267_v55 = vcombine.low %v4223_v24, %v4255_v42  ;;  %v9205_v37 = vpack.i.bf16 %v2097_v56, %v1961_v25  ;;  %v15777_v49 = vcombine.low %v15775_v20, %v15776_v16  ;;  %v15795_v25 = vld [vmem:[#allocation17_spill] sm:$0xff]  ;;  %v15797_v56 = vld [vmem:[#allocation16_spill] sm:$0xff] }
 0x39e   : > { %v3500_v31 = vcombine.high %v15779_v50, %v15778_v36  ;;  %v4790_v30 = vcombine.high %v15781_v23, %v15780_v0  ;;  %v3436_v43 = vcombine.high %v15783_v5, %v15782_v32  ;;  %v3078_v10 = vcombine.high %v15785_v38, %v15784_v39  ;;  %v15804_v32 = vld [vmem:[#allocation102_spill] sm:$0xff]  ;;  %v15806_v39 = vld [vmem:[#allocation104_spill] sm:$0xff] }
 0x39f   : > { %9186 = vrot.lane.b32.xlu0 %v9185_v21, %s9803_s16  ;;  %v9265_v46 = vpack.i.bf16 %v4267_v55, %v15777_v49  ;;  %v3110_v26 = vcombine.high %v15787_v40, %v15786_v41  ;;  %v3046_v33 = vcombine.high %v15789_v9, %v15788_v6  ;;  %v4656_v2 = vcombine.high %v11844_v47, %v11827_v1  ;;  %v15808_v6 = vld [vmem:[#allocation7_spill] sm:$0xff] }
 0x3a0   : > { %9251 = vrot.lane.b32.xlu1 %v9250_v7, %s9803_s16  ;;  %v9215_v61 = vpack.i.bf16 %v4790_v30, %v4654_v11  ;;  %v4248_v17 = vcombine.high %v4182_v35, %v11894_v58  ;;  %v11988_v4 = vrot.slane %v3468_v8, %v9989_v28  ;;  %v4268_v12 = vcombine.high %v4223_v24, %v4255_v42  ;;  %v15790_v35 = vld [vmem:[#allocation110_spill] sm:$0xff]  ;;  %v15791_v42 = vld [vmem:[#allocation103_spill] sm:$0xff] }
 0x3a1   : > { %v9270_v21 = vpack.i.bf16 %v3500_v31, %v3110_v26  ;;  %v4792_v13 = vcombine.high %v11861_v59, %v11847_v18  ;;  %v11994_v7 = vrot.slane %v3436_v43, %v9989_v28  ;;  %v4216_v45 = vcombine.high %v11907_v44, %v11904_v29  ;;  %v15792_v18 = vld [vmem:[#allocation6_spill] sm:$0xff]  ;;  %v15800_v8 = vld [vmem:[#allocation19_spill] sm:$0xff] }
 0x3a2   : > { %v3092_v1 = vrot.slane %v3078_v10, %v9989_v28  ;;  %v3060_v47 = vrot.slane %v3046_v33, %v9989_v28  ;;  %v4264_v27 = vcombine.high %v15791_v42, %v15790_v35  ;;  %v12004_v24 = vrot.slane %v4248_v17, %v9989_v28  ;;  %v15793_v59 = vld [vmem:[#allocation10_spill] sm:$0xff]  ;;  %v15807_v26 = vld [vmem:[#allocation11_spill] sm:$0xff]  ;;  %v15809_v33 = vld [vmem:[#allocation13_spill] sm:$0xff] }
 0x3a3   : > { %9196 = vrot.lane.b32.xlu0 %v9195_v48, %s9801_s12  ;;  %v9225_v58 = vpack.i.bf16 %v4792_v13, %v4656_v2  ;;  %v3420_v34 = vcombine.high %v15793_v59, %v15792_v18  ;;  %v15794_v48 = vcombine.high %v15775_v20, %v15776_v16  ;;  %v3501_v44 = vcombine.low %v11994_v7, %v11988_v4  ;;  %v15802_v31 = vld [vmem:[#allocation18_spill] sm:$0xff]  ;;  %v15803_v16 = vld [vmem:[#allocation129_spill] sm:$0xff]  ;;  %v15815_v18 = vld [vmem:[#allocation100_spill] sm:$0xff] }
 0x3a4   : > { %9256 = vrot.lane.b32.xlu1 %v9255_v62, %s9794_s25  ;;  %v15796_v62 = vld [vmem:[#allocation15_spill] sm:$0xff]  ;;  %v3388_v49 = vcombine.high %v15800_v8, %v15799_v60  ;;  %v12023_v20 = vrot.slane %v4216_v45, %v9989_v28  ;;  %v3404_v5 = vcombine.high %v15804_v32, %v15803_v16  ;;  %v15805_v43 = vld [vmem:[#allocation86_spill] sm:$0xff]  ;;  %v3111_v10 = vcombine.low %v3060_v47, %v3092_v1  ;;  %v15811_v17 = vld [vmem:[#allocation61_spill] sm:$0xff] }
 0x3a5   : > { %v9275_v29 = vpack.i.bf16 %v4268_v12, %v15794_v48  ;;  %v2998_v55 = vcombine.high %v15796_v62, %v15795_v25  ;;  %v3030_v38 = vcombine.high %v15806_v39, %v15805_v43  ;;  %v2218_v9 = vcombine.high %v15808_v6, %v15807_v26  ;;  %v15818_v60 = vld [vmem:[#allocation134_spill] sm:$0xff]  ;;  %v15819_v8 = vld [vmem:[#allocation105_spill] sm:$0xff]  ;;  %v15823_v43 = vld [vmem:[#allocation91_spill] sm:$0xff] }
 0x3a6   : > { %v4659_v45 = vcombine.low %v11931_v19, %v11923_v63  ;;  %v12042_v48 = vrot.slane %v3420_v34, %v15592_v52  ;;  %v4269_v25 = vcombine.low %v12023_v20, %v12004_v24  ;;  %v4795_v63 = vcombine.low %v11942_v22, %v11936_v51  ;;  %v15816_v34 = vld [vmem:[#allocation26_spill] sm:$0xff]  ;;  %v15825_v6 = vld [vmem:[#allocation28_spill] sm:$0xff] }
 0x3a7   : > { %9206 = vrot.lane.b32.xlu0 %v9205_v37, %s9793_s24  ;;  %v15798_v37 = vld [vmem:[#allocation14_spill] sm:$0xff]  ;;  %v12047_v62 = vrot.slane %v2998_v55, %v15592_v52  ;;  %v12064_v55 = vrot.slane %v3404_v5, %v15592_v52 }
 0x3a8   : > { %9266 = vrot.lane.b32.xlu1 %v9265_v46, %s9801_s12  ;;  %v2982_v11 = vcombine.high %v15798_v37, %v15797_v56  ;;  %v15801_v46 = vld [vmem:[#allocation20_spill] sm:$0xff]  ;;  %v9245_v22 = vpack.i.bf16 %v4795_v63, %v4659_v45  ;;  %v15822_v5 = vld [vmem:[#allocation62_spill] sm:$0xff]  ;;  %v15830_v45 = vld [vmem:[#allocation77_spill] sm:$0xff] }
 0x3a9   : > { %v3372_v30 = vcombine.high %v15802_v31, %v15801_v46  ;;  %v15820_v46 = vld [vmem:[#allocation127_spill] sm:$0xff]  ;;  %v15821_v31 = vld [vmem:[#allocation50_spill] sm:$0xff]  ;;  %v3483_v32 = vcombine.low %v12064_v55, %v12042_v48  ;;  %v15824_v39 = vcombine.low %v15822_v5, %v15823_v43 }
 0x3aa   : > { %v12050_v56 = vrot.slane %v2982_v11, %v15592_v52  ;;  %v12067_v11 = vrot.slane %v3030_v38, %v15592_v52  ;;  %v2450_v51 = vcombine.high %v15821_v31, %v15820_v46  ;;  %v15835_v46 = vld [vmem:[#allocation122_spill] sm:$0xff] }
 0x3ab   : > { %9216 = vrot.lane.b32.xlu0 %v9215_v61, %s9802_s15  ;;  %v15810_v61 = vld [vmem:[#allocation9_spill] sm:$0xff]  ;;  %v12059_v19 = vrot.slane %v3372_v30, %v15592_v52  ;;  %v4266_v30 = vcombine.high %v11911_v54, %v11897_v3  ;;  %v9285_v38 = vpack.i.bf16 %v4269_v25, %v15824_v39  ;;  %v15827_v3 = vld [vmem:[#allocation111_spill] sm:$0xff]  ;;  %v15828_v54 = vld [vmem:[#allocation40_spill] sm:$0xff]  ;;  %v3112_v25 = vcombine.high %v3060_v47, %v3092_v1 }
 0x3ac   : > { %9271 = vrot.lane.b32.xlu1 %v9270_v21, %s9802_s15  ;;  %v2234_v2 = vcombine.high %v15810_v61, %v15809_v33  ;;  %v15812_v21 = vld [vmem:[#allocation90_spill] sm:$0xff]  ;;  %v3061_v26 = vcombine.low %v12050_v56, %v12047_v62  ;;  %v15826_v33 = vld [vmem:[#allocation24_spill] sm:$0xff]  ;;  %v3491_v39 = vrot.slane %v3483_v32, %v9989_v28  ;;  %v4270_v1 = vcombine.high %v12023_v20, %v12004_v24 }
 0x3ad   : > { %v15813_v12 = vcombine.high %v15811_v17, %v15812_v21  ;;  %v2370_v61 = vcombine.high %v15826_v33, %v15825_v6 }
 0x3af   : > { %9226 = vrot.lane.b32.xlu0 %v9225_v58, %s9800_s11  ;;  %v9240_v13 = vpack.i.bf16 %v4264_v27, %v15813_v12  ;;  %v15814_v58 = vld [vmem:[#allocation128_spill] sm:$0xff]  ;;  %v12053_v27 = vrot.slane %v3388_v49, %v15592_v52  ;;  %v2402_v49 = vcombine.high %v15819_v8, %v15818_v60  ;;  %v2418_v12 = vcombine.high %v15828_v54, %v15827_v3  ;;  %v15834_v8 = vld [vmem:[#allocation106_spill] sm:$0xff] }
 0x3b0   : > { %9276 = vrot.lane.b32.xlu1 %v9275_v29, %s9796_s28  ;;  %v3014_v59 = vcombine.high %v15815_v18, %v15814_v58  ;;  %v9280_v29 = vpack.i.bf16 %v3501_v44, %v3111_v10  ;;  %v15817_v44 = vld [vmem:[#allocation22_spill] sm:$0xff]  ;;  %v3502_v10 = vcombine.high %v11994_v7, %v11988_v4  ;;  %v2482_v31 = vcombine.high %v15835_v46, %v15834_v8 }
 0x3b1   : > { %v2354_v37 = vcombine.high %v15817_v44, %v15816_v34  ;;  %v3451_v18 = vcombine.low %v12059_v19, %v12053_v27  ;;  %v12103_v63 = vrot.slane %v2402_v49, %v15592_v52  ;;  %v2464_v34 = vrot.slane %v2450_v51, %v9989_v28  ;;  %v15836_v51 = vld [vmem:[#allocation37_spill] sm:$0xff] }
 0x3b2   : > { %v12077_v16 = vrot.slane %v3014_v59, %v15592_v52  ;;  %v15831_v59 = vld [vmem:[#allocation32_spill] sm:$0xff]  ;;  %v15833_v44 = vcombine.high %v15769_v57, %v15770_v15  ;;  %v9290_v6 = vpack.i.bf16 %v3502_v10, %v3112_v25  ;;  %v12118_v47 = vrot.slane %v2370_v61, %v15592_v52  ;;  %v15837_v57 = vld [vmem:[#allocation71_spill] sm:$0xff] }
 0x3b3   : > { %9241 = vrot.lane.b32.xlu0 %v9240_v13, %s9802_s15  ;;  %v15829_v13 = vld [vmem:[#allocation112_spill] sm:$0xff]  ;;  %v2432_v49 = vrot.slane %v2418_v12, %v9989_v28  ;;  %v2250_v15 = vcombine.high %v15837_v57, %v15836_v51  ;;  %v3069_v54 = vrot.slane %v3061_v26, %v9989_v28  ;;  %v15841_v12 = vcombine.high %v15822_v5, %v15823_v43  ;;  %v15843_v43 = vld [vmem:[#allocation93_spill] sm:$0xff]  ;;  %v15848_v57 = vld [vmem:[#allocation27_spill] sm:$0xff] }
 0x3b4   : > { %9281 = vrot.lane.b32.xlu1 %v9280_v29, %s9803_s16  ;;  %v2386_v58 = vcombine.high %v15830_v45, %v15829_v13  ;;  %v15832_v29 = vld [vmem:[#allocation101_spill] sm:$0xff]  ;;  %v3093_v7 = vcombine.low %v12077_v16, %v12067_v11  ;;  %v9260_v60 = vpack.i.bf16 %v4266_v30, %v15833_v44  ;;  %v15839_v10 = vld [vmem:[#allocation92_spill] sm:$0xff] }
 0x3b5   : > { %v2266_v4 = vcombine.high %v15832_v29, %v15831_v59  ;;  %v2483_v3 = vcombine.low %v2432_v49, %v2464_v34  ;;  %v9295_v13 = vpack.i.bf16 %v4270_v1, %v15841_v12  ;;  %v2264_v29 = vrot.slane %v2250_v15, %v15592_v52  ;;  %v15842_v5 = vld [vmem:[#allocation72_spill] sm:$0xff]  ;;  %v15847_v51 = vld [vmem:[#allocation57_spill] sm:$0xff] }
 0x3b6   : > { %v12124_v30 = vrot.slane %v2386_v58, %v15592_v52  ;;  %v3101_v32 = vrot.slane %v3093_v7, %v9989_v28  ;;  %v2232_v58 = vrot.slane %v2218_v9, %v15592_v52  ;;  %v15844_v25 = vcombine.low %v15842_v5, %v15843_v43  ;;  %v15850_v12 = vld [vmem:[#allocation12_spill] sm:$0xff] }
 0x3b7   : > { %9246 = vrot.lane.b32.xlu0 %v9245_v22, %s9793_s24  ;;  %v12112_v22 = vrot.slane %v2354_v37, %v15592_v52  ;;  %v3459_v37 = vrot.slane %v3451_v18, %v9989_v28  ;;  %v2280_v24 = vrot.slane %v2266_v4, %v15592_v52  ;;  %v2248_v18 = vrot.slane %v2234_v2, %v15592_v52  ;;  %v15845_v2 = vld [vmem:[#allocation132_spill] sm:$0xff] }
 0x3b8   : > { %9286 = vrot.lane.b32.xlu1 %v9285_v38, %s9793_s24  ;;  %v2465_v20 = vcombine.low %v12124_v30, %v12103_v63  ;;  %v15838_v38 = vld [vmem:[#allocation66_spill] sm:$0xff]  ;;  %v3113_v4 = vcombine.low %v3069_v54, %v3101_v32  ;;  %v9315_v9 = vpack.i.bf16 %v15844_v25, %v2483_v3  ;;  %v2484_v44 = vcombine.high %v2432_v49, %v2464_v34  ;;  %v15852_v25 = vld [vmem:[#allocation63_spill] sm:$0xff] }
 0x3b9   : > { %v15840_v33 = vcombine.high %v15838_v38, %v15839_v10  ;;  %v3503_v45 = vcombine.low %v3459_v37, %v3491_v39  ;;  %v2433_v59 = vcombine.low %v12112_v22, %v12118_v47  ;;  %v2329_v26 = vcombine.low %v2264_v29, %v2280_v24 }
 0x3ba   : > { %v12148_v7 = vrot.slane %v2465_v20, %v9989_v28  ;;  %v2346_v15 = vcombine.high %v15848_v57, %v15847_v51  ;;  %v15849_v20 = vld [vmem:[#allocation8_spill] sm:$0xff]  ;;  %v15851_v49 = vcombine.high %v15842_v5, %v15843_v43  ;;  %v3452_v5 = vcombine.high %v12059_v19, %v12053_v27 }
 0x3bb   : > { %9261 = vrot.lane.b32.xlu0 %v9260_v60, %s9800_s11  ;;  %v9300_v61 = vpack.i.bf16 %v15840_v33, %v2482_v31  ;;  %v15846_v60 = vld [vmem:[#allocation131_spill] sm:$0xff]  ;;  %v9305_v1 = vpack.i.bf16 %v3503_v45, %v3113_v4  ;;  %v2297_v33 = vcombine.low %v2232_v58, %v2248_v18  ;;  %v2337_v34 = vrot.slane %v2329_v26, %v9989_v28 }
 0x3bc   : > { %9291 = vrot.lane.b32.xlu1 %v9290_v6, %s9800_s11  ;;  %v2314_v31 = vcombine.high %v15846_v60, %v15845_v2  ;;  %v12155_v6 = vpop.permute.xlu0 %9076  ;;  %v9330_v3 = vpack.i.bf16 %v15851_v49, %v2484_v44  ;;  %v3094_v43 = vcombine.high %v12077_v16, %v12067_v11  ;;  %v2298_v49 = vcombine.high %v2232_v58, %v2248_v18  ;;  %v15861_v58 = vld [vmem:[#allocation67_spill] sm:$0xff]  ;;  %v15862_v18 = vld [vmem:[#allocation96_spill] sm:$0xff] }
 0x3bd   : > { %v3466_v11 = vrot.slane %v3452_v5, %v9989_v28 }
 0x3be   : > { %v2328_v4 = vrot.slane %v2314_v31, %v9989_v28  ;;  %v15855_v31 = vld [vmem:[#allocation73_spill] sm:$0xff]  ;;  %v3108_v16 = vrot.slane %v3094_v43, %v9989_v28 }
 0x3bf   : > { %9301 = vrot.lane.b32.xlu0 %v9300_v61, %s9802_s15  ;;  %v12160_v61 = vrot.slane %v2433_v59, %v9989_v28  ;;  %v3484_v59 = vcombine.high %v12064_v55, %v12042_v48  ;;  %v3114_v48 = vcombine.high %v3069_v54, %v3101_v32  ;;  %v2330_v55 = vcombine.high %v2264_v29, %v2280_v24  ;;  %v15858_v24 = vld [vmem:[#allocation68_spill] sm:$0xff]  ;;  %v15859_v54 = vld [vmem:[#allocation97_spill] sm:$0xff] }
 0x3c0   : > { %9296 = vrot.lane.b32.xlu1 %v9295_v13, %s9794_s25  ;;  %v2282_v13 = vcombine.high %v15850_v12, %v15849_v20  ;;  %v3504_v20 = vcombine.high %v3459_v37, %v3491_v39  ;;  %v12185_v44 = vpop.permute.xlu0 %9086  ;;  %v15856_v39 = vld [vmem:[#allocation95_spill] sm:$0xff]  ;;  %v3062_v12 = vcombine.high %v12050_v56, %v12047_v62  ;;  %v15860_v29 = vcombine.low %v15858_v24, %v15859_v54 }
 0x3c1   : > { %v2485_v45 = vcombine.low %v12160_v61, %v12148_v7  ;;  %v15857_v37 = vcombine.low %v15855_v31, %v15856_v39  ;;  %v2344_v32 = vrot.slane %v2330_v55, %v9989_v28  ;;  %v15864_v43 = vcombine.high %v15858_v24, %v15859_v54 }
 0x3c2   : > { %v2296_v26 = vrot.slane %v2282_v13, %v9989_v28  ;;  %v3498_v13 = vrot.slane %v3484_v59, %v9989_v28  ;;  %v9320_v27 = vpack.i.bf16 %v3504_v20, %v3114_v48  ;;  %v3076_v56 = vrot.slane %v3062_v12, %v9989_v28 }
 0x3c3   : > { %9316 = vrot.lane.b32.xlu0 %v9315_v9, %s9803_s16  ;;  %v15853_v9 = vld [vmem:[#allocation94_spill] sm:$0xff]  ;;  %v15863_v59 = vcombine.low %v15861_v58, %v15862_v18  ;;  %v2312_v20 = vrot.slane %v2298_v49, %v9989_v28  ;;  %v2466_v49 = vcombine.high %v12124_v30, %v12103_v63  ;;  %v15868_v24 = vcombine.high %v15861_v58, %v15862_v18 }
 0x3c4   : > { %9306 = vrot.lane.b32.xlu1 %v9305_v1, %s9801_s12  ;;  %v15854_v2 = vcombine.high %v15852_v25, %v15853_v9  ;;  %v2305_v1 = vrot.slane %v2297_v33, %v9989_v28  ;;  %v2347_v19 = vcombine.low %v2296_v26, %v2328_v4  ;;  %v3115_v5 = vcombine.low %v3076_v56, %v3108_v16 }
 0x3c5   : > { %v2348_v55 = vcombine.high %v2296_v26, %v2328_v4  ;;  %v2434_v4 = vcombine.high %v12112_v22, %v12118_v47  ;;  %v3116_v26 = vcombine.high %v3076_v56, %v3108_v16  ;;  %v2480_v63 = vrot.slane %v2466_v49, %v9989_v28 }
 0x3c6   : > { %v9310_v60 = vpack.i.bf16 %v15854_v2, %v2346_v15  ;;  %v9345_v15 = vpack.i.bf16 %v15857_v37, %v2485_v45  ;;  %v2349_v33 = vcombine.low %v2305_v1, %v2337_v34  ;;  %v2350_v62 = vcombine.high %v2305_v1, %v2337_v34  ;;  %v12203_v45 = vpop.permute.xlu0 %9096 }
 0x3c7   : > { %9331 = vrot.lane.b32.xlu0 %v9330_v3, %s9800_s11  ;;  %v9325_v2 = vpack.i.bf16 %v15863_v59, %v2347_v19  ;;  %v2351_v1 = vcombine.low %v2312_v20, %v2344_v32  ;;  %v2352_v19 = vcombine.high %v2312_v20, %v2344_v32  ;;  %v9340_v54 = vpack.i.bf16 %v15868_v24, %v2348_v55  ;;  %v15871_v59 = vld [vmem:[#allocation74_spill] sm:$0xff] }
 0x3c8   : > { %9311 = vrot.lane.b32.xlu1 %v9310_v60, %s9802_s15  ;;  %v9355_v3 = vpack.i.bf16 %v15860_v29, %v2349_v33  ;;  %v3505_v60 = vcombine.low %v3466_v11, %v3498_v13  ;;  %v9365_v34 = vpack.i.bf16 %v15864_v43, %v2350_v62  ;;  %v15866_v33 = vld [vmem:[#allocation98_spill] sm:$0xff]  ;;  %v3506_v29 = vcombine.high %v3466_v11, %v3498_v13  ;;  %v12238_v11 = vpop.permute.xlu1 %9081 }
 0x3c9   : > { %v2486_v58 = vcombine.high %v12160_v61, %v12148_v7  ;;  %v2448_v13 = vrot.slane %v2434_v4, %v9989_v28  ;;  %v15870_v22 = vcombine.high %v15855_v31, %v15856_v39  ;;  %v15872_v7 = vld [vmem:[#allocation99_spill] sm:$0xff]  ;;  %v9809_v39 = vmov 0  }
 0x3ca   : > { %v9335_v48 = vpack.i.bf16 %v3505_v60, %v3115_v5  ;;  %v12215_v37 = vpop.permute.xlu0 %9106  ;;  %v9350_v30 = vpack.i.bf16 %v3506_v29, %v3116_v26  ;;  %v15873_v61 = vcombine.low %v15871_v59, %v15872_v7  ;;  %v15874_v5 = vcombine.high %v15871_v59, %v15872_v7  ;;  %4921 = vmatprep.mubr.bf16.mxu0 %v9809_v39  ;;  %v15876_v29 = vld [vmem:[#allocation85_spill] sm:$0xff]  ;;  %v15888_v28 = vld [vmem:[#allocation83_spill] sm:$0xff] }
 0x3cb   : > { %9346 = vrot.lane.b32.xlu0 %v9345_v15, %s9801_s12  ;;  %v15865_v15 = vld [vmem:[#allocation69_spill] sm:$0xff]  ;;  %v9360_v47 = vpack.i.bf16 %v15870_v22, %v2486_v58  ;;  %v2487_v16 = vcombine.low %v2448_v13, %v2480_v63  ;;  %v2488_v60 = vcombine.high %v2448_v13, %v2480_v63  ;;  %9390 = vset.pattern.permute.xlu1 %v9809_v39 }
 0x3cc   : > { %9321 = vrot.lane.b32.xlu1 %v9320_v27, %s9796_s28  ;;  %v15867_v12 = vcombine.low %v15865_v15, %v15866_v33  ;;  %v15869_v32 = vcombine.high %v15865_v15, %v15866_v33  ;;  %v12245_v18 = vpop.permute.xlu1 %9091  ;;  %9391 = vset.pattern.permute.xlu0 %v9809_v39 }
 0x3cd   : > { %v9380_v31 = vpack.i.bf16 %v15874_v5, %v2488_v60  ;;  %8858 = vmatprep.mubr.bf16.mxu1 %v9809_v39 }
 0x3ce   : > { %v9375_v27 = vpack.i.bf16 %v15867_v12, %v2351_v1  ;;  %v9385_v62 = vpack.i.bf16 %v15869_v32, %v2352_v19  ;;  %v15878_v32 = vld [vmem:[#allocation118_spill] sm:$0xff] }
 0x3cf   : > { %9356 = vrot.lane.b32.xlu0 %v9355_v3, %s9801_s12 }
 0x3d0   : > { %9326 = vrot.lane.b32.xlu1 %v9325_v2, %s9803_s16  ;;  %v9370_v2 = vpack.i.bf16 %v15873_v61, %v2487_v16  ;;  %v12256_v43 = vpop.permute.xlu1 %9101 }
 0x3d3   : > { %9366 = vrot.lane.b32.xlu0 %v9365_v34, %s9796_s28  ;;  %v4938_v34 = vld [vmem:[%s15041_s6] sm:$0xff] }
 0x3d4   : > { %9336 = vrot.lane.b32.xlu1 %v9335_v48, %s9793_s24  ;;  %v4930_v48 = vld [vmem:[%s15040_s5] sm:$0xff] }
 0x3d5   : > { %v9117_v55 = vpop.permute.xlu1 %9116 }
 0x3d6   : > { %v9112_v3 = vpop.permute.xlu0 %9111  ;;  %v9119_v19 = vunpack.i.h.bf16 %v9117_v55  ;;  %v9118_v49 = vunpack.i.l.bf16 %v9117_v55 }
 0x3d7   : > { %9376 = vrot.lane.b32.xlu0 %v9375_v27, %s9793_s24  ;;  %v9114_v33 = vunpack.i.h.bf16 %v9112_v3  ;;  %v9113_v12 = vunpack.i.l.bf16 %v9112_v3 }
 0x3d8   : > { %9341 = vrot.lane.b32.xlu1 %v9340_v54, %s9800_s11  ;;  %v15875_v54 = vld [vmem:[#allocation56_spill] sm:$0xff] }
 0x3d9   : > { %v15877_v4 = vcombine.low %v15875_v54, %v15876_v29 }
 0x3da   : > { %v9127_v27 = vpop.permute.xlu1 %9126 }
 0x3db   : > { %9386 = vrot.lane.b32.xlu0 %v9385_v62, %s9794_s25  ;;  %v4064_v26 = vsel %vm1742_vm5, %v15877_v4, %v9113_v12  ;;  %v15879_v62 = vld [vmem:[#allocation120_spill] sm:$0xff]  ;;  %v9129_v16 = vunpack.i.h.bf16 %v9127_v27  ;;  %v9128_v59 = vunpack.i.l.bf16 %v9127_v27 }
 0x3dc   : > { %9351 = vrot.lane.b32.xlu1 %v9350_v30, %s9794_s25  ;;  %v9122_v56 = vpop.permute.xlu0 %9121  ;;  %v15880_v63 = vcombine.low %v15878_v32, %v15879_v62 }
 0x3dd   : > { %v9124_v58 = vunpack.i.h.bf16 %v9122_v56  ;;  %v9123_v13 = vunpack.i.l.bf16 %v9122_v56 }
 0x3de   : > { %v4470_v30 = vsel %vm1742_vm5, %v15880_v63, %v9114_v33 }
 0x3df   : > { %4941 = vperm.xlu0 %9391, %v4938_v34   ;;  %v4471_v3 = vsel %vm1744_vm6, %v4470_v30, %v9119_v19 }
 0x3e0   : > { %9361 = vrot.lane.b32.xlu1 %v9360_v47, %s9796_s28  ;;  %v4065_v47 = vsel %vm1744_vm6, %v4064_v26, %v9118_v49  ;;  %v15887_v26 = vld [vmem:[#allocation54_spill] sm:$0xff] }
 0x3e1   : > { %v4066_v61 = vsel %vm1746_vm7, %v4065_v47, %v9123_v13  ;;  %v9079_v47 = vunpack.i.h.bf16 %v12155_v6 }
 0x3e2   : > { %v12251_v20 = vpop.permute.xlu0 %9131  ;;  %v4067_v34 = vsel %vm1748_vm8, %v4066_v61, %v9128_v59 }
 0x3e3   : > { %v9134_v63 = vunpack.i.h.bf16 %v12251_v20  ;;  %v9133_v30 = vunpack.i.l.bf16 %v12251_v20  ;;  %v15881_v20 = vld [vmem:[#allocation124_spill] sm:$0xff] }
 0x3e4   : > { %9371 = vrot.lane.b32.xlu1 %v9370_v2, %s9793_s24  ;;  %v4472_v2 = vsel %vm1746_vm7, %v4471_v3, %v9124_v58 }
 0x3e7   : > { %v9137_v1 = vpop.permute.xlu0 %9136 }
 0x3e8   : > { %9381 = vrot.lane.b32.xlu1 %v9380_v31, %s9794_s25  ;;  %v9139_v60 = vunpack.i.h.bf16 %v9137_v1  ;;  %v9138_v5 = vunpack.i.l.bf16 %v9137_v1 }
 0x3ea   : > { %v4068_v33 = vsel %vm1750_vm9, %v4067_v34, %v9138_v5  ;;  %v15882_v34 = vld [vmem:[#allocation125_spill] sm:$0xff] }
 0x3ec   : > { %4933 = vperm.xlu1 %9390, %v4930_v48   ;;  %v12265_v15 = vpop.permute.xlu0 %9141  ;;  %v4473_v48 = vsel %vm1748_vm8, %v4472_v2, %v9129_v16  ;;  %v9078_v16 = vunpack.i.l.bf16 %v12155_v6  ;;  %v9084_v2 = vunpack.i.h.bf16 %v12238_v11 }
 0x3ed   : > { %v4474_v12 = vsel %vm1750_vm9, %v4473_v48, %v9139_v60  ;;  %v9144_v13 = vunpack.i.h.bf16 %v12265_v15  ;;  %v9143_v3 = vunpack.i.l.bf16 %v12265_v15  ;;  %v9083_v60 = vunpack.i.l.bf16 %v12238_v11  ;;  %v15885_v15 = vld [vmem:[#allocation36_spill] sm:$0xff] }
 0x3ee   : > { %v15883_v48 = vcombine.low %v15881_v20, %v15882_v34  ;;  %v15889_v20 = vcombine.low %v15887_v26, %v15888_v28  ;;  %v15890_v34 = vld [vmem:[#allocation55_spill] sm:$0xff] }
 0x3f3   : > { %v12275_v22 = vpop.permute.xlu1 %9181 }
 0x3f4   : > { %v9147_v24 = vpop.permute.xlu0 %9146 }
 0x3f5   : > { %v9149_v56 = vunpack.i.h.bf16 %v9147_v24  ;;  %v9148_v39 = vunpack.i.l.bf16 %v9147_v24 }
 0x3f7   : > { %v4069_v1 = vsel %vm1752_vm10, %v4068_v33, %v9148_v39  ;;  %v4475_v24 = vsel %vm1752_vm10, %v4474_v12, %v9149_v56  ;;  %v15884_v33 = vld [vmem:[#allocation30_spill] sm:$0xff] }
 0x3f8   : > { %v9152_v7 = vpop.permute.xlu0 %9151  ;;  %v12281_v31 = vpop.permute.xlu1 %9191  ;;  %v15886_v12 = vcombine.low %v15884_v33, %v15885_v15 }
 0x3f9   : > { %v9154_v59 = vunpack.i.h.bf16 %v9152_v7  ;;  %v9153_v61 = vunpack.i.l.bf16 %v9152_v7 }
 0x3fc   : > { %v12287_v49 = vpop.permute.xlu1 %9201 }
 0x3fd   : > { %v9157_v55 = vpop.permute.xlu0 %9156 }
 0x3fe   : > { %v9159_v27 = vunpack.i.h.bf16 %v9157_v55  ;;  %v9158_v19 = vunpack.i.l.bf16 %v9157_v55  ;;  %v3316_v55 = vsel %vm1742_vm5, %v15883_v48, %v9133_v30  ;;  %v1743_v30 = vsel %vm1742_vm5, %v15889_v20, %v9078_v16  ;;  %v15891_v48 = vld [vmem:[#allocation84_spill] sm:$0xff] }
 0x3ff   : > { %v15892_v33 = vcombine.low %v15890_v34, %v15891_v48 }
 0x400   : > { %v12292_v54 = vsel %vm1754_vm11, %v4069_v1, %v9158_v19  ;;  %v12295_v29 = vsel %vm1754_vm11, %v4475_v24, %v9159_v27  ;;  %v12299_v32 = vpop.permute.xlu1 %9211  ;;  %v3706_v27 = vsel %vm1742_vm5, %v15886_v12, %v9134_v63  ;;  %v3317_v1 = vsel %vm1744_vm6, %v3316_v55, %v9143_v3 }
 0x401   : > { %v9162_v4 = vpop.permute.xlu0 %9161  ;;  %v3707_v11 = vsel %vm1744_vm6, %v3706_v27, %v9144_v13  ;;  %v1756_v63 = vsel %vm1742_vm5, %v15892_v33, %v9079_v47  ;;  %v9089_v3 = vunpack.i.h.bf16 %v12185_v44  ;;  %v9088_v13 = vunpack.i.l.bf16 %v12185_v44 }
 0x402   : > { %v9164_v5 = vunpack.i.h.bf16 %v9162_v4  ;;  %v9163_v56 = vunpack.i.l.bf16 %v9162_v4  ;;  %v3708_v15 = vsel %vm1746_vm7, %v3707_v11, %v9154_v59  ;;  %v9183_v59 = vunpack.i.l.bf16 %v12275_v22 }
 0x404   : > { %v3709_v55 = vsel %vm1748_vm8, %v3708_v15, %v9164_v5  ;;  %v15893_v15 = vld [vmem:[#allocation113_spill] sm:$0xff] }
 0x405   : > { %v9167_v62 = vpop.permute.xlu0 %9166 }
 0x406   : > { %v12303_v58 = vpop.permute.xlu1 %9221  ;;  %v9169_v6 = vunpack.i.h.bf16 %v9167_v62  ;;  %v9168_v19 = vunpack.i.l.bf16 %v9167_v62  ;;  %v3318_v62 = vsel %vm1746_vm7, %v3317_v1, %v9153_v61  ;;  %v9184_v61 = vunpack.i.h.bf16 %v12275_v22 }
 0x407   : > { %v9094_v22 = vunpack.i.h.bf16 %v12245_v18 }
 0x408   : > { %v3710_v16 = vsel %vm1750_vm9, %v3709_v55, %v9169_v6  ;;  %v1757_v6 = vsel %vm1744_vm6, %v1756_v63, %v9084_v2  ;;  %v15894_v2 = vld [vmem:[#allocation130_spill] sm:$0xff] }
 0x409   : > { %v9172_v39 = vpop.permute.xlu0 %9171  ;;  %v15895_v63 = vcombine.low %v15893_v15, %v15894_v2  ;;  %v9204_v15 = vunpack.i.h.bf16 %v12287_v49 }
 0x40a   : > { %v12319_v7 = vpop.permute.xlu1 %9231  ;;  %v9174_v24 = vunpack.i.h.bf16 %v9172_v39  ;;  %v9173_v4 = vunpack.i.l.bf16 %v9172_v39  ;;  %v3319_v39 = vsel %vm1748_vm8, %v3318_v62, %v9163_v56  ;;  %v1758_v62 = vsel %vm1746_vm7, %v1757_v6, %v9089_v3 }
 0x40b   : > { %v3320_v26 = vsel %vm1750_vm9, %v3319_v39, %v9168_v19  ;;  %v1745_v19 = vsel %vm1744_vm6, %v1743_v30, %v9083_v60  ;;  %v2162_v60 = vsel %vm1742_vm5, %v15895_v63, %v9184_v61  ;;  %v15896_v30 = vld [vmem:[#allocation23_spill] sm:$0xff]  ;;  %v9194_v3 = vunpack.i.h.bf16 %v12281_v31 }
 0x40c   : > { %v3321_v1 = vsel %vm1752_vm10, %v3320_v26, %v9173_v4  ;;  %v3711_v44 = vsel %vm1752_vm10, %v3710_v16, %v9174_v24  ;;  %v9093_v4 = vunpack.i.l.bf16 %v12245_v18  ;;  %v1747_v33 = vsel %vm1746_vm7, %v1745_v19, %v9088_v13  ;;  %v15897_v39 = vld [vmem:[#allocation79_spill] sm:$0xff] }
 0x40d   : > { %v9177_v28 = vpop.permute.xlu0 %9176  ;;  %v15898_v55 = vcombine.low %v15896_v30, %v15897_v39  ;;  %v9099_v18 = vunpack.i.h.bf16 %v12203_v45  ;;  %v9098_v26 = vunpack.i.l.bf16 %v12203_v45  ;;  %v9104_v19 = vunpack.i.h.bf16 %v12256_v43 }
 0x40e   : > { %v9179_v12 = vunpack.i.h.bf16 %v9177_v28  ;;  %v9178_v27 = vunpack.i.l.bf16 %v9177_v28  ;;  %v12339_v47 = vpop.permute.xlu1 %9236  ;;  %v1749_v61 = vsel %vm1748_vm8, %v1747_v33, %v9093_v4  ;;  %v9103_v45 = vunpack.i.l.bf16 %v12256_v43 }
 0x40f   : > { %v2155_v28 = vsel %vm1742_vm5, %v15898_v55, %v9183_v59  ;;  %v9109_v33 = vunpack.i.h.bf16 %v12215_v37  ;;  %v9203_v43 = vunpack.i.l.bf16 %v12287_v49  ;;  %v9214_v39 = vunpack.i.h.bf16 %v12299_v32 }
 0x410   : > { %v12346_v56 = vsel %vm1754_vm11, %v3321_v1, %v9178_v27  ;;  %v12349_v5 = vsel %vm1754_vm11, %v3711_v44, %v9179_v12  ;;  %v9193_v12 = vunpack.i.l.bf16 %v12281_v31  ;;  %v1759_v1 = vsel %vm1748_vm8, %v1758_v62, %v9094_v22 }
 0x411   : > { %v9187_v11 = vpop.permute.xlu0 %9186  ;;  %v4872_v20 = vpack.c.bf16 %v12349_v5, %v12346_v56  ;;  %v1760_v31 = vsel %vm1750_vm9, %v1759_v1, %v9099_v18  ;;  %v9108_v62 = vunpack.i.l.bf16 %v12215_v37  ;;  %v9213_v55 = vunpack.i.l.bf16 %v12299_v32 }
 0x412   : > { %v9189_v34 = vunpack.i.h.bf16 %v9187_v11  ;;  %v9188_v24 = vunpack.i.l.bf16 %v9187_v11  ;;  %v12357_v48 = vpop.permute.xlu1 %9251 }
 0x414   : > { %v2156_v16 = vsel %vm1744_vm6, %v2155_v28, %v9188_v24  ;;  %v2163_v13 = vsel %vm1744_vm6, %v2162_v60, %v9189_v34  ;;  %v1751_v24 = vsel %vm1750_vm9, %v1749_v61, %v9098_v26 }
 0x415   : > { %v9197_v27 = vpop.permute.xlu0 %9196  ;;  %v2157_v11 = vsel %vm1746_vm7, %v2156_v16, %v9193_v12  ;;  %v2164_v34 = vsel %vm1746_vm7, %v2163_v13, %v9194_v3  ;;  %v1753_v26 = vsel %vm1752_vm10, %v1751_v24, %v9103_v45  ;;  %v1761_v16 = vsel %vm1752_vm10, %v1760_v31, %v9104_v19 }
 0x416   : > { %v9199_v44 = vunpack.i.h.bf16 %v9197_v27  ;;  %v9198_v6 = vunpack.i.l.bf16 %v9197_v27  ;;  %v12377_v59 = vpop.permute.xlu1 %9256  ;;  %v12402_v13 = vsel %vm1754_vm11, %v1753_v26, %v9108_v62  ;;  %v12405_v12 = vsel %vm1754_vm11, %v1761_v16, %v9109_v33 }
 0x417   : > { %v15899_v45 = vcombine.low %v15781_v23, %v15780_v0  ;;  %v9238_v26 = vunpack.i.l.bf16 %v12339_v47  ;;  %v9254_v16 = vunpack.i.h.bf16 %v12357_v48 }
 0x418   : > { %v2158_v4 = vsel %vm1748_vm8, %v2157_v11, %v9198_v6  ;;  %v2165_v22 = vsel %vm1748_vm8, %v2164_v34, %v9199_v44  ;;  %v15900_v34 = vcombine.low %v15773_v53, %v15772_v14  ;;  %v9234_v14 = vunpack.i.h.bf16 %v12319_v7 }
 0x419   : > { %v9207_v2 = vpop.permute.xlu0 %9206  ;;  %v2159_v28 = vsel %vm1750_vm9, %v2158_v4, %v9203_v43  ;;  %v2166_v18 = vsel %vm1750_vm9, %v2165_v22, %v9204_v15  ;;  %v9224_v4 = vunpack.i.h.bf16 %v12303_v58  ;;  %v9223_v22 = vunpack.i.l.bf16 %v12303_v58 }
 0x41a   : > { %v9209_v63 = vunpack.i.h.bf16 %v9207_v2  ;;  %v9208_v60 = vunpack.i.l.bf16 %v9207_v2  ;;  %v12391_v30 = vpop.permute.xlu1 %9266  ;;  %v9233_v53 = vunpack.i.l.bf16 %v12319_v7  ;;  %v9259_v7 = vunpack.i.h.bf16 %v12377_v59 }
 0x41c   : > { %v2160_v37 = vsel %vm1752_vm10, %v2159_v28, %v9208_v60  ;;  %v2167_v49 = vsel %vm1752_vm10, %v2166_v18, %v9209_v63  ;;  %v9239_v18 = vunpack.i.h.bf16 %v12339_v47 }
 0x41d   : > { %v9217_v3 = vpop.permute.xlu0 %9216  ;;  %v12408_v32 = vsel %vm1754_vm11, %v2167_v49, %v9214_v39  ;;  %v12411_v27 = vsel %vm1754_vm11, %v2160_v37, %v9213_v55 }
 0x41e   : > { %v9219_v61 = vunpack.i.h.bf16 %v9217_v3  ;;  %v9218_v1 = vunpack.i.l.bf16 %v9217_v3  ;;  %v12413_v44 = vpop.permute.xlu1 %9271  ;;  %v4868_v6 = vpack.c.bf16 %v12408_v32, %v12405_v12  ;;  %v4867_v19 = vpack.c.bf16 %v12411_v27, %v12402_v13 }
 0x420   : > { %v4860_v11 = vsel %vm1742_vm5, %v15899_v45, %v9219_v61  ;;  %v4853_v24 = vsel %vm1742_vm5, %v15900_v34, %v9218_v1  ;;  %v9258_v1 = vunpack.i.l.bf16 %v12377_v59  ;;  %v15901_v34 = vcombine.low %v15791_v42, %v15790_v35 }
 0x421   : > { %v9227_v31 = vpop.permute.xlu0 %9226  ;;  %v4854_v43 = vsel %vm1744_vm6, %v4853_v24, %v9223_v22  ;;  %v4861_v2 = vsel %vm1744_vm6, %v4860_v11, %v9224_v4  ;;  %v15902_v24 = vcombine.low %v15811_v17, %v15812_v21  ;;  %v9253_v59 = vunpack.i.l.bf16 %v12357_v48 }
 0x422   : > { %v9229_v33 = vunpack.i.h.bf16 %v9227_v31  ;;  %v9228_v62 = vunpack.i.l.bf16 %v9227_v31  ;;  %v9277_v15 = vpop.permute.xlu1 %9276  ;;  %v9268_v21 = vunpack.i.l.bf16 %v12391_v30 }
 0x423   : > { %v9278_v48 = vunpack.i.l.bf16 %v9277_v15 }
 0x424   : > { %v4855_v0 = vsel %vm1746_vm7, %v4854_v43, %v9228_v62  ;;  %v4862_v23 = vsel %vm1746_vm7, %v4861_v2, %v9229_v33  ;;  %v9269_v33 = vunpack.i.h.bf16 %v12391_v30 }
 0x425   : > { %v9242_v63 = vpop.permute.xlu0 %9241  ;;  %v4856_v58 = vsel %vm1748_vm8, %v4855_v0, %v9233_v53  ;;  %v4863_v39 = vsel %vm1748_vm8, %v4862_v23, %v9234_v14 }
 0x426   : > { %v12435_v60 = vpop.permute.xlu1 %9281  ;;  %v9244_v55 = vunpack.i.h.bf16 %v9242_v63  ;;  %v9243_v28 = vunpack.i.l.bf16 %v9242_v63  ;;  %v4864_v45 = vsel %vm1750_vm9, %v4863_v39, %v9239_v18  ;;  %v4857_v11 = vsel %vm1750_vm9, %v4856_v58, %v9238_v26 }
 0x427   : > { %v9279_v63 = vunpack.i.h.bf16 %v9277_v15 }
 0x428   : > { %v4463_v47 = vsel %vm1742_vm5, %v15901_v34, %v9244_v55  ;;  %v4057_v31 = vsel %vm1742_vm5, %v15902_v24, %v9243_v28 }
 0x429   : > { %v9247_v37 = vpop.permute.xlu0 %9246  ;;  %v4058_v14 = vsel %vm1744_vm6, %v4057_v31, %v9253_v59  ;;  %v4464_v53 = vsel %vm1744_vm6, %v4463_v47, %v9254_v16 }
 0x42a   : > { %v9249_v49 = vunpack.i.h.bf16 %v9247_v37  ;;  %v9248_v3 = vunpack.i.l.bf16 %v9247_v37  ;;  %v9287_v61 = vpop.permute.xlu1 %9286 }
 0x42b   : > { %v9289_v28 = vunpack.i.h.bf16 %v9287_v61  ;;  %v9288_v18 = vunpack.i.l.bf16 %v9287_v61 }
 0x42c   : > { %v4865_v4 = vsel %vm1752_vm10, %v4864_v45, %v9249_v49  ;;  %v4858_v22 = vsel %vm1752_vm10, %v4857_v11, %v9248_v3  ;;  %v15903_v3 = vpack.c.bf16 %v12295_v29, %v12292_v54 }
 0x42d   : > { %v9262_v62 = vpop.permute.xlu0 %9261  ;;  %v4866_v43 = vsel %vm1754_vm11, %v4865_v4, %v9259_v7  ;;  %v4859_v35 = vsel %vm1754_vm11, %v4858_v22, %v9258_v1 }
 0x42e   : > { %v9264_v42 = vunpack.i.h.bf16 %v9262_v62  ;;  %v9263_v2 = vunpack.i.l.bf16 %v9262_v62  ;;  %v9292_v0 = vpop.permute.xlu1 %9291  ;;  %v4876_v23 = vpack.c.bf16 %v4866_v43, %v4866_v43  ;;  %v4875_v17 = vpack.c.bf16 %v4859_v35, %v4859_v35 }
 0x42f   : > { %v9273_v62 = vunpack.i.l.bf16 %v12413_v44  ;;  %v9284_v35 = vunpack.i.h.bf16 %v12435_v60 }
 0x430   : > { %v4059_v58 = vsel %vm1746_vm7, %v4058_v14, %v9263_v2  ;;  %v4465_v39 = vsel %vm1746_vm7, %v4464_v53, %v9264_v42  ;;  %8980 = vmatprep.subr.msk.bf16.mxu0 %vm4882_vm12, %v4876_v23  ;;  %v4884_v55 = vsel %vm4882_vm12, %v4875_v17, 0  ;;  %v9283_v42 = vunpack.i.l.bf16 %v12435_v60 }
 0x431   : > { %v4060_v26 = vsel %vm1748_vm8, %v4059_v58, %v9268_v21  ;;  %v4466_v30 = vsel %vm1748_vm8, %v4465_v39, %v9269_v33  ;;  %v12469_v37 = vpop.permute.xlu0 %9301  ;;  %4896 = vmatpush1.bf16.msra.mxu0 %v4884_v55  ;;  %v9274_v33 = vunpack.i.h.bf16 %v12413_v44  ;;  %v9294_v2 = vunpack.i.h.bf16 %v9292_v0 }
 0x432   : > { %v9297_v49 = vpop.permute.xlu1 %9296  ;;  %v4061_v15 = vsel %vm1750_vm9, %v4060_v26, %v9278_v48  ;;  %v4467_v16 = vsel %vm1750_vm9, %v4466_v30, %v9279_v63  ;;  %4897 = vmatprep.subr.bf16.mxu0 %v15903_v3  ;;  %v9293_v23 = vunpack.i.l.bf16 %v9292_v0  ;;  %v15904_v63 = vcombine.low %v15779_v50, %v15778_v36 }
 0x433   : > { %v9299_v7 = vunpack.i.h.bf16 %v9297_v49  ;;  %v9298_v1 = vunpack.i.l.bf16 %v9297_v49  ;;  %v4062_v61 = vsel %vm1752_vm10, %v4061_v15, %v9288_v18  ;;  %v4468_v45 = vsel %vm1752_vm10, %v4467_v16, %v9289_v28 }
 0x434   : > { %v3699_v14 = vsel %vm1742_vm5, %v15904_v63, %v9274_v33  ;;  %v15905_v44 = vcombine.low %v15787_v40, %v15786_v41  ;;  %v15906_v41 = vcombine.low %v15852_v25, %v15853_v9  ;;  %v15907_v30 = vcombine.low %v15848_v57, %v15847_v51 }
 0x435   : > { %v4063_v11 = vsel %vm1754_vm11, %v4062_v61, %v9298_v1  ;;  %v4469_v34 = vsel %vm1754_vm11, %v4468_v45, %v9299_v7  ;;  %v12480_v47 = vpop.permute.xlu0 %9316  ;;  %v3700_v39 = vsel %vm1744_vm6, %v3699_v14, %v9284_v35 }
 0x436   : > { %v9307_v24 = vpop.permute.xlu1 %9306  ;;  %v4873_v31 = vpack.c.bf16 %v4469_v34, %v4063_v11  ;;  %v3309_v53 = vsel %vm1742_vm5, %v15905_v44, %v9273_v62  ;;  %v3701_v36 = vsel %vm1746_vm7, %v3700_v39, %v9294_v2 }
 0x437   : > { %v9309_v56 = vunpack.i.h.bf16 %v9307_v24  ;;  %v9308_v5 = vunpack.i.l.bf16 %v9307_v24  ;;  %v3310_v0 = vsel %vm1744_vm6, %v3309_v53, %v9283_v42 }
 0x438   : > { %4898 = vmatpush1.bf16.msra.mxu0 %v4873_v31  ;;  %v3311_v18 = vsel %vm1746_vm7, %v3310_v0, %v9293_v23 }
 0x439   : > { %4899 = vmatprep.subr.bf16.mxu0 %v4872_v20  ;;  %v12485_v54 = vpop.permute.xlu0 %9331  ;;  %v3312_v50 = vsel %vm1748_vm8, %v3311_v18, %v9308_v5  ;;  %v3702_v26 = vsel %vm1748_vm8, %v3701_v36, %v9309_v56  ;;  %v9319_v18 = vunpack.i.h.bf16 %v12480_v47  ;;  %v9318_v36 = vunpack.i.l.bf16 %v12480_v47 }
 0x43a   : > { %v9312_v29 = vpop.permute.xlu1 %9311 }
 0x43b   : > { %v9314_v20 = vunpack.i.h.bf16 %v9312_v29  ;;  %v9313_v17 = vunpack.i.l.bf16 %v9312_v29 }
 0x43d   : > { %v12487_v4 = vpop.permute.xlu0 %9346  ;;  %v2903_v40 = vsel %vm1742_vm5, %v15906_v41, %v9314_v20  ;;  %v2545_v49 = vsel %vm1742_vm5, %v15907_v30, %v9313_v17 }
 0x43e   : > { %v9322_v22 = vpop.permute.xlu1 %9321  ;;  %v9349_v41 = vunpack.i.h.bf16 %v12487_v4 }
 0x43f   : > { %v9324_v48 = vunpack.i.h.bf16 %v9322_v22  ;;  %v9323_v58 = vunpack.i.l.bf16 %v9322_v22 }
 0x441   : > { %v9357_v59 = vpop.permute.xlu0 %9356  ;;  %v3313_v16 = vsel %vm1750_vm9, %v3312_v50, %v9323_v58  ;;  %v3703_v3 = vsel %vm1750_vm9, %v3702_v26, %v9324_v48  ;;  %v9334_v50 = vunpack.i.h.bf16 %v12485_v54  ;;  %v9333_v26 = vunpack.i.l.bf16 %v12485_v54 }
 0x442   : > { %v9327_v43 = vpop.permute.xlu1 %9326  ;;  %v9359_v7 = vunpack.i.h.bf16 %v9357_v59  ;;  %v9358_v1 = vunpack.i.l.bf16 %v9357_v59 }
 0x443   : > { %v9329_v55 = vunpack.i.h.bf16 %v9327_v43  ;;  %v9328_v28 = vunpack.i.l.bf16 %v9327_v43 }
 0x445   : > { %v9367_v21 = vpop.permute.xlu0 %9366  ;;  %v2546_v45 = vsel %vm1744_vm6, %v2545_v49, %v9328_v28  ;;  %v2904_v11 = vsel %vm1744_vm6, %v2903_v40, %v9329_v55  ;;  %v9304_v55 = vunpack.i.h.bf16 %v12469_v37  ;;  %v9303_v28 = vunpack.i.l.bf16 %v12469_v37 }
 0x446   : > { %v9337_v60 = vpop.permute.xlu1 %9336  ;;  %v9369_v34 = vunpack.i.h.bf16 %v9367_v21  ;;  %v9368_v24 = vunpack.i.l.bf16 %v9367_v21  ;;  %v9348_v40 = vunpack.i.l.bf16 %v12487_v4  ;;  %v15908_v49 = vcombine.low %v15838_v38, %v15839_v10 }
 0x447   : > { %v9339_v31 = vunpack.i.h.bf16 %v9337_v60  ;;  %v9338_v51 = vunpack.i.l.bf16 %v9337_v60  ;;  %v15909_v37 = vcombine.low %v15835_v46, %v15834_v8 }
 0x449   : > { %v9377_v15 = vpop.permute.xlu0 %9376  ;;  %v3314_v17 = vsel %vm1752_vm10, %v3313_v16, %v9338_v51  ;;  %v3704_v21 = vsel %vm1752_vm10, %v3703_v3, %v9339_v31  ;;  %v2552_v47 = vsel %vm1742_vm5, %v15909_v37, %v9303_v28 }
 0x44a   : > { %v9342_v61 = vpop.permute.xlu1 %9341  ;;  %v9379_v57 = vunpack.i.h.bf16 %v9377_v15  ;;  %v9378_v29 = vunpack.i.l.bf16 %v9377_v15  ;;  %v2910_v15 = vsel %vm1742_vm5, %v15908_v49, %v9304_v55 }
 0x44b   : > { %v9344_v25 = vunpack.i.h.bf16 %v9342_v61  ;;  %v9343_v9 = vunpack.i.l.bf16 %v9342_v61  ;;  %v2911_v54 = vsel %vm1744_vm6, %v2910_v15, %v9319_v18 }
 0x44d   : > { %v2547_v22 = vsel %vm1746_vm7, %v2546_v45, %v9343_v9  ;;  %v2905_v33 = vsel %vm1746_vm7, %v2904_v11, %v9344_v25  ;;  %v9387_v62 = vpop.permute.xlu0 %9386  ;;  %v2912_v45 = vsel %vm1746_vm7, %v2911_v54, %v9334_v50 }
 0x44e   : > { %v2548_v59 = vsel %vm1748_vm8, %v2547_v22, %v9358_v1  ;;  %v2906_v43 = vsel %vm1748_vm8, %v2905_v33, %v9359_v7  ;;  %v9389_v35 = vunpack.i.h.bf16 %v9387_v62  ;;  %v9388_v42 = vunpack.i.l.bf16 %v9387_v62  ;;  %v9352_v2 = vpop.permute.xlu1 %9351 }
 0x44f   : > { %v2549_v23 = vsel %vm1750_vm9, %v2548_v59, %v9368_v24  ;;  %v2907_v56 = vsel %vm1750_vm9, %v2906_v43, %v9369_v34  ;;  %v9354_v5 = vunpack.i.h.bf16 %v9352_v2  ;;  %v9353_v20 = vunpack.i.l.bf16 %v9352_v2 }
 0x450   : > { %v2550_v63 = vsel %vm1752_vm10, %v2549_v23, %v9378_v29  ;;  %v2908_v14 = vsel %vm1752_vm10, %v2907_v56, %v9379_v57  ;;  %v2553_v7 = vsel %vm1744_vm6, %v2552_v47, %v9318_v36  ;;  %v2913_v10 = vsel %vm1748_vm8, %v2912_v45, %v9349_v41  ;;  %v4877_v29 = vld [vmem:[%s15039_s4] sm:$0xf]  ;;  %v15910_v36 = vld [vmem:[#allocation5_spill] sm:$0xff] }
 0x451   : > { %v2551_v44 = vsel %vm1754_vm11, %v2550_v63, %v9388_v42  ;;  %v2909_v53 = vsel %vm1754_vm11, %v2908_v14, %v9389_v35  ;;  %v3315_v48 = vsel %vm1754_vm11, %v3314_v17, %v9353_v20  ;;  %v3705_v58 = vsel %vm1754_vm11, %v3704_v21, %v9354_v5 }
 0x452   : > { %v9362_v60 = vpop.permute.xlu1 %9361  ;;  %v4871_v0 = vpack.c.bf16 %v3705_v58, %v3315_v48  ;;  %v4869_v39 = vpack.c.bf16 %v2909_v53, %v2551_v44  ;;  %v2554_v4 = vsel %vm1746_vm7, %v2553_v7, %v9333_v26 }
 0x453   : > { %v9364_v16 = vunpack.i.h.bf16 %v9362_v60  ;;  %v9363_v3 = vunpack.i.l.bf16 %v9362_v60  ;;  %v2555_v38 = vsel %vm1748_vm8, %v2554_v4, %v9348_v40 }
 0x454   : > { %4900 = vmatpush1.bf16.msra.mxu0 %v4871_v0 }
 0x455   : > { %v2914_v8 = vsel %vm1750_vm9, %v2913_v10, %v9364_v16  ;;  %v2556_v46 = vsel %vm1750_vm9, %v2555_v38, %v9363_v3 }
 0x456   : > { %v9372_v30 = vpop.permute.xlu1 %9371 }
 0x457   : > { %v9374_v1 = vunpack.i.h.bf16 %v9372_v30  ;;  %v9373_v61 = vunpack.i.l.bf16 %v9372_v30 }
 0x459   : > { %v2557_v34 = vsel %vm1752_vm10, %v2556_v46, %v9373_v61  ;;  %v2915_v24 = vsel %vm1752_vm10, %v2914_v8, %v9374_v1 }
 0x45a   : > { %v9382_v11 = vpop.permute.xlu1 %9381  ;;  %v4942_v62 = vpop.permute.xlu0 %4941 }
 0x45b   : > { %v9384_v25 = vunpack.i.h.bf16 %v9382_v11  ;;  %v9383_v9 = vunpack.i.l.bf16 %v9382_v11 }
 0x45d   : > { %v2558_v31 = vsel %vm1754_vm11, %v2557_v34, %v9383_v9  ;;  %v2916_v51 = vsel %vm1754_vm11, %v2915_v24, %v9384_v25 }
 0x45e   : > { %v4870_v57 = vpack.c.bf16 %v2916_v51, %v2558_v31 }
 0x460   : > { %4901 = vmatprep.subr.bf16.mxu0 %v4870_v57 }
 0x461   : > { %4902 = vmatpush1.bf16.msra.mxu0 %v4869_v39 }
 0x462   : > { %4903 = vmatprep.subr.bf16.mxu0 %v4868_v6 }
 0x465   : > { %4904 = vmatpush1.bf16.msra.mxu0 %v4867_v19 }
 0x467   : > { %v4934_v22 = vpop.permute.xlu1 %4933 }
 0x468   : > { %8981 = vmatmul.mubr.msk.bf16.vlgmr.msra.gmra.mxu0 %vm4878_vm13, %v4877_v29 }
 0x528   : > { %v4923_v33 = vpop.f32.mrf.mxu0 }
 0x529   : > { %v4936_v59 = vmul.f32 %v4934_v22, %v4923_v33 }
 0x52a   : > { %v4925_v43 = vpop.f32.mrf.mxu0 }
 0x52b   : > { %v4944_v35 = vadd.f32 %v4942_v62, %v4936_v59  ;;  %v4937_v13 = vmul.f32 %v4934_v22, %v4925_v43 }
 0x52c   : > { %v4927_v42 = vpop.f32.mrf.mxu0 }
 0x52d   : > { %v4946_v12 = vmax.f32 %v4944_v35, 0.0  ;;  %v4945_v27 = vadd.f32 %v4942_v62, %v4937_v13 }
 0x52e   : > { %v4928_v32 = vpop.f32.mrf.mxu0 }
 0x52f   : > { %4955 = vrot.lane.b32.xlu0 %v4946_v12, %s9796_s28  ;;  %4949 = vrot.lane.b32.xlu1 %v4946_v12, %s9794_s25  ;;  %v12577_v6 = vmax.f32 %v4945_v27, 0.0 }
 0x533   : > { %4961 = vrot.lane.b32.xlu0 %v4946_v12, %s9800_s11  ;;  %4952 = vrot.lane.b32.xlu1 %v4946_v12, %s9793_s24 }
 0x537   : > { %4967 = vrot.lane.b32.xlu0 %v4946_v12, %s9802_s15  ;;  %4958 = vrot.lane.b32.xlu1 %v4946_v12, %s9801_s12 }
 0x53b   : > { %4964 = vrot.lane.b32.xlu1 %v4946_v12, %s9803_s16  ;;  %4974 = vrot.lane.b32.xlu0 %v12577_v6, %s9793_s24 }
 0x53f   : > { %4980 = vrot.lane.b32.xlu0 %v12577_v6, %s9801_s12  ;;  %4971 = vrot.lane.b32.xlu1 %v12577_v6, %s9794_s25 }
 0x543   : > { %4986 = vrot.lane.b32.xlu0 %v12577_v6, %s9803_s16  ;;  %4977 = vrot.lane.b32.xlu1 %v12577_v6, %s9796_s28 }
 0x547   : > { %4983 = vrot.lane.b32.xlu1 %v12577_v6, %s9800_s11 }
 0x54b   : > { %4989 = vrot.lane.b32.xlu1 %v12577_v6, %s9802_s15 }
 0x5a1   : > { %v4956_v19 = vpop.permute.xlu0 %4955  ;;  %v4950_v2 = vpop.permute.xlu1 %4949 }
 0x5a2   : > { %v5008_v21 = vcombine.low %v4950_v2, %v4956_v19  ;;  %v5009_v1 = vcombine.high %v4950_v2, %v4956_v19 }
 0x5a4   : > { %v5016_v58 = vrot.slane %v5008_v21, %v15592_v52  ;;  %v5023_v24 = vrot.slane %v5009_v1, %v15592_v52 }
 0x5a5   : > { %v4962_v23 = vpop.permute.xlu0 %4961  ;;  %v4953_v56 = vpop.permute.xlu1 %4952 }
 0x5a6   : > { %v4992_v5 = vcombine.low %v4946_v12, %v4953_v56  ;;  %v4993_v37 = vcombine.high %v4946_v12, %v4953_v56 }
 0x5a8   : > { %v5000_v14 = vrot.slane %v4992_v5, %v15592_v52  ;;  %v5007_v11 = vrot.slane %v4993_v37, %v15592_v52 }
 0x5a9   : > { %v4968_v20 = vpop.permute.xlu0 %4967  ;;  %v4959_v17 = vpop.permute.xlu1 %4958 }
 0x5aa   : > { %v5040_v63 = vcombine.low %v4962_v23, %v4968_v20  ;;  %v5056_v39 = vcombine.low %v5000_v14, %v5016_v58  ;;  %v5057_v47 = vcombine.high %v5000_v14, %v5016_v58  ;;  %v5041_v16 = vcombine.high %v4962_v23, %v4968_v20 }
 0x5ab   : > { %v5072_v33 = vcombine.low %v5007_v11, %v5023_v24  ;;  %v5073_v20 = vcombine.high %v5007_v11, %v5023_v24 }
 0x5ac   : > { %v5048_v60 = vrot.slane %v5040_v63, %v15592_v52  ;;  %v5064_v41 = vrot.slane %v5056_v39, %v15910_v36  ;;  %v5055_v8 = vrot.slane %v5041_v16, %v15592_v52  ;;  %v5071_v25 = vrot.slane %v5057_v47, %v15910_v36 }
 0x5ad   : > { %v4965_v44 = vpop.permute.xlu1 %4964  ;;  %v12595_v53 = vpop.permute.xlu0 %4974  ;;  %v5080_v12 = vrot.slane %v5072_v33, %v15910_v36 }
 0x5ae   : > { %v5024_v48 = vcombine.low %v4959_v17, %v4965_v44  ;;  %v5025_v40 = vcombine.high %v4959_v17, %v4965_v44  ;;  %v5128_v54 = vcombine.low %v12577_v6, %v12595_v53  ;;  %v5129_v17 = vcombine.high %v12577_v6, %v12595_v53 }
 0x5af   : > { %v5087_v6 = vrot.slane %v5073_v20, %v15910_v36 }
 0x5b0   : > { %v5032_v0 = vrot.slane %v5024_v48, %v15592_v52  ;;  %v5039_v61 = vrot.slane %v5025_v40, %v15592_v52  ;;  %v5136_v9 = vrot.slane %v5128_v54, %v15592_v52  ;;  %v5143_v53 = vrot.slane %v5129_v17, %v15592_v52 }
 0x5b1   : > { %v12600_v55 = vpop.permute.xlu1 %4971  ;;  %v4981_v18 = vpop.permute.xlu0 %4980 }
 0x5b2   : > { %v5088_v28 = vcombine.low %v5032_v0, %v5048_v60  ;;  %v5089_v30 = vcombine.high %v5032_v0, %v5048_v60  ;;  %v5104_v31 = vcombine.low %v5039_v61, %v5055_v8  ;;  %v5105_v19 = vcombine.high %v5039_v61, %v5055_v8 }
 0x5b4   : > { %v5096_v50 = vrot.slane %v5088_v28, %v15910_v36  ;;  %v5103_v45 = vrot.slane %v5089_v30, %v15910_v36  ;;  %v5112_v43 = vrot.slane %v5104_v31, %v15910_v36  ;;  %v5119_v48 = vrot.slane %v5105_v19, %v15910_v36 }
 0x5b5   : > { %v4978_v26 = vpop.permute.xlu1 %4977  ;;  %v4987_v3 = vpop.permute.xlu0 %4986 }
 0x5b6   : > { %v5120_v49 = vcombine.low %v5064_v41, %v5096_v50  ;;  %v5144_v15 = vcombine.low %v12600_v55, %v4978_v26  ;;  %v5121_v4 = vcombine.high %v5064_v41, %v5096_v50  ;;  %v5160_v38 = vcombine.low %v4981_v18, %v4987_v3 }
 0x5b7   : > { %v5122_v51 = vcombine.low %v5071_v25, %v5103_v45  ;;  %v5123_v59 = vcombine.high %v5071_v25, %v5103_v45  ;;  %v5124_v2 = vcombine.low %v5080_v12, %v5112_v43  ;;  %v5161_v23 = vcombine.high %v4981_v18, %v4987_v3 }
 0x5b8   : > { %5280 = vrot.lane.b32.xlu0 %v5120_v49, %s9806_s17  ;;  %v5152_v10 = vrot.slane %v5144_v15, %v15592_v52  ;;  %v5168_v57 = vrot.slane %v5160_v38, %v15592_v52  ;;  %v5145_v56 = vcombine.high %v12600_v55, %v4978_v26  ;;  %v5125_v44 = vcombine.high %v5080_v12, %v5112_v43 }
 0x5b9   : > { %v4984_v7 = vpop.permute.xlu1 %4983  ;;  %v5175_v58 = vrot.slane %v5161_v23, %v15592_v52  ;;  %v5126_v28 = vcombine.low %v5087_v6, %v5119_v48  ;;  %v5127_v41 = vcombine.high %v5087_v6, %v5119_v48 }
 0x5ba   : > { %v5192_v29 = vcombine.low %v5136_v9, %v5152_v10  ;;  %v5193_v5 = vcombine.high %v5136_v9, %v5152_v10  ;;  %v5159_v60 = vrot.slane %v5145_v56, %v15592_v52 }
 0x5bc   : > { %5284 = vrot.lane.b32.xlu0 %v5121_v4, %s9806_s17  ;;  %v5200_v35 = vrot.slane %v5192_v29, %v15910_v36  ;;  %v5207_v0 = vrot.slane %v5193_v5, %v15910_v36  ;;  %v5208_v18 = vcombine.low %v5143_v53, %v5159_v60  ;;  %v5209_v15 = vcombine.high %v5143_v53, %v5159_v60 }
 0x5bd   : > { %v4990_v46 = vpop.permute.xlu1 %4989 }
 0x5be   : > { %v5176_v34 = vcombine.low %v4984_v7, %v4990_v46  ;;  %v5177_v32 = vcombine.high %v4984_v7, %v4990_v46  ;;  %v5216_v40 = vrot.slane %v5208_v18, %v15910_v36  ;;  %v5223_v16 = vrot.slane %v5209_v15, %v15910_v36 }
 0x5c0   : > { %v5184_v22 = vrot.slane %v5176_v34, %v15592_v52  ;;  %5288 = vrot.lane.b32.xlu0 %v5122_v51, %s9806_s17  ;;  %v5191_v21 = vrot.slane %v5177_v32, %v15592_v52 }
 0x5c2   : > { %v5224_v62 = vcombine.low %v5168_v57, %v5184_v22  ;;  %v5225_v13 = vcombine.high %v5168_v57, %v5184_v22  ;;  %v5240_v39 = vcombine.low %v5175_v58, %v5191_v21  ;;  %v5241_v30 = vcombine.high %v5175_v58, %v5191_v21 }
 0x5c4   : > { %v5232_v42 = vrot.slane %v5224_v62, %v15910_v36  ;;  %5292 = vrot.lane.b32.xlu0 %v5123_v59, %s9806_s17  ;;  %v5239_v14 = vrot.slane %v5225_v13, %v15910_v36  ;;  %v5248_v26 = vrot.slane %v5240_v39, %v15910_v36  ;;  %v5255_v47 = vrot.slane %v5241_v30, %v15910_v36 }
 0x5c6   : > { %v5256_v27 = vcombine.low %v5200_v35, %v5232_v42  ;;  %v5257_v63 = vcombine.high %v5200_v35, %v5232_v42  ;;  %v5258_v55 = vcombine.low %v5207_v0, %v5239_v14  ;;  %v5259_v50 = vcombine.high %v5207_v0, %v5239_v14 }
 0x5c7   : > { %v5260_v49 = vcombine.low %v5216_v40, %v5248_v26  ;;  %v5261_v37 = vcombine.high %v5216_v40, %v5248_v26  ;;  %v5262_v3 = vcombine.low %v5223_v16, %v5255_v47  ;;  %v5263_v7 = vcombine.high %v5223_v16, %v5255_v47 }
 0x5c8   : > { %5282 = vrot.lane.b32.xlu1 %v5256_v27, %s9806_s17  ;;  %5296 = vrot.lane.b32.xlu0 %v5124_v2, %s9806_s17 }
 0x5cc   : > { %5286 = vrot.lane.b32.xlu1 %v5257_v63, %s9806_s17  ;;  %5300 = vrot.lane.b32.xlu0 %v5125_v44, %s9806_s17 }
 0x5d0   : > { %5290 = vrot.lane.b32.xlu1 %v5258_v55, %s9806_s17  ;;  %5304 = vrot.lane.b32.xlu0 %v5126_v28, %s9806_s17 }
 0x5d4   : > { %5294 = vrot.lane.b32.xlu1 %v5259_v50, %s9806_s17  ;;  %5308 = vrot.lane.b32.xlu0 %v5127_v41, %s9806_s17 }
 0x5d8   : > { %5298 = vrot.lane.b32.xlu1 %v5260_v49, %s9806_s17 }
 0x5dc   : > { %5302 = vrot.lane.b32.xlu1 %v5261_v37, %s9806_s17 }
 0x5e0   : > { %5306 = vrot.lane.b32.xlu1 %v5262_v3, %s9806_s17 }
 0x5e4   : > { %5310 = vrot.lane.b32.xlu1 %v5263_v7, %s9806_s17 }
 0x62a   : > { %v5281_v54 = vpop.permute.xlu0 %5280 }
 0x62b   : > { %5328 = vst.msk [vmem:[#allocation3 + $0x1] sm:$0xff] %vm652_vm4, %v5281_v54 }
 0x62e   : > { %v5285_v1 = vpop.permute.xlu0 %5284 }
 0x62f   : > { %5330 = vst.msk [vmem:[#allocation3 + $0x19] sm:$0xff] %vm652_vm4, %v5285_v1 }
 0x632   : > { %v5289_v61 = vpop.permute.xlu0 %5288  ;;  %v5344_v4 = vld [vmem:[#allocation3] sm:$0xff] }
 0x633   : > { %5332 = vst.msk [vmem:[#allocation3 + $0x31] sm:$0xff] %vm652_vm4, %v5289_v61  ;;  %6108 = vrot.lane.b32.xlu0 %v5344_v4, %s9807_s20  ;;  %5718 = vrot.lane.b32.xlu1 %v5344_v4, %s9808_s21  ;;  %v12661_v8 = vld [vmem:[#allocation3 + $0x1] sm:$0xff] }
 0x636   : > { %v5293_v45 = vpop.permute.xlu0 %5292  ;;  %v5346_v38 = vld [vmem:[#allocation3 + $0x18] sm:$0xff] }
 0x637   : > { %5334 = vst.msk [vmem:[#allocation3 + $0x49] sm:$0xff] %vm652_vm4, %v5293_v45  ;;  %6112 = vrot.lane.b32.xlu0 %v5346_v38, %s9807_s20  ;;  %5722 = vrot.lane.b32.xlu1 %v5346_v38, %s9808_s21  ;;  %v12681_v22 = vld [vmem:[#allocation3 + $0x19] sm:$0xff] }
 0x63a   : > { %v5283_v10 = vpop.permute.xlu1 %5282  ;;  %v5297_v11 = vpop.permute.xlu0 %5296  ;;  %v12663_v46 = vld [vmem:[#allocation3 + $0x30] sm:$0xff] }
 0x63b   : > { %5329 = vst.msk [vmem:[#allocation3 + $0x9] sm:$0xff] %vm652_vm4, %v5283_v10  ;;  %v12665_v25 = vld [vmem:[#allocation3 + $0x31] sm:$0xff]  ;;  %5336 = vst.msk [vmem:[#allocation3 + $0x61] sm:$0xff] %vm652_vm4, %v5297_v11  ;;  %6872 = vrot.lane.b32.xlu0 %v12661_v8, %s9808_s21  ;;  %v5360_v9 = vcombine.low %v5344_v4, %v12663_v46  ;;  %v5361_v34 = vcombine.high %v5344_v4, %v12663_v46  ;;  %5726 = vrot.lane.b32.xlu1 %v12663_v46, %s9808_s21 }
 0x63c   : > { %v6514_v24 = vcombine.low %v12661_v8, %v12665_v25  ;;  %v6515_v31 = vcombine.high %v12661_v8, %v12665_v25 }
 0x63d   : > { %v12695_v35 = vrot.slane %v5360_v9, %v15592_v52  ;;  %v12700_v12 = vrot.slane %v5361_v34, %v15592_v52 }
 0x63e   : > { %v5287_v51 = vpop.permute.xlu1 %5286  ;;  %v5301_v57 = vpop.permute.xlu0 %5300  ;;  %v12679_v29 = vld [vmem:[#allocation3 + $0x48] sm:$0xff]  ;;  %v12712_v2 = vrot.slane %v6514_v24, %v15592_v52  ;;  %v12715_v23 = vrot.slane %v6515_v31, %v15592_v52 }
 0x63f   : > { %5331 = vst.msk [vmem:[#allocation3 + $0x21] sm:$0xff] %vm652_vm4, %v5287_v51  ;;  %v12683_v33 = vld [vmem:[#allocation3 + $0x49] sm:$0xff]  ;;  %5338 = vst.msk [vmem:[#allocation3 + $0x79] sm:$0xff] %vm652_vm4, %v5301_v57  ;;  %6880 = vrot.lane.b32.xlu0 %v12665_v25, %s9808_s21  ;;  %v5376_v62 = vcombine.low %v5346_v38, %v12679_v29  ;;  %v5377_v59 = vcombine.high %v5346_v38, %v12679_v29  ;;  %5730 = vrot.lane.b32.xlu1 %v12679_v29, %s9808_s21 }
 0x640   : > { %v6530_v43 = vcombine.low %v12681_v22, %v12683_v33  ;;  %v6531_v42 = vcombine.high %v12681_v22, %v12683_v33 }
 0x641   : > { %v12703_v32 = vrot.slane %v5376_v62, %v15592_v52  ;;  %v12706_v13 = vrot.slane %v5377_v59, %v15592_v52 }
 0x642   : > { %v5291_v27 = vpop.permute.xlu1 %5290  ;;  %v12709_v19 = vrot.slane %v6530_v43, %v15592_v52  ;;  %v5305_v56 = vpop.permute.xlu0 %5304  ;;  %v12718_v5 = vld [vmem:[#allocation3 + $0x61] sm:$0xff]  ;;  %v12723_v17 = vrot.slane %v6531_v42, %v15592_v52 }
 0x643   : > { %5333 = vst.msk [vmem:[#allocation3 + $0x39] sm:$0xff] %vm652_vm4, %v5291_v27  ;;  %v12720_v20 = vld [vmem:[#allocation3 + $0x60] sm:$0xff]  ;;  %v5424_v21 = vcombine.low %v12695_v35, %v12703_v32  ;;  %v5425_v63 = vcombine.high %v12695_v35, %v12703_v32  ;;  %v5440_v14 = vcombine.low %v12700_v12, %v12706_v13  ;;  %v5441_v44 = vcombine.high %v12700_v12, %v12706_v13  ;;  %v12752_v28 = vld [vmem:[#allocation3 + $0x8] sm:$0xff] }
 0x644   : > { %5340 = vst.msk [vmem:[#allocation3 + $0x91] sm:$0xff] %vm652_vm4, %v5305_v56  ;;  %6888 = vrot.lane.b32.xlu0 %v12718_v5, %s9808_s21  ;;  %5734 = vrot.lane.b32.xlu1 %v12720_v20, %s9808_s21  ;;  %v6578_v48 = vcombine.low %v12712_v2, %v12709_v19  ;;  %v6594_v60 = vcombine.low %v12715_v23, %v12723_v17 }
 0x645   : > { %v6595_v0 = vcombine.high %v12715_v23, %v12723_v17  ;;  %v12940_v35 = vrot.slane %v5441_v44, %v15910_v36 }
 0x646   : > { %v5295_v6 = vpop.permute.xlu1 %5294  ;;  %v5309_v53 = vpop.permute.xlu0 %5308  ;;  %v12747_v39 = vld [vmem:[#allocation3 + $0x78] sm:$0xff]  ;;  %v12772_v16 = vld [vmem:[#allocation3 + $0x20] sm:$0xff]  ;;  %v12946_v32 = vrot.slane %v6594_v60, %v15910_v36  ;;  %v12967_v13 = vrot.slane %v6578_v48, %v15910_v36 }
 0x647   : > { %5335 = vst.msk [vmem:[#allocation3 + $0x51] sm:$0xff] %vm652_vm4, %v5295_v6  ;;  %5342 = vst.msk [vmem:[#allocation3 + $0xa9] sm:$0xff] %vm652_vm4, %v5309_v53  ;;  %v12791_v45 = vld [vmem:[#allocation3 + $0x79] sm:$0xff]  ;;  %v12924_v6 = vld [vmem:[#allocation3 + $0x22] sm:$0xff]  ;;  %v12961_v12 = vrot.slane %v6595_v0, %v15910_v36 }
 0x648   : > { %5738 = vrot.lane.b32.xlu1 %v12747_v39, %s9808_s21  ;;  %15918 = vst [vmem:[#allocation34_spill] sm:$0xff] %v12946_v32  ;;  %v12955_v58 = vld [vmem:[#allocation3 + $0x21] sm:$0xff]  ;;  %15921 = vst [vmem:[#allocation4_spill] sm:$0xff] %v12967_v13 }
 0x649   : > { %15920 = vst [vmem:[#allocation70_spill] sm:$0xff] %v12961_v12 }
 0x64a   : > { %v5299_v55 = vpop.permute.xlu1 %5298  ;;  %v12754_v18 = vld [vmem:[#allocation3 + $0x38] sm:$0xff] }
 0x64b   : > { %5337 = vst.msk [vmem:[#allocation3 + $0x69] sm:$0xff] %vm652_vm4, %v5299_v55  ;;  %v6510_v50 = vld [vmem:[#allocation3 + $0x91] sm:$0xff]  ;;  %v5496_v41 = vcombine.low %v12752_v28, %v12754_v18  ;;  %v5497_v40 = vcombine.high %v12752_v28, %v12754_v18 }
 0x64c   : > { %v12757_v26 = vld [vmem:[#allocation3 + $0x90] sm:$0xff]  ;;  %6896 = vrot.lane.b32.xlu0 %v6510_v50, %s9808_s21  ;;  %v6546_v30 = vcombine.low %v12718_v5, %v6510_v50  ;;  %v6547_v49 = vcombine.high %v12718_v5, %v6510_v50 }
 0x64d   : > { %v5392_v15 = vcombine.low %v12720_v20, %v12757_v26  ;;  %v5393_v37 = vcombine.high %v12720_v20, %v12757_v26  ;;  %5742 = vrot.lane.b32.xlu1 %v12757_v26, %s9808_s21  ;;  %v12775_v3 = vrot.slane %v5496_v41, %v15592_v52  ;;  %v12778_v7 = vrot.slane %v5497_v40, %v15592_v52 }
 0x64e   : > { %v5303_v47 = vpop.permute.xlu1 %5302  ;;  %v12780_v54 = vld [vmem:[#allocation3 + $0x50] sm:$0xff]  ;;  %v12783_v1 = vrot.slane %v6546_v30, %v15592_v52  ;;  %v12786_v61 = vrot.slane %v6547_v49, %v15592_v52  ;;  %v12789_v4 = vld [vmem:[#allocation3 + $0xa8] sm:$0xff]  ;;  %v12951_v30 = vld [vmem:[#allocation3 + $0x1a] sm:$0xff] }
 0x64f   : > { %5339 = vst.msk [vmem:[#allocation3 + $0x81] sm:$0xff] %vm652_vm4, %v5303_v47  ;;  %15911 = vst [vmem:[#allocation65_spill] sm:$0xff] %v12789_v4  ;;  %v12793_v38 = vld [vmem:[#allocation3 + $0xa9] sm:$0xff]  ;;  %v5512_v10 = vcombine.low %v12772_v16, %v12780_v54  ;;  %v5513_v11 = vcombine.high %v12772_v16, %v12780_v54  ;;  %v5408_v9 = vcombine.low %v12747_v39, %v12789_v4  ;;  %v12904_v41 = vld [vmem:[#allocation3 + $0x52] sm:$0xff] }
 0x650   : > { %7262 = vrot.lane.b32.xlu0 %v12661_v8, %s9807_s20  ;;  %v5409_v34 = vcombine.high %v12747_v39, %v12789_v4  ;;  %v6562_v24 = vcombine.low %v12791_v45, %v12793_v38  ;;  %v6563_v31 = vcombine.high %v12791_v45, %v12793_v38  ;;  %v12810_v51 = vrot.slane %v5392_v15, %v15592_v52  ;;  %v12906_v15 = vld [vmem:[#allocation3 + $0x32] sm:$0xff]  ;;  %v12908_v55 = vld [vmem:[#allocation3 + $0x4a] sm:$0xff] }
 0x651   : > { %v12813_v57 = vrot.slane %v5393_v37, %v15592_v52  ;;  %5746 = vrot.lane.b32.xlu1 %v12789_v4, %s9808_s21  ;;  %v12818_v8 = vrot.slane %v5512_v10, %v15592_v52  ;;  %v12821_v62 = vrot.slane %v5513_v11, %v15592_v52  ;;  %v12824_v59 = vrot.slane %v5408_v9, %v15592_v52  ;;  %v12896_v37 = vld [vmem:[#allocation3 + $0x3a] sm:$0xff]  ;;  %v12900_v10 = vld [vmem:[#allocation3 + $0xa] sm:$0xff] }
 0x652   : > { %v12827_v43 = vrot.slane %v5409_v34, %v15592_v52  ;;  %v5307_v42 = vpop.permute.xlu1 %5306  ;;  %v12830_v27 = vrot.slane %v6562_v24, %v15592_v52  ;;  %v12833_v56 = vrot.slane %v6563_v31, %v15592_v52  ;;  %v12872_v34 = vld [vmem:[#allocation3 + $0x68] sm:$0xff]  ;;  %v12928_v53 = vld [vmem:[#allocation3 + $0x51] sm:$0xff] }
 0x653   : > { %5341 = vst.msk [vmem:[#allocation3 + $0x99] sm:$0xff] %vm652_vm4, %v5307_v42  ;;  %15913 = vst [vmem:[#allocation80_spill] sm:$0xff] %v12872_v34  ;;  %v12996_v23 = vld [vmem:[#allocation3 + $0x62] sm:$0xff]  ;;  %v15934_v48 = vcombine.low %v12810_v51, %v12824_v59 }
 0x654   : > { %7270 = vrot.lane.b32.xlu0 %v12665_v25, %s9807_s20  ;;  %15928 = vst [vmem:[#allocation108_spill] sm:$0xff] %v12996_v23 }
 0x655   : > { %6876 = vrot.lane.b32.xlu1 %v12681_v22, %s9808_s21 }
 0x656   : > { %v5311_v9 = vpop.permute.xlu1 %5310  ;;  %v12878_v31 = vld [vmem:[#allocation3 + $0x80] sm:$0xff] }
 0x657   : > { %5343 = vst.msk [vmem:[#allocation3 + $0xb1] sm:$0xff] %vm652_vm4, %v5311_v9  ;;  %15914 = vst [vmem:[#allocation33_spill] sm:$0xff] %v12878_v31  ;;  %v13002_v17 = vld [vmem:[#allocation3 + $0x7a] sm:$0xff] }
 0x658   : > { %7278 = vrot.lane.b32.xlu0 %v12718_v5, %s9807_s20  ;;  %15929 = vst [vmem:[#allocation114_spill] sm:$0xff] %v13002_v17 }
 0x659   : > { %6884 = vrot.lane.b32.xlu1 %v12683_v33, %s9808_s21 }
 0x65a   : > { %v12869_v25 = vld [vmem:[#allocation3 + $0x98] sm:$0xff] }
 0x65b   : > { %15912 = vst [vmem:[#allocation121_spill] sm:$0xff] %v12869_v25  ;;  %v5528_v24 = vcombine.low %v12872_v34, %v12869_v25  ;;  %v5529_v11 = vcombine.high %v12872_v34, %v12869_v25  ;;  %v12985_v0 = vld [vmem:[#allocation3 + $0x9a] sm:$0xff] }
 0x65c   : > { %7286 = vrot.lane.b32.xlu0 %v6510_v50, %s9807_s20  ;;  %15924 = vst [vmem:[#allocation58_spill] sm:$0xff] %v12985_v0  ;;  %v13006_v25 = vld [vmem:[#allocation3 + $0x99] sm:$0xff] }
 0x65d   : > { %6892 = vrot.lane.b32.xlu1 %v12791_v45, %s9808_s21  ;;  %v12891_v9 = vrot.slane %v5528_v24, %v15592_v52  ;;  %v12914_v24 = vrot.slane %v5425_v63, %v15910_v36  ;;  %v12934_v63 = vrot.slane %v5440_v14, %v15910_v36  ;;  %v12953_v14 = vld [vmem:[#allocation3 + $0x82] sm:$0xff]  ;;  %15931 = vst [vmem:[#allocation48_spill] sm:$0xff] %v13006_v25 }
 0x65e   : > { %v12880_v42 = vld [vmem:[#allocation3 + $0xb0] sm:$0xff]  ;;  %15919 = vst [vmem:[#allocation107_spill] sm:$0xff] %v12953_v14 }
 0x65f   : > { %15915 = vst [vmem:[#allocation76_spill] sm:$0xff] %v12880_v42  ;;  %v5544_v5 = vcombine.low %v12878_v31, %v12880_v42  ;;  %v5545_v50 = vcombine.high %v12878_v31, %v12880_v42  ;;  %v12926_v40 = vld [vmem:[#allocation3 + $0xb2] sm:$0xff] }
 0x660   : > { %6116 = vrot.lane.b32.xlu0 %v12663_v46, %s9807_s20  ;;  %v12902_v46 = vld [vmem:[#allocation3 + $0x2] sm:$0xff]  ;;  %15917 = vst [vmem:[#allocation78_spill] sm:$0xff] %v12926_v40  ;;  %v7852_v60 = vcombine.low %v12953_v14, %v12926_v40  ;;  %v13004_v42 = vld [vmem:[#allocation3 + $0xb1] sm:$0xff]  ;;  %v13021_v14 = vrot.slane %v15934_v48, %v15910_v36 }
 0x661   : > { %6900 = vrot.lane.b32.xlu1 %v12793_v38, %s9808_s21  ;;  %v12894_v47 = vrot.slane %v5544_v5, %v15592_v52  ;;  %v12920_v5 = vrot.slane %v5424_v21, %v15910_v36  ;;  %v5559_v21 = vrot.slane %v5545_v50, %v15592_v52  ;;  %15930 = vst [vmem:[#allocation41_spill] sm:$0xff] %v13004_v42 }
 0x662   : > { %15935 = vst [vmem:[#allocation47_spill] sm:$0xff] %v13021_v14 }
 0x663   : > { %15916 = vst [vmem:[#allocation116_spill] sm:$0xff] %v12920_v5  ;;  %v5593_v49 = vcombine.high %v12891_v9, %v12894_v47  ;;  %v5592_v50 = vcombine.low %v12891_v9, %v12894_v47  ;;  %v15932_v47 = vcombine.high %v12810_v51, %v12824_v59  ;;  %v15933_v9 = vcombine.high %v12775_v3, %v12818_v8  ;;  %v13033_v51 = vld [vmem:[#allocation3 + $0x81] sm:$0xff]  ;;  %v13035_v59 = vld [vmem:[#allocation3 + $0x69] sm:$0xff] }
 0x664   : > { %6124 = vrot.lane.b32.xlu0 %v12720_v20, %s9807_s20  ;;  %v15922_v20 = vcombine.high %v12712_v2, %v12709_v19  ;;  %v12987_v19 = vld [vmem:[#allocation3 + $0x92] sm:$0xff]  ;;  %v12989_v2 = vld [vmem:[#allocation3 + $0xaa] sm:$0xff] }
 0x665   : > { %7266 = vrot.lane.b32.xlu1 %v12681_v22, %s9807_s20  ;;  %15925 = vst [vmem:[#allocation87_spill] sm:$0xff] %v12987_v19  ;;  %15926 = vst [vmem:[#allocation38_spill] sm:$0xff] %v12989_v2  ;;  %v5543_v22 = vrot.slane %v5529_v11, %v15592_v52  ;;  %v5471_v11 = vrot.slane %v15932_v47, %v15910_v36  ;;  %v5575_v31 = vrot.slane %v15933_v9, %v15910_v36 }
 0x666   : > { %v12973_v44 = vrot.slane %v15922_v20, %v15910_v36  ;;  %v12994_v20 = vld [vmem:[#allocation3 + $0x6a] sm:$0xff]  ;;  %v5607_v40 = vrot.slane %v5593_v49, %v15910_v36  ;;  %v7700_v34 = vcombine.low %v12996_v23, %v12987_v19  ;;  %v7716_v9 = vcombine.low %v13002_v17, %v12989_v2 }
 0x667   : > { %15927 = vst [vmem:[#allocation75_spill] sm:$0xff] %v12994_v20  ;;  %v5608_v4 = vcombine.low %v5543_v22, %v5559_v21  ;;  %v7836_v47 = vcombine.low %v12994_v20, %v12985_v0  ;;  %v5609_v49 = vcombine.high %v5543_v22, %v5559_v21  ;;  %v5489_v0 = vcombine.high %v12920_v5, %v13021_v14 }
 0x668   : > { %15923 = vst [vmem:[#allocation64_spill] sm:$0xff] %v12973_v44  ;;  %6132 = vrot.lane.b32.xlu0 %v12757_v26, %s9807_s20  ;;  %v5490_v26 = vcombine.low %v12914_v24, %v5471_v11  ;;  %v5626_v48 = vcombine.low %v5575_v31, %v5607_v40  ;;  %v13041_v20 = vrot.slane %v7852_v60, %v15592_v52 }
 0x669   : > { %7274 = vrot.lane.b32.xlu1 %v12683_v33, %s9807_s20  ;;  %v6698_v2 = vcombine.low %v13033_v51, %v13004_v42  ;;  %v6682_v33 = vcombine.low %v13035_v59, %v13006_v25  ;;  %v15937_v21 = vcombine.low %v12775_v3, %v12818_v8  ;;  %v13056_v17 = vrot.slane %v5592_v50, %v15910_v36 }
 0x66a   : > { %15936 = vst [vmem:[#allocation51_spill] sm:$0xff] %v13041_v20  ;;  %v13053_v19 = vpack.i.bf16 %v5626_v48, %v5490_v26  ;;  %v15941_v60 = vcombine.low %v12813_v57, %v12827_v43  ;;  %v15942_v25 = vcombine.low %v12778_v7, %v12821_v62  ;;  %v5616_v3 = vrot.slane %v5608_v4, %v15910_v36 }
 0x66b   : > { %v13051_v22 = vrot.slane %v15937_v21, %v15910_v36  ;;  %15940 = vst [vmem:[#allocation45_spill] sm:$0xff] %v13056_v17  ;;  %v5491_v8 = vcombine.high %v12914_v24, %v5471_v11  ;;  %v5627_v26 = vcombine.high %v5575_v31, %v5607_v40  ;;  %v15943_v50 = vcombine.high %v12813_v57, %v12827_v43 }
 0x66c   : > { %15939 = vst [vmem:[#allocation117_spill] sm:$0xff] %v13053_v19  ;;  %v5480_v23 = vrot.slane %v15941_v60, %v15910_v36  ;;  %v5584_v42 = vrot.slane %v15942_v25, %v15910_v36  ;;  %5720 = vrot.lane.b32.xlu0 %v12752_v28, %s9808_s21  ;;  %v15944_v4 = vcombine.high %v12778_v7, %v12821_v62 }
 0x66d   : > { %15938 = vst [vmem:[#allocation39_spill] sm:$0xff] %v13051_v22  ;;  %v5487_v48 = vrot.slane %v15943_v50, %v15910_v36  ;;  %7282 = vrot.lane.b32.xlu1 %v12791_v45, %s9807_s20  ;;  %v5625_v21 = vcombine.high %v13051_v22, %v13056_v17  ;;  %v5623_v40 = vrot.slane %v5609_v49, %v15910_v36 }
 0x66e   : > { %v5492_v25 = vcombine.low %v12934_v63, %v5480_v23  ;;  %v5591_v60 = vrot.slane %v15944_v4, %v15910_v36  ;;  %v5628_v31 = vcombine.low %v5584_v42, %v5616_v3  ;;  %v13084_v24 = vpack.i.bf16 %v5627_v26, %v5491_v8 }
 0x66f   : > { %v5494_v57 = vcombine.low %v12940_v35, %v5487_v48  ;;  %v5493_v43 = vcombine.high %v12934_v63, %v5480_v23  ;;  %v13088_v45 = vpack.i.bf16 %v5625_v21, %v5489_v0  ;;  %v5629_v50 = vcombine.high %v5584_v42, %v5616_v3  ;;  %v13109_v42 = vld [vmem:[#allocation3 + $0x39] sm:$0xff] }
 0x670   : > { %15945 = vst [vmem:[#allocation43_spill] sm:$0xff] %v13084_v24  ;;  %v5630_v11 = vcombine.low %v5591_v60, %v5623_v40  ;;  %v5495_v19 = vcombine.high %v12940_v35, %v5487_v48  ;;  %5724 = vrot.lane.b32.xlu0 %v12772_v16, %s9808_s21  ;;  %v13093_v7 = vpack.i.bf16 %v5628_v31, %v5492_v25  ;;  %15950 = vst [vmem:[#allocation81_spill] sm:$0xff] %v13109_v42  ;;  %v15989_v25 = vld [vmem:[#allocation114_spill] sm:$0xff] }
 0x671   : > { %v5631_v62 = vcombine.high %v5591_v60, %v5623_v40  ;;  %v15946_v49 = vcombine.low %v12786_v61, %v12833_v56  ;;  %v15948_v63 = vcombine.high %v12786_v61, %v12833_v56  ;;  %7290 = vrot.lane.b32.xlu1 %v12793_v38, %s9807_s20  ;;  %v13113_v0 = vpack.i.bf16 %v5629_v50, %v5493_v43  ;;  %v13138_v60 = vld [vmem:[#allocation3 + $0x9] sm:$0xff]  ;;  %v15991_v38 = vld [vmem:[#allocation87_spill] sm:$0xff] }
 0x672   : > { %v13111_v35 = vpack.i.bf16 %v5630_v11, %v5494_v57  ;;  %v15953_v3 = vcombine.low %v12783_v1, %v12830_v27  ;;  %v15955_v61 = vcombine.high %v12783_v1, %v12830_v27  ;;  %v13136_v4 = vrot.slane %v7716_v9, %v15592_v52  ;;  %15959 = vst [vmem:[#allocation89_spill] sm:$0xff] %v13138_v60  ;;  %v15977_v1 = vld [vmem:[#allocation80_spill] sm:$0xff] }
 0x673   : > { %v13099_v8 = vrot.slane %v15946_v49, %v15910_v36  ;;  %v13105_v23 = vrot.slane %v15948_v63, %v15910_v36  ;;  %15952 = vst [vmem:[#allocation88_spill] sm:$0xff] %v13113_v0  ;;  %v13127_v48 = vpack.i.bf16 %v5631_v62, %v5495_v19  ;;  %v6650_v40 = vcombine.low %v13138_v60, %v13109_v42  ;;  %v15979_v19 = vld [vmem:[#allocation65_spill] sm:$0xff] }
 0x674   : > { %15951 = vst [vmem:[#allocation59_spill] sm:$0xff] %v13111_v35  ;;  %v13119_v26 = vrot.slane %v15953_v3, %v15910_v36  ;;  %v13125_v56 = vrot.slane %v15955_v61, %v15910_v36  ;;  %15958 = vst [vmem:[#allocation60_spill] sm:$0xff] %v13136_v4  ;;  %5728 = vrot.lane.b32.xlu0 %v12754_v18, %s9808_s21  ;;  %v13151_v9 = vrot.slane %v6698_v2, %v15592_v52 }
 0x675   : > { %15947 = vst [vmem:[#allocation44_spill] sm:$0xff] %v13099_v8  ;;  %15949 = vst [vmem:[#allocation42_spill] sm:$0xff] %v13105_v23  ;;  %6120 = vrot.lane.b32.xlu1 %v12679_v29, %s9807_s20  ;;  %v15961_v31 = vcombine.low %v12924_v6, %v12904_v41  ;;  %v15963_v43 = vcombine.low %v12951_v30, %v12908_v55  ;;  %v13168_v50 = vrot.slane %v7836_v47, %v15592_v52  ;;  %v16004_v8 = vld [vmem:[#allocation41_spill] sm:$0xff] }
 0x676   : > { %15954 = vst [vmem:[#allocation123_spill] sm:$0xff] %v13119_v26  ;;  %15956 = vst [vmem:[#allocation109_spill] sm:$0xff] %v13125_v56  ;;  %v13171_v2 = vrot.slane %v7700_v34, %v15592_v52  ;;  %v15967_v29 = vcombine.low %v12955_v58, %v12928_v53  ;;  %v13180_v49 = vrot.slane %v6682_v33, %v15592_v52 }
 0x677   : > { %15957 = vst [vmem:[#allocation126_spill] sm:$0xff] %v13127_v48  ;;  %15960 = vst [vmem:[#allocation82_spill] sm:$0xff] %v13151_v9  ;;  %v13159_v57 = vrot.slane %v15961_v31, %v15592_v52  ;;  %v13165_v11 = vrot.slane %v15963_v43, %v15592_v52  ;;  %v15970_v63 = vcombine.low %v12900_v10, %v12896_v37 }
 0x678   : > { %15965 = vst [vmem:[#allocation115_spill] sm:$0xff] %v13168_v50  ;;  %15966 = vst [vmem:[#allocation35_spill] sm:$0xff] %v13171_v2  ;;  %v13177_v62 = vrot.slane %v15967_v29, %v15592_v52  ;;  %v15972_v34 = vcombine.low %v12902_v46, %v12906_v15  ;;  %v7900_v61 = vcombine.low %v13168_v50, %v13041_v20  ;;  %5732 = vrot.lane.b32.xlu0 %v12780_v54, %s9808_s21 }
 0x679   : > { %15962 = vst [vmem:[#allocation46_spill] sm:$0xff] %v13159_v57  ;;  %15964 = vst [vmem:[#allocation53_spill] sm:$0xff] %v13165_v11  ;;  %v13186_v3 = vrot.slane %v15970_v63, %v15592_v52  ;;  %v7764_v31 = vcombine.low %v13171_v2, %v13136_v4  ;;  %v13201_v33 = vrot.slane %v6650_v40, %v15592_v52  ;;  %6128 = vrot.lane.b32.xlu1 %v12747_v39, %s9807_s20 }
 0x67a   : > { %15968 = vst [vmem:[#allocation31_spill] sm:$0xff] %v13177_v62  ;;  %15969 = vst [vmem:[#allocation133_spill] sm:$0xff] %v13180_v49  ;;  %v13192_v47 = vrot.slane %v15972_v34, %v15592_v52  ;;  %v6746_v43 = vcombine.low %v13180_v49, %v13151_v9  ;;  %v13218_v27 = vrot.slane %v7900_v61, %v15910_v36 }
 0x67b   : > { %15971 = vst [vmem:[#allocation119_spill] sm:$0xff] %v13186_v3  ;;  %15974 = vst [vmem:[#allocation49_spill] sm:$0xff] %v13201_v33  ;;  %v7868_v29 = vcombine.low %v13186_v3, %v13159_v57  ;;  %v6714_v40 = vcombine.low %v13201_v33, %v13177_v62  ;;  %v13221_v39 = vrot.slane %v7764_v31, %v15910_v36  ;;  %v15992_v33 = vld [vmem:[#allocation78_spill] sm:$0xff] }
 0x67c   : > { %15973 = vst [vmem:[#allocation52_spill] sm:$0xff] %v13192_v47  ;;  %v7732_v63 = vcombine.low %v13192_v47, %v13165_v11  ;;  %15975 = vst [vmem:[#allocation29_spill] sm:$0xff] %v13218_v27  ;;  %5736 = vrot.lane.b32.xlu0 %v15977_v1, %s9808_s21  ;;  %v13228_v34 = vrot.slane %v6746_v43, %v15910_v36  ;;  %v15990_v43 = vld [vmem:[#allocation58_spill] sm:$0xff]  ;;  %v7821_v35 = vcombine.high %v12924_v6, %v12904_v41 }
 0x67d   : > { %15976 = vst [vmem:[#allocation25_spill] sm:$0xff] %v13221_v39  ;;  %6136 = vrot.lane.b32.xlu1 %v15979_v19, %s9807_s20  ;;  %v13233_v21 = vrot.slane %v7868_v29, %v15910_v36  ;;  %v13239_v31 = vrot.slane %v6714_v40, %v15910_v36  ;;  %v15983_v19 = vld [vmem:[#allocation33_spill] sm:$0xff]  ;;  %v15985_v40 = vld [vmem:[#allocation76_spill] sm:$0xff]  ;;  %v15988_v29 = vld [vmem:[#allocation107_spill] sm:$0xff] }
 0x67e   : > { %15978 = vst [vmem:[#allocation110_spill] sm:$0xff] %v13228_v34  ;;  %v13236_v61 = vrot.slane %v7732_v63, %v15910_v36  ;;  %v15984_v63 = vld [vmem:[#allocation121_spill] sm:$0xff]  ;;  %v15993_v34 = vld [vmem:[#allocation38_spill] sm:$0xff] }
 0x67f   : > { %15980 = vst [vmem:[#allocation103_spill] sm:$0xff] %v13233_v21  ;;  %15982 = vst [vmem:[#allocation10_spill] sm:$0xff] %v13239_v31 }
 0x680   : > { %15981 = vst [vmem:[#allocation6_spill] sm:$0xff] %v13236_v61  ;;  %5740 = vrot.lane.b32.xlu0 %v15983_v19, %s9808_s21 }
 0x681   : > { %6110 = vrot.lane.b32.xlu1 %v12752_v28, %s9807_s20  ;;  %v15986_v28 = vld [vmem:[#allocation75_spill] sm:$0xff] }
 0x684   : > { %5744 = vrot.lane.b32.xlu0 %v15984_v63, %s9808_s21 }
 0x685   : > { %6114 = vrot.lane.b32.xlu1 %v12772_v16, %s9807_s20  ;;  %v15987_v16 = vld [vmem:[#allocation108_spill] sm:$0xff] }
 0x688   : > { %5748 = vrot.lane.b32.xlu0 %v15985_v40, %s9808_s21 }
 0x689   : > { %8418 = vrot.lane.b32.xlu1 %v12900_v10, %s9807_s20 }
 0x68c   : > { %8416 = vrot.lane.b32.xlu0 %v12902_v46, %s9807_s20 }
 0x68d   : > { %8422 = vrot.lane.b32.xlu1 %v12924_v6, %s9807_s20 }
 0x690   : > { %8420 = vrot.lane.b32.xlu0 %v12951_v30, %s9807_s20 }
 0x691   : > { %8426 = vrot.lane.b32.xlu1 %v12896_v37, %s9807_s20 }
 0x694   : > { %8424 = vrot.lane.b32.xlu0 %v12906_v15, %s9807_s20 }
 0x695   : > { %8430 = vrot.lane.b32.xlu1 %v12904_v41, %s9807_s20 }
 0x698   : > { %8428 = vrot.lane.b32.xlu0 %v12908_v55, %s9807_s20 }
 0x699   : > { %8434 = vrot.lane.b32.xlu1 %v15986_v28, %s9807_s20 }
 0x69c   : > { %8432 = vrot.lane.b32.xlu0 %v15987_v16, %s9807_s20 }
 0x69d   : > { %8438 = vrot.lane.b32.xlu1 %v15988_v29, %s9807_s20 }
 0x6a0   : > { %8436 = vrot.lane.b32.xlu0 %v15989_v25, %s9807_s20 }
 0x6a1   : > { %8442 = vrot.lane.b32.xlu1 %v15990_v43, %s9807_s20 }
 0x6a4   : > { %8440 = vrot.lane.b32.xlu0 %v15991_v38, %s9807_s20 }
 0x6a5   : > { %8446 = vrot.lane.b32.xlu1 %v15992_v33, %s9807_s20  ;;  %v13289_v62 = vpop.permute.xlu0 %6108  ;;  %v13291_v31 = vpop.permute.xlu1 %5718 }
 0x6a8   : > { %8444 = vrot.lane.b32.xlu0 %v15993_v34, %s9807_s20 }
 0x6a9   : > { %8032 = vrot.lane.b32.xlu1 %v12924_v6, %s9808_s21  ;;  %v13297_v49 = vpop.permute.xlu0 %6112  ;;  %v13299_v9 = vpop.permute.xlu1 %5722 }
 0x6ac   : > { %8028 = vrot.lane.b32.xlu0 %v12900_v10, %s9808_s21 }
 0x6ad   : > { %8040 = vrot.lane.b32.xlu1 %v12904_v41, %s9808_s21  ;;  %v13305_v17 = vpop.permute.xlu0 %6872  ;;  %v13307_v22 = vpop.permute.xlu1 %5726  ;;  %v13492_v41 = vrot.slane %v7821_v35, %v15592_v52 }
 0x6ae   : > { %v5766_v50 = vcombine.low %v13291_v31, %v13307_v22 }
 0x6af   : > { %16010 = vst [vmem:[#allocation13_spill] sm:$0xff] %v13492_v41  ;;  %v16031_v41 = vld [vmem:[#allocation88_spill] sm:$0xff] }
 0x6b0   : > { %8036 = vrot.lane.b32.xlu0 %v12896_v37, %s9808_s21 }
 0x6b1   : > { %8048 = vrot.lane.b32.xlu1 %v15988_v29, %s9808_s21  ;;  %v13313_v14 = vpop.permute.xlu1 %5730  ;;  %v13315_v5 = vpop.permute.xlu0 %6880 }
 0x6b2   : > { %v5782_v4 = vcombine.low %v13299_v9, %v13313_v14 }
 0x6b4   : > { %8044 = vrot.lane.b32.xlu0 %v15986_v28, %s9808_s21  ;;  %v13354_v28 = vrot.slane %v5782_v4, %v15592_v52 }
 0x6b5   : > { %8056 = vrot.lane.b32.xlu1 %v15992_v33, %s9808_s21 }
 0x6b6   : > { %v13321_v61 = vpop.permute.xlu1 %5734  ;;  %v13327_v39 = vpop.permute.xlu0 %6888  ;;  %15998 = vst [vmem:[#allocation21_spill] sm:$0xff] %v13354_v28 }
 0x6b7   : > { %15994 = vst [vmem:[#allocation17_spill] sm:$0xff] %v13321_v61 }
 0x6b8   : > { %8052 = vrot.lane.b32.xlu0 %v15990_v43, %s9808_s21 }
 0x6b9   : > { %8030 = vrot.lane.b32.xlu1 %v12951_v30, %s9808_s21 }
 0x6ba   : > { %v13329_v21 = vpop.permute.xlu1 %5738 }
 0x6bb   : > { %15995 = vst [vmem:[#allocation15_spill] sm:$0xff] %v13329_v21 }
 0x6bc   : > { %8026 = vrot.lane.b32.xlu0 %v12902_v46, %s9808_s21 }
 0x6bd   : > { %8038 = vrot.lane.b32.xlu1 %v12908_v55, %s9808_s21 }
 0x6be   : > { %v13335_v27 = vpop.permute.xlu0 %6896 }
 0x6bf   : > { %v13337_v2 = vpop.permute.xlu1 %5742  ;;  %v6952_v13 = vcombine.low %v13327_v39, %v13335_v27 }
 0x6c0   : > { %15996 = vst [vmem:[#allocation16_spill] sm:$0xff] %v13337_v2  ;;  %8034 = vrot.lane.b32.xlu0 %v12906_v15, %s9808_s21  ;;  %v5798_v20 = vcombine.low %v13321_v61, %v13337_v2 }
 0x6c1   : > { %8046 = vrot.lane.b32.xlu1 %v15989_v25, %s9808_s21  ;;  %v13363_v25 = vrot.slane %v5766_v50, %v15592_v52  ;;  %v13427_v32 = vrot.slane %v6952_v13, %v15592_v52 }
 0x6c2   : > { %v13349_v29 = vpop.permute.xlu0 %7262  ;;  %v13366_v47 = vrot.slane %v5798_v20, %v15592_v52 }
 0x6c3   : > { %v13351_v33 = vpop.permute.xlu1 %5746  ;;  %15999 = vst [vmem:[#allocation19_spill] sm:$0xff] %v13363_v25  ;;  %v5830_v44 = vcombine.low %v13363_v25, %v13354_v28  ;;  %v16005_v28 = vld [vmem:[#allocation48_spill] sm:$0xff] }
 0x6c4   : > { %15997 = vst [vmem:[#allocation14_spill] sm:$0xff] %v13351_v33  ;;  %v5814_v43 = vcombine.low %v13329_v21, %v13351_v33  ;;  %8042 = vrot.lane.b32.xlu0 %v15987_v16, %s9808_s21  ;;  %16000 = vst [vmem:[#allocation20_spill] sm:$0xff] %v13366_v47  ;;  %v7805_v33 = vcombine.high %v12900_v10, %v12896_v37  ;;  %v7669_v37 = vcombine.high %v12902_v46, %v12906_v15 }
 0x6c5   : > { %8054 = vrot.lane.b32.xlu1 %v15993_v34, %s9808_s21  ;;  %v13391_v34 = vrot.slane %v5830_v44, %v15910_v36  ;;  %v7685_v10 = vcombine.high %v12951_v30, %v12908_v55  ;;  %v5783_v30 = vcombine.high %v13299_v9, %v13313_v14  ;;  %v6953_v55 = vcombine.high %v13327_v39, %v13335_v27 }
 0x6c6   : > { %v13369_v11 = vrot.slane %v5814_v43, %v15592_v52  ;;  %v13371_v4 = vpop.permute.xlu0 %7270  ;;  %v13508_v35 = vrot.slane %v7805_v33, %v15592_v52 }
 0x6c7   : > { %v13373_v56 = vpop.permute.xlu1 %6876  ;;  %16003 = vst [vmem:[#allocation102_spill] sm:$0xff] %v13391_v34  ;;  %v13541_v14 = vrot.slane %v7685_v10, %v15592_v52 }
 0x6c8   : > { %16001 = vst [vmem:[#allocation18_spill] sm:$0xff] %v13369_v11  ;;  %v5862_v16 = vcombine.low %v13366_v47, %v13369_v11  ;;  %8050 = vrot.lane.b32.xlu0 %v15991_v38, %s9808_s21  ;;  %v6920_v11 = vcombine.low %v13305_v17, %v13315_v5  ;;  %16011 = vst [vmem:[#allocation9_spill] sm:$0xff] %v13508_v35  ;;  %v16033_v35 = vld [vmem:[#allocation42_spill] sm:$0xff] }
 0x6c9   : > { %6878 = vrot.lane.b32.xlu1 %v12955_v58, %s9808_s21  ;;  %16013 = vst [vmem:[#allocation90_spill] sm:$0xff] %v13541_v14 }
 0x6ca   : > { %v13384_v20 = vrot.slane %v5862_v16, %v15910_v36  ;;  %v13386_v50 = vpop.permute.xlu0 %7278  ;;  %v13435_v2 = vrot.slane %v6920_v11, %v15592_v52 }
 0x6cb   : > { %v13388_v43 = vpop.permute.xlu1 %6884 }
 0x6cc   : > { %16002 = vst [vmem:[#allocation129_spill] sm:$0xff] %v13384_v20  ;;  %6874 = vrot.lane.b32.xlu0 %v13138_v60, %s9808_s21  ;;  %v6936_v44 = vcombine.low %v13373_v56, %v13388_v43 }
 0x6cd   : > { %6886 = vrot.lane.b32.xlu1 %v12928_v53, %s9808_s21 }
 0x6ce   : > { %v13397_v38 = vpop.permute.xlu0 %7286  ;;  %v13422_v20 = vrot.slane %v6936_v44, %v15592_v52 }
 0x6cf   : > { %v13401_v16 = vpop.permute.xlu1 %6892 }
 0x6d0   : > { %6882 = vrot.lane.b32.xlu0 %v13109_v42, %s9808_s21  ;;  %v6984_v13 = vcombine.low %v13435_v2, %v13422_v20 }
 0x6d1   : > { %6894 = vrot.lane.b32.xlu1 %v13033_v51, %s9808_s21 }
 0x6d2   : > { %v13411_v47 = vpop.permute.xlu0 %6116  ;;  %v13457_v12 = vrot.slane %v6984_v13, %v15910_v36 }
 0x6d3   : > { %v13415_v26 = vpop.permute.xlu1 %6900 }
 0x6d4   : > { %v6968_v34 = vcombine.low %v13401_v16, %v13415_v26  ;;  %6890 = vrot.lane.b32.xlu0 %v13035_v59, %s9808_s21  ;;  %16007 = vst [vmem:[#allocation104_spill] sm:$0xff] %v13457_v12 }
 0x6d5   : > { %6902 = vrot.lane.b32.xlu1 %v16004_v8, %s9808_s21 }
 0x6d6   : > { %v13430_v48 = vrot.slane %v6968_v34, %v15592_v52  ;;  %v13432_v61 = vpop.permute.xlu0 %6124 }
 0x6d7   : > { %v13437_v25 = vpop.permute.xlu1 %7266 }
 0x6d8   : > { %v7016_v44 = vcombine.low %v13427_v32, %v13430_v48  ;;  %6898 = vrot.lane.b32.xlu0 %v16005_v28, %s9808_s21 }
 0x6d9   : > { %7268 = vrot.lane.b32.xlu1 %v12955_v58, %s9807_s20 }
 0x6da   : > { %v13447_v34 = vpop.permute.xlu0 %6132  ;;  %v13450_v23 = vrot.slane %v7016_v44, %v15910_v36 }
 0x6db   : > { %v13452_v11 = vpop.permute.xlu1 %7274 }
 0x6dc   : > { %16006 = vst [vmem:[#allocation86_spill] sm:$0xff] %v13450_v23  ;;  %7264 = vrot.lane.b32.xlu0 %v13138_v60, %s9807_s20 }
 0x6dd   : > { %7276 = vrot.lane.b32.xlu1 %v12928_v53, %s9807_s20 }
 0x6de   : > { %v13461_v0 = vpop.permute.xlu0 %5720 }
 0x6df   : > { %16008 = vst [vmem:[#allocation11_spill] sm:$0xff] %v13461_v0  ;;  %v13463_v21 = vpop.permute.xlu1 %7282  ;;  %v7326_v0 = vcombine.low %v13437_v25, %v13452_v11 }
 0x6e0   : > { %7272 = vrot.lane.b32.xlu0 %v13109_v42, %s9807_s20 }
 0x6e1   : > { %7284 = vrot.lane.b32.xlu1 %v13033_v51, %s9807_s20  ;;  %v7342_v51 = vcombine.low %v13386_v50, %v13397_v38 }
 0x6e2   : > { %v13471_v44 = vpop.permute.xlu0 %5724 }
 0x6e3   : > { %v13473_v13 = vpop.permute.xlu1 %7290 }
 0x6e4   : > { %v7358_v24 = vcombine.low %v13463_v21, %v13473_v13  ;;  %7280 = vrot.lane.b32.xlu0 %v13035_v59, %s9807_s20  ;;  %v7310_v59 = vcombine.low %v13349_v29, %v13371_v4 }
 0x6e5   : > { %7292 = vrot.lane.b32.xlu1 %v16004_v8, %s9807_s20 }
 0x6e6   : > { %v13489_v12 = vpop.permute.xlu0 %5728  ;;  %v13497_v8 = vrot.slane %v7358_v24, %v15592_v52  ;;  %v13513_v24 = vrot.slane %v7342_v51, %v15592_v52  ;;  %v6189_v51 = vcombine.high %v13432_v61, %v13447_v34 }
 0x6e7   : > { %16009 = vst [vmem:[#allocation7_spill] sm:$0xff] %v13489_v12  ;;  %v6121_v6 = vpop.permute.xlu1 %6120  ;;  %v5767_v12 = vcombine.high %v13291_v31, %v13307_v22  ;;  %v13564_v22 = vrot.slane %v5783_v30, %v15592_v52  ;;  %v6156_v30 = vcombine.low %v13289_v62, %v13411_v47 }
 0x6e8   : > { %7288 = vrot.lane.b32.xlu0 %v16005_v28, %s9807_s20  ;;  %v13516_v28 = vrot.slane %v7326_v0, %v15592_v52  ;;  %v13531_v0 = vrot.slane %v7310_v59, %v15592_v52  ;;  %v7406_v33 = vcombine.low %v13513_v24, %v13497_v8 }
 0x6e9   : > { %6122 = vrot.lane.b32.xlu1 %v12780_v54, %s9807_s20  ;;  %v6921_v54 = vcombine.high %v13305_v17, %v13315_v5  ;;  %v13538_v5 = vrot.slane %v7669_v37, %v15592_v52  ;;  %v13550_v31 = vrot.slane %v5767_v12, %v15592_v52  ;;  %v6172_v12 = vcombine.low %v13297_v49, %v6121_v6 }
 0x6ea   : > { %v13518_v23 = vpop.permute.xlu0 %5732  ;;  %v7374_v59 = vcombine.low %v13531_v0, %v13516_v28 }
 0x6eb   : > { %v6129_v15 = vpop.permute.xlu1 %6128  ;;  %16012 = vst [vmem:[#allocation61_spill] sm:$0xff] %v13538_v5  ;;  %v13561_v10 = vrot.slane %v6921_v54, %v15592_v52  ;;  %v13575_v54 = vrot.slane %v7406_v33, %v15910_v36  ;;  %v16036_v5 = vld [vmem:[#allocation21_spill] sm:$0xff] }
 0x6ec   : > { %6118 = vrot.lane.b32.xlu0 %v12754_v18, %s9807_s20  ;;  %v6188_v18 = vcombine.low %v13432_v61, %v13447_v34  ;;  %v7311_v61 = vcombine.high %v13349_v29, %v13371_v4  ;;  %v7343_v34 = vcombine.high %v13386_v50, %v13397_v38  ;;  %v6969_v38 = vcombine.high %v13401_v16, %v13415_v26 }
 0x6ed   : > { %6130 = vrot.lane.b32.xlu1 %v15983_v19, %s9807_s20  ;;  %v6173_v19 = vcombine.high %v13297_v49, %v6121_v6  ;;  %16014 = vst [vmem:[#allocation128_spill] sm:$0xff] %v13575_v54  ;;  %v6157_v49 = vcombine.high %v13289_v62, %v13411_v47  ;;  %v6203_v29 = vrot.slane %v6189_v51, %v15592_v52 }
 0x6ee   : > { %v13558_v37 = vpop.permute.xlu0 %5736  ;;  %v13588_v39 = vrot.slane %v6188_v18, %v15592_v52  ;;  %v13597_v62 = vrot.slane %v6172_v12, %v15592_v52  ;;  %v13609_v16 = vrot.slane %v6953_v55, %v15592_v52  ;;  %v13621_v18 = vrot.slane %v6156_v30, %v15592_v52  ;;  %v16017_v12 = vld [vmem:[#allocation117_spill] sm:$0xff] }
 0x6ef   : > { %v6137_v46 = vpop.permute.xlu1 %6136  ;;  %v13600_v47 = vrot.slane %v6173_v19, %v15592_v52  ;;  %v6171_v51 = vrot.slane %v6157_v49, %v15592_v52  ;;  %v7407_v19 = vcombine.high %v13513_v24, %v13497_v8  ;;  %v13639_v30 = vrot.slane %v7343_v34, %v15592_v52 }
 0x6f0   : > { %6126 = vrot.lane.b32.xlu0 %v15977_v1, %s9807_s20  ;;  %v6204_v6 = vcombine.low %v6129_v15, %v6137_v46  ;;  %v6205_v27 = vcombine.high %v6129_v15, %v6137_v46  ;;  %v13592_v1 = vrot.slane %v7374_v59, %v15910_v36  ;;  %v13612_v15 = vrot.slane %v7311_v61, %v15592_v52 }
 0x6f1   : > { %6138 = vrot.lane.b32.xlu1 %v15985_v40, %s9807_s20  ;;  %v7017_v46 = vcombine.high %v13427_v32, %v13430_v48  ;;  %v6937_v32 = vcombine.high %v13373_v56, %v13388_v43  ;;  %v6985_v48 = vcombine.high %v13435_v2, %v13422_v20  ;;  %v13642_v49 = vrot.slane %v6969_v38, %v15592_v52  ;;  %v16023_v38 = vld [vmem:[#allocation11_spill] sm:$0xff] }
 0x6f2   : > { %16015 = vst [vmem:[#allocation100_spill] sm:$0xff] %v13592_v1  ;;  %v13594_v4 = vpop.permute.xlu0 %5740  ;;  %v13603_v40 = vrot.slane %v6204_v6, %v15592_v52  ;;  %v6219_v26 = vrot.slane %v6205_v27, %v15592_v52  ;;  %v6220_v56 = vcombine.low %v13621_v18, %v13597_v62  ;;  %v6237_v43 = vcombine.high %v6171_v51, %v13600_v47  ;;  %v16022_v27 = vld [vmem:[#allocation7_spill] sm:$0xff] }
 0x6f3   : > { %v13606_v50 = vpop.permute.xlu1 %6110  ;;  %v7327_v20 = vcombine.high %v13437_v25, %v13452_v11  ;;  %v5918_v8 = vcombine.low %v13471_v44, %v13518_v23  ;;  %v16020_v25 = vld [vmem:[#allocation86_spill] sm:$0xff]  ;;  %v16021_v11 = vld [vmem:[#allocation104_spill] sm:$0xff] }
 0x6f4   : > { %16016 = vst [vmem:[#allocation26_spill] sm:$0xff] %v13606_v50  ;;  %6134 = vrot.lane.b32.xlu0 %v15984_v63, %s9807_s20  ;;  %v6252_v55 = vcombine.low %v13588_v39, %v13603_v40  ;;  %v6269_v59 = vcombine.high %v6203_v29, %v6219_v26  ;;  %v7359_v63 = vcombine.high %v13463_v21, %v13473_v13 }
 0x6f5   : > { %9398 = vrot.lane.b32.xlu1 %v16017_v12, %s9803_s16  ;;  %v13650_v21 = vrot.slane %v7017_v46, %v15910_v36  ;;  %v7375_v13 = vcombine.high %v13531_v0, %v13516_v28  ;;  %v7049_v28 = vcombine.high %v16021_v11, %v16020_v25  ;;  %v5902_v46 = vcombine.low %v16023_v38, %v16022_v27  ;;  %v16027_v11 = vld [vmem:[#allocation59_spill] sm:$0xff] }
 0x6f6   : > { %v13636_v61 = vpop.permute.xlu0 %5744  ;;  %v13661_v24 = vrot.slane %v6252_v55, %v15910_v36  ;;  %v13664_v34 = vrot.slane %v6269_v59, %v15910_v36  ;;  %v13673_v0 = vrot.slane %v7359_v63, %v15592_v52  ;;  %v6268_v55 = vcombine.low %v6203_v29, %v6219_v26 }
 0x6f7   : > { %v13647_v2 = vpop.permute.xlu1 %6114  ;;  %v5934_v6 = vcombine.low %v13558_v37, %v13636_v61  ;;  %v13681_v12 = vrot.slane %v6220_v56, %v15910_v36  ;;  %v13684_v33 = vrot.slane %v6237_v43, %v15910_v36  ;;  %v7439_v63 = vcombine.high %v13592_v1, %v13575_v54  ;;  %v16026_v56 = vld [vmem:[#allocation43_spill] sm:$0xff]  ;;  %v16029_v1 = vld [vmem:[#allocation14_spill] sm:$0xff] }
 0x6f8   : > { %16018 = vst [vmem:[#allocation22_spill] sm:$0xff] %v13647_v2  ;;  %9393 = vrot.lane.b32.xlu0 %v13088_v45, %s9802_s15  ;;  %16019 = vst [vmem:[#allocation134_spill] sm:$0xff] %v13661_v24  ;;  %v13676_v45 = vrot.slane %v7407_v19, %v15910_v36  ;;  %v13692_v19 = vrot.slane %v7327_v20, %v15592_v52  ;;  %v7389_v17 = vrot.slane %v7375_v13, %v15910_v36 }
 0x6f9   : > { %9408 = vrot.lane.b32.xlu1 %v13093_v7, %s9801_s12  ;;  %16024 = vst [vmem:[#allocation105_spill] sm:$0xff] %v13681_v12  ;;  %v6236_v29 = vcombine.low %v6171_v51, %v13600_v47  ;;  %v13697_v26 = vrot.slane %v5918_v8, %v15592_v52  ;;  %v13702_v43 = vrot.slane %v5934_v6, %v15592_v52 }
 0x6fa   : > { %v5749_v59 = vpop.permute.xlu0 %5748  ;;  %v6291_v47 = vcombine.high %v13684_v33, %v13664_v34  ;;  %v13714_v51 = vrot.slane %v6937_v32, %v15592_v52  ;;  %v6999_v13 = vrot.slane %v6985_v48, %v15910_v36  ;;  %v7422_v8 = vcombine.low %v13639_v30, %v13673_v0  ;;  %v16030_v48 = vld [vmem:[#allocation15_spill] sm:$0xff] }
 0x6fb   : > { %v5950_v7 = vcombine.low %v13594_v4, %v5749_v59  ;;  %v13687_v9 = vpop.permute.xlu1 %8418  ;;  %v6276_v6 = vrot.slane %v6268_v55, %v15910_v36  ;;  %v9427_v54 = vpack.i.bf16 %v7439_v63, %v7049_v28  ;;  %v7440_v32 = vcombine.low %v7389_v17, %v13676_v45  ;;  %v16037_v28 = vld [vmem:[#allocation19_spill] sm:$0xff] }
 0x6fc   : > { %16025 = vst [vmem:[#allocation127_spill] sm:$0xff] %v13687_v9  ;;  %9403 = vrot.lane.b32.xlu0 %v16026_v56, %s9800_s11  ;;  %v5815_v2 = vcombine.high %v16030_v48, %v16029_v1  ;;  %v7032_v50 = vcombine.low %v13609_v16, %v13642_v49  ;;  %v6244_v55 = vrot.slane %v6236_v29, %v15910_v36  ;;  %v16038_v48 = vld [vmem:[#allocation16_spill] sm:$0xff] }
 0x6fd   : > { %v13705_v25 = vrot.slane %v5950_v7, %v15592_v52  ;;  %9418 = vrot.lane.b32.xlu1 %v16027_v11, %s9793_s24  ;;  %v13723_v11 = vrot.slane %v5902_v46, %v15592_v52  ;;  %v16032_v46 = vld [vmem:[#allocation70_spill] sm:$0xff]  ;;  %v5831_v63 = vcombine.high %v16037_v28, %v16036_v5  ;;  %v7390_v14 = vcombine.low %v13612_v15, %v13692_v19 }
 0x6fe   : > { %v13720_v7 = vpop.permute.xlu0 %8416  ;;  %v16034_v57 = vcombine.high %v16032_v46, %v16033_v35  ;;  %v7050_v29 = vcombine.low %v6999_v13, %v13650_v21  ;;  %v6288_v5 = vcombine.low %v6244_v55, %v6276_v6  ;;  %v13758_v28 = vrot.slane %v7422_v8, %v15910_v36  ;;  %v16040_v8 = vld [vmem:[#allocation126_spill] sm:$0xff] }
 0x6ff   : > { %16028 = vst [vmem:[#allocation50_spill] sm:$0xff] %v13720_v7  ;;  %v5998_v56 = vcombine.low %v13702_v43, %v13705_v25  ;;  %v13727_v20 = vpop.permute.xlu1 %8422  ;;  %v5966_v1 = vcombine.low %v13723_v11, %v13697_v26  ;;  %v7441_v9 = vcombine.high %v7389_v17, %v13676_v45  ;;  %v5903_v17 = vcombine.high %v16023_v38, %v16022_v27 }
 0x700   : > { %9413 = vrot.lane.b32.xlu0 %v16031_v41, %s9796_s28  ;;  %v13740_v3 = vpack.i.bf16 %v16034_v57, %v6291_v47  ;;  %v16039_v41 = vld [vmem:[#allocation17_spill] sm:$0xff]  ;;  %v7000_v57 = vcombine.low %v13561_v10, %v13714_v51  ;;  %v5951_v47 = vcombine.high %v13594_v4, %v5749_v59  ;;  %v9432_v7 = vpack.i.bf16 %v7440_v32, %v7050_v29 }
 0x701   : > { %9428 = vrot.lane.b32.xlu1 %v9427_v54, %s9802_s15  ;;  %v5799_v42 = vcombine.high %v16039_v41, %v16038_v48  ;;  %v13761_v60 = vrot.slane %v5998_v56, %v15910_v36  ;;  %v13767_v48 = vrot.slane %v5815_v2, %v15592_v52  ;;  %v13770_v41 = vrot.slane %v7032_v50, %v15910_v36 }
 0x702   : > { %16035 = vst [vmem:[#allocation62_spill] sm:$0xff] %v13740_v3  ;;  %v13755_v3 = vpop.permute.xlu0 %8420  ;;  %v5919_v4 = vcombine.high %v13471_v44, %v13518_v23  ;;  %v5935_v59 = vcombine.high %v13558_v37, %v13636_v61  ;;  %v13779_v56 = vrot.slane %v7390_v14, %v15910_v36  ;;  %v13784_v2 = vrot.slane %v5966_v1, %v15910_v36  ;;  %v16041_v61 = vld [vmem:[#allocation34_spill] sm:$0xff]  ;;  %v16042_v14 = vld [vmem:[#allocation44_spill] sm:$0xff] }
 0x703   : > { %v13763_v54 = vpop.permute.xlu1 %8426  ;;  %v7051_v50 = vcombine.high %v6999_v13, %v13650_v21  ;;  %v5965_v23 = vrot.slane %v5951_v47, %v15592_v52  ;;  %v5999_v44 = vcombine.high %v13702_v43, %v13705_v25  ;;  %v16043_v45 = vcombine.low %v16041_v61, %v16042_v14  ;;  %v16044_v25 = vld [vmem:[#allocation18_spill] sm:$0xff]  ;;  %v16045_v43 = vld [vmem:[#allocation20_spill] sm:$0xff] }
 0x704   : > { %9423 = vrot.lane.b32.xlu0 %v16040_v8, %s9794_s25  ;;  %v6289_v29 = vcombine.high %v6244_v55, %v6276_v6  ;;  %v13797_v27 = vrot.slane %v7000_v57, %v15910_v36  ;;  %v7442_v21 = vcombine.low %v13779_v56, %v13758_v28  ;;  %v5863_v1 = vcombine.high %v16045_v43, %v16044_v25 }
 0x705   : > { %9433 = vrot.lane.b32.xlu1 %v9432_v7, %s9803_s16  ;;  %v9477_v32 = vpack.i.bf16 %v16043_v45, %v6288_v5  ;;  %v9437_v7 = vpack.i.bf16 %v7441_v9, %v7051_v50  ;;  %v5933_v47 = vrot.slane %v5919_v4, %v15592_v52  ;;  %v5967_v6 = vcombine.high %v13723_v11, %v13697_v26 }
 0x706   : > { %v13791_v37 = vpop.permute.xlu0 %8424  ;;  %v5949_v55 = vrot.slane %v5935_v59, %v15592_v52  ;;  %v5846_v9 = vcombine.low %v13550_v31, %v13564_v22  ;;  %v5813_v57 = vrot.slane %v5799_v42, %v15592_v52  ;;  %v5917_v5 = vrot.slane %v5903_v17, %v15592_v52 }
 0x707   : > { %v13799_v38 = vpop.permute.xlu1 %8430  ;;  %v7052_v8 = vcombine.low %v13797_v27, %v13770_v41  ;;  %v13820_v4 = vrot.slane %v5999_v44, %v15910_v36  ;;  %v16046_v59 = vcombine.high %v16041_v61, %v16042_v14  ;;  %v6290_v42 = vcombine.low %v13684_v33, %v13664_v34 }
 0x708   : > { %9478 = vrot.lane.b32.xlu0 %v9477_v32, %s9801_s12  ;;  %v6014_v26 = vcombine.low %v5949_v55, %v5965_v23  ;;  %v5847_v17 = vcombine.high %v13550_v31, %v13564_v22  ;;  %v6253_v45 = vcombine.high %v13588_v39, %v13603_v40  ;;  %v13838_v25 = vrot.slane %v5863_v1, %v15910_v36 }
 0x709   : > { %9438 = vrot.lane.b32.xlu1 %v9437_v7, %s9800_s11  ;;  %v9482_v50 = vpack.i.bf16 %v16046_v59, %v6289_v29  ;;  %v9442_v44 = vpack.i.bf16 %v7442_v21, %v7052_v8  ;;  %v6285_v7 = vcombine.high %v13681_v12, %v13661_v24  ;;  %v5878_v61 = vcombine.low %v5813_v57, %v13767_v48 }
 0x70a   : > { %v13822_v11 = vpop.permute.xlu0 %8428  ;;  %v13842_v14 = vrot.slane %v5967_v6, %v15910_v36  ;;  %v5982_v33 = vcombine.low %v5917_v5, %v5933_v47  ;;  %v13846_v22 = vrot.slane %v5831_v63, %v15910_v36  ;;  %v13849_v31 = vrot.slane %v5846_v9, %v15910_v36  ;;  %v16050_v6 = vld [vmem:[#allocation123_spill] sm:$0xff] }
 0x70b   : > { %v13833_v32 = vpop.permute.xlu1 %8434  ;;  %v5879_v39 = vcombine.high %v5813_v57, %v13767_v48  ;;  %v6221_v40 = vcombine.high %v13621_v18, %v13597_v62  ;;  %v6015_v34 = vcombine.high %v5949_v55, %v5965_v23  ;;  %v13856_v29 = vrot.slane %v6014_v26, %v15910_v36  ;;  %v16049_v23 = vld [vmem:[#allocation4_spill] sm:$0xff] }
 0x70c   : > { %9483 = vrot.lane.b32.xlu0 %v9482_v50, %s9796_s28  ;;  %16047 = vst [vmem:[#allocation91_spill] sm:$0xff] %v13849_v31  ;;  %v16048_v63 = vcombine.low %v16032_v46, %v16033_v35  ;;  %v6032_v1 = vcombine.low %v13842_v14, %v13820_v4  ;;  %v7423_v48 = vcombine.high %v13639_v30, %v13673_v0 }
 0x70d   : > { %9443 = vrot.lane.b32.xlu1 %v9442_v44, %s9801_s12  ;;  %v13868_v62 = vrot.slane %v6253_v45, %v15910_v36  ;;  %v16051_v55 = vcombine.high %v16049_v23, %v16050_v6  ;;  %v7443_v57 = vcombine.high %v13779_v56, %v13758_v28  ;;  %v13878_v35 = vrot.slane %v5878_v61, %v15910_v36 }
 0x70e   : > { %v13858_v21 = vpop.permute.xlu0 %8432  ;;  %v9487_v43 = vpack.i.bf16 %v16048_v63, %v6290_v42  ;;  %v5983_v46 = vcombine.high %v5917_v5, %v5933_v47  ;;  %v13881_v8 = vrot.slane %v5982_v33, %v15910_v36  ;;  %v5896_v30 = vcombine.low %v13846_v22, %v13838_v25  ;;  %v16058_v63 = vld [vmem:[#allocation127_spill] sm:$0xff] }
 0x70f   : > { %v13870_v18 = vpop.permute.xlu1 %8438  ;;  %v9447_v9 = vpack.i.bf16 %v16051_v55, %v6285_v7  ;;  %16052 = vst [vmem:[#allocation28_spill] sm:$0xff] %v13878_v35  ;;  %v7033_v0 = vcombine.high %v13609_v16, %v13642_v49  ;;  %v7391_v26 = vcombine.high %v13612_v15, %v13692_v19  ;;  %v13891_v28 = vrot.slane %v6221_v40, %v15910_v36 }
 0x710   : > { %9488 = vrot.lane.b32.xlu0 %v9487_v43, %s9793_s24  ;;  %v7053_v56 = vcombine.high %v13797_v27, %v13770_v41  ;;  %v7001_v47 = vcombine.high %v13561_v10, %v13714_v51  ;;  %v13899_v5 = vrot.slane %v6015_v34, %v15910_v36  ;;  %v9497_v16 = vpack.i.bf16 %v6032_v1, %v5896_v30  ;;  %v16059_v1 = vld [vmem:[#allocation50_spill] sm:$0xff] }
 0x711   : > { %9448 = vrot.lane.b32.xlu1 %v9447_v9, %s9802_s15  ;;  %v6034_v15 = vcombine.low %v13881_v8, %v13856_v29  ;;  %v16054_v49 = vcombine.high %v12955_v58, %v12928_v53  ;;  %v13912_v41 = vrot.slane %v7423_v48, %v15910_v36  ;;  %v6286_v51 = vcombine.low %v13891_v28, %v13868_v62  ;;  %v16060_v9 = vld [vmem:[#allocation64_spill] sm:$0xff] }
 0x712   : > { %16053 = vst [vmem:[#allocation24_spill] sm:$0xff] %v13899_v5  ;;  %v13901_v59 = vpop.permute.xlu0 %8436  ;;  %v9452_v10 = vpack.i.bf16 %v7443_v57, %v7053_v56  ;;  %v13919_v50 = vrot.slane %v5847_v17, %v15910_v36  ;;  %v13922_v42 = vrot.slane %v5879_v39, %v15910_v36  ;;  %v13925_v45 = vrot.slane %v5983_v46, %v15910_v36  ;;  %v16061_v57 = vld [vmem:[#allocation109_spill] sm:$0xff] }
 0x713   : > { %v13909_v19 = vrot.slane %v16054_v49, %v15592_v52  ;;  %v13914_v27 = vpop.permute.xlu1 %8442  ;;  %v5898_v58 = vcombine.low %v13849_v31, %v13878_v35  ;;  %v13931_v53 = vrot.slane %v7033_v0, %v15910_v36  ;;  %v13934_v44 = vrot.slane %v7391_v26, %v15910_v36 }
 0x714   : > { %16055 = vst [vmem:[#allocation111_spill] sm:$0xff] %v13919_v50  ;;  %16056 = vst [vmem:[#allocation40_spill] sm:$0xff] %v13922_v42  ;;  %9498 = vrot.lane.b32.xlu0 %v9497_v16, %s9803_s16  ;;  %v8616_v17 = vcombine.low %v13727_v20, %v13799_v38  ;;  %v8480_v7 = vcombine.low %v13755_v3, %v13822_v11  ;;  %v13942_v61 = vrot.slane %v7001_v47, %v15910_v36  ;;  %v16065_v16 = vld [vmem:[#allocation89_spill] sm:$0xff] }
 0x715   : > { %16057 = vst [vmem:[#allocation112_spill] sm:$0xff] %v13925_v45  ;;  %9453 = vrot.lane.b32.xlu1 %v9452_v10, %s9796_s28  ;;  %v8632_v33 = vcombine.low %v13833_v32, %v13914_v27  ;;  %v9507_v40 = vpack.i.bf16 %v6034_v15, %v5898_v58  ;;  %v6036_v34 = vcombine.low %v13925_v45, %v13899_v5  ;;  %v16066_v15 = vld [vmem:[#allocation81_spill] sm:$0xff] }
 0x716   : > { %v13946_v39 = vpop.permute.xlu0 %8440  ;;  %v8600_v43 = vcombine.low %v16058_v63, %v13763_v54  ;;  %v8464_v48 = vcombine.low %v16059_v1, %v13791_v37  ;;  %v16062_v46 = vcombine.low %v16060_v9, %v16061_v57  ;;  %v7444_v0 = vcombine.low %v13934_v44, %v13912_v41 }
 0x717   : > { %v13954_v55 = vpop.permute.xlu1 %8446  ;;  %v16067_v49 = vcombine.high %v16065_v16, %v16066_v15  ;;  %v8488_v13 = vrot.slane %v8480_v7, %v15592_v52  ;;  %v8496_v47 = vcombine.low %v13858_v21, %v13946_v39  ;;  %v7054_v16 = vcombine.low %v13942_v61, %v13931_v53 }
 0x718   : > { %v9457_v30 = vpack.i.bf16 %v16062_v46, %v6286_v51  ;;  %v8648_v58 = vcombine.low %v13870_v18, %v13954_v55  ;;  %9508 = vrot.lane.b32.xlu0 %v9507_v40, %s9801_s12  ;;  %v5900_v51 = vcombine.low %v13919_v50, %v13922_v42  ;;  %v8624_v46 = vrot.slane %v8616_v17, %v15592_v52 }
 0x719   : > { %v13967_v10 = vrot.slane %v16067_v49, %v15592_v52  ;;  %v8640_v15 = vrot.slane %v8632_v33, %v15592_v52  ;;  %v6287_v17 = vcombine.high %v13891_v28, %v13868_v62  ;;  %v8608_v7 = vrot.slane %v8600_v43, %v15592_v52  ;;  %v16076_v33 = vld [vmem:[#allocation87_spill] sm:$0xff] }
 0x71a   : > { %9458 = vrot.lane.b32.xlu1 %v9457_v30, %s9803_s16  ;;  %v8656_v49 = vrot.slane %v8648_v58, %v15592_v52  ;;  %v13983_v40 = vpop.permute.xlu0 %8444  ;;  %v9517_v24 = vpack.i.bf16 %v6036_v34, %v5900_v51  ;;  %v8472_v12 = vrot.slane %v8464_v48, %v15592_v52  ;;  %v9462_v23 = vpack.i.bf16 %v7444_v0, %v7054_v16  ;;  %v16070_v34 = vld [vmem:[#allocation58_spill] sm:$0xff]  ;;  %v16071_v51 = vld [vmem:[#allocation75_spill] sm:$0xff] }
 0x71b   : > { %v8512_v30 = vcombine.low %v13901_v59, %v13983_v40  ;;  %v13991_v6 = vpop.permute.xlu1 %8032  ;;  %v7837_v50 = vcombine.high %v16071_v51, %v16070_v34  ;;  %v8664_v28 = vcombine.low %v8608_v7, %v8624_v46  ;;  %v8504_v48 = vrot.slane %v8496_v47, %v15592_v52  ;;  %v16072_v0 = vld [vmem:[#allocation78_spill] sm:$0xff]  ;;  %v16073_v16 = vld [vmem:[#allocation107_spill] sm:$0xff] }
 0x71c   : > { %v8696_v62 = vcombine.low %v8640_v15, %v8656_v49  ;;  %9518 = vrot.lane.b32.xlu0 %v9517_v24, %s9793_s24  ;;  %v8528_v43 = vcombine.low %v8472_v12, %v8488_v13  ;;  %v7853_v56 = vcombine.high %v16073_v16, %v16072_v0  ;;  %v8529_v45 = vcombine.high %v8472_v12, %v8488_v13  ;;  %v16077_v0 = vld [vmem:[#allocation108_spill] sm:$0xff]  ;;  %v16078_v13 = vld [vmem:[#allocation38_spill] sm:$0xff] }
 0x71d   : > { %v8520_v42 = vrot.slane %v8512_v30, %v15592_v52  ;;  %v16074_v34 = vcombine.high %v16060_v9, %v16061_v57  ;;  %v7445_v24 = vcombine.high %v13934_v44, %v13912_v41  ;;  %v8697_v58 = vcombine.high %v8640_v15, %v8656_v49  ;;  %v16079_v16 = vld [vmem:[#allocation114_spill] sm:$0xff] }
 0x71e   : > { %9463 = vrot.lane.b32.xlu1 %v9462_v23, %s9793_s24  ;;  %v14005_v5 = vpop.permute.xlu0 %8028  ;;  %v14013_v47 = vrot.slane %v8696_v62, %v15910_v36  ;;  %v7701_v12 = vcombine.high %v16077_v0, %v16076_v33  ;;  %v7717_v31 = vcombine.high %v16079_v16, %v16078_v13  ;;  %v8665_v35 = vcombine.high %v8608_v7, %v8624_v46  ;;  %v16098_v13 = vld [vmem:[#allocation103_spill] sm:$0xff] }
 0x71f   : > { %v9467_v51 = vpack.i.bf16 %v16074_v34, %v6287_v17  ;;  %v8560_v30 = vcombine.low %v8504_v48, %v8520_v42  ;;  %v8561_v26 = vcombine.high %v8504_v48, %v8520_v42  ;;  %v14015_v23 = vpop.permute.xlu1 %8040  ;;  %v7055_v9 = vcombine.high %v13942_v61, %v13931_v53 }
 0x720   : > { %16075 = vst [vmem:[#allocation77_spill] sm:$0xff] %v14013_v47  ;;  %v14024_v41 = vrot.slane %v8664_v28, %v15910_v36  ;;  %v14027_v44 = vrot.slane %v8528_v43, %v15910_v36  ;;  %v14037_v15 = vrot.slane %v7837_v50, %v15592_v52  ;;  %v14040_v46 = vrot.slane %v7853_v56, %v15592_v52  ;;  %v16083_v28 = vld [vmem:[#allocation129_spill] sm:$0xff] }
 0x721   : > { %v14030_v42 = vrot.slane %v8560_v30, %v15910_v36  ;;  %v14033_v57 = vrot.slane %v8561_v26, %v15910_v36  ;;  %v9472_v61 = vpack.i.bf16 %v7445_v24, %v7055_v9  ;;  %v6031_v49 = vcombine.high %v13784_v2, %v13761_v60  ;;  %v16086_v30 = vld [vmem:[#allocation115_spill] sm:$0xff] }
 0x722   : > { %16080 = vst [vmem:[#allocation32_spill] sm:$0xff] %v14024_v41  ;;  %16081 = vst [vmem:[#allocation101_spill] sm:$0xff] %v14027_v44  ;;  %9468 = vrot.lane.b32.xlu1 %v9467_v51, %s9800_s11  ;;  %v14042_v53 = vpop.permute.xlu0 %8036  ;;  %v14047_v17 = vrot.slane %v8529_v45, %v15910_v36  ;;  %v14050_v26 = vrot.slane %v8697_v58, %v15910_v36  ;;  %v8729_v56 = vcombine.high %v14024_v41, %v14013_v47  ;;  %v16084_v45 = vld [vmem:[#allocation102_spill] sm:$0xff] }
 0x723   : > { %16082 = vst [vmem:[#allocation106_spill] sm:$0xff] %v14030_v42  ;;  %v14052_v7 = vpop.permute.xlu1 %8048  ;;  %v8593_v50 = vcombine.high %v14027_v44, %v14030_v42  ;;  %v14059_v33 = vrot.slane %v7701_v12, %v15592_v52  ;;  %v14062_v62 = vrot.slane %v7717_v31, %v15592_v52  ;;  %v5895_v43 = vcombine.high %v16084_v45, %v16083_v28  ;;  %v16085_v31 = vld [vmem:[#allocation51_spill] sm:$0xff] }
 0x724   : > { %v6033_v58 = vcombine.high %v13842_v14, %v13820_v4  ;;  %v14069_v48 = vrot.slane %v8665_v35, %v15910_v36  ;;  %v8210_v34 = vcombine.low %v14005_v5, %v14042_v53  ;;  %v8595_v24 = vcombine.high %v14047_v17, %v14033_v57 }
 0x725   : > { %v9527_v51 = vpack.i.bf16 %v8729_v56, %v8593_v50  ;;  %v8513_v4 = vcombine.high %v13901_v59, %v13983_v40  ;;  %v5897_v35 = vcombine.high %v13846_v22, %v13838_v25  ;;  %v8226_v16 = vcombine.low %v13991_v6, %v14015_v23 }
 0x726   : > { %9473 = vrot.lane.b32.xlu1 %v9472_v61, %s9794_s25  ;;  %v14082_v14 = vpop.permute.xlu0 %8044  ;;  %v9492_v61 = vpack.i.bf16 %v6031_v49, %v5895_v43  ;;  %v8731_v50 = vcombine.high %v14069_v48, %v14050_v26  ;;  %v8481_v59 = vcombine.high %v13755_v3, %v13822_v11  ;;  %v8497_v25 = vcombine.high %v13858_v21, %v13946_v39 }
 0x727   : > { %v14090_v9 = vpop.permute.xlu1 %8056  ;;  %9528 = vrot.lane.b32.xlu0 %v9527_v51, %s9802_s15  ;;  %v9502_v22 = vpack.i.bf16 %v6033_v58, %v5897_v35  ;;  %v6035_v40 = vcombine.high %v13881_v8, %v13856_v29  ;;  %v8649_v56 = vcombine.high %v13870_v18, %v13954_v55  ;;  %v14104_v12 = vrot.slane %v8210_v34, %v15592_v52  ;;  %v16088_v58 = vld [vmem:[#allocation91_spill] sm:$0xff] }
 0x728   : > { %v8258_v49 = vcombine.low %v14052_v7, %v14090_v9  ;;  %v9537_v43 = vpack.i.bf16 %v8731_v50, %v8595_v24  ;;  %v8465_v3 = vcombine.high %v16059_v1, %v13791_v37  ;;  %v8617_v11 = vcombine.high %v13727_v20, %v13799_v38  ;;  %v16087_v1 = vld [vmem:[#allocation28_spill] sm:$0xff]  ;;  %v16090_v35 = vld [vmem:[#allocation35_spill] sm:$0xff] }
 0x729   : > { %v8633_v29 = vcombine.high %v13833_v32, %v13914_v27  ;;  %v14116_v21 = vrot.slane %v8513_v4, %v15592_v52  ;;  %v14121_v8 = vrot.slane %v8226_v16, %v15592_v52  ;;  %v8601_v38 = vcombine.high %v16058_v63, %v13763_v54  ;;  %v16089_v63 = vld [vmem:[#allocation60_spill] sm:$0xff] }
 0x72a   : > { %9493 = vrot.lane.b32.xlu1 %v9492_v61, %s9802_s15  ;;  %v14118_v18 = vpop.permute.xlu0 %8052  ;;  %v14135_v32 = vrot.slane %v8481_v59, %v15592_v52  ;;  %v14138_v27 = vrot.slane %v8497_v25, %v15592_v52  ;;  %v5899_v34 = vcombine.high %v16088_v58, %v16087_v1  ;;  %v14143_v51 = vrot.slane %v8649_v56, %v15592_v52  ;;  %v16091_v25 = vld [vmem:[#allocation24_spill] sm:$0xff] }
 0x72b   : > { %v8242_v39 = vcombine.low %v14082_v14, %v14118_v18  ;;  %v14125_v55 = vpop.permute.xlu1 %8030  ;;  %9538 = vrot.lane.b32.xlu0 %v9537_v43, %s9800_s11  ;;  %v8274_v24 = vcombine.low %v14104_v12, %v14121_v8  ;;  %v14148_v4 = vrot.slane %v8258_v49, %v15592_v52  ;;  %v7765_v16 = vcombine.high %v16090_v35, %v16089_v63  ;;  %v16092_v56 = vld [vmem:[#allocation112_spill] sm:$0xff] }
 0x72c   : > { %v8479_v61 = vrot.slane %v8465_v3, %v15592_v52  ;;  %v14158_v50 = vrot.slane %v8617_v11, %v15592_v52  ;;  %v6037_v43 = vcombine.high %v16092_v56, %v16091_v25  ;;  %v8647_v49 = vrot.slane %v8633_v29, %v15592_v52  ;;  %v16093_v35 = vld [vmem:[#allocation40_spill] sm:$0xff]  ;;  %v16094_v25 = vld [vmem:[#allocation111_spill] sm:$0xff] }
 0x72d   : > { %v14151_v54 = vrot.slane %v8242_v39, %v15592_v52  ;;  %v8576_v39 = vcombine.low %v14138_v27, %v14116_v21  ;;  %v9512_v58 = vpack.i.bf16 %v6035_v40, %v5899_v34  ;;  %v14174_v11 = vrot.slane %v8601_v38, %v15592_v52  ;;  %v14189_v38 = vld [vmem:[#allocation3 + $0xb1] sm:$0xff]  ;;  %v14191_v34 = vld [vmem:[#allocation3 + $0x81] sm:$0xff] }
 0x72e   : > { %9503 = vrot.lane.b32.xlu1 %v9502_v22, %s9800_s11  ;;  %v14160_v59 = vpop.permute.xlu0 %8026  ;;  %v8544_v63 = vcombine.low %v8479_v61, %v14135_v32  ;;  %v5901_v29 = vcombine.high %v16094_v25, %v16093_v35  ;;  %v8712_v37 = vcombine.low %v8647_v49, %v14143_v51  ;;  %v14183_v20 = vrot.slane %v8274_v24, %v15910_v36  ;;  %v16097_v24 = vld [vmem:[#allocation29_spill] sm:$0xff] }
 0x72f   : > { %v8306_v22 = vcombine.low %v14151_v54, %v14148_v4  ;;  %v14169_v1 = vpop.permute.xlu1 %8038  ;;  %v8680_v25 = vcombine.low %v14174_v11, %v14158_v50  ;;  %v7933_v0 = vcombine.high %v16098_v13, %v16097_v24  ;;  %v8594_v35 = vcombine.low %v14047_v17, %v14033_v57 }
 0x730   : > { %16095 = vst [vmem:[#allocation122_spill] sm:$0xff] %v14183_v20  ;;  %v9522_v3 = vpack.i.bf16 %v6037_v43, %v5901_v29  ;;  %v8552_v42 = vrot.slane %v8544_v63, %v15910_v36  ;;  %v16099_v43 = vld [vmem:[#allocation119_spill] sm:$0xff]  ;;  %v16100_v29 = vld [vmem:[#allocation46_spill] sm:$0xff]  ;;  %v14224_v13 = vrot.slane %v7765_v16, %v15910_v36  ;;  %v16103_v16 = vld [vmem:[#allocation52_spill] sm:$0xff] }
 0x731   : > { %v14186_v40 = vrot.slane %v8306_v22, %v15910_v36  ;;  %v8584_v22 = vrot.slane %v8576_v39, %v15910_v36  ;;  %v16101_v44 = vcombine.high %v16099_v43, %v16100_v29  ;;  %v16102_v39 = vcombine.high %v16086_v30, %v16085_v31  ;;  %v16104_v29 = vld [vmem:[#allocation53_spill] sm:$0xff] }
 0x732   : > { %9513 = vrot.lane.b32.xlu1 %v9512_v58, %s9796_s28  ;;  %v14197_v56 = vpop.permute.xlu0 %8034  ;;  %v8688_v63 = vrot.slane %v8680_v25, %v15910_v36  ;;  %v8545_v31 = vcombine.high %v8479_v61, %v14135_v32  ;;  %v8713_v30 = vcombine.high %v8647_v49, %v14143_v51  ;;  %v8681_v32 = vcombine.high %v14174_v11, %v14158_v50  ;;  %v16106_v61 = vld [vmem:[#allocation25_spill] sm:$0xff]  ;;  %v16107_v49 = vld [vmem:[#allocation6_spill] sm:$0xff] }
 0x733   : > { %16096 = vst [vmem:[#allocation37_spill] sm:$0xff] %v14186_v40  ;;  %v14204_v47 = vpop.permute.xlu1 %8046  ;;  %v8339_v41 = vcombine.high %v14183_v20, %v14186_v40  ;;  %v14215_v24 = vrot.slane %v16101_v44, %v15910_v36  ;;  %v14221_v58 = vrot.slane %v16102_v39, %v15910_v36  ;;  %v8720_v40 = vrot.slane %v8712_v37, %v15910_v36 }
 0x734   : > { %v8074_v57 = vcombine.low %v14160_v59, %v14197_v56  ;;  %v8730_v44 = vcombine.low %v14069_v48, %v14050_v26  ;;  %v16105_v37 = vcombine.high %v16103_v16, %v16104_v29  ;;  %v7797_v25 = vcombine.high %v16107_v49, %v16106_v61 }
 0x735   : > { %v9547_v17 = vpack.i.bf16 %v8339_v41, %v7933_v0  ;;  %v8090_v41 = vcombine.low %v14125_v55, %v14169_v1  ;;  %v8596_v0 = vcombine.low %v8552_v42, %v8584_v22  ;;  %v7934_v51 = vcombine.low %v14215_v24, %v14221_v58 }
 0x736   : > { %9523 = vrot.lane.b32.xlu1 %v9522_v3, %s9794_s25  ;;  %v8043_v43 = vpop.permute.xlu0 %8042  ;;  %v14239_v39 = vrot.slane %v16105_v37, %v15910_v36  ;;  %v8307_v3 = vcombine.high %v14151_v54, %v14148_v4  ;;  %v9532_v48 = vpack.i.bf16 %v8730_v44, %v8594_v35  ;;  %v8275_v54 = vcombine.high %v14104_v12, %v14121_v8 }
 0x737   : > { %v14245_v26 = vpop.permute.xlu1 %8054  ;;  %9548 = vrot.lane.b32.xlu0 %v9547_v17, %s9802_s15  ;;  %v8082_v16 = vrot.slane %v8074_v57, %v15592_v52  ;;  %v8732_v50 = vcombine.low %v8688_v63, %v8720_v40  ;;  %v14263_v11 = vrot.slane %v8545_v31, %v15910_v36  ;;  %v14266_v17 = vrot.slane %v8713_v30, %v15910_v36 }
 0x738   : > { %v8122_v35 = vcombine.low %v14204_v47, %v14245_v26  ;;  %v8243_v44 = vcombine.high %v14082_v14, %v14118_v18  ;;  %v8597_v37 = vcombine.high %v8552_v42, %v8584_v22  ;;  %v14271_v12 = vrot.slane %v8307_v3, %v15910_v36 }
 0x739   : > { %v8098_v8 = vrot.slane %v8090_v41, %v15592_v52  ;;  %v8577_v31 = vcombine.high %v14138_v27, %v14116_v21  ;;  %v8211_v30 = vcombine.high %v14005_v5, %v14042_v53  ;;  %v8259_v14 = vcombine.high %v14052_v7, %v14090_v9 }
 0x73a   : > { %9533 = vrot.lane.b32.xlu1 %v9532_v48, %s9803_s16  ;;  %v8051_v29 = vpop.permute.xlu0 %8050  ;;  %v9542_v48 = vpack.i.bf16 %v8732_v50, %v8596_v0  ;;  %v8733_v18 = vcombine.high %v8688_v63, %v8720_v40  ;;  %v14283_v42 = vrot.slane %v8275_v54, %v15910_v36  ;;  %v8130_v3 = vrot.slane %v8122_v35, %v15592_v52 }
 0x73b   : > { %v8106_v57 = vcombine.low %v8043_v43, %v8051_v29  ;;  %v14274_v4 = vpop.permute.xlu1 %6878  ;;  %v8138_v22 = vcombine.low %v8082_v16, %v8098_v8  ;;  %v8227_v21 = vcombine.high %v13991_v6, %v14015_v23  ;;  %v14291_v27 = vrot.slane %v8243_v44, %v15592_v52 }
 0x73c   : > { %v8139_v5 = vcombine.high %v8082_v16, %v8098_v8  ;;  %v9552_v7 = vpack.i.bf16 %v8733_v18, %v8597_v37  ;;  %v8107_v9 = vcombine.high %v8043_v43, %v8051_v29  ;;  %v8340_v54 = vcombine.low %v14283_v42, %v14271_v12 }
 0x73d   : > { %v8114_v41 = vrot.slane %v8106_v57, %v15592_v52  ;;  %v8591_v35 = vrot.slane %v8577_v31, %v15910_v36  ;;  %v14301_v50 = vrot.slane %v8211_v30, %v15592_v52  ;;  %v14304_v6 = vrot.slane %v8259_v14, %v15592_v52 }
 0x73e   : > { %9543 = vrot.lane.b32.xlu1 %v9542_v48, %s9801_s12  ;;  %v14293_v53 = vpop.permute.xlu0 %6874  ;;  %v8075_v23 = vcombine.high %v14160_v59, %v14197_v56  ;;  %v14309_v43 = vrot.slane %v8138_v22, %v15910_v36  ;;  %v8123_v16 = vcombine.high %v14204_v47, %v14245_v26  ;;  %v14321_v37 = vrot.slane %v8227_v21, %v15592_v52  ;;  %v9782_v21 = vld [vmem:[#allocation3 + $0x69] sm:$0xff] }
 0x73f   : > { %v8170_v40 = vcombine.low %v8114_v41, %v8130_v3  ;;  %v8171_v63 = vcombine.high %v8114_v41, %v8130_v3  ;;  %v14295_v0 = vpop.permute.xlu1 %6886  ;;  %v8322_v59 = vcombine.low %v14291_v27, %v14304_v6  ;;  %v8091_v56 = vcombine.high %v14125_v55, %v14169_v1  ;;  %v9781_v41 = vld [vmem:[#allocation3 + $0x99] sm:$0xff] }
 0x740   : > { %16108 = vst [vmem:[#allocation71_spill] sm:$0xff] %v14309_v43  ;;  %v14328_v8 = vrot.slane %v8139_v5, %v15910_v36  ;;  %v14333_v26 = vrot.slane %v8107_v9, %v15592_v52  ;;  %v9562_v31 = vpack.i.bf16 %v8340_v54, %v7934_v51  ;;  %v8695_v14 = vrot.slane %v8681_v32, %v15910_v36 }
 0x741   : > { %v14314_v44 = vrot.slane %v8170_v40, %v15910_v36  ;;  %v14317_v29 = vrot.slane %v8171_v63, %v15910_v36  ;;  %v14343_v55 = vrot.slane %v8075_v23, %v15592_v52  ;;  %v8598_v18 = vcombine.low %v14263_v11, %v8591_v35 }
 0x742   : > { %9553 = vrot.lane.b32.xlu1 %v9552_v7, %s9796_s28  ;;  %v14330_v47 = vpop.permute.xlu0 %6882  ;;  %v8290_v22 = vcombine.low %v14301_v50, %v14321_v37  ;;  %v14351_v3 = vrot.slane %v8123_v16, %v15592_v52  ;;  %v6683_v5 = vcombine.high %v9782_v21, %v9781_v41  ;;  %v14360_v7 = vrot.slane %v8091_v56, %v15592_v52 }
 0x743   : > { %16109 = vst [vmem:[#allocation66_spill] sm:$0xff] %v14314_v44  ;;  %v14337_v48 = vpop.permute.xlu1 %6894  ;;  %v8203_v30 = vcombine.high %v14309_v43, %v14314_v44  ;;  %v8204_v1 = vcombine.low %v14328_v8, %v14317_v29  ;;  %v7056_v51 = vcombine.low %v14293_v53, %v14330_v47  ;;  %v16110_v40 = vcombine.low %v14239_v39, %v14224_v13  ;;  %v16118_v44 = vld [vmem:[#allocation90_spill] sm:$0xff] }
 0x744   : > { %v8599_v54 = vcombine.high %v14263_v11, %v8591_v35  ;;  %v14369_v23 = vrot.slane %v8322_v59, %v15910_v36  ;;  %v7072_v16 = vcombine.low %v14274_v4, %v14295_v0  ;;  %v8734_v56 = vcombine.low %v8695_v14, %v14266_v17 }
 0x745   : > { %v9557_v32 = vpack.i.bf16 %v8203_v30, %v7797_v25  ;;  %v9572_v63 = vpack.i.bf16 %v8204_v1, %v16110_v40  ;;  %v8186_v25 = vcombine.low %v14333_v26, %v14351_v3  ;;  %v8154_v30 = vcombine.low %v14343_v55, %v14360_v7 }
 0x746   : > { %9563 = vrot.lane.b32.xlu1 %v9562_v31, %s9803_s16  ;;  %v14362_v9 = vpop.permute.xlu0 %6890  ;;  %v8735_v11 = vcombine.high %v8695_v14, %v14266_v17  ;;  %v8341_v35 = vcombine.high %v14283_v42, %v14271_v12  ;;  %v16111_v59 = vcombine.low %v14037_v15, %v14040_v46  ;;  %v14391_v41 = vrot.slane %v8290_v22, %v15910_v36 }
 0x747   : > { %v14375_v31 = vpop.permute.xlu1 %6902  ;;  %9558 = vrot.lane.b32.xlu0 %v9557_v32, %s9802_s15  ;;  %v14394_v32 = vrot.slane %v7056_v51, %v15592_v52  ;;  %v9567_v17 = vpack.i.bf16 %v8734_v56, %v8598_v18  ;;  %v16112_v12 = vcombine.high %v14191_v34, %v14189_v38  ;;  %v7935_v22 = vcombine.high %v14215_v24, %v14221_v58  ;;  %v16113_v51 = vld [vmem:[#allocation9_spill] sm:$0xff] }
 0x748   : > { %v14388_v1 = vrot.slane %v16111_v59, %v15910_v36  ;;  %v7104_v21 = vcombine.low %v14337_v48, %v14375_v31  ;;  %v9582_v40 = vpack.i.bf16 %v8735_v11, %v8599_v54  ;;  %v16114_v59 = vld [vmem:[#allocation13_spill] sm:$0xff]  ;;  %v14416_v18 = vrot.slane %v8186_v25, %v15910_v36 }
 0x749   : > { %v14403_v42 = vrot.slane %v16112_v12, %v15592_v52  ;;  %v16115_v57 = vcombine.low %v16113_v51, %v16114_v59  ;;  %v8342_v24 = vcombine.low %v14391_v41, %v14369_v23  ;;  %v8162_v58 = vrot.slane %v8154_v30, %v15910_v36 }
 0x74a   : > { %9573 = vrot.lane.b32.xlu1 %v9572_v63, %s9803_s16  ;;  %v14405_v14 = vpop.permute.xlu0 %6898  ;;  %v14419_v63 = vrot.slane %v7072_v16, %v15592_v52  ;;  %v16116_v25 = vcombine.low %v14059_v33, %v14062_v62  ;;  %v14438_v11 = vrot.slane %v7104_v21, %v15592_v52  ;;  %v8205_v30 = vcombine.high %v14328_v8, %v14317_v29  ;;  %v16117_v21 = vld [vmem:[#allocation61_spill] sm:$0xff] }
 0x74b   : > { %v14413_v20 = vrot.slane %v16115_v57, %v15910_v36  ;;  %v7088_v38 = vcombine.low %v14362_v9, %v14405_v14  ;;  %v14423_v34 = vpop.permute.xlu1 %7268  ;;  %9568 = vrot.lane.b32.xlu0 %v9567_v17, %s9793_s24  ;;  %v9577_v57 = vpack.i.bf16 %v8341_v35, %v7935_v22  ;;  %v6731_v35 = vcombine.high %v13967_v10, %v13909_v19 }
 0x74c   : > { %v7788_v16 = vrot.slane %v16116_v25, %v15910_v36  ;;  %v7120_v56 = vcombine.low %v14394_v32, %v14419_v63  ;;  %v6697_v12 = vrot.slane %v6683_v5, %v15592_v52  ;;  %v7799_v25 = vcombine.high %v14239_v39, %v14224_v13 }
 0x74d   : > { %v7936_v54 = vcombine.low %v14413_v20, %v14388_v1  ;;  %v14441_v17 = vrot.slane %v7088_v38, %v15592_v52  ;;  %v16119_v38 = vcombine.low %v16117_v21, %v16118_v44  ;;  %v8206_v61 = vcombine.low %v8162_v58, %v14416_v18 }
 0x74e   : > { %9583 = vrot.lane.b32.xlu1 %v9582_v40, %s9794_s25  ;;  %v14449_v22 = vpop.permute.xlu0 %7264  ;;  %v8187_v40 = vcombine.high %v14333_v26, %v14351_v3  ;;  %v7917_v13 = vcombine.high %v14037_v15, %v14040_v46  ;;  %v6762_v39 = vcombine.low %v6697_v12, %v14403_v42  ;;  %v16120_v26 = vcombine.high %v14059_v33, %v14062_v62 }
 0x74f   : > { %v7756_v43 = vrot.slane %v16119_v38, %v15910_v36  ;;  %v7152_v29 = vcombine.low %v14441_v17, %v14438_v11  ;;  %v14461_v8 = vpop.permute.xlu1 %7276  ;;  %9578 = vrot.lane.b32.xlu0 %v9577_v57, %s9800_s11  ;;  %v9592_v5 = vpack.i.bf16 %v8342_v24, %v7936_v54  ;;  %v8155_v38 = vcombine.high %v14343_v55, %v14360_v7 }
 0x750   : > { %v14472_v3 = vrot.slane %v16120_v26, %v15910_v36  ;;  %v14477_v57 = vrot.slane %v7120_v56, %v15910_v36  ;;  %v9587_v15 = vpack.i.bf16 %v8205_v30, %v7799_v25  ;;  %v6763_v46 = vcombine.high %v6697_v12, %v14403_v42 }
 0x751   : > { %v7800_v49 = vcombine.low %v7756_v43, %v7788_v16  ;;  %v14480_v24 = vrot.slane %v7152_v29, %v15910_v36  ;;  %v8323_v54 = vcombine.high %v14291_v27, %v14304_v6  ;;  %v16121_v62 = vcombine.high %v16117_v21, %v16118_v44 }
 0x752   : > { %9593 = vrot.lane.b32.xlu1 %v9592_v5, %s9801_s12  ;;  %v14486_v33 = vpop.permute.xlu0 %7272  ;;  %v7937_v7 = vcombine.high %v14413_v20, %v14388_v1  ;;  %v14497_v56 = vrot.slane %v8187_v40, %v15910_v36  ;;  %v8207_v6 = vcombine.high %v8162_v58, %v14416_v18  ;;  %v8291_v44 = vcombine.high %v14301_v50, %v14321_v37 }
 0x753   : > { %v14492_v55 = vrot.slane %v16121_v62, %v15910_v36  ;;  %v14501_v30 = vpop.permute.xlu1 %7284  ;;  %9588 = vrot.lane.b32.xlu0 %v9587_v15, %s9800_s11  ;;  %v9602_v27 = vpack.i.bf16 %v8206_v61, %v7800_v49  ;;  %v7801_v12 = vcombine.high %v7756_v43, %v7788_v16  ;;  %v16122_v20 = vcombine.high %v16113_v51, %v16114_v59 }
 0x754   : > { %v14514_v25 = vrot.slane %v7917_v13, %v15910_v36  ;;  %v8169_v21 = vrot.slane %v8155_v38, %v15910_v36  ;;  %v7446_v61 = vcombine.low %v14449_v22, %v14486_v33  ;;  %v14523_v50 = vrot.slane %v6762_v39, %v15910_v36 }
 0x755   : > { %v14511_v1 = vrot.slane %v16122_v20, %v15910_v36  ;;  %v7802_v49 = vcombine.low %v14492_v55, %v14472_v3  ;;  %v14526_v43 = vrot.slane %v8323_v54, %v15910_v36  ;;  %v7057_v37 = vcombine.high %v14293_v53, %v14330_v47 }
 0x756   : > { %9603 = vrot.lane.b32.xlu1 %v9602_v27, %s9801_s12  ;;  %v14530_v51 = vpop.permute.xlu0 %7280  ;;  %v7803_v59 = vcombine.high %v14492_v55, %v14472_v3  ;;  %v14535_v18 = vrot.slane %v6763_v46, %v15910_v36  ;;  %v7462_v58 = vcombine.low %v14423_v34, %v14461_v8  ;;  %v9617_v40 = vpack.i.bf16 %v8207_v6, %v7801_v12  ;;  %v16129_v12 = vld [vmem:[#allocation39_spill] sm:$0xff] }
 0x757   : > { %v14539_v16 = vpop.permute.xlu1 %7292  ;;  %v8208_v29 = vcombine.low %v8169_v21, %v14497_v56  ;;  %v16123_v53 = vcombine.low %v13967_v10, %v13909_v19  ;;  %v14549_v5 = vrot.slane %v8291_v44, %v15910_v36  ;;  %v7073_v13 = vcombine.high %v14274_v4, %v14295_v0 }
 0x758   : > { %v7938_v39 = vcombine.low %v14511_v1, %v14514_v25  ;;  %v14556_v26 = vrot.slane %v6731_v35, %v15910_v36  ;;  %v7454_v3 = vrot.slane %v7446_v61, %v15592_v52  ;;  %v7494_v38 = vcombine.low %v14501_v30, %v14539_v16 }
 0x759   : > { %v14546_v47 = vrot.slane %v16123_v53, %v15910_v36  ;;  %v14567_v4 = vrot.slane %v7057_v37, %v15592_v52  ;;  %v8343_v35 = vcombine.high %v14391_v41, %v14369_v23  ;;  %v8344_v15 = vcombine.low %v14549_v5, %v14526_v43 }
 0x75a   : > { %9618 = vrot.lane.b32.xlu1 %v9617_v40, %s9796_s28  ;;  %v7289_v0 = vpop.permute.xlu0 %7288  ;;  %v6784_v46 = vcombine.low %v14556_v26, %v14535_v18  ;;  %v7470_v54 = vrot.slane %v7462_v58, %v15592_v52  ;;  %v9632_v27 = vpack.i.bf16 %v8208_v29, %v7802_v49  ;;  %v8209_v6 = vcombine.high %v8169_v21, %v14497_v56 }
 0x75b   : > { %v6783_v19 = vcombine.high %v14546_v47, %v14523_v50  ;;  %v7478_v62 = vcombine.low %v14530_v51, %v7289_v0  ;;  %v6123_v55 = vpop.permute.xlu1 %6122  ;;  %v14579_v44 = vrot.slane %v7073_v13, %v15592_v52  ;;  %v7121_v23 = vcombine.high %v14394_v32, %v14419_v63 }
 0x75c   : > { %v7089_v41 = vcombine.high %v14362_v9, %v14405_v14  ;;  %v7105_v20 = vcombine.high %v14337_v48, %v14375_v31  ;;  %v7510_v61 = vcombine.low %v7454_v3, %v7470_v54  ;;  %v7502_v49 = vrot.slane %v7494_v38, %v15592_v52 }
 0x75d   : > { %v7486_v56 = vrot.slane %v7478_v62, %v15592_v52  ;;  %v7153_v21 = vcombine.high %v14441_v17, %v14438_v11  ;;  %v9607_v63 = vpack.i.bf16 %v8343_v35, %v7937_v7  ;;  %v14594_v37 = vpack.i.bf16 %v8344_v15, %v7938_v39  ;;  %v16124_v11 = vld [vmem:[#allocation26_spill] sm:$0xff] }
 0x75e   : > { %9633 = vrot.lane.b32.xlu1 %v9632_v27, %s9793_s24  ;;  %v6119_v32 = vpop.permute.xlu0 %6118  ;;  %v9647_v40 = vpack.i.bf16 %v8209_v6, %v7803_v59  ;;  %v14601_v29 = vrot.slane %v7121_v23, %v15910_v36  ;;  %v14604_v53 = vrot.slane %v7089_v41, %v15592_v52  ;;  %v14609_v13 = vrot.slane %v7105_v20, %v15592_v52  ;;  %v16125_v62 = vld [vmem:[#allocation22_spill] sm:$0xff] }
 0x75f   : > { %v7542_v31 = vcombine.low %v7486_v56, %v7502_v49  ;;  %v7543_v14 = vcombine.high %v7486_v56, %v7502_v49  ;;  %v6131_v58 = vpop.permute.xlu1 %6130  ;;  %v6292_v17 = vcombine.low %v16124_v11, %v6119_v32  ;;  %v6293_v7 = vcombine.high %v16124_v11, %v6119_v32 }
 0x760   : > { %v7511_v39 = vcombine.high %v7454_v3, %v7470_v54  ;;  %v14612_v38 = vrot.slane %v7510_v61, %v15910_v36  ;;  %v14619_v59 = vrot.slane %v7153_v21, %v15910_v36  ;;  %v7479_v15 = vcombine.high %v14530_v51, %v7289_v0 }
 0x761   : > { %v14615_v35 = vrot.slane %v7542_v31, %v15910_v36  ;;  %v6308_v27 = vcombine.low %v16125_v62, %v6123_v55  ;;  %v6309_v6 = vcombine.high %v16125_v62, %v6123_v55  ;;  %v14625_v3 = vrot.slane %v7543_v14, %v15910_v36 }
 0x762   : > { %9648 = vrot.lane.b32.xlu1 %v9647_v40, %s9794_s25  ;;  %v6127_v23 = vpop.permute.xlu0 %6126  ;;  %v7185_v20 = vcombine.high %v14477_v57, %v14480_v24  ;;  %v7495_v0 = vcombine.high %v14501_v30, %v14539_v16  ;;  %v14638_v55 = vrot.slane %v6292_v17, %v15592_v52  ;;  %v6307_v49 = vrot.slane %v6293_v7, %v15592_v52 }
 0x763   : > { %v6139_v41 = vpop.permute.xlu1 %6138  ;;  %v7575_v61 = vcombine.high %v14612_v38, %v14615_v35  ;;  %v14642_v56 = vrot.slane %v7511_v39, %v15910_v36  ;;  %v7447_v14 = vcombine.high %v14449_v22, %v14486_v33  ;;  %v14647_v40 = vrot.slane %v7479_v15, %v15592_v52 }
 0x764   : > { %v6340_v21 = vcombine.low %v6131_v58, %v6139_v41  ;;  %v6341_v32 = vcombine.high %v6131_v58, %v6139_v41  ;;  %v14650_v11 = vrot.slane %v6308_v27, %v15592_v52  ;;  %v6323_v30 = vrot.slane %v6309_v6, %v15592_v52 }
 0x765   : > { %v9597_v31 = vpack.i.bf16 %v7575_v61, %v7185_v20  ;;  %v7186_v58 = vcombine.low %v14601_v29, %v14619_v59  ;;  %v7576_v22 = vcombine.low %v14642_v56, %v14625_v3  ;;  %v14659_v33 = vrot.slane %v7495_v0, %v15592_v52 }
 0x766   : > { %v6135_v16 = vpop.permute.xlu0 %6134  ;;  %v6356_v39 = vcombine.low %v14638_v55, %v14650_v11  ;;  %v6372_v15 = vcombine.low %v6307_v49, %v6323_v30  ;;  %v6373_v27 = vcombine.high %v6307_v49, %v6323_v30  ;;  %v14664_v6 = vrot.slane %v6340_v21, %v15592_v52 }
 0x767   : > { %v6324_v17 = vcombine.low %v6127_v23, %v6135_v16  ;;  %v6325_v7 = vcombine.high %v6127_v23, %v6135_v16  ;;  %v9399_v62 = vpop.permute.xlu1 %9398  ;;  %9598 = vrot.lane.b32.xlu0 %v9597_v31, %s9802_s15  ;;  %v6355_v23 = vrot.slane %v6341_v32, %v15592_v52  ;;  %v7463_v61 = vcombine.high %v14423_v34, %v14461_v8 }
 0x768   : > { %v14674_v0 = vrot.slane %v7447_v14, %v15592_v52  ;;  %v7558_v31 = vcombine.low %v14647_v40, %v14659_v33  ;;  %v7577_v21 = vcombine.high %v14642_v56, %v14625_v3  ;;  %v14684_v34 = vrot.slane %v6356_v39, %v15910_v36  ;;  %v16127_v39 = vld [vmem:[#allocation47_spill] sm:$0xff] }
 0x769   : > { %v14668_v41 = vrot.slane %v6324_v17, %v15592_v52  ;;  %v6339_v20 = vrot.slane %v6325_v7, %v15592_v52  ;;  %v9612_v7 = vpack.i.bf16 %v7576_v22, %v7186_v58  ;;  %v14687_v8 = vrot.slane %v6372_v15, %v15910_v36  ;;  %v16126_v22 = vld [vmem:[#allocation116_spill] sm:$0xff] }
 0x76a   : > { %v9394_v49 = vpop.permute.xlu0 %9393  ;;  %v14690_v42 = vrot.slane %v6373_v27, %v15910_v36  ;;  %v9401_v58 = vunpack.i.h.bf16 %v9399_v62 }
 0x76b   : > { %v6388_v32 = vcombine.low %v14668_v41, %v14664_v6  ;;  %v6404_v30 = vcombine.low %v6339_v20, %v6355_v23  ;;  %v6405_v16 = vcombine.high %v6339_v20, %v6355_v23  ;;  %v9409_v17 = vpop.permute.xlu1 %9408  ;;  %9608 = vrot.lane.b32.xlu0 %v9607_v63, %s9796_s28  ;;  %v9396_v14 = vunpack.i.h.bf16 %v9394_v49 }
 0x76c   : > { %v9395_v54 = vunpack.i.l.bf16 %v9394_v49  ;;  %v9400_v23 = vunpack.i.l.bf16 %v9399_v62  ;;  %v16128_v20 = vcombine.low %v16126_v22, %v16127_v39  ;;  %v16130_v49 = vld [vmem:[#allocation45_spill] sm:$0xff]  ;;  %v9411_v62 = vunpack.i.h.bf16 %v9409_v17 }
 0x76d   : > { %v14693_v3 = vrot.slane %v6388_v32, %v15910_v36  ;;  %v14696_v56 = vrot.slane %v6404_v30, %v15910_v36  ;;  %v6419_v63 = vrot.slane %v6405_v16, %v15910_v36  ;;  %v16131_v48 = vcombine.low %v16129_v12, %v16130_v49 }
 0x76e   : > { %v5688_v15 = vsel %vm1742_vm5, %v16128_v20, %v9395_v54  ;;  %v9404_v9 = vpop.permute.xlu0 %9403  ;;  %v9410_v22 = vunpack.i.l.bf16 %v9409_v17 }
 0x76f   : > { %v5695_v27 = vsel %vm1742_vm5, %v16131_v48, %v9396_v14  ;;  %v9406_v30 = vunpack.i.h.bf16 %v9404_v9  ;;  %v9405_v10 = vunpack.i.l.bf16 %v9404_v9  ;;  %v5689_v51 = vsel %vm1744_vm6, %v5688_v15, %v9400_v23  ;;  %v9419_v16 = vpop.permute.xlu1 %9418  ;;  %9613 = vrot.lane.b32.xlu0 %v9612_v7, %s9803_s16 }
 0x770   : > { %v5696_v54 = vsel %vm1744_vm6, %v5695_v27, %v9401_v58  ;;  %v6425_v12 = vcombine.high %v14687_v8, %v14696_v56  ;;  %v14715_v48 = vrot.slane %v7463_v61, %v15592_v52  ;;  %v7187_v9 = vcombine.high %v14601_v29, %v14619_v59 }
 0x771   : > { %v5690_v14 = vsel %vm1746_vm7, %v5689_v51, %v9405_v10  ;;  %v5697_v39 = vsel %vm1746_vm7, %v5696_v54, %v9406_v30  ;;  %v6426_v20 = vcombine.low %v14690_v42, %v6419_v63  ;;  %v14730_v10 = vrot.slane %v7558_v31, %v15910_v36  ;;  %v16133_v54 = vld [vmem:[#allocation128_spill] sm:$0xff] }
 0x772   : > { %v9414_v23 = vpop.permute.xlu0 %9413  ;;  %v5691_v7 = vsel %vm1748_vm8, %v5690_v14, %v9410_v22  ;;  %v5698_v17 = vsel %vm1748_vm8, %v5697_v39, %v9411_v62  ;;  %v9687_v58 = vpack.i.bf16 %v6783_v19, %v6425_v12  ;;  %v7526_v52 = vcombine.low %v14674_v0, %v14715_v48  ;;  %v16132_v22 = vld [vmem:[#allocation100_spill] sm:$0xff] }
 0x773   : > { %v9416_v51 = vunpack.i.h.bf16 %v9414_v23  ;;  %v9415_v61 = vunpack.i.l.bf16 %v9414_v23  ;;  %v9429_v29 = vpop.permute.xlu1 %9428  ;;  %9623 = vrot.lane.b32.xlu0 %v14594_v37, %s9793_s24  ;;  %v9420_v59 = vunpack.i.l.bf16 %v9419_v16  ;;  %v9627_v19 = vpack.i.bf16 %v7577_v21, %v7187_v9  ;;  %v16135_v39 = vld [vmem:[#allocation104_spill] sm:$0xff]  ;;  %v16136_v37 = vld [vmem:[#allocation86_spill] sm:$0xff] }
 0x774   : > { %v9431_v15 = vunpack.i.h.bf16 %v9429_v29  ;;  %v9430_v49 = vunpack.i.l.bf16 %v9429_v29  ;;  %9688 = vrot.lane.b32.xlu1 %v9687_v58, %s9796_s28  ;;  %v9421_v27 = vunpack.i.h.bf16 %v9419_v16  ;;  %v6427_v31 = vcombine.high %v14690_v42, %v6419_v63 }
 0x775   : > { %v5692_v30 = vsel %vm1750_vm9, %v5691_v7, %v9415_v61  ;;  %v5699_v62 = vsel %vm1750_vm9, %v5698_v17, %v9416_v51  ;;  %v16134_v12 = vcombine.low %v16132_v22, %v16133_v54  ;;  %v16137_v23 = vcombine.low %v16135_v39, %v16136_v37 }
 0x776   : > { %v9424_v32 = vpop.permute.xlu0 %9423  ;;  %v5693_v21 = vsel %vm1752_vm10, %v5692_v30, %v9420_v59  ;;  %v9692_v16 = vpack.i.bf16 %v6784_v46, %v6426_v20  ;;  %v16138_v42 = vcombine.low %v14604_v53, %v14609_v13  ;;  %v7534_v9 = vrot.slane %v7526_v52, %v15910_v36 }
 0x777   : > { %v7638_v14 = vsel %vm1742_vm5, %v16134_v12, %v9431_v15  ;;  %v7248_v29 = vsel %vm1742_vm5, %v16137_v23, %v9430_v49  ;;  %v9426_v7 = vunpack.i.h.bf16 %v9424_v32  ;;  %v9425_v17 = vunpack.i.l.bf16 %v9424_v32  ;;  %v9434_v58 = vpop.permute.xlu1 %9433  ;;  %9628 = vrot.lane.b32.xlu0 %v9627_v19, %s9800_s11 }
 0x778   : > { %v7176_v63 = vrot.slane %v16138_v42, %v15910_v36  ;;  %v9436_v51 = vunpack.i.h.bf16 %v9434_v58  ;;  %v9435_v61 = vunpack.i.l.bf16 %v9434_v58  ;;  %9693 = vrot.lane.b32.xlu1 %v9692_v16, %s9793_s24  ;;  %v16139_v59 = vcombine.high %v14511_v1, %v14514_v25 }
 0x779   : > { %v16140_v46 = vcombine.high %v14549_v5, %v14526_v43  ;;  %v5700_v15 = vsel %vm1752_vm10, %v5699_v62, %v9421_v27  ;;  %v16141_v32 = vcombine.low %v14567_v4, %v14579_v44  ;;  %v14769_v49 = vsel %vm1754_vm11, %v5693_v21, %v9425_v17  ;;  %v16148_v17 = vld [vmem:[#allocation49_spill] sm:$0xff] }
 0x77a   : > { %v7578_v19 = vcombine.low %v7534_v9, %v14730_v10  ;;  %v14773_v30 = vsel %vm1754_vm11, %v5700_v15, %v9426_v7  ;;  %v7249_v1 = vsel %vm1744_vm6, %v7248_v29, %v9435_v61  ;;  %v7639_v25 = vsel %vm1744_vm6, %v7638_v14, %v9436_v51  ;;  %v8867_v14 = vld [vmem:[%s15043_s8] sm:$0xff]  ;;  %v16147_v7 = vld [vmem:[#allocation31_spill] sm:$0xff] }
 0x77b   : > { %v9637_v20 = vpack.i.bf16 %v16140_v46, %v16139_v59  ;;  %v7144_v52 = vrot.slane %v16141_v32, %v15910_v36  ;;  %v16142_v43 = vcombine.high %v14556_v26, %v14535_v18  ;;  %v9439_v27 = vpop.permute.xlu1 %9438  ;;  %v6389_v12 = vcombine.high %v14668_v41, %v14664_v6  ;;  %v16143_v26 = vld [vmem:[#allocation82_spill] sm:$0xff] }
 0x77c   : > { %v9441_v22 = vunpack.i.h.bf16 %v9439_v27  ;;  %v9440_v54 = vunpack.i.l.bf16 %v9439_v27  ;;  %v6421_v18 = vcombine.high %v14684_v34, %v14693_v3  ;;  %v6357_v21 = vcombine.high %v14638_v55, %v14650_v11  ;;  %v16145_v6 = vld [vmem:[#allocation110_spill] sm:$0xff] }
 0x77d   : > { %v9697_v5 = vpack.i.bf16 %v16142_v43, %v6427_v31  ;;  %9638 = vrot.lane.b32.xlu0 %v9637_v20, %s9794_s25  ;;  %v7188_v62 = vcombine.low %v7144_v52, %v7176_v63  ;;  %v16144_v31 = vld [vmem:[#allocation133_spill] sm:$0xff]  ;;  %v16146_v41 = vld [vmem:[#allocation10_spill] sm:$0xff]  ;;  %v6715_v58 = vcombine.high %v16148_v17, %v16147_v7  ;;  %v7559_v59 = vcombine.high %v14647_v40, %v14659_v33  ;;  %v9479_v43 = vpop.permute.xlu0 %9478 }
 0x77e   : > { %v6747_v37 = vcombine.high %v16144_v31, %v16143_v26  ;;  %v7250_v23 = vsel %vm1746_vm7, %v7249_v1, %v9440_v54  ;;  %v7640_v29 = vsel %vm1746_vm7, %v7639_v25, %v9441_v22  ;;  %v6779_v42 = vcombine.high %v16146_v41, %v16145_v6  ;;  %v16149_v22 = vld [vmem:[#allocation4_spill] sm:$0xff] }
 0x77f   : > { %9698 = vrot.lane.b32.xlu1 %v9697_v5, %s9794_s25  ;;  %v9642_v39 = vpack.i.bf16 %v7578_v19, %v7188_v62  ;;  %v9444_v16 = vpop.permute.xlu1 %9443  ;;  %v6403_v46 = vrot.slane %v6389_v12, %v15910_v36  ;;  %v7579_v55 = vcombine.high %v7534_v9, %v14730_v10  ;;  %v7169_v19 = vcombine.high %v14604_v53, %v14609_v13  ;;  %v16152_v12 = vld [vmem:[#allocation105_spill] sm:$0xff] }
 0x780   : > { %v9446_v51 = vunpack.i.h.bf16 %v9444_v16  ;;  %v9445_v61 = vunpack.i.l.bf16 %v9444_v16  ;;  %v9652_v20 = vpack.i.bf16 %v6779_v42, %v6421_v18  ;;  %v6761_v32 = vrot.slane %v6747_v37, %v15910_v36 }
 0x781   : > { %9643 = vrot.lane.b32.xlu0 %v9642_v39, %s9801_s12  ;;  %v7527_v1 = vcombine.high %v14674_v0, %v14715_v48  ;;  %v6371_v25 = vrot.slane %v6357_v21, %v15910_v36  ;;  %v7189_v33 = vcombine.high %v7144_v52, %v7176_v63  ;;  %v6729_v5 = vrot.slane %v6715_v58, %v15910_v36  ;;  %v16150_v0 = vld [vmem:[#allocation123_spill] sm:$0xff]  ;;  %v16153_v39 = vld [vmem:[#allocation134_spill] sm:$0xff]  ;;  %v9484_v21 = vpop.permute.xlu0 %9483 }
 0x782   : > { %v7251_v11 = vsel %vm1748_vm8, %v7250_v23, %v9445_v61  ;;  %v7641_v15 = vsel %vm1748_vm8, %v7640_v29, %v9446_v51  ;;  %v7137_v27 = vcombine.high %v14567_v4, %v14579_v44  ;;  %v7573_v62 = vrot.slane %v7559_v59, %v15910_v36 }
 0x783   : > { %8870 = vperm.xlu1 %9390, %v8867_v14   ;;  %v9449_v40 = vpop.permute.xlu1 %9448  ;;  %v9657_v53 = vpack.i.bf16 %v7579_v55, %v7189_v33  ;;  %v6422_v13 = vcombine.low %v6371_v25, %v6403_v46  ;;  %v16151_v48 = vcombine.low %v16149_v22, %v16150_v0  ;;  %v16154_v63 = vcombine.low %v16152_v12, %v16153_v39 }
 0x784   : > { %v9451_v10 = vunpack.i.h.bf16 %v9449_v40  ;;  %v9450_v9 = vunpack.i.l.bf16 %v9449_v40  ;;  %v7183_v14 = vrot.slane %v7169_v19, %v15910_v36  ;;  %v7541_v18 = vrot.slane %v7527_v1, %v15910_v36 }
 0x785   : > { %9653 = vrot.lane.b32.xlu0 %v9652_v20, %s9802_s15  ;;  %v6780_v4 = vcombine.low %v6729_v5, %v6761_v32  ;;  %v7151_v37 = vrot.slane %v7137_v27, %v15910_v36  ;;  %v6423_v59 = vcombine.high %v6371_v25, %v6403_v46  ;;  %v6781_v19 = vcombine.high %v6729_v5, %v6761_v32  ;;  %v9489_v1 = vpop.permute.xlu0 %9488 }
 0x786   : > { %v6842_v54 = vsel %vm1742_vm5, %v16151_v48, %v9451_v10  ;;  %v6484_v52 = vsel %vm1742_vm5, %v16154_v63, %v9450_v9  ;;  %v7580_v29 = vcombine.low %v7541_v18, %v7573_v62  ;;  %v7581_v33 = vcombine.high %v7541_v18, %v7573_v62 }
 0x787   : > { %v9454_v26 = vpop.permute.xlu1 %9453  ;;  %v9662_v23 = vpack.i.bf16 %v6780_v4, %v6422_v13  ;;  %v7190_v17 = vcombine.low %v7151_v37, %v7183_v14  ;;  %v7191_v46 = vcombine.high %v7151_v37, %v7183_v14  ;;  %v6782_v13 = vcombine.low %v14546_v47, %v14523_v50 }
 0x788   : > { %v9456_v44 = vunpack.i.h.bf16 %v9454_v26  ;;  %v9455_v31 = vunpack.i.l.bf16 %v9454_v26  ;;  %v9481_v22 = vunpack.i.h.bf16 %v9479_v43  ;;  %v9480_v32 = vunpack.i.l.bf16 %v9479_v43 }
 0x789   : > { %9658 = vrot.lane.b32.xlu0 %v9657_v53, %s9796_s28  ;;  %v9667_v61 = vpack.i.bf16 %v7580_v29, %v7190_v17  ;;  %v9677_v5 = vpack.i.bf16 %v7581_v33, %v7191_v46  ;;  %v6424_v0 = vcombine.low %v14687_v8, %v14696_v56  ;;  %v9486_v62 = vunpack.i.h.bf16 %v9484_v21 }
 0x78a   : > { %v7252_v16 = vsel %vm1750_vm9, %v7251_v11, %v9455_v31  ;;  %v7642_v42 = vsel %vm1750_vm9, %v7641_v15, %v9456_v44  ;;  %v9672_v15 = vpack.i.bf16 %v6781_v19, %v6423_v59  ;;  %v9485_v48 = vunpack.i.l.bf16 %v9484_v21  ;;  %v16157_v19 = vld [vmem:[#allocation62_spill] sm:$0xff] }
 0x78b   : > { %v9491_v63 = vunpack.i.h.bf16 %v9489_v1  ;;  %v9682_v26 = vpack.i.bf16 %v6782_v13, %v6424_v0 }
 0x78c   : > { %v9459_v7 = vpop.permute.xlu1 %9458 }
 0x78d   : > { %9663 = vrot.lane.b32.xlu0 %v9662_v23, %s9803_s16  ;;  %v9461_v58 = vunpack.i.h.bf16 %v9459_v7  ;;  %v9460_v51 = vunpack.i.l.bf16 %v9459_v7 }
 0x78f   : > { %v6485_v20 = vsel %vm1744_vm6, %v6484_v52, %v9460_v51  ;;  %v6843_v55 = vsel %vm1744_vm6, %v6842_v54, %v9461_v58  ;;  %v9499_v54 = vpop.permute.xlu0 %9498  ;;  %v9490_v52 = vunpack.i.l.bf16 %v9489_v1  ;;  %v16155_v58 = vcombine.low %v13784_v2, %v13761_v60  ;;  %v8875_v60 = vld [vmem:[%s15044_s9] sm:$0xff] }
 0x790   : > { %v9464_v36 = vpop.permute.xlu1 %9463  ;;  %v9501_v7 = vunpack.i.h.bf16 %v9499_v54  ;;  %v9500_v17 = vunpack.i.l.bf16 %v9499_v54 }
 0x791   : > { %9668 = vrot.lane.b32.xlu0 %v9667_v61, %s9793_s24  ;;  %v9466_v11 = vunpack.i.h.bf16 %v9464_v36  ;;  %v9465_v40 = vunpack.i.l.bf16 %v9464_v36  ;;  %v16156_v61 = vcombine.low %v16084_v45, %v16083_v28 }
 0x793   : > { %v7253_v10 = vsel %vm1752_vm10, %v7252_v16, %v9465_v40  ;;  %v7643_v9 = vsel %vm1752_vm10, %v7642_v42, %v9466_v11  ;;  %v9509_v21 = vpop.permute.xlu0 %9508 }
 0x794   : > { %v9469_v27 = vpop.permute.xlu1 %9468  ;;  %v9511_v2 = vunpack.i.h.bf16 %v9509_v21  ;;  %v9510_v40 = vunpack.i.l.bf16 %v9509_v21 }
 0x795   : > { %9673 = vrot.lane.b32.xlu0 %v9672_v15, %s9800_s11  ;;  %v9471_v25 = vunpack.i.h.bf16 %v9469_v27  ;;  %v9470_v53 = vunpack.i.l.bf16 %v9469_v27 }
 0x797   : > { %v6486_v12 = vsel %vm1746_vm7, %v6485_v20, %v9470_v53  ;;  %v6844_v39 = vsel %vm1746_vm7, %v6843_v55, %v9471_v25  ;;  %v9519_v15 = vpop.permute.xlu0 %9518 }
 0x798   : > { %v6487_v14 = vsel %vm1748_vm8, %v6486_v12, %v9480_v32  ;;  %v6845_v18 = vsel %vm1748_vm8, %v6844_v39, %v9481_v22  ;;  %v9474_v50 = vpop.permute.xlu1 %9473  ;;  %v9521_v25 = vunpack.i.h.bf16 %v9519_v15  ;;  %v9520_v53 = vunpack.i.l.bf16 %v9519_v15 }
 0x799   : > { %9678 = vrot.lane.b32.xlu0 %v9677_v5, %s9794_s25  ;;  %v9476_v47 = vunpack.i.h.bf16 %v9474_v50  ;;  %v9475_v43 = vunpack.i.l.bf16 %v9474_v50  ;;  %v6488_v8 = vsel %vm1750_vm9, %v6487_v14, %v9485_v48  ;;  %v6846_v56 = vsel %vm1750_vm9, %v6845_v18, %v9486_v62 }
 0x79a   : > { %v14850_v4 = vsel %vm1752_vm10, %v6488_v8, %v9490_v52  ;;  %v14853_v44 = vsel %vm1752_vm10, %v6846_v56, %v9491_v63 }
 0x79b   : > { %v14856_v31 = vsel %vm1754_vm11, %v7253_v10, %v9475_v43  ;;  %v14859_v37 = vsel %vm1754_vm11, %v7643_v9, %v9476_v47  ;;  %v9529_v39 = vpop.permute.xlu0 %9528 }
 0x79c   : > { %v8810_v23 = vpack.c.bf16 %v14859_v37, %v14856_v31  ;;  %v9494_v29 = vpop.permute.xlu1 %9493  ;;  %v9531_v43 = vunpack.i.h.bf16 %v9529_v39  ;;  %v9530_v8 = vunpack.i.l.bf16 %v9529_v39 }
 0x79d   : > { %9683 = vrot.lane.b32.xlu0 %v9682_v26, %s9801_s12  ;;  %v9496_v16 = vunpack.i.h.bf16 %v9494_v29  ;;  %v9495_v42 = vunpack.i.l.bf16 %v9494_v29  ;;  %s8987_s12 = sshll.u32 %s16181_s14, 4 }
 0x79e   : > { %s376_s21 = scalar_lea.vmem %s15045_s10, %s8987_s12 }
 0x79f   : > { %v6101_v51 = vsel %vm1742_vm5, %v16155_v58, %v9496_v16  ;;  %v6094_v59 = vsel %vm1742_vm5, %v16156_v61, %v9495_v42  ;;  %v9539_v50 = vpop.permute.xlu0 %9538  ;;  %v16158_v16 = vld [vmem:[#allocation101_spill] sm:$0xff]  ;;  %v16159_v42 = vld [vmem:[#allocation106_spill] sm:$0xff]  ;;  %v16161_v58 = vld [vmem:[#allocation32_spill] sm:$0xff] }
 0x7a0   : > { %v9504_v20 = vpop.permute.xlu1 %9503  ;;  %v6095_v55 = vsel %vm1744_vm6, %v6094_v59, %v9500_v17  ;;  %v6102_v36 = vsel %vm1744_vm6, %v6101_v51, %v9501_v7  ;;  %v16160_v7 = vcombine.low %v16158_v16, %v16159_v42  ;;  %v16162_v51 = vld [vmem:[#allocation77_spill] sm:$0xff] }
 0x7a1   : > { %9703 = vrot.lane.b32.xlu0 %v16157_v19, %s9794_s25  ;;  %v9506_v1 = vunpack.i.h.bf16 %v9504_v20  ;;  %v9505_v11 = vunpack.i.l.bf16 %v9504_v20  ;;  %v16163_v61 = vcombine.low %v16161_v58, %v16162_v51  ;;  %v16165_v58 = vld [vmem:[#allocation25_spill] sm:$0xff] }
 0x7a2   : > { %v8792_v17 = vsel %vm1742_vm5, %v16160_v7, %v9530_v8 }
 0x7a3   : > { %v6096_v28 = vsel %vm1746_vm7, %v6095_v55, %v9505_v11  ;;  %v6103_v45 = vsel %vm1746_vm7, %v6102_v36, %v9506_v1  ;;  %v8799_v59 = vsel %vm1742_vm5, %v16163_v61, %v9531_v43  ;;  %v9541_v11 = vunpack.i.h.bf16 %v9539_v50 }
 0x7a4   : > { %v9514_v33 = vpop.permute.xlu1 %9513  ;;  %v6097_v10 = vsel %vm1748_vm8, %v6096_v28, %v9510_v40  ;;  %v6104_v9 = vsel %vm1748_vm8, %v6103_v45, %v9511_v2 }
 0x7a5   : > { %8878 = vperm.xlu0 %9391, %v8875_v60   ;;  %v9516_v27 = vunpack.i.h.bf16 %v9514_v33  ;;  %v9515_v46 = vunpack.i.l.bf16 %v9514_v33  ;;  %v9540_v60 = vunpack.i.l.bf16 %v9539_v50 }
 0x7a7   : > { %v6098_v13 = vsel %vm1750_vm9, %v6097_v10, %v9515_v46  ;;  %v6105_v22 = vsel %vm1750_vm9, %v6104_v9, %v9516_v27 }
 0x7a8   : > { %v9524_v32 = vpop.permute.xlu1 %9523  ;;  %v6099_v5 = vsel %vm1752_vm10, %v6098_v13, %v9520_v53  ;;  %v6106_v0 = vsel %vm1752_vm10, %v6105_v22, %v9521_v25 }
 0x7a9   : > { %v9526_v62 = vunpack.i.h.bf16 %v9524_v32  ;;  %v9525_v48 = vunpack.i.l.bf16 %v9524_v32  ;;  %v14897_v56 = vpop.permute.xlu0 %9548 }
 0x7ab   : > { %v14888_v54 = vsel %vm1754_vm11, %v6099_v5, %v9525_v48  ;;  %v14891_v12 = vsel %vm1754_vm11, %v6106_v0, %v9526_v62 }
 0x7ac   : > { %v8806_v63 = vpack.c.bf16 %v14888_v54, %v14769_v49  ;;  %v9534_v52 = vpop.permute.xlu1 %9533  ;;  %v8807_v14 = vpack.c.bf16 %v14891_v12, %v14773_v30 }
 0x7ad   : > { %v9536_v26 = vunpack.i.h.bf16 %v9534_v52  ;;  %v9535_v29 = vunpack.i.l.bf16 %v9534_v52 }
 0x7af   : > { %v8800_v55 = vsel %vm1744_vm6, %v8799_v59, %v9536_v26  ;;  %v8793_v36 = vsel %vm1744_vm6, %v8792_v17, %v9535_v29  ;;  %v16164_v17 = vld [vmem:[#allocation6_spill] sm:$0xff]  ;;  %v16167_v59 = vld [vmem:[#allocation71_spill] sm:$0xff] }
 0x7b0   : > { %v9544_v18 = vpop.permute.xlu1 %9543  ;;  %v8794_v28 = vsel %vm1746_vm7, %v8793_v36, %v9540_v60  ;;  %v8801_v45 = vsel %vm1746_vm7, %v8800_v55, %v9541_v11  ;;  %v16166_v51 = vcombine.low %v16164_v17, %v16165_v58  ;;  %v16168_v55 = vld [vmem:[#allocation66_spill] sm:$0xff] }
 0x7b1   : > { %v9546_v19 = vunpack.i.h.bf16 %v9544_v18  ;;  %v9545_v1 = vunpack.i.l.bf16 %v9544_v18  ;;  %v16169_v36 = vcombine.low %v16167_v59, %v16168_v55 }
 0x7b3   : > { %v8795_v10 = vsel %vm1748_vm8, %v8794_v28, %v9545_v1  ;;  %v8802_v9 = vsel %vm1748_vm8, %v8801_v45, %v9546_v19 }
 0x7b4   : > { %v9554_v47 = vpop.permute.xlu1 %9553 }
 0x7b5   : > { %v9556_v2 = vunpack.i.h.bf16 %v9554_v47  ;;  %v9555_v40 = vunpack.i.l.bf16 %v9554_v47 }
 0x7b7   : > { %v8796_v25 = vsel %vm1750_vm9, %v8795_v10, %v9555_v40  ;;  %v8803_v53 = vsel %vm1750_vm9, %v8802_v9, %v9556_v2 }
 0x7b8   : > { %v14899_v21 = vpop.permute.xlu1 %9563 }
 0x7b9   : > { %v9559_v20 = vpop.permute.xlu0 %9558 }
 0x7ba   : > { %v9561_v8 = vunpack.i.h.bf16 %v9559_v20  ;;  %v9560_v26 = vunpack.i.l.bf16 %v9559_v20 }
 0x7bc   : > { %v9574_v15 = vpop.permute.xlu1 %9573  ;;  %v7996_v61 = vsel %vm1742_vm5, %v16166_v51, %v9560_v26  ;;  %v8402_v19 = vsel %vm1742_vm5, %v16169_v36, %v9561_v8  ;;  %v9551_v26 = vunpack.i.h.bf16 %v14897_v56  ;;  %v16170_v51 = vld [vmem:[#allocation103_spill] sm:$0xff]  ;;  %v16173_v36 = vld [vmem:[#allocation122_spill] sm:$0xff] }
 0x7bd   : > { %v9569_v33 = vpop.permute.xlu0 %9568  ;;  %v9576_v16 = vunpack.i.h.bf16 %v9574_v15  ;;  %v9575_v42 = vunpack.i.l.bf16 %v9574_v15 }
 0x7be   : > { %v9571_v27 = vunpack.i.h.bf16 %v9569_v33  ;;  %v9570_v46 = vunpack.i.l.bf16 %v9569_v33 }
 0x7bf   : > { %v8403_v60 = vsel %vm1744_vm6, %v8402_v19, %v9576_v16  ;;  %v7997_v20 = vsel %vm1744_vm6, %v7996_v61, %v9575_v42  ;;  %v9566_v16 = vunpack.i.h.bf16 %v14899_v21  ;;  %v9565_v42 = vunpack.i.l.bf16 %v14899_v21  ;;  %v16171_v61 = vld [vmem:[#allocation29_spill] sm:$0xff] }
 0x7c0   : > { %v9584_v13 = vpop.permute.xlu1 %9583  ;;  %v8797_v22 = vsel %vm1752_vm10, %v8796_v25, %v9570_v46  ;;  %v8804_v32 = vsel %vm1752_vm10, %v8803_v53, %v9571_v27  ;;  %v16172_v59 = vcombine.low %v16170_v51, %v16171_v61  ;;  %v16174_v19 = vld [vmem:[#allocation37_spill] sm:$0xff] }
 0x7c1   : > { %v9586_v5 = vunpack.i.h.bf16 %v9584_v13  ;;  %v9585_v0 = vunpack.i.l.bf16 %v9584_v13  ;;  %v9579_v52 = vpop.permute.xlu0 %9578 }
 0x7c2   : > { %v9581_v17 = vunpack.i.h.bf16 %v9579_v52  ;;  %v9580_v58 = vunpack.i.l.bf16 %v9579_v52 }
 0x7c3   : > { %v8805_v62 = vsel %vm1754_vm11, %v8804_v32, %v9586_v5  ;;  %v8798_v48 = vsel %vm1754_vm11, %v8797_v22, %v9585_v0 }
 0x7c4   : > { %v8815_v39 = vpack.c.bf16 %v8805_v62, %v8805_v62  ;;  %v14921_v18 = vpop.permute.xlu1 %9593  ;;  %v8814_v50 = vpack.c.bf16 %v8798_v48, %v8798_v48 }
 0x7c5   : > { %v9589_v29 = vpop.permute.xlu0 %9588  ;;  %v9595_v21 = vunpack.i.l.bf16 %v14921_v18 }
 0x7c6   : > { %8982 = vmatprep.subr.msk.bf16.mxu1 %vm4882_vm12, %v8815_v39  ;;  %v8821_v47 = vsel %vm4882_vm12, %v8814_v50, 0  ;;  %v9591_v1 = vunpack.i.h.bf16 %v9589_v29  ;;  %v9590_v11 = vunpack.i.l.bf16 %v9589_v29  ;;  %v9550_v29 = vunpack.i.l.bf16 %v14897_v56 }
 0x7c7   : > { %8833 = vmatpush1.bf16.msra.mxu1 %v8821_v47 }
 0x7c8   : > { %v9604_v43 = vpop.permute.xlu1 %9603  ;;  %v7998_v28 = vsel %vm1746_vm7, %v7997_v20, %v9590_v11  ;;  %v8404_v45 = vsel %vm1746_vm7, %v8403_v60, %v9591_v1  ;;  %v8003_v55 = vsel %vm1742_vm5, %v16172_v59, %v9550_v29  ;;  %v16175_v1 = vcombine.low %v16173_v36, %v16174_v19 }
 0x7c9   : > { %v9606_v2 = vunpack.i.h.bf16 %v9604_v43  ;;  %v9605_v40 = vunpack.i.l.bf16 %v9604_v43  ;;  %v8004_v56 = vsel %vm1744_vm6, %v8003_v55, %v9565_v42  ;;  %v9596_v20 = vunpack.i.h.bf16 %v14921_v18 }
 0x7ca   : > { %v8409_v11 = vsel %vm1742_vm5, %v16175_v1, %v9551_v26  ;;  %v8005_v52 = vsel %vm1746_vm7, %v8004_v56, %v9580_v58  ;;  %v16176_v55 = vcombine.low %v14477_v57, %v14480_v24 }
 0x7cb   : > { %v7999_v46 = vsel %vm1748_vm8, %v7998_v28, %v9605_v40  ;;  %v8405_v25 = vsel %vm1748_vm8, %v8404_v45, %v9606_v2  ;;  %v8410_v60 = vsel %vm1744_vm6, %v8409_v11, %v9566_v16 }
 0x7cc   : > { %v9619_v7 = vpop.permute.xlu1 %9618  ;;  %v8411_v40 = vsel %vm1746_vm7, %v8410_v60, %v9581_v17 }
 0x7cd   : > { %v9621_v33 = vunpack.i.h.bf16 %v9619_v7  ;;  %v9620_v10 = vunpack.i.l.bf16 %v9619_v7 }
 0x7cf   : > { %v8000_v13 = vsel %vm1750_vm9, %v7999_v46, %v9620_v10  ;;  %v8406_v22 = vsel %vm1750_vm9, %v8405_v25, %v9621_v33  ;;  %v8006_v10 = vsel %vm1748_vm8, %v8005_v52, %v9595_v21 }
 0x7d0   : > { %v9634_v15 = vpop.permute.xlu1 %9633 }
 0x7d1   : > { %v9636_v9 = vunpack.i.h.bf16 %v9634_v15  ;;  %v9635_v27 = vunpack.i.l.bf16 %v9634_v15 }
 0x7d3   : > { %v8001_v0 = vsel %vm1752_vm10, %v8000_v13, %v9635_v27  ;;  %v8407_v62 = vsel %vm1752_vm10, %v8406_v22, %v9636_v9  ;;  %v8412_v9 = vsel %vm1748_vm8, %v8411_v40, %v9596_v20 }
 0x7d4   : > { %v9649_v53 = vpop.permute.xlu1 %9648 }
 0x7d5   : > { %v9651_v32 = vunpack.i.h.bf16 %v9649_v53  ;;  %v9650_v5 = vunpack.i.l.bf16 %v9649_v53 }
 0x7d7   : > { %v8002_v48 = vsel %vm1754_vm11, %v8001_v0, %v9650_v5  ;;  %v8408_v39 = vsel %vm1754_vm11, %v8407_v62, %v9651_v32 }
 0x7d8   : > { %v8812_v50 = vpack.c.bf16 %v8408_v39, %v8002_v48 }
 0x7d9   : > { %v9599_v47 = vpop.permute.xlu0 %9598 }
 0x7da   : > { %v9601_v26 = vunpack.i.h.bf16 %v9599_v47  ;;  %v9600_v29 = vunpack.i.l.bf16 %v9599_v47 }
 0x7dc   : > { %v7255_v36 = vsel %vm1742_vm5, %v16176_v55, %v9600_v29 }
 0x7dd   : > { %v9609_v43 = vpop.permute.xlu0 %9608 }
 0x7de   : > { %v9611_v15 = vunpack.i.h.bf16 %v9609_v43  ;;  %v9610_v28 = vunpack.i.l.bf16 %v9609_v43 }
 0x7e0   : > { %v8007_v46 = vsel %vm1750_vm9, %v8006_v10, %v9610_v28  ;;  %v8413_v25 = vsel %vm1750_vm9, %v8412_v9, %v9611_v15 }
 0x7e1   : > { %v9614_v8 = vpop.permute.xlu0 %9613 }
 0x7e2   : > { %v9616_v42 = vunpack.i.h.bf16 %v9614_v8 }
 0x7e5   : > { %v9624_v7 = vpop.permute.xlu0 %9623 }
 0x7e6   : > { %v9626_v45 = vunpack.i.h.bf16 %v9624_v7  ;;  %v9625_v33 = vunpack.i.l.bf16 %v9624_v7  ;;  %v9615_v7 = vunpack.i.l.bf16 %v9614_v8  ;;  %v9689_v17 = vpop.permute.xlu1 %9688 }
 0x7e8   : > { %v8008_v13 = vsel %vm1752_vm10, %v8007_v46, %v9625_v33  ;;  %v8414_v22 = vsel %vm1752_vm10, %v8413_v25, %v9626_v45  ;;  %v7256_v8 = vsel %vm1744_vm6, %v7255_v36, %v9615_v7  ;;  %v9690_v7 = vunpack.i.l.bf16 %v9689_v17 }
 0x7e9   : > { %v9629_v2 = vpop.permute.xlu0 %9628 }
 0x7ea   : > { %v9631_v58 = vunpack.i.h.bf16 %v9629_v2  ;;  %v9630_v51 = vunpack.i.l.bf16 %v9629_v2  ;;  %v9694_v24 = vpop.permute.xlu1 %9693 }
 0x7ec   : > { %v7257_v56 = vsel %vm1746_vm7, %v7256_v8, %v9630_v51 }
 0x7ef   : > { %v9639_v27 = vpop.permute.xlu0 %9638 }
 0x7f0   : > { %v9641_v53 = vunpack.i.h.bf16 %v9639_v27  ;;  %v9640_v18 = vunpack.i.l.bf16 %v9639_v27 }
 0x7f2   : > { %v8009_v32 = vsel %vm1754_vm11, %v8008_v13, %v9640_v18  ;;  %v8415_v5 = vsel %vm1754_vm11, %v8414_v22, %v9641_v53  ;;  %v16178_v22 = vcombine.low %v16146_v41, %v16145_v6 }
 0x7f3   : > { %v9644_v0 = vpop.permute.xlu0 %9643  ;;  %v8813_v62 = vpack.c.bf16 %v8415_v5, %v8009_v32  ;;  %v16179_v5 = vcombine.low %v14684_v34, %v14693_v3  ;;  %v9695_v34 = vunpack.i.l.bf16 %v9694_v24 }
 0x7f4   : > { %v9646_v61 = vunpack.i.h.bf16 %v9644_v0  ;;  %v9645_v59 = vunpack.i.l.bf16 %v9644_v0 }
 0x7f5   : > { %8834 = vmatprep.subr.bf16.mxu1 %v8813_v62 }
 0x7f6   : > { %8835 = vmatpush1.bf16.msra.mxu1 %v8812_v50  ;;  %v16177_v50 = vcombine.low %v14612_v38, %v14615_v35  ;;  %v7258_v2 = vsel %vm1748_vm8, %v7257_v56, %v9645_v59  ;;  %v8816_v56 = vld [vmem:[%s15042_s7] sm:$0xf] }
 0x7f7   : > { %v9654_v48 = vpop.permute.xlu0 %9653 }
 0x7f8   : > { %v7645_v19 = vsel %vm1742_vm5, %v16177_v50, %v9601_v26  ;;  %v9656_v35 = vunpack.i.h.bf16 %v9654_v48  ;;  %v9655_v52 = vunpack.i.l.bf16 %v9654_v48 }
 0x7f9   : > { %v7646_v60 = vsel %vm1744_vm6, %v7645_v19, %v9616_v42  ;;  %v9691_v42 = vunpack.i.h.bf16 %v9689_v17 }
 0x7fa   : > { %v7647_v20 = vsel %vm1746_vm7, %v7646_v60, %v9631_v58  ;;  %v6849_v32 = vsel %vm1742_vm5, %v16178_v22, %v9656_v35  ;;  %v6491_v0 = vsel %vm1742_vm5, %v16179_v5, %v9655_v52  ;;  %v9696_v58 = vunpack.i.h.bf16 %v9694_v24 }
 0x7fb   : > { %v9659_v39 = vpop.permute.xlu0 %9658  ;;  %v7648_v38 = vsel %vm1748_vm8, %v7647_v20, %v9646_v61 }
 0x7fc   : > { %v9661_v1 = vunpack.i.h.bf16 %v9659_v39  ;;  %v9660_v47 = vunpack.i.l.bf16 %v9659_v39  ;;  %v9699_v39 = vpop.permute.xlu1 %9698 }
 0x7fd   : > { %v9701_v61 = vunpack.i.h.bf16 %v9699_v39  ;;  %v9700_v59 = vunpack.i.l.bf16 %v9699_v39 }
 0x7fe   : > { %v7649_v40 = vsel %vm1750_vm9, %v7648_v38, %v9661_v1  ;;  %v7259_v15 = vsel %vm1750_vm9, %v7258_v2, %v9660_v47 }
 0x7ff   : > { %v9664_v43 = vpop.permute.xlu0 %9663 }
 0x800   : > { %v9666_v45 = vunpack.i.h.bf16 %v9664_v43  ;;  %v9665_v33 = vunpack.i.l.bf16 %v9664_v43 }
 0x802   : > { %v6492_v43 = vsel %vm1744_vm6, %v6491_v0, %v9665_v33  ;;  %v6850_v26 = vsel %vm1744_vm6, %v6849_v32, %v9666_v45 }
 0x803   : > { %v9669_v16 = vpop.permute.xlu0 %9668 }
 0x804   : > { %v9671_v21 = vunpack.i.h.bf16 %v9669_v16  ;;  %v9670_v57 = vunpack.i.l.bf16 %v9669_v16 }
 0x806   : > { %v7260_v27 = vsel %vm1752_vm10, %v7259_v15, %v9670_v57  ;;  %v7650_v46 = vsel %vm1752_vm10, %v7649_v40, %v9671_v21 }
 0x807   : > { %v9674_v11 = vpop.permute.xlu0 %9673 }
 0x808   : > { %v9676_v25 = vunpack.i.h.bf16 %v9674_v11  ;;  %v9675_v53 = vunpack.i.l.bf16 %v9674_v11 }
 0x80a   : > { %v6493_v6 = vsel %vm1746_vm7, %v6492_v43, %v9675_v53  ;;  %v6851_v41 = vsel %vm1746_vm7, %v6850_v26, %v9676_v25 }
 0x80b   : > { %v9679_v28 = vpop.permute.xlu0 %9678 }
 0x80c   : > { %v9681_v10 = vunpack.i.h.bf16 %v9679_v28  ;;  %v9680_v9 = vunpack.i.l.bf16 %v9679_v28 }
 0x80e   : > { %v7261_v18 = vsel %vm1754_vm11, %v7260_v27, %v9680_v9  ;;  %v7651_v13 = vsel %vm1754_vm11, %v7650_v46, %v9681_v10 }
 0x80f   : > { %v9684_v62 = vpop.permute.xlu0 %9683  ;;  %v8811_v48 = vpack.c.bf16 %v7651_v13, %v7261_v18 }
 0x810   : > { %v9686_v29 = vunpack.i.h.bf16 %v9684_v62  ;;  %v9685_v16 = vunpack.i.l.bf16 %v9684_v62 }
 0x811   : > { %8836 = vmatprep.subr.bf16.mxu1 %v8811_v48 }
 0x812   : > { %v6494_v3 = vsel %vm1748_vm8, %v6493_v6, %v9685_v16  ;;  %v6852_v51 = vsel %vm1748_vm8, %v6851_v41, %v9686_v29  ;;  %8837 = vmatpush1.bf16.msra.mxu1 %v8810_v23 }
 0x813   : > { %v6495_v55 = vsel %vm1750_vm9, %v6494_v3, %v9690_v7  ;;  %v6853_v17 = vsel %vm1750_vm9, %v6852_v51, %v9691_v42  ;;  %v9704_v36 = vpop.permute.xlu0 %9703 }
 0x814   : > { %v9706_v50 = vunpack.i.h.bf16 %v9704_v36  ;;  %v9705_v19 = vunpack.i.l.bf16 %v9704_v36  ;;  %v6496_v1 = vsel %vm1752_vm10, %v6495_v55, %v9695_v34  ;;  %v6854_v47 = vsel %vm1752_vm10, %v6853_v17, %v9696_v58 }
 0x815   : > { %v6497_v11 = vsel %vm1754_vm11, %v6496_v1, %v9700_v59  ;;  %v6855_v8 = vsel %vm1754_vm11, %v6854_v47, %v9701_v61 }
 0x816   : > { %v6490_v31 = vsel %vm1754_vm11, %v14850_v4, %v9705_v19  ;;  %v6848_v37 = vsel %vm1754_vm11, %v14853_v44, %v9706_v50  ;;  %v8809_v23 = vpack.c.bf16 %v6855_v8, %v6497_v11  ;;  %v8871_v4 = vpop.permute.xlu1 %8870 }
 0x817   : > { %v8808_v60 = vpack.c.bf16 %v6848_v37, %v6490_v31 }
 0x818   : > { %8838 = vmatprep.subr.bf16.mxu1 %v8809_v23 }
 0x819   : > { %8839 = vmatpush1.bf16.msra.mxu1 %v8808_v60 }
 0x81a   : > { %8840 = vmatprep.subr.bf16.mxu1 %v8807_v14 }
 0x81d   : > { %8841 = vmatpush1.bf16.msra.mxu1 %v8806_v63 }
 0x820   : > { %8983 = vmatmul.mubr.msk.bf16.vlgmr.msra.gmra.mxu1 %vm4878_vm13, %v8816_v56  ;;  %v8879_v21 = vpop.permute.xlu0 %8878 }
 0x8e0   : > { %v8860_v44 = vpop.f32.mrf.mxu1 }
 0x8e1   : > { %v8873_v20 = vmul.f32 %v8871_v4, %v8860_v44 }
 0x8e2   : > { %v8862_v57 = vpop.f32.mrf.mxu1 }
 0x8e3   : > { %v8881_v24 = vadd.f32 %v8879_v21, %v8873_v20  ;;  %v8874_v2 = vmul.f32 %v8871_v4, %v8862_v57 }
 0x8e4   : > { %v8864_v49 = vpop.f32.mrf.mxu1 }
 0x8e5   : > { %v8883_v30 = vmax.f32 %v8881_v24, 0.0  ;;  %v8882_v54 = vadd.f32 %v8879_v21, %v8874_v2 }
 0x8e6   : > { %v8865_v12 = vpop.f32.mrf.mxu1 }
 0x8e7   : > { %8885 = vst [vmem:[%s376_s21] sm:$0xff] %v8883_v30  ;;  %v8884_v63 = vmax.f32 %v8882_v54, 0.0 }
 0x8e9   : > { %8886 = vst [vmem:[%s376_s21 + $0x8] sm:$0xff] %v8884_v63 }
 0x8ea PF: > { %s20_s13 = sadd.s32 1, %s9789_s13  }
 0x8eb   : > { %p17_p4 = scmp.ge.s32.totalorder %s20_s13, 4  }
 0x8ed   :  { %19 = sbr.rel (!%p17_p4) target bundleno = 1 (0x1), region = 97 }

</bundles_post_ra>
